<compile_context>
chip_gen: v7x
topology: tpu7x:2x2x1
jax: 0.10.0
libtpu: 0.0.40
codegen_flags: <defaults>
</compile_context>

<pallas_src>
import jax
import jax.numpy as jnp
from jax.experimental import pallas as pl
from jax.experimental.pallas import tpu as pltpu

# ----------------------------- model constants -----------------------------
C_IN, C1, C2 = 3, 32, 64
K1 = 32                      # conv1 im2col contraction (27 real taps, padded)
CONV1_ROWS = 32 * 32         # conv1 output positions (H=W=32)
PAD1_W = 18                  # pooled1 (16x16) zero-padded width
PAD1_ROWS = 18 * 18 + 2      # flat padded pooled1 rows + 2 slack rows = 326
CONV2_ROWS = 16 * 18         # conv2 output rows (16 valid + junk cols) = 288
FC_IN, FC_HID, FC_OUT = 8 * 8 * C2, 128, 10


def _pick_block(batch):
    """Largest image block in {8,4,2,1} that divides B and keeps >=2 grid steps."""
    for blk in (8, 4, 2, 1):
        if batch % blk == 0 and batch // blk >= 2:
            return blk
    return 1


# --------------------------------------------------------------------------
# Fused kernel: conv1 -> relu -> pool -> conv2 -> relu -> pool -> fc1 -> relu
# -> fc2.  One grid step processes `blk` images; weights have constant index
# maps so they stay resident in VMEM across the grid.
# --------------------------------------------------------------------------
def _simple_cnn_kernel(x_ref, w1_ref, b1_ref, w2_ref, b2_ref,
                       w3_ref, b3_ref, w4_ref, b4_ref, o_ref,
                       act1_ref, pad1_ref, act2_ref, pool2_ref):
    blk = x_ref.shape[0]

    # Zero pad1 once per grid step: its zero border/slack rows are never
    # overwritten by the pool1 writes below, and every interior row conv2 reads
    # is rewritten for each image, so this covers all `blk` images.
    pad1_ref[...] = jnp.zeros_like(pad1_ref)

    for b in range(blk):
        # ---- conv1 + ReLU: single im2col matmul (1024, 32) @ (32, 32) ------
        a1 = jnp.dot(x_ref[b], w1_ref[...], preferred_element_type=jnp.float32)
        act1_ref[...] = jnp.maximum(a1 + b1_ref[...], 0.0)       # (1024, 32)

        # ---- maxpool 2x2 on conv1 output, written lane-packed (the three ----
        # ---- kj taps at lane offsets 0/32/64) into the padded flat layout ---
        for h in range(16):
            base = 2 * h * 32
            p = jnp.maximum(
                jnp.maximum(act1_ref[pl.ds(base, 16, stride=2), :],
                            act1_ref[pl.ds(base + 1, 16, stride=2), :]),
                jnp.maximum(act1_ref[pl.ds(base + 32, 16, stride=2), :],
                            act1_ref[pl.ds(base + 33, 16, stride=2), :]))
            r0 = (h + 1) * PAD1_W + 2
            pad1_ref[r0:r0 + 16, 0:32] = p           # kj = 0 tap
            pad1_ref[r0 - 1:r0 + 15, 32:64] = p      # kj = 1 tap
            pad1_ref[r0 - 2:r0 + 14, 64:96] = p      # kj = 2 tap

        # ---- conv2 + ReLU: 3 lane-packed taps, (288, 96) @ (96, 64) each ----
        a2 = jnp.dot(pad1_ref[0:CONV2_ROWS, :], w2_ref[0],
                     preferred_element_type=jnp.float32)
        a2 = a2 + jnp.dot(pad1_ref[PAD1_W:PAD1_W + CONV2_ROWS, :], w2_ref[1],
                          preferred_element_type=jnp.float32)
        a2 = a2 + jnp.dot(pad1_ref[2 * PAD1_W:2 * PAD1_W + CONV2_ROWS, :],
                          w2_ref[2], preferred_element_type=jnp.float32)
        act2_ref[...] = jnp.maximum(a2 + b2_ref[...], 0.0)       # (288, 64)

        # ---- maxpool 2x2 -> 64 compact NHWC rows for this image -------------
        for h in range(8):
            base = 2 * h * PAD1_W + 1
            p = jnp.maximum(
                jnp.maximum(act2_ref[pl.ds(base, 8, stride=2), :],
                            act2_ref[pl.ds(base + 1, 8, stride=2), :]),
                jnp.maximum(act2_ref[pl.ds(base + PAD1_W, 8, stride=2), :],
                            act2_ref[pl.ds(base + PAD1_W + 1, 8, stride=2), :]))
            pool2_ref[64 * b + 8 * h:64 * b + 8 * h + 8, :] = p

    # ---- fc1 + ReLU + fc2, once per grid step with M = blk ------------------
    # Gather each spatial position's (blk, 64) channel slab with a stride-64
    # sublane read and lane-concatenate into the flat (blk, 4096) activations.
    if blk == 1:
        pieces = [pool2_ref[pl.ds(hw, 1), :] for hw in range(64)]
    else:
        pieces = [pool2_ref[pl.ds(hw, blk, stride=64), :] for hw in range(64)]
    fc_in = jnp.concatenate(pieces, axis=1)                      # (blk, 4096)
    h1 = jnp.maximum(jnp.dot(fc_in, w3_ref[...],
                             preferred_element_type=jnp.float32) + b3_ref[...],
                     0.0)                                        # (blk, 128)
    out = jnp.dot(h1, w4_ref[...],
                  preferred_element_type=jnp.float32) + b4_ref[...]
    o_ref[0] = out.astype(o_ref.dtype)                           # (blk, 10)


def simple_cnn_pallas(xcol, params, batch, blk):
    grid = batch // blk
    return pl.pallas_call(
        _simple_cnn_kernel,
        out_shape=jax.ShapeDtypeStruct((grid, blk, FC_OUT), jnp.float32),
        grid_spec=pltpu.PrefetchScalarGridSpec(
            num_scalar_prefetch=0,
            grid=(grid,),
            in_specs=[
                pl.BlockSpec((blk, CONV1_ROWS, K1), lambda g: (g, 0, 0)),
                pl.BlockSpec((K1, C1), lambda g: (0, 0)),
                pl.BlockSpec((1, C1), lambda g: (0, 0)),
                pl.BlockSpec((3, 3 * C1, C2), lambda g: (0, 0, 0)),
                pl.BlockSpec((1, C2), lambda g: (0, 0)),
                pl.BlockSpec((FC_IN, FC_HID), lambda g: (0, 0)),
                pl.BlockSpec((1, FC_HID), lambda g: (0, 0)),
                pl.BlockSpec((FC_HID, FC_OUT), lambda g: (0, 0)),
                pl.BlockSpec((1, FC_OUT), lambda g: (0, 0)),
            ],
            out_specs=pl.BlockSpec((1, blk, FC_OUT), lambda g: (g, 0, 0)),
            scratch_shapes=[
                pltpu.VMEM((CONV1_ROWS, C1), jnp.float32),   # conv1 activations
                pltpu.VMEM((PAD1_ROWS, 3 * C1), jnp.float32),  # lane-packed pad1
                pltpu.VMEM((CONV2_ROWS, C2), jnp.float32),   # conv2 activations
                pltpu.VMEM((blk * 64, C2), jnp.float32),     # pooled2, all images
            ],
        ),
        compiler_params=pltpu.CompilerParams(
            dimension_semantics=("parallel",)),
    )(xcol, params["conv1_w"], params["conv1_b"],
      params["conv2_w"], params["conv2_b"],
      params["fc1_w"], params["fc1_b"],
      params["fc2_w"], params["fc2_b"])


# ------------------------------- parameters --------------------------------
def init_params(key):
    """PyTorch-layout parameters (uniform +-1/sqrt(fan_in), default init)."""
    ks = jax.random.split(key, 8)

    def u(k, shape, fan_in):
        bound = 1.0 / jnp.sqrt(jnp.float32(fan_in))
        return jax.random.uniform(k, shape, jnp.float32, -bound, bound)

    return {
        "conv1_w": u(ks[0], (C1, C_IN, 3, 3), C_IN * 9),
        "conv1_b": u(ks[1], (C1,), C_IN * 9),
        "conv2_w": u(ks[2], (C2, C1, 3, 3), C1 * 9),
        "conv2_b": u(ks[3], (C2,), C1 * 9),
        "fc1_w": u(ks[4], (FC_HID, FC_IN), FC_IN),
        "fc1_b": u(ks[5], (FC_HID,), FC_IN),
        "fc2_w": u(ks[6], (FC_OUT, FC_HID), FC_HID),
        "fc2_b": u(ks[7], (FC_OUT,), FC_HID),
    }


def prepare_params(p):
    """One-time re-layout of PyTorch-shaped params for the fused kernel."""
    # conv1: (Cout, Cin, 3, 3) -> im2col weight (27, 32), zero-padded to (32, 32)
    w1 = jnp.transpose(p["conv1_w"], (2, 3, 1, 0)).reshape(9 * C_IN, C1)
    w1 = jnp.pad(w1, ((0, K1 - 9 * C_IN), (0, 0)))
    # conv2: (Cout, Cin, 3, 3) -> per-ki lane-packed weight (3, 3*Cin, Cout)
    w2 = jnp.transpose(p["conv2_w"], (2, 3, 1, 0)).reshape(3, 3 * C1, C2)
    # fc1: permute feature axis from PyTorch's (c, h, w) flatten order to the
    # kernel's NHWC (h, w, c) order, then pre-transpose.
    w3 = jnp.transpose(p["fc1_w"].reshape(FC_HID, C2, 8, 8),
                       (0, 2, 3, 1)).reshape(FC_HID, FC_IN).T
    return {
        "conv1_w": w1, "conv1_b": p["conv1_b"].reshape(1, C1),
        "conv2_w": w2, "conv2_b": p["conv2_b"].reshape(1, C2),
        "fc1_w": w3, "fc1_b": p["fc1_b"].reshape(1, FC_HID),
        "fc2_w": p["fc2_w"].T, "fc2_b": p["fc2_b"].reshape(1, FC_OUT),
    }


# --------------------------------- forward ---------------------------------
def simple_cnn_forward(x, params):
    """x: (B, 3, 32, 32) float32 NCHW, like the PyTorch module."""
    B = x.shape[0]
    blk = _pick_block(B)
    # API boundary only: NCHW -> NHWC, zero-pad, im2col (9 taps x 3ch on lanes,
    # zero-padded 27 -> 32).  ~128 KB/image of extra HBM, one matmul per conv1.
    xh = jnp.transpose(x, (0, 2, 3, 1))
    xp = jnp.pad(xh, ((0, 0), (1, 1), (1, 1), (0, 0)))            # (B,34,34,3)
    taps = [xp[:, ki:ki + 32, kj:kj + 32, :]
            for ki in range(3) for kj in range(3)]
    xcol = jnp.stack(taps, axis=3).reshape(B, CONV1_ROWS, 9 * C_IN)
    xcol = jnp.pad(xcol, ((0, 0), (0, 0), (0, K1 - 9 * C_IN)))    # (B,1024,32)

    out = simple_cnn_pallas(xcol, params, B, blk)                 # (G, blk, 10)
    return out.reshape(B, FC_OUT)


# -------------------------- pure-JAX reference -----------------------------
def reference_forward(x, tp):
    dn = ("NCHW", "OIHW", "NCHW")
    hi = jax.lax.Precision.HIGHEST
    y = jax.lax.conv_general_dilated(x, tp["conv1_w"], (1, 1), ((1, 1), (1, 1)),
                                     dimension_numbers=dn, precision=hi)
    y = jnp.maximum(y + tp["conv1_b"][None, :, None, None], 0.0)
    B, C, H, W = y.shape
    y = y.reshape(B, C, H // 2, 2, W // 2, 2).max(axis=(3, 5))
    y = jax.lax.conv_general_dilated(y, tp["conv2_w"], (1, 1), ((1, 1), (1, 1)),
                                     dimension_numbers=dn, precision=hi)
    y = jnp.maximum(y + tp["conv2_b"][None, :, None, None], 0.0)
    B, C, H, W = y.shape
    y = y.reshape(B, C, H // 2, 2, W // 2, 2).max(axis=(3, 5))
    y = y.reshape(B, -1)
    y = jnp.maximum(jnp.dot(y, tp["fc1_w"].T, precision=hi) + tp["fc1_b"], 0.0)
    return jnp.dot(y, tp["fc2_w"].T, precision=hi) + tp["fc2_b"]


if __name__ == "__main__":
    key = jax.random.PRNGKey(0)
    pkey, xkey = jax.random.split(key)
    torch_params = init_params(pkey)
    params = prepare_params(torch_params)     # one-time weight re-layout

    fwd = jax.jit(simple_cnn_forward)

    # fc1 expects 64*8*8 features => 3x32x32 input (two 2x2 pools).
    # B=2 exercises the blk=1 / 2-step grid path, B=8 the blk=4 batched path.
    for B in (2, 8):
        x = jax.random.normal(jax.random.fold_in(xkey, B),
                              (B, 3, 32, 32), jnp.float32)
        out = jax.block_until_ready(fwd(x, params))
        assert out.shape == (B, FC_OUT), out.shape
        assert out.dtype == jnp.float32
        ref = reference_forward(x, torch_params)
        err = float(jnp.max(jnp.abs(out - ref)))
        assert err < 1e-3, f"B={B}: max abs err vs reference: {err}"

    print("KERNEL_OK")
</pallas_src>

<mosaic_0001>
module attributes {stable_mosaic.version = 11 : i64} {
  func.func @_simple_cnn_kernel(%arg0: i32, %arg1: memref<1x1024x32xf32, #tpu.memory_space<vmem>>, %arg2: memref<32x32xf32, #tpu.memory_space<vmem>>, %arg3: memref<1x32xf32, #tpu.memory_space<vmem>>, %arg4: memref<3x96x64xf32, #tpu.memory_space<vmem>>, %arg5: memref<1x64xf32, #tpu.memory_space<vmem>>, %arg6: memref<4096x128xf32, #tpu.memory_space<vmem>>, %arg7: memref<1x128xf32, #tpu.memory_space<vmem>>, %arg8: memref<128x10xf32, #tpu.memory_space<vmem>>, %arg9: memref<1x10xf32, #tpu.memory_space<vmem>>, %arg10: memref<1x1x10xf32, #tpu.memory_space<vmem>>, %arg11: memref<1024x32xf32, #tpu.memory_space<vmem>>, %arg12: memref<326x96xf32, #tpu.memory_space<vmem>>, %arg13: memref<288x64xf32, #tpu.memory_space<vmem>>, %arg14: memref<64x64xf32, #tpu.memory_space<vmem>>) attributes {dimension_semantics = [#tpu.dimension_semantics<parallel>], iteration_bounds = array<i64: 2>, scalar_prefetch = 0 : i64, scratch_operands = 4 : i64, tpu.core_type = #tpu.core_type<tc>, window_params = [{transform_indices = @transform_0, window_bounds = array<i64: 1, 1024, 32>}, {pipeline_mode = #tpu.pipeline_mode<synchronous>, transform_indices = @transform_1, window_bounds = array<i64: 32, 32>}, {pipeline_mode = #tpu.pipeline_mode<synchronous>, transform_indices = @transform_2, window_bounds = array<i64: 1, 32>}, {pipeline_mode = #tpu.pipeline_mode<synchronous>, transform_indices = @transform_3, window_bounds = array<i64: 3, 96, 64>}, {pipeline_mode = #tpu.pipeline_mode<synchronous>, transform_indices = @transform_4, window_bounds = array<i64: 1, 64>}, {pipeline_mode = #tpu.pipeline_mode<synchronous>, transform_indices = @transform_5, window_bounds = array<i64: 4096, 128>}, {pipeline_mode = #tpu.pipeline_mode<synchronous>, transform_indices = @transform_6, window_bounds = array<i64: 1, 128>}, {pipeline_mode = #tpu.pipeline_mode<synchronous>, transform_indices = @transform_7, window_bounds = array<i64: 128, 10>}, {pipeline_mode = #tpu.pipeline_mode<synchronous>, transform_indices = @transform_8, window_bounds = array<i64: 1, 10>}, {transform_indices = @transform_9, window_bounds = array<i64: 1, 1, 10>}]} {
    %cst = arith.constant 0.000000e+00 : f32
    %0 = vector.broadcast %cst : f32 to vector<326x96xf32>
    %c0 = arith.constant 0 : index
    %c0_0 = arith.constant 0 : index
    %1 = vector.load %arg12[%c0, %c0_0] : memref<326x96xf32, #tpu.memory_space<vmem>>, vector<326x96xf32>
    tpu.vector_store %arg12[%c0, %c0_0], %0 {strides = array<i32>} : memref<326x96xf32, #tpu.memory_space<vmem>>, vector<326x96xf32>,
    %c0_1 = arith.constant 0 : index
    %c0_2 = arith.constant 0 : index
    %c0_3 = arith.constant 0 : index
    %2 = vector.load %arg1[%c0_1, %c0_2, %c0_3] : memref<1x1024x32xf32, #tpu.memory_space<vmem>>, vector<1x1024x32xf32>
    %3 = vector.shape_cast %2 : vector<1x1024x32xf32> to vector<1024x32xf32>
    %c0_4 = arith.constant 0 : index
    %c0_5 = arith.constant 0 : index
    %4 = vector.load %arg2[%c0_4, %c0_5] : memref<32x32xf32, #tpu.memory_space<vmem>>, vector<32x32xf32>
    %cst_6 = arith.constant dense<0.000000e+00> : vector<1024x32xf32>
    %5 = tpu.matmul %3, %4, %cst_6 {dimension_numbers = #tpu.dot_dimension_numbers<[1], [0], [0], [1], [0, 0, 1, 1], [], []>} : vector<1024x32xf32>, vector<32x32xf32>, vector<1024x32xf32> -> vector<1024x32xf32>
    %c0_7 = arith.constant 0 : index
    %c0_8 = arith.constant 0 : index
    %6 = vector.load %arg3[%c0_7, %c0_8] : memref<1x32xf32, #tpu.memory_space<vmem>>, vector<1x32xf32>
    %7 = vector.broadcast %6 : vector<1x32xf32> to vector<1024x32xf32>
    %8 = arith.addf %5, %7 : vector<1024x32xf32>
    %cst_9 = arith.constant 0.000000e+00 : f32
    %9 = vector.broadcast %cst_9 : f32 to vector<1024x32xf32>
    %10 = arith.maximumf %8, %9 : vector<1024x32xf32>
    %c0_10 = arith.constant 0 : index
    %c0_11 = arith.constant 0 : index
    %11 = vector.load %arg11[%c0_10, %c0_11] : memref<1024x32xf32, #tpu.memory_space<vmem>>, vector<1024x32xf32>
    tpu.vector_store %arg11[%c0_10, %c0_11], %10 {strides = array<i32>} : memref<1024x32xf32, #tpu.memory_space<vmem>>, vector<1024x32xf32>,
    %c0_12 = arith.constant 0 : index
    %c0_13 = arith.constant 0 : index
    %12 = tpu.strided_load %arg11[%c0_12, %c0_13] {strides = array<i32: 2, 1>} : memref<1024x32xf32, #tpu.memory_space<vmem>>, vector<16x32xf32>
    %c1 = arith.constant 1 : index
    %c0_14 = arith.constant 0 : index
    %13 = tpu.strided_load %arg11[%c1, %c0_14] {strides = array<i32: 2, 1>} : memref<1024x32xf32, #tpu.memory_space<vmem>>, vector<16x32xf32>
    %14 = arith.maximumf %12, %13 : vector<16x32xf32>
    %c32 = arith.constant 32 : index
    %c0_15 = arith.constant 0 : index
    %15 = tpu.strided_load %arg11[%c32, %c0_15] {strides = array<i32: 2, 1>} : memref<1024x32xf32, #tpu.memory_space<vmem>>, vector<16x32xf32>
    %c33 = arith.constant 33 : index
    %c0_16 = arith.constant 0 : index
    %16 = tpu.strided_load %arg11[%c33, %c0_16] {strides = array<i32: 2, 1>} : memref<1024x32xf32, #tpu.memory_space<vmem>>, vector<16x32xf32>
    %17 = arith.maximumf %15, %16 : vector<16x32xf32>
    %18 = arith.maximumf %14, %17 : vector<16x32xf32>
    %c20 = arith.constant 20 : index
    %c0_17 = arith.constant 0 : index
    %19 = vector.load %arg12[%c20, %c0_17] : memref<326x96xf32, #tpu.memory_space<vmem>>, vector<16x32xf32>
    tpu.vector_store %arg12[%c20, %c0_17], %18 {strides = array<i32>} : memref<326x96xf32, #tpu.memory_space<vmem>>, vector<16x32xf32>,
    %c19 = arith.constant 19 : index
    %c32_18 = arith.constant 32 : index
    %20 = vector.load %arg12[%c19, %c32_18] : memref<326x96xf32, #tpu.memory_space<vmem>>, vector<16x32xf32>
    tpu.vector_store %arg12[%c19, %c32_18], %18 {strides = array<i32>} : memref<326x96xf32, #tpu.memory_space<vmem>>, vector<16x32xf32>,
    %c18 = arith.constant 18 : index
    %c64 = arith.constant 64 : index
    %21 = vector.load %arg12[%c18, %c64] : memref<326x96xf32, #tpu.memory_space<vmem>>, vector<16x32xf32>
    tpu.vector_store %arg12[%c18, %c64], %18 {strides = array<i32>} : memref<326x96xf32, #tpu.memory_space<vmem>>, vector<16x32xf32>,
    %c64_19 = arith.constant 64 : index
    %c0_20 = arith.constant 0 : index
    %22 = tpu.strided_load %arg11[%c64_19, %c0_20] {strides = array<i32: 2, 1>} : memref<1024x32xf32, #tpu.memory_space<vmem>>, vector<16x32xf32>
    %c65 = arith.constant 65 : index
    %c0_21 = arith.constant 0 : index
    %23 = tpu.strided_load %arg11[%c65, %c0_21] {strides = array<i32: 2, 1>} : memref<1024x32xf32, #tpu.memory_space<vmem>>, vector<16x32xf32>
    %24 = arith.maximumf %22, %23 : vector<16x32xf32>
    %c96 = arith.constant 96 : index
    %c0_22 = arith.constant 0 : index
    %25 = tpu.strided_load %arg11[%c96, %c0_22] {strides = array<i32: 2, 1>} : memref<1024x32xf32, #tpu.memory_space<vmem>>, vector<16x32xf32>
    %c97 = arith.constant 97 : index
    %c0_23 = arith.constant 0 : index
    %26 = tpu.strided_load %arg11[%c97, %c0_23] {strides = array<i32: 2, 1>} : memref<1024x32xf32, #tpu.memory_space<vmem>>, vector<16x32xf32>
    %27 = arith.maximumf %25, %26 : vector<16x32xf32>
    %28 = arith.maximumf %24, %27 : vector<16x32xf32>
    %c38 = arith.constant 38 : index
    %c0_24 = arith.constant 0 : index
    %29 = vector.load %arg12[%c38, %c0_24] : memref<326x96xf32, #tpu.memory_space<vmem>>, vector<16x32xf32>
    tpu.vector_store %arg12[%c38, %c0_24], %28 {strides = array<i32>} : memref<326x96xf32, #tpu.memory_space<vmem>>, vector<16x32xf32>,
    %c37 = arith.constant 37 : index
    %c32_25 = arith.constant 32 : index
    %30 = vector.load %arg12[%c37, %c32_25] : memref<326x96xf32, #tpu.memory_space<vmem>>, vector<16x32xf32>
    tpu.vector_store %arg12[%c37, %c32_25], %28 {strides = array<i32>} : memref<326x96xf32, #tpu.memory_space<vmem>>, vector<16x32xf32>,
    %c36 = arith.constant 36 : index
    %c64_26 = arith.constant 64 : index
    %31 = vector.load %arg12[%c36, %c64_26] : memref<326x96xf32, #tpu.memory_space<vmem>>, vector<16x32xf32>
    tpu.vector_store %arg12[%c36, %c64_26], %28 {strides = array<i32>} : memref<326x96xf32, #tpu.memory_space<vmem>>, vector<16x32xf32>,
    %c128 = arith.constant 128 : index
    %c0_27 = arith.constant 0 : index
    %32 = tpu.strided_load %arg11[%c128, %c0_27] {strides = array<i32: 2, 1>} : memref<1024x32xf32, #tpu.memory_space<vmem>>, vector<16x32xf32>
    %c129 = arith.constant 129 : index
    %c0_28 = arith.constant 0 : index
    %33 = tpu.strided_load %arg11[%c129, %c0_28] {strides = array<i32: 2, 1>} : memref<1024x32xf32, #tpu.memory_space<vmem>>, vector<16x32xf32>
    %34 = arith.maximumf %32, %33 : vector<16x32xf32>
    %c160 = arith.constant 160 : index
    %c0_29 = arith.constant 0 : index
    %35 = tpu.strided_load %arg11[%c160, %c0_29] {strides = array<i32: 2, 1>} : memref<1024x32xf32, #tpu.memory_space<vmem>>, vector<16x32xf32>
    %c161 = arith.constant 161 : index
    %c0_30 = arith.constant 0 : index
    %36 = tpu.strided_load %arg11[%c161, %c0_30] {strides = array<i32: 2, 1>} : memref<1024x32xf32, #tpu.memory_space<vmem>>, vector<16x32xf32>
    %37 = arith.maximumf %35, %36 : vector<16x32xf32>
    %38 = arith.maximumf %34, %37 : vector<16x32xf32>
    %c56 = arith.constant 56 : index
    %c0_31 = arith.constant 0 : index
    %39 = vector.load %arg12[%c56, %c0_31] : memref<326x96xf32, #tpu.memory_space<vmem>>, vector<16x32xf32>
    tpu.vector_store %arg12[%c56, %c0_31], %38 {strides = array<i32>} : memref<326x96xf32, #tpu.memory_space<vmem>>, vector<16x32xf32>,
    %c55 = arith.constant 55 : index
    %c32_32 = arith.constant 32 : index
    %40 = vector.load %arg12[%c55, %c32_32] : memref<326x96xf32, #tpu.memory_space<vmem>>, vector<16x32xf32>
    tpu.vector_store %arg12[%c55, %c32_32], %38 {strides = array<i32>} : memref<326x96xf32, #tpu.memory_space<vmem>>, vector<16x32xf32>,
    %c54 = arith.constant 54 : index
    %c64_33 = arith.constant 64 : index
    %41 = vector.load %arg12[%c54, %c64_33] : memref<326x96xf32, #tpu.memory_space<vmem>>, vector<16x32xf32>
    tpu.vector_store %arg12[%c54, %c64_33], %38 {strides = array<i32>} : memref<326x96xf32, #tpu.memory_space<vmem>>, vector<16x32xf32>,
    %c192 = arith.constant 192 : index
    %c0_34 = arith.constant 0 : index
    %42 = tpu.strided_load %arg11[%c192, %c0_34] {strides = array<i32: 2, 1>} : memref<1024x32xf32, #tpu.memory_space<vmem>>, vector<16x32xf32>
    %c193 = arith.constant 193 : index
    %c0_35 = arith.constant 0 : index
    %43 = tpu.strided_load %arg11[%c193, %c0_35] {strides = array<i32: 2, 1>} : memref<1024x32xf32, #tpu.memory_space<vmem>>, vector<16x32xf32>
    %44 = arith.maximumf %42, %43 : vector<16x32xf32>
    %c224 = arith.constant 224 : index
    %c0_36 = arith.constant 0 : index
    %45 = tpu.strided_load %arg11[%c224, %c0_36] {strides = array<i32: 2, 1>} : memref<1024x32xf32, #tpu.memory_space<vmem>>, vector<16x32xf32>
    %c225 = arith.constant 225 : index
    %c0_37 = arith.constant 0 : index
    %46 = tpu.strided_load %arg11[%c225, %c0_37] {strides = array<i32: 2, 1>} : memref<1024x32xf32, #tpu.memory_space<vmem>>, vector<16x32xf32>
    %47 = arith.maximumf %45, %46 : vector<16x32xf32>
    %48 = arith.maximumf %44, %47 : vector<16x32xf32>
    %c74 = arith.constant 74 : index
    %c0_38 = arith.constant 0 : index
    %49 = vector.load %arg12[%c74, %c0_38] : memref<326x96xf32, #tpu.memory_space<vmem>>, vector<16x32xf32>
    tpu.vector_store %arg12[%c74, %c0_38], %48 {strides = array<i32>} : memref<326x96xf32, #tpu.memory_space<vmem>>, vector<16x32xf32>,
    %c73 = arith.constant 73 : index
    %c32_39 = arith.constant 32 : index
    %50 = vector.load %arg12[%c73, %c32_39] : memref<326x96xf32, #tpu.memory_space<vmem>>, vector<16x32xf32>
    tpu.vector_store %arg12[%c73, %c32_39], %48 {strides = array<i32>} : memref<326x96xf32, #tpu.memory_space<vmem>>, vector<16x32xf32>,
    %c72 = arith.constant 72 : index
    %c64_40 = arith.constant 64 : index
    %51 = vector.load %arg12[%c72, %c64_40] : memref<326x96xf32, #tpu.memory_space<vmem>>, vector<16x32xf32>
    tpu.vector_store %arg12[%c72, %c64_40], %48 {strides = array<i32>} : memref<326x96xf32, #tpu.memory_space<vmem>>, vector<16x32xf32>,
    %c256 = arith.constant 256 : index
    %c0_41 = arith.constant 0 : index
    %52 = tpu.strided_load %arg11[%c256, %c0_41] {strides = array<i32: 2, 1>} : memref<1024x32xf32, #tpu.memory_space<vmem>>, vector<16x32xf32>
    %c257 = arith.constant 257 : index
    %c0_42 = arith.constant 0 : index
    %53 = tpu.strided_load %arg11[%c257, %c0_42] {strides = array<i32: 2, 1>} : memref<1024x32xf32, #tpu.memory_space<vmem>>, vector<16x32xf32>
    %54 = arith.maximumf %52, %53 : vector<16x32xf32>
    %c288 = arith.constant 288 : index
    %c0_43 = arith.constant 0 : index
    %55 = tpu.strided_load %arg11[%c288, %c0_43] {strides = array<i32: 2, 1>} : memref<1024x32xf32, #tpu.memory_space<vmem>>, vector<16x32xf32>
    %c289 = arith.constant 289 : index
    %c0_44 = arith.constant 0 : index
    %56 = tpu.strided_load %arg11[%c289, %c0_44] {strides = array<i32: 2, 1>} : memref<1024x32xf32, #tpu.memory_space<vmem>>, vector<16x32xf32>
    %57 = arith.maximumf %55, %56 : vector<16x32xf32>
    %58 = arith.maximumf %54, %57 : vector<16x32xf32>
    %c92 = arith.constant 92 : index
    %c0_45 = arith.constant 0 : index
    %59 = vector.load %arg12[%c92, %c0_45] : memref<326x96xf32, #tpu.memory_space<vmem>>, vector<16x32xf32>
    tpu.vector_store %arg12[%c92, %c0_45], %58 {strides = array<i32>} : memref<326x96xf32, #tpu.memory_space<vmem>>, vector<16x32xf32>,
    %c91 = arith.constant 91 : index
    %c32_46 = arith.constant 32 : index
    %60 = vector.load %arg12[%c91, %c32_46] : memref<326x96xf32, #tpu.memory_space<vmem>>, vector<16x32xf32>
    tpu.vector_store %arg12[%c91, %c32_46], %58 {strides = array<i32>} : memref<326x96xf32, #tpu.memory_space<vmem>>, vector<16x32xf32>,
    %c90 = arith.constant 90 : index
    %c64_47 = arith.constant 64 : index
    %61 = vector.load %arg12[%c90, %c64_47] : memref<326x96xf32, #tpu.memory_space<vmem>>, vector<16x32xf32>
    tpu.vector_store %arg12[%c90, %c64_47], %58 {strides = array<i32>} : memref<326x96xf32, #tpu.memory_space<vmem>>, vector<16x32xf32>,
    %c320 = arith.constant 320 : index
    %c0_48 = arith.constant 0 : index
    %62 = tpu.strided_load %arg11[%c320, %c0_48] {strides = array<i32: 2, 1>} : memref<1024x32xf32, #tpu.memory_space<vmem>>, vector<16x32xf32>
    %c321 = arith.constant 321 : index
    %c0_49 = arith.constant 0 : index
    %63 = tpu.strided_load %arg11[%c321, %c0_49] {strides = array<i32: 2, 1>} : memref<1024x32xf32, #tpu.memory_space<vmem>>, vector<16x32xf32>
    %64 = arith.maximumf %62, %63 : vector<16x32xf32>
    %c352 = arith.constant 352 : index
    %c0_50 = arith.constant 0 : index
    %65 = tpu.strided_load %arg11[%c352, %c0_50] {strides = array<i32: 2, 1>} : memref<1024x32xf32, #tpu.memory_space<vmem>>, vector<16x32xf32>
    %c353 = arith.constant 353 : index
    %c0_51 = arith.constant 0 : index
    %66 = tpu.strided_load %arg11[%c353, %c0_51] {strides = array<i32: 2, 1>} : memref<1024x32xf32, #tpu.memory_space<vmem>>, vector<16x32xf32>
    %67 = arith.maximumf %65, %66 : vector<16x32xf32>
    %68 = arith.maximumf %64, %67 : vector<16x32xf32>
    %c110 = arith.constant 110 : index
    %c0_52 = arith.constant 0 : index
    %69 = vector.load %arg12[%c110, %c0_52] : memref<326x96xf32, #tpu.memory_space<vmem>>, vector<16x32xf32>
    tpu.vector_store %arg12[%c110, %c0_52], %68 {strides = array<i32>} : memref<326x96xf32, #tpu.memory_space<vmem>>, vector<16x32xf32>,
    %c109 = arith.constant 109 : index
    %c32_53 = arith.constant 32 : index
    %70 = vector.load %arg12[%c109, %c32_53] : memref<326x96xf32, #tpu.memory_space<vmem>>, vector<16x32xf32>
    tpu.vector_store %arg12[%c109, %c32_53], %68 {strides = array<i32>} : memref<326x96xf32, #tpu.memory_space<vmem>>, vector<16x32xf32>,
    %c108 = arith.constant 108 : index
    %c64_54 = arith.constant 64 : index
    %71 = vector.load %arg12[%c108, %c64_54] : memref<326x96xf32, #tpu.memory_space<vmem>>, vector<16x32xf32>
    tpu.vector_store %arg12[%c108, %c64_54], %68 {strides = array<i32>} : memref<326x96xf32, #tpu.memory_space<vmem>>, vector<16x32xf32>,
    %c384 = arith.constant 384 : index
    %c0_55 = arith.constant 0 : index
    %72 = tpu.strided_load %arg11[%c384, %c0_55] {strides = array<i32: 2, 1>} : memref<1024x32xf32, #tpu.memory_space<vmem>>, vector<16x32xf32>
    %c385 = arith.constant 385 : index
    %c0_56 = arith.constant 0 : index
    %73 = tpu.strided_load %arg11[%c385, %c0_56] {strides = array<i32: 2, 1>} : memref<1024x32xf32, #tpu.memory_space<vmem>>, vector<16x32xf32>
    %74 = arith.maximumf %72, %73 : vector<16x32xf32>
    %c416 = arith.constant 416 : index
    %c0_57 = arith.constant 0 : index
    %75 = tpu.strided_load %arg11[%c416, %c0_57] {strides = array<i32: 2, 1>} : memref<1024x32xf32, #tpu.memory_space<vmem>>, vector<16x32xf32>
    %c417 = arith.constant 417 : index
    %c0_58 = arith.constant 0 : index
    %76 = tpu.strided_load %arg11[%c417, %c0_58] {strides = array<i32: 2, 1>} : memref<1024x32xf32, #tpu.memory_space<vmem>>, vector<16x32xf32>
    %77 = arith.maximumf %75, %76 : vector<16x32xf32>
    %78 = arith.maximumf %74, %77 : vector<16x32xf32>
    %c128_59 = arith.constant 128 : index
    %c0_60 = arith.constant 0 : index
    %79 = vector.load %arg12[%c128_59, %c0_60] : memref<326x96xf32, #tpu.memory_space<vmem>>, vector<16x32xf32>
    tpu.vector_store %arg12[%c128_59, %c0_60], %78 {strides = array<i32>} : memref<326x96xf32, #tpu.memory_space<vmem>>, vector<16x32xf32>,
    %c127 = arith.constant 127 : index
    %c32_61 = arith.constant 32 : index
    %80 = vector.load %arg12[%c127, %c32_61] : memref<326x96xf32, #tpu.memory_space<vmem>>, vector<16x32xf32>
    tpu.vector_store %arg12[%c127, %c32_61], %78 {strides = array<i32>} : memref<326x96xf32, #tpu.memory_space<vmem>>, vector<16x32xf32>,
    %c126 = arith.constant 126 : index
    %c64_62 = arith.constant 64 : index
    %81 = vector.load %arg12[%c126, %c64_62] : memref<326x96xf32, #tpu.memory_space<vmem>>, vector<16x32xf32>
    tpu.vector_store %arg12[%c126, %c64_62], %78 {strides = array<i32>} : memref<326x96xf32, #tpu.memory_space<vmem>>, vector<16x32xf32>,
    %c448 = arith.constant 448 : index
    %c0_63 = arith.constant 0 : index
    %82 = tpu.strided_load %arg11[%c448, %c0_63] {strides = array<i32: 2, 1>} : memref<1024x32xf32, #tpu.memory_space<vmem>>, vector<16x32xf32>
    %c449 = arith.constant 449 : index
    %c0_64 = arith.constant 0 : index
    %83 = tpu.strided_load %arg11[%c449, %c0_64] {strides = array<i32: 2, 1>} : memref<1024x32xf32, #tpu.memory_space<vmem>>, vector<16x32xf32>
    %84 = arith.maximumf %82, %83 : vector<16x32xf32>
    %c480 = arith.constant 480 : index
    %c0_65 = arith.constant 0 : index
    %85 = tpu.strided_load %arg11[%c480, %c0_65] {strides = array<i32: 2, 1>} : memref<1024x32xf32, #tpu.memory_space<vmem>>, vector<16x32xf32>
    %c481 = arith.constant 481 : index
    %c0_66 = arith.constant 0 : index
    %86 = tpu.strided_load %arg11[%c481, %c0_66] {strides = array<i32: 2, 1>} : memref<1024x32xf32, #tpu.memory_space<vmem>>, vector<16x32xf32>
    %87 = arith.maximumf %85, %86 : vector<16x32xf32>
    %88 = arith.maximumf %84, %87 : vector<16x32xf32>
    %c146 = arith.constant 146 : index
    %c0_67 = arith.constant 0 : index
    %89 = vector.load %arg12[%c146, %c0_67] : memref<326x96xf32, #tpu.memory_space<vmem>>, vector<16x32xf32>
    tpu.vector_store %arg12[%c146, %c0_67], %88 {strides = array<i32>} : memref<326x96xf32, #tpu.memory_space<vmem>>, vector<16x32xf32>,
    %c145 = arith.constant 145 : index
    %c32_68 = arith.constant 32 : index
    %90 = vector.load %arg12[%c145, %c32_68] : memref<326x96xf32, #tpu.memory_space<vmem>>, vector<16x32xf32>
    tpu.vector_store %arg12[%c145, %c32_68], %88 {strides = array<i32>} : memref<326x96xf32, #tpu.memory_space<vmem>>, vector<16x32xf32>,
    %c144 = arith.constant 144 : index
    %c64_69 = arith.constant 64 : index
    %91 = vector.load %arg12[%c144, %c64_69] : memref<326x96xf32, #tpu.memory_space<vmem>>, vector<16x32xf32>
    tpu.vector_store %arg12[%c144, %c64_69], %88 {strides = array<i32>} : memref<326x96xf32, #tpu.memory_space<vmem>>, vector<16x32xf32>,
    %c512 = arith.constant 512 : index
    %c0_70 = arith.constant 0 : index
    %92 = tpu.strided_load %arg11[%c512, %c0_70] {strides = array<i32: 2, 1>} : memref<1024x32xf32, #tpu.memory_space<vmem>>, vector<16x32xf32>
    %c513 = arith.constant 513 : index
    %c0_71 = arith.constant 0 : index
    %93 = tpu.strided_load %arg11[%c513, %c0_71] {strides = array<i32: 2, 1>} : memref<1024x32xf32, #tpu.memory_space<vmem>>, vector<16x32xf32>
    %94 = arith.maximumf %92, %93 : vector<16x32xf32>
    %c544 = arith.constant 544 : index
    %c0_72 = arith.constant 0 : index
    %95 = tpu.strided_load %arg11[%c544, %c0_72] {strides = array<i32: 2, 1>} : memref<1024x32xf32, #tpu.memory_space<vmem>>, vector<16x32xf32>
    %c545 = arith.constant 545 : index
    %c0_73 = arith.constant 0 : index
    %96 = tpu.strided_load %arg11[%c545, %c0_73] {strides = array<i32: 2, 1>} : memref<1024x32xf32, #tpu.memory_space<vmem>>, vector<16x32xf32>
    %97 = arith.maximumf %95, %96 : vector<16x32xf32>
    %98 = arith.maximumf %94, %97 : vector<16x32xf32>
    %c164 = arith.constant 164 : index
    %c0_74 = arith.constant 0 : index
    %99 = vector.load %arg12[%c164, %c0_74] : memref<326x96xf32, #tpu.memory_space<vmem>>, vector<16x32xf32>
    tpu.vector_store %arg12[%c164, %c0_74], %98 {strides = array<i32>} : memref<326x96xf32, #tpu.memory_space<vmem>>, vector<16x32xf32>,
    %c163 = arith.constant 163 : index
    %c32_75 = arith.constant 32 : index
    %100 = vector.load %arg12[%c163, %c32_75] : memref<326x96xf32, #tpu.memory_space<vmem>>, vector<16x32xf32>
    tpu.vector_store %arg12[%c163, %c32_75], %98 {strides = array<i32>} : memref<326x96xf32, #tpu.memory_space<vmem>>, vector<16x32xf32>,
    %c162 = arith.constant 162 : index
    %c64_76 = arith.constant 64 : index
    %101 = vector.load %arg12[%c162, %c64_76] : memref<326x96xf32, #tpu.memory_space<vmem>>, vector<16x32xf32>
    tpu.vector_store %arg12[%c162, %c64_76], %98 {strides = array<i32>} : memref<326x96xf32, #tpu.memory_space<vmem>>, vector<16x32xf32>,
    %c576 = arith.constant 576 : index
    %c0_77 = arith.constant 0 : index
    %102 = tpu.strided_load %arg11[%c576, %c0_77] {strides = array<i32: 2, 1>} : memref<1024x32xf32, #tpu.memory_space<vmem>>, vector<16x32xf32>
    %c577 = arith.constant 577 : index
    %c0_78 = arith.constant 0 : index
    %103 = tpu.strided_load %arg11[%c577, %c0_78] {strides = array<i32: 2, 1>} : memref<1024x32xf32, #tpu.memory_space<vmem>>, vector<16x32xf32>
    %104 = arith.maximumf %102, %103 : vector<16x32xf32>
    %c608 = arith.constant 608 : index
    %c0_79 = arith.constant 0 : index
    %105 = tpu.strided_load %arg11[%c608, %c0_79] {strides = array<i32: 2, 1>} : memref<1024x32xf32, #tpu.memory_space<vmem>>, vector<16x32xf32>
    %c609 = arith.constant 609 : index
    %c0_80 = arith.constant 0 : index
    %106 = tpu.strided_load %arg11[%c609, %c0_80] {strides = array<i32: 2, 1>} : memref<1024x32xf32, #tpu.memory_space<vmem>>, vector<16x32xf32>
    %107 = arith.maximumf %105, %106 : vector<16x32xf32>
    %108 = arith.maximumf %104, %107 : vector<16x32xf32>
    %c182 = arith.constant 182 : index
    %c0_81 = arith.constant 0 : index
    %109 = vector.load %arg12[%c182, %c0_81] : memref<326x96xf32, #tpu.memory_space<vmem>>, vector<16x32xf32>
    tpu.vector_store %arg12[%c182, %c0_81], %108 {strides = array<i32>} : memref<326x96xf32, #tpu.memory_space<vmem>>, vector<16x32xf32>,
    %c181 = arith.constant 181 : index
    %c32_82 = arith.constant 32 : index
    %110 = vector.load %arg12[%c181, %c32_82] : memref<326x96xf32, #tpu.memory_space<vmem>>, vector<16x32xf32>
    tpu.vector_store %arg12[%c181, %c32_82], %108 {strides = array<i32>} : memref<326x96xf32, #tpu.memory_space<vmem>>, vector<16x32xf32>,
    %c180 = arith.constant 180 : index
    %c64_83 = arith.constant 64 : index
    %111 = vector.load %arg12[%c180, %c64_83] : memref<326x96xf32, #tpu.memory_space<vmem>>, vector<16x32xf32>
    tpu.vector_store %arg12[%c180, %c64_83], %108 {strides = array<i32>} : memref<326x96xf32, #tpu.memory_space<vmem>>, vector<16x32xf32>,
    %c640 = arith.constant 640 : index
    %c0_84 = arith.constant 0 : index
    %112 = tpu.strided_load %arg11[%c640, %c0_84] {strides = array<i32: 2, 1>} : memref<1024x32xf32, #tpu.memory_space<vmem>>, vector<16x32xf32>
    %c641 = arith.constant 641 : index
    %c0_85 = arith.constant 0 : index
    %113 = tpu.strided_load %arg11[%c641, %c0_85] {strides = array<i32: 2, 1>} : memref<1024x32xf32, #tpu.memory_space<vmem>>, vector<16x32xf32>
    %114 = arith.maximumf %112, %113 : vector<16x32xf32>
    %c672 = arith.constant 672 : index
    %c0_86 = arith.constant 0 : index
    %115 = tpu.strided_load %arg11[%c672, %c0_86] {strides = array<i32: 2, 1>} : memref<1024x32xf32, #tpu.memory_space<vmem>>, vector<16x32xf32>
    %c673 = arith.constant 673 : index
    %c0_87 = arith.constant 0 : index
    %116 = tpu.strided_load %arg11[%c673, %c0_87] {strides = array<i32: 2, 1>} : memref<1024x32xf32, #tpu.memory_space<vmem>>, vector<16x32xf32>
    %117 = arith.maximumf %115, %116 : vector<16x32xf32>
    %118 = arith.maximumf %114, %117 : vector<16x32xf32>
    %c200 = arith.constant 200 : index
    %c0_88 = arith.constant 0 : index
    %119 = vector.load %arg12[%c200, %c0_88] : memref<326x96xf32, #tpu.memory_space<vmem>>, vector<16x32xf32>
    tpu.vector_store %arg12[%c200, %c0_88], %118 {strides = array<i32>} : memref<326x96xf32, #tpu.memory_space<vmem>>, vector<16x32xf32>,
    %c199 = arith.constant 199 : index
    %c32_89 = arith.constant 32 : index
    %120 = vector.load %arg12[%c199, %c32_89] : memref<326x96xf32, #tpu.memory_space<vmem>>, vector<16x32xf32>
    tpu.vector_store %arg12[%c199, %c32_89], %118 {strides = array<i32>} : memref<326x96xf32, #tpu.memory_space<vmem>>, vector<16x32xf32>,
    %c198 = arith.constant 198 : index
    %c64_90 = arith.constant 64 : index
    %121 = vector.load %arg12[%c198, %c64_90] : memref<326x96xf32, #tpu.memory_space<vmem>>, vector<16x32xf32>
    tpu.vector_store %arg12[%c198, %c64_90], %118 {strides = array<i32>} : memref<326x96xf32, #tpu.memory_space<vmem>>, vector<16x32xf32>,
    %c704 = arith.constant 704 : index
    %c0_91 = arith.constant 0 : index
    %122 = tpu.strided_load %arg11[%c704, %c0_91] {strides = array<i32: 2, 1>} : memref<1024x32xf32, #tpu.memory_space<vmem>>, vector<16x32xf32>
    %c705 = arith.constant 705 : index
    %c0_92 = arith.constant 0 : index
    %123 = tpu.strided_load %arg11[%c705, %c0_92] {strides = array<i32: 2, 1>} : memref<1024x32xf32, #tpu.memory_space<vmem>>, vector<16x32xf32>
    %124 = arith.maximumf %122, %123 : vector<16x32xf32>
    %c736 = arith.constant 736 : index
    %c0_93 = arith.constant 0 : index
    %125 = tpu.strided_load %arg11[%c736, %c0_93] {strides = array<i32: 2, 1>} : memref<1024x32xf32, #tpu.memory_space<vmem>>, vector<16x32xf32>
    %c737 = arith.constant 737 : index
    %c0_94 = arith.constant 0 : index
    %126 = tpu.strided_load %arg11[%c737, %c0_94] {strides = array<i32: 2, 1>} : memref<1024x32xf32, #tpu.memory_space<vmem>>, vector<16x32xf32>
    %127 = arith.maximumf %125, %126 : vector<16x32xf32>
    %128 = arith.maximumf %124, %127 : vector<16x32xf32>
    %c218 = arith.constant 218 : index
    %c0_95 = arith.constant 0 : index
    %129 = vector.load %arg12[%c218, %c0_95] : memref<326x96xf32, #tpu.memory_space<vmem>>, vector<16x32xf32>
    tpu.vector_store %arg12[%c218, %c0_95], %128 {strides = array<i32>} : memref<326x96xf32, #tpu.memory_space<vmem>>, vector<16x32xf32>,
    %c217 = arith.constant 217 : index
    %c32_96 = arith.constant 32 : index
    %130 = vector.load %arg12[%c217, %c32_96] : memref<326x96xf32, #tpu.memory_space<vmem>>, vector<16x32xf32>
    tpu.vector_store %arg12[%c217, %c32_96], %128 {strides = array<i32>} : memref<326x96xf32, #tpu.memory_space<vmem>>, vector<16x32xf32>,
    %c216 = arith.constant 216 : index
    %c64_97 = arith.constant 64 : index
    %131 = vector.load %arg12[%c216, %c64_97] : memref<326x96xf32, #tpu.memory_space<vmem>>, vector<16x32xf32>
    tpu.vector_store %arg12[%c216, %c64_97], %128 {strides = array<i32>} : memref<326x96xf32, #tpu.memory_space<vmem>>, vector<16x32xf32>,
    %c768 = arith.constant 768 : index
    %c0_98 = arith.constant 0 : index
    %132 = tpu.strided_load %arg11[%c768, %c0_98] {strides = array<i32: 2, 1>} : memref<1024x32xf32, #tpu.memory_space<vmem>>, vector<16x32xf32>
    %c769 = arith.constant 769 : index
    %c0_99 = arith.constant 0 : index
    %133 = tpu.strided_load %arg11[%c769, %c0_99] {strides = array<i32: 2, 1>} : memref<1024x32xf32, #tpu.memory_space<vmem>>, vector<16x32xf32>
    %134 = arith.maximumf %132, %133 : vector<16x32xf32>
    %c800 = arith.constant 800 : index
    %c0_100 = arith.constant 0 : index
    %135 = tpu.strided_load %arg11[%c800, %c0_100] {strides = array<i32: 2, 1>} : memref<1024x32xf32, #tpu.memory_space<vmem>>, vector<16x32xf32>
    %c801 = arith.constant 801 : index
    %c0_101 = arith.constant 0 : index
    %136 = tpu.strided_load %arg11[%c801, %c0_101] {strides = array<i32: 2, 1>} : memref<1024x32xf32, #tpu.memory_space<vmem>>, vector<16x32xf32>
    %137 = arith.maximumf %135, %136 : vector<16x32xf32>
    %138 = arith.maximumf %134, %137 : vector<16x32xf32>
    %c236 = arith.constant 236 : index
    %c0_102 = arith.constant 0 : index
    %139 = vector.load %arg12[%c236, %c0_102] : memref<326x96xf32, #tpu.memory_space<vmem>>, vector<16x32xf32>
    tpu.vector_store %arg12[%c236, %c0_102], %138 {strides = array<i32>} : memref<326x96xf32, #tpu.memory_space<vmem>>, vector<16x32xf32>,
    %c235 = arith.constant 235 : index
    %c32_103 = arith.constant 32 : index
    %140 = vector.load %arg12[%c235, %c32_103] : memref<326x96xf32, #tpu.memory_space<vmem>>, vector<16x32xf32>
    tpu.vector_store %arg12[%c235, %c32_103], %138 {strides = array<i32>} : memref<326x96xf32, #tpu.memory_space<vmem>>, vector<16x32xf32>,
    %c234 = arith.constant 234 : index
    %c64_104 = arith.constant 64 : index
    %141 = vector.load %arg12[%c234, %c64_104] : memref<326x96xf32, #tpu.memory_space<vmem>>, vector<16x32xf32>
    tpu.vector_store %arg12[%c234, %c64_104], %138 {strides = array<i32>} : memref<326x96xf32, #tpu.memory_space<vmem>>, vector<16x32xf32>,
    %c832 = arith.constant 832 : index
    %c0_105 = arith.constant 0 : index
    %142 = tpu.strided_load %arg11[%c832, %c0_105] {strides = array<i32: 2, 1>} : memref<1024x32xf32, #tpu.memory_space<vmem>>, vector<16x32xf32>
    %c833 = arith.constant 833 : index
    %c0_106 = arith.constant 0 : index
    %143 = tpu.strided_load %arg11[%c833, %c0_106] {strides = array<i32: 2, 1>} : memref<1024x32xf32, #tpu.memory_space<vmem>>, vector<16x32xf32>
    %144 = arith.maximumf %142, %143 : vector<16x32xf32>
    %c864 = arith.constant 864 : index
    %c0_107 = arith.constant 0 : index
    %145 = tpu.strided_load %arg11[%c864, %c0_107] {strides = array<i32: 2, 1>} : memref<1024x32xf32, #tpu.memory_space<vmem>>, vector<16x32xf32>
    %c865 = arith.constant 865 : index
    %c0_108 = arith.constant 0 : index
    %146 = tpu.strided_load %arg11[%c865, %c0_108] {strides = array<i32: 2, 1>} : memref<1024x32xf32, #tpu.memory_space<vmem>>, vector<16x32xf32>
    %147 = arith.maximumf %145, %146 : vector<16x32xf32>
    %148 = arith.maximumf %144, %147 : vector<16x32xf32>
    %c254 = arith.constant 254 : index
    %c0_109 = arith.constant 0 : index
    %149 = vector.load %arg12[%c254, %c0_109] : memref<326x96xf32, #tpu.memory_space<vmem>>, vector<16x32xf32>
    tpu.vector_store %arg12[%c254, %c0_109], %148 {strides = array<i32>} : memref<326x96xf32, #tpu.memory_space<vmem>>, vector<16x32xf32>,
    %c253 = arith.constant 253 : index
    %c32_110 = arith.constant 32 : index
    %150 = vector.load %arg12[%c253, %c32_110] : memref<326x96xf32, #tpu.memory_space<vmem>>, vector<16x32xf32>
    tpu.vector_store %arg12[%c253, %c32_110], %148 {strides = array<i32>} : memref<326x96xf32, #tpu.memory_space<vmem>>, vector<16x32xf32>,
    %c252 = arith.constant 252 : index
    %c64_111 = arith.constant 64 : index
    %151 = vector.load %arg12[%c252, %c64_111] : memref<326x96xf32, #tpu.memory_space<vmem>>, vector<16x32xf32>
    tpu.vector_store %arg12[%c252, %c64_111], %148 {strides = array<i32>} : memref<326x96xf32, #tpu.memory_space<vmem>>, vector<16x32xf32>,
    %c896 = arith.constant 896 : index
    %c0_112 = arith.constant 0 : index
    %152 = tpu.strided_load %arg11[%c896, %c0_112] {strides = array<i32: 2, 1>} : memref<1024x32xf32, #tpu.memory_space<vmem>>, vector<16x32xf32>
    %c897 = arith.constant 897 : index
    %c0_113 = arith.constant 0 : index
    %153 = tpu.strided_load %arg11[%c897, %c0_113] {strides = array<i32: 2, 1>} : memref<1024x32xf32, #tpu.memory_space<vmem>>, vector<16x32xf32>
    %154 = arith.maximumf %152, %153 : vector<16x32xf32>
    %c928 = arith.constant 928 : index
    %c0_114 = arith.constant 0 : index
    %155 = tpu.strided_load %arg11[%c928, %c0_114] {strides = array<i32: 2, 1>} : memref<1024x32xf32, #tpu.memory_space<vmem>>, vector<16x32xf32>
    %c929 = arith.constant 929 : index
    %c0_115 = arith.constant 0 : index
    %156 = tpu.strided_load %arg11[%c929, %c0_115] {strides = array<i32: 2, 1>} : memref<1024x32xf32, #tpu.memory_space<vmem>>, vector<16x32xf32>
    %157 = arith.maximumf %155, %156 : vector<16x32xf32>
    %158 = arith.maximumf %154, %157 : vector<16x32xf32>
    %c272 = arith.constant 272 : index
    %c0_116 = arith.constant 0 : index
    %159 = vector.load %arg12[%c272, %c0_116] : memref<326x96xf32, #tpu.memory_space<vmem>>, vector<16x32xf32>
    tpu.vector_store %arg12[%c272, %c0_116], %158 {strides = array<i32>} : memref<326x96xf32, #tpu.memory_space<vmem>>, vector<16x32xf32>,
    %c271 = arith.constant 271 : index
    %c32_117 = arith.constant 32 : index
    %160 = vector.load %arg12[%c271, %c32_117] : memref<326x96xf32, #tpu.memory_space<vmem>>, vector<16x32xf32>
    tpu.vector_store %arg12[%c271, %c32_117], %158 {strides = array<i32>} : memref<326x96xf32, #tpu.memory_space<vmem>>, vector<16x32xf32>,
    %c270 = arith.constant 270 : index
    %c64_118 = arith.constant 64 : index
    %161 = vector.load %arg12[%c270, %c64_118] : memref<326x96xf32, #tpu.memory_space<vmem>>, vector<16x32xf32>
    tpu.vector_store %arg12[%c270, %c64_118], %158 {strides = array<i32>} : memref<326x96xf32, #tpu.memory_space<vmem>>, vector<16x32xf32>,
    %c960 = arith.constant 960 : index
    %c0_119 = arith.constant 0 : index
    %162 = tpu.strided_load %arg11[%c960, %c0_119] {strides = array<i32: 2, 1>} : memref<1024x32xf32, #tpu.memory_space<vmem>>, vector<16x32xf32>
    %c961 = arith.constant 961 : index
    %c0_120 = arith.constant 0 : index
    %163 = tpu.strided_load %arg11[%c961, %c0_120] {strides = array<i32: 2, 1>} : memref<1024x32xf32, #tpu.memory_space<vmem>>, vector<16x32xf32>
    %164 = arith.maximumf %162, %163 : vector<16x32xf32>
    %c992 = arith.constant 992 : index
    %c0_121 = arith.constant 0 : index
    %165 = tpu.strided_load %arg11[%c992, %c0_121] {strides = array<i32: 2, 1>} : memref<1024x32xf32, #tpu.memory_space<vmem>>, vector<16x32xf32>
    %c993 = arith.constant 993 : index
    %c0_122 = arith.constant 0 : index
    %166 = tpu.strided_load %arg11[%c993, %c0_122] {strides = array<i32: 2, 1>} : memref<1024x32xf32, #tpu.memory_space<vmem>>, vector<16x32xf32>
    %167 = arith.maximumf %165, %166 : vector<16x32xf32>
    %168 = arith.maximumf %164, %167 : vector<16x32xf32>
    %c290 = arith.constant 290 : index
    %c0_123 = arith.constant 0 : index
    %169 = vector.load %arg12[%c290, %c0_123] : memref<326x96xf32, #tpu.memory_space<vmem>>, vector<16x32xf32>
    tpu.vector_store %arg12[%c290, %c0_123], %168 {strides = array<i32>} : memref<326x96xf32, #tpu.memory_space<vmem>>, vector<16x32xf32>,
    %c289_124 = arith.constant 289 : index
    %c32_125 = arith.constant 32 : index
    %170 = vector.load %arg12[%c289_124, %c32_125] : memref<326x96xf32, #tpu.memory_space<vmem>>, vector<16x32xf32>
    tpu.vector_store %arg12[%c289_124, %c32_125], %168 {strides = array<i32>} : memref<326x96xf32, #tpu.memory_space<vmem>>, vector<16x32xf32>,
    %c288_126 = arith.constant 288 : index
    %c64_127 = arith.constant 64 : index
    %171 = vector.load %arg12[%c288_126, %c64_127] : memref<326x96xf32, #tpu.memory_space<vmem>>, vector<16x32xf32>
    tpu.vector_store %arg12[%c288_126, %c64_127], %168 {strides = array<i32>} : memref<326x96xf32, #tpu.memory_space<vmem>>, vector<16x32xf32>,
    %c0_128 = arith.constant 0 : index
    %c0_129 = arith.constant 0 : index
    %172 = vector.load %arg12[%c0_128, %c0_129] : memref<326x96xf32, #tpu.memory_space<vmem>>, vector<288x96xf32>
    %c0_130 = arith.constant 0 : index
    %c0_131 = arith.constant 0 : index
    %c0_132 = arith.constant 0 : index
    %173 = vector.load %arg4[%c0_130, %c0_131, %c0_132] : memref<3x96x64xf32, #tpu.memory_space<vmem>>, vector<1x96x64xf32>
    %174 = vector.shape_cast %173 : vector<1x96x64xf32> to vector<96x64xf32>
    %cst_133 = arith.constant dense<0.000000e+00> : vector<288x64xf32>
    %175 = tpu.matmul %172, %174, %cst_133 {dimension_numbers = #tpu.dot_dimension_numbers<[1], [0], [0], [1], [0, 0, 1, 1], [], []>} : vector<288x96xf32>, vector<96x64xf32>, vector<288x64xf32> -> vector<288x64xf32>
    %c18_134 = arith.constant 18 : index
    %c0_135 = arith.constant 0 : index
    %176 = vector.load %arg12[%c18_134, %c0_135] : memref<326x96xf32, #tpu.memory_space<vmem>>, vector<288x96xf32>
    %c1_136 = arith.constant 1 : index
    %c0_137 = arith.constant 0 : index
    %c0_138 = arith.constant 0 : index
    %177 = vector.load %arg4[%c1_136, %c0_137, %c0_138] : memref<3x96x64xf32, #tpu.memory_space<vmem>>, vector<1x96x64xf32>
    %178 = vector.shape_cast %177 : vector<1x96x64xf32> to vector<96x64xf32>
    %cst_139 = arith.constant dense<0.000000e+00> : vector<288x64xf32>
    %179 = tpu.matmul %176, %178, %cst_139 {dimension_numbers = #tpu.dot_dimension_numbers<[1], [0], [0], [1], [0, 0, 1, 1], [], []>} : vector<288x96xf32>, vector<96x64xf32>, vector<288x64xf32> -> vector<288x64xf32>
    %180 = arith.addf %175, %179 : vector<288x64xf32>
    %c36_140 = arith.constant 36 : index
    %c0_141 = arith.constant 0 : index
    %181 = vector.load %arg12[%c36_140, %c0_141] : memref<326x96xf32, #tpu.memory_space<vmem>>, vector<288x96xf32>
    %c2 = arith.constant 2 : index
    %c0_142 = arith.constant 0 : index
    %c0_143 = arith.constant 0 : index
    %182 = vector.load %arg4[%c2, %c0_142, %c0_143] : memref<3x96x64xf32, #tpu.memory_space<vmem>>, vector<1x96x64xf32>
    %183 = vector.shape_cast %182 : vector<1x96x64xf32> to vector<96x64xf32>
    %cst_144 = arith.constant dense<0.000000e+00> : vector<288x64xf32>
    %184 = tpu.matmul %181, %183, %cst_144 {dimension_numbers = #tpu.dot_dimension_numbers<[1], [0], [0], [1], [0, 0, 1, 1], [], []>} : vector<288x96xf32>, vector<96x64xf32>, vector<288x64xf32> -> vector<288x64xf32>
    %185 = arith.addf %180, %184 : vector<288x64xf32>
    %c0_145 = arith.constant 0 : index
    %c0_146 = arith.constant 0 : index
    %186 = vector.load %arg5[%c0_145, %c0_146] : memref<1x64xf32, #tpu.memory_space<vmem>>, vector<1x64xf32>
    %187 = vector.broadcast %186 : vector<1x64xf32> to vector<288x64xf32>
    %188 = arith.addf %185, %187 : vector<288x64xf32>
    %cst_147 = arith.constant 0.000000e+00 : f32
    %189 = vector.broadcast %cst_147 : f32 to vector<288x64xf32>
    %190 = arith.maximumf %188, %189 : vector<288x64xf32>
    %c0_148 = arith.constant 0 : index
    %c0_149 = arith.constant 0 : index
    %191 = vector.load %arg13[%c0_148, %c0_149] : memref<288x64xf32, #tpu.memory_space<vmem>>, vector<288x64xf32>
    tpu.vector_store %arg13[%c0_148, %c0_149], %190 {strides = array<i32>} : memref<288x64xf32, #tpu.memory_space<vmem>>, vector<288x64xf32>,
    %c1_150 = arith.constant 1 : index
    %c0_151 = arith.constant 0 : index
    %192 = tpu.strided_load %arg13[%c1_150, %c0_151] {strides = array<i32: 2, 1>} : memref<288x64xf32, #tpu.memory_space<vmem>>, vector<8x64xf32>
    %c2_152 = arith.constant 2 : index
    %c0_153 = arith.constant 0 : index
    %193 = tpu.strided_load %arg13[%c2_152, %c0_153] {strides = array<i32: 2, 1>} : memref<288x64xf32, #tpu.memory_space<vmem>>, vector<8x64xf32>
    %194 = arith.maximumf %192, %193 : vector<8x64xf32>
    %c19_154 = arith.constant 19 : index
    %c0_155 = arith.constant 0 : index
    %195 = tpu.strided_load %arg13[%c19_154, %c0_155] {strides = array<i32: 2, 1>} : memref<288x64xf32, #tpu.memory_space<vmem>>, vector<8x64xf32>
    %c20_156 = arith.constant 20 : index
    %c0_157 = arith.constant 0 : index
    %196 = tpu.strided_load %arg13[%c20_156, %c0_157] {strides = array<i32: 2, 1>} : memref<288x64xf32, #tpu.memory_space<vmem>>, vector<8x64xf32>
    %197 = arith.maximumf %195, %196 : vector<8x64xf32>
    %198 = arith.maximumf %194, %197 : vector<8x64xf32>
    %c0_158 = arith.constant 0 : index
    %c0_159 = arith.constant 0 : index
    %199 = vector.load %arg14[%c0_158, %c0_159] : memref<64x64xf32, #tpu.memory_space<vmem>>, vector<8x64xf32>
    tpu.vector_store %arg14[%c0_158, %c0_159], %198 {strides = array<i32>} : memref<64x64xf32, #tpu.memory_space<vmem>>, vector<8x64xf32>,
    %c37_160 = arith.constant 37 : index
    %c0_161 = arith.constant 0 : index
    %200 = tpu.strided_load %arg13[%c37_160, %c0_161] {strides = array<i32: 2, 1>} : memref<288x64xf32, #tpu.memory_space<vmem>>, vector<8x64xf32>
    %c38_162 = arith.constant 38 : index
    %c0_163 = arith.constant 0 : index
    %201 = tpu.strided_load %arg13[%c38_162, %c0_163] {strides = array<i32: 2, 1>} : memref<288x64xf32, #tpu.memory_space<vmem>>, vector<8x64xf32>
    %202 = arith.maximumf %200, %201 : vector<8x64xf32>
    %c55_164 = arith.constant 55 : index
    %c0_165 = arith.constant 0 : index
    %203 = tpu.strided_load %arg13[%c55_164, %c0_165] {strides = array<i32: 2, 1>} : memref<288x64xf32, #tpu.memory_space<vmem>>, vector<8x64xf32>
    %c56_166 = arith.constant 56 : index
    %c0_167 = arith.constant 0 : index
    %204 = tpu.strided_load %arg13[%c56_166, %c0_167] {strides = array<i32: 2, 1>} : memref<288x64xf32, #tpu.memory_space<vmem>>, vector<8x64xf32>
    %205 = arith.maximumf %203, %204 : vector<8x64xf32>
    %206 = arith.maximumf %202, %205 : vector<8x64xf32>
    %c8 = arith.constant 8 : index
    %c0_168 = arith.constant 0 : index
    %207 = vector.load %arg14[%c8, %c0_168] : memref<64x64xf32, #tpu.memory_space<vmem>>, vector<8x64xf32>
    tpu.vector_store %arg14[%c8, %c0_168], %206 {strides = array<i32>} : memref<64x64xf32, #tpu.memory_space<vmem>>, vector<8x64xf32>,
    %c73_169 = arith.constant 73 : index
    %c0_170 = arith.constant 0 : index
    %208 = tpu.strided_load %arg13[%c73_169, %c0_170] {strides = array<i32: 2, 1>} : memref<288x64xf32, #tpu.memory_space<vmem>>, vector<8x64xf32>
    %c74_171 = arith.constant 74 : index
    %c0_172 = arith.constant 0 : index
    %209 = tpu.strided_load %arg13[%c74_171, %c0_172] {strides = array<i32: 2, 1>} : memref<288x64xf32, #tpu.memory_space<vmem>>, vector<8x64xf32>
    %210 = arith.maximumf %208, %209 : vector<8x64xf32>
    %c91_173 = arith.constant 91 : index
    %c0_174 = arith.constant 0 : index
    %211 = tpu.strided_load %arg13[%c91_173, %c0_174] {strides = array<i32: 2, 1>} : memref<288x64xf32, #tpu.memory_space<vmem>>, vector<8x64xf32>
    %c92_175 = arith.constant 92 : index
    %c0_176 = arith.constant 0 : index
    %212 = tpu.strided_load %arg13[%c92_175, %c0_176] {strides = array<i32: 2, 1>} : memref<288x64xf32, #tpu.memory_space<vmem>>, vector<8x64xf32>
    %213 = arith.maximumf %211, %212 : vector<8x64xf32>
    %214 = arith.maximumf %210, %213 : vector<8x64xf32>
    %c16 = arith.constant 16 : index
    %c0_177 = arith.constant 0 : index
    %215 = vector.load %arg14[%c16, %c0_177] : memref<64x64xf32, #tpu.memory_space<vmem>>, vector<8x64xf32>
    tpu.vector_store %arg14[%c16, %c0_177], %214 {strides = array<i32>} : memref<64x64xf32, #tpu.memory_space<vmem>>, vector<8x64xf32>,
    %c109_178 = arith.constant 109 : index
    %c0_179 = arith.constant 0 : index
    %216 = tpu.strided_load %arg13[%c109_178, %c0_179] {strides = array<i32: 2, 1>} : memref<288x64xf32, #tpu.memory_space<vmem>>, vector<8x64xf32>
    %c110_180 = arith.constant 110 : index
    %c0_181 = arith.constant 0 : index
    %217 = tpu.strided_load %arg13[%c110_180, %c0_181] {strides = array<i32: 2, 1>} : memref<288x64xf32, #tpu.memory_space<vmem>>, vector<8x64xf32>
    %218 = arith.maximumf %216, %217 : vector<8x64xf32>
    %c127_182 = arith.constant 127 : index
    %c0_183 = arith.constant 0 : index
    %219 = tpu.strided_load %arg13[%c127_182, %c0_183] {strides = array<i32: 2, 1>} : memref<288x64xf32, #tpu.memory_space<vmem>>, vector<8x64xf32>
    %c128_184 = arith.constant 128 : index
    %c0_185 = arith.constant 0 : index
    %220 = tpu.strided_load %arg13[%c128_184, %c0_185] {strides = array<i32: 2, 1>} : memref<288x64xf32, #tpu.memory_space<vmem>>, vector<8x64xf32>
    %221 = arith.maximumf %219, %220 : vector<8x64xf32>
    %222 = arith.maximumf %218, %221 : vector<8x64xf32>
    %c24 = arith.constant 24 : index
    %c0_186 = arith.constant 0 : index
    %223 = vector.load %arg14[%c24, %c0_186] : memref<64x64xf32, #tpu.memory_space<vmem>>, vector<8x64xf32>
    tpu.vector_store %arg14[%c24, %c0_186], %222 {strides = array<i32>} : memref<64x64xf32, #tpu.memory_space<vmem>>, vector<8x64xf32>,
    %c145_187 = arith.constant 145 : index
    %c0_188 = arith.constant 0 : index
    %224 = tpu.strided_load %arg13[%c145_187, %c0_188] {strides = array<i32: 2, 1>} : memref<288x64xf32, #tpu.memory_space<vmem>>, vector<8x64xf32>
    %c146_189 = arith.constant 146 : index
    %c0_190 = arith.constant 0 : index
    %225 = tpu.strided_load %arg13[%c146_189, %c0_190] {strides = array<i32: 2, 1>} : memref<288x64xf32, #tpu.memory_space<vmem>>, vector<8x64xf32>
    %226 = arith.maximumf %224, %225 : vector<8x64xf32>
    %c163_191 = arith.constant 163 : index
    %c0_192 = arith.constant 0 : index
    %227 = tpu.strided_load %arg13[%c163_191, %c0_192] {strides = array<i32: 2, 1>} : memref<288x64xf32, #tpu.memory_space<vmem>>, vector<8x64xf32>
    %c164_193 = arith.constant 164 : index
    %c0_194 = arith.constant 0 : index
    %228 = tpu.strided_load %arg13[%c164_193, %c0_194] {strides = array<i32: 2, 1>} : memref<288x64xf32, #tpu.memory_space<vmem>>, vector<8x64xf32>
    %229 = arith.maximumf %227, %228 : vector<8x64xf32>
    %230 = arith.maximumf %226, %229 : vector<8x64xf32>
    %c32_195 = arith.constant 32 : index
    %c0_196 = arith.constant 0 : index
    %231 = vector.load %arg14[%c32_195, %c0_196] : memref<64x64xf32, #tpu.memory_space<vmem>>, vector<8x64xf32>
    tpu.vector_store %arg14[%c32_195, %c0_196], %230 {strides = array<i32>} : memref<64x64xf32, #tpu.memory_space<vmem>>, vector<8x64xf32>,
    %c181_197 = arith.constant 181 : index
    %c0_198 = arith.constant 0 : index
    %232 = tpu.strided_load %arg13[%c181_197, %c0_198] {strides = array<i32: 2, 1>} : memref<288x64xf32, #tpu.memory_space<vmem>>, vector<8x64xf32>
    %c182_199 = arith.constant 182 : index
    %c0_200 = arith.constant 0 : index
    %233 = tpu.strided_load %arg13[%c182_199, %c0_200] {strides = array<i32: 2, 1>} : memref<288x64xf32, #tpu.memory_space<vmem>>, vector<8x64xf32>
    %234 = arith.maximumf %232, %233 : vector<8x64xf32>
    %c199_201 = arith.constant 199 : index
    %c0_202 = arith.constant 0 : index
    %235 = tpu.strided_load %arg13[%c199_201, %c0_202] {strides = array<i32: 2, 1>} : memref<288x64xf32, #tpu.memory_space<vmem>>, vector<8x64xf32>
    %c200_203 = arith.constant 200 : index
    %c0_204 = arith.constant 0 : index
    %236 = tpu.strided_load %arg13[%c200_203, %c0_204] {strides = array<i32: 2, 1>} : memref<288x64xf32, #tpu.memory_space<vmem>>, vector<8x64xf32>
    %237 = arith.maximumf %235, %236 : vector<8x64xf32>
    %238 = arith.maximumf %234, %237 : vector<8x64xf32>
    %c40 = arith.constant 40 : index
    %c0_205 = arith.constant 0 : index
    %239 = vector.load %arg14[%c40, %c0_205] : memref<64x64xf32, #tpu.memory_space<vmem>>, vector<8x64xf32>
    tpu.vector_store %arg14[%c40, %c0_205], %238 {strides = array<i32>} : memref<64x64xf32, #tpu.memory_space<vmem>>, vector<8x64xf32>,
    %c217_206 = arith.constant 217 : index
    %c0_207 = arith.constant 0 : index
    %240 = tpu.strided_load %arg13[%c217_206, %c0_207] {strides = array<i32: 2, 1>} : memref<288x64xf32, #tpu.memory_space<vmem>>, vector<8x64xf32>
    %c218_208 = arith.constant 218 : index
    %c0_209 = arith.constant 0 : index
    %241 = tpu.strided_load %arg13[%c218_208, %c0_209] {strides = array<i32: 2, 1>} : memref<288x64xf32, #tpu.memory_space<vmem>>, vector<8x64xf32>
    %242 = arith.maximumf %240, %241 : vector<8x64xf32>
    %c235_210 = arith.constant 235 : index
    %c0_211 = arith.constant 0 : index
    %243 = tpu.strided_load %arg13[%c235_210, %c0_211] {strides = array<i32: 2, 1>} : memref<288x64xf32, #tpu.memory_space<vmem>>, vector<8x64xf32>
    %c236_212 = arith.constant 236 : index
    %c0_213 = arith.constant 0 : index
    %244 = tpu.strided_load %arg13[%c236_212, %c0_213] {strides = array<i32: 2, 1>} : memref<288x64xf32, #tpu.memory_space<vmem>>, vector<8x64xf32>
    %245 = arith.maximumf %243, %244 : vector<8x64xf32>
    %246 = arith.maximumf %242, %245 : vector<8x64xf32>
    %c48 = arith.constant 48 : index
    %c0_214 = arith.constant 0 : index
    %247 = vector.load %arg14[%c48, %c0_214] : memref<64x64xf32, #tpu.memory_space<vmem>>, vector<8x64xf32>
    tpu.vector_store %arg14[%c48, %c0_214], %246 {strides = array<i32>} : memref<64x64xf32, #tpu.memory_space<vmem>>, vector<8x64xf32>,
    %c253_215 = arith.constant 253 : index
    %c0_216 = arith.constant 0 : index
    %248 = tpu.strided_load %arg13[%c253_215, %c0_216] {strides = array<i32: 2, 1>} : memref<288x64xf32, #tpu.memory_space<vmem>>, vector<8x64xf32>
    %c254_217 = arith.constant 254 : index
    %c0_218 = arith.constant 0 : index
    %249 = tpu.strided_load %arg13[%c254_217, %c0_218] {strides = array<i32: 2, 1>} : memref<288x64xf32, #tpu.memory_space<vmem>>, vector<8x64xf32>
    %250 = arith.maximumf %248, %249 : vector<8x64xf32>
    %c271_219 = arith.constant 271 : index
    %c0_220 = arith.constant 0 : index
    %251 = tpu.strided_load %arg13[%c271_219, %c0_220] {strides = array<i32: 2, 1>} : memref<288x64xf32, #tpu.memory_space<vmem>>, vector<8x64xf32>
    %c272_221 = arith.constant 272 : index
    %c0_222 = arith.constant 0 : index
    %252 = tpu.strided_load %arg13[%c272_221, %c0_222] {strides = array<i32: 2, 1>} : memref<288x64xf32, #tpu.memory_space<vmem>>, vector<8x64xf32>
    %253 = arith.maximumf %251, %252 : vector<8x64xf32>
    %254 = arith.maximumf %250, %253 : vector<8x64xf32>
    %c56_223 = arith.constant 56 : index
    %c0_224 = arith.constant 0 : index
    %255 = vector.load %arg14[%c56_223, %c0_224] : memref<64x64xf32, #tpu.memory_space<vmem>>, vector<8x64xf32>
    tpu.vector_store %arg14[%c56_223, %c0_224], %254 {strides = array<i32>} : memref<64x64xf32, #tpu.memory_space<vmem>>, vector<8x64xf32>,
    %c0_225 = arith.constant 0 : index
    %c0_226 = arith.constant 0 : index
    %256 = vector.load %arg14[%c0_225, %c0_226] : memref<64x64xf32, #tpu.memory_space<vmem>>, vector<1x64xf32>
    %c1_227 = arith.constant 1 : index
    %c0_228 = arith.constant 0 : index
    %257 = vector.load %arg14[%c1_227, %c0_228] : memref<64x64xf32, #tpu.memory_space<vmem>>, vector<1x64xf32>
    %c2_229 = arith.constant 2 : index
    %c0_230 = arith.constant 0 : index
    %258 = vector.load %arg14[%c2_229, %c0_230] : memref<64x64xf32, #tpu.memory_space<vmem>>, vector<1x64xf32>
    %c3 = arith.constant 3 : index
    %c0_231 = arith.constant 0 : index
    %259 = vector.load %arg14[%c3, %c0_231] : memref<64x64xf32, #tpu.memory_space<vmem>>, vector<1x64xf32>
    %c4 = arith.constant 4 : index
    %c0_232 = arith.constant 0 : index
    %260 = vector.load %arg14[%c4, %c0_232] : memref<64x64xf32, #tpu.memory_space<vmem>>, vector<1x64xf32>
    %c5 = arith.constant 5 : index
    %c0_233 = arith.constant 0 : index
    %261 = vector.load %arg14[%c5, %c0_233] : memref<64x64xf32, #tpu.memory_space<vmem>>, vector<1x64xf32>
    %c6 = arith.constant 6 : index
    %c0_234 = arith.constant 0 : index
    %262 = vector.load %arg14[%c6, %c0_234] : memref<64x64xf32, #tpu.memory_space<vmem>>, vector<1x64xf32>
    %c7 = arith.constant 7 : index
    %c0_235 = arith.constant 0 : index
    %263 = vector.load %arg14[%c7, %c0_235] : memref<64x64xf32, #tpu.memory_space<vmem>>, vector<1x64xf32>
    %c8_236 = arith.constant 8 : index
    %c0_237 = arith.constant 0 : index
    %264 = vector.load %arg14[%c8_236, %c0_237] : memref<64x64xf32, #tpu.memory_space<vmem>>, vector<1x64xf32>
    %c9 = arith.constant 9 : index
    %c0_238 = arith.constant 0 : index
    %265 = vector.load %arg14[%c9, %c0_238] : memref<64x64xf32, #tpu.memory_space<vmem>>, vector<1x64xf32>
    %c10 = arith.constant 10 : index
    %c0_239 = arith.constant 0 : index
    %266 = vector.load %arg14[%c10, %c0_239] : memref<64x64xf32, #tpu.memory_space<vmem>>, vector<1x64xf32>
    %c11 = arith.constant 11 : index
    %c0_240 = arith.constant 0 : index
    %267 = vector.load %arg14[%c11, %c0_240] : memref<64x64xf32, #tpu.memory_space<vmem>>, vector<1x64xf32>
    %c12 = arith.constant 12 : index
    %c0_241 = arith.constant 0 : index
    %268 = vector.load %arg14[%c12, %c0_241] : memref<64x64xf32, #tpu.memory_space<vmem>>, vector<1x64xf32>
    %c13 = arith.constant 13 : index
    %c0_242 = arith.constant 0 : index
    %269 = vector.load %arg14[%c13, %c0_242] : memref<64x64xf32, #tpu.memory_space<vmem>>, vector<1x64xf32>
    %c14 = arith.constant 14 : index
    %c0_243 = arith.constant 0 : index
    %270 = vector.load %arg14[%c14, %c0_243] : memref<64x64xf32, #tpu.memory_space<vmem>>, vector<1x64xf32>
    %c15 = arith.constant 15 : index
    %c0_244 = arith.constant 0 : index
    %271 = vector.load %arg14[%c15, %c0_244] : memref<64x64xf32, #tpu.memory_space<vmem>>, vector<1x64xf32>
    %c16_245 = arith.constant 16 : index
    %c0_246 = arith.constant 0 : index
    %272 = vector.load %arg14[%c16_245, %c0_246] : memref<64x64xf32, #tpu.memory_space<vmem>>, vector<1x64xf32>
    %c17 = arith.constant 17 : index
    %c0_247 = arith.constant 0 : index
    %273 = vector.load %arg14[%c17, %c0_247] : memref<64x64xf32, #tpu.memory_space<vmem>>, vector<1x64xf32>
    %c18_248 = arith.constant 18 : index
    %c0_249 = arith.constant 0 : index
    %274 = vector.load %arg14[%c18_248, %c0_249] : memref<64x64xf32, #tpu.memory_space<vmem>>, vector<1x64xf32>
    %c19_250 = arith.constant 19 : index
    %c0_251 = arith.constant 0 : index
    %275 = vector.load %arg14[%c19_250, %c0_251] : memref<64x64xf32, #tpu.memory_space<vmem>>, vector<1x64xf32>
    %c20_252 = arith.constant 20 : index
    %c0_253 = arith.constant 0 : index
    %276 = vector.load %arg14[%c20_252, %c0_253] : memref<64x64xf32, #tpu.memory_space<vmem>>, vector<1x64xf32>
    %c21 = arith.constant 21 : index
    %c0_254 = arith.constant 0 : index
    %277 = vector.load %arg14[%c21, %c0_254] : memref<64x64xf32, #tpu.memory_space<vmem>>, vector<1x64xf32>
    %c22 = arith.constant 22 : index
    %c0_255 = arith.constant 0 : index
    %278 = vector.load %arg14[%c22, %c0_255] : memref<64x64xf32, #tpu.memory_space<vmem>>, vector<1x64xf32>
    %c23 = arith.constant 23 : index
    %c0_256 = arith.constant 0 : index
    %279 = vector.load %arg14[%c23, %c0_256] : memref<64x64xf32, #tpu.memory_space<vmem>>, vector<1x64xf32>
    %c24_257 = arith.constant 24 : index
    %c0_258 = arith.constant 0 : index
    %280 = vector.load %arg14[%c24_257, %c0_258] : memref<64x64xf32, #tpu.memory_space<vmem>>, vector<1x64xf32>
    %c25 = arith.constant 25 : index
    %c0_259 = arith.constant 0 : index
    %281 = vector.load %arg14[%c25, %c0_259] : memref<64x64xf32, #tpu.memory_space<vmem>>, vector<1x64xf32>
    %c26 = arith.constant 26 : index
    %c0_260 = arith.constant 0 : index
    %282 = vector.load %arg14[%c26, %c0_260] : memref<64x64xf32, #tpu.memory_space<vmem>>, vector<1x64xf32>
    %c27 = arith.constant 27 : index
    %c0_261 = arith.constant 0 : index
    %283 = vector.load %arg14[%c27, %c0_261] : memref<64x64xf32, #tpu.memory_space<vmem>>, vector<1x64xf32>
    %c28 = arith.constant 28 : index
    %c0_262 = arith.constant 0 : index
    %284 = vector.load %arg14[%c28, %c0_262] : memref<64x64xf32, #tpu.memory_space<vmem>>, vector<1x64xf32>
    %c29 = arith.constant 29 : index
    %c0_263 = arith.constant 0 : index
    %285 = vector.load %arg14[%c29, %c0_263] : memref<64x64xf32, #tpu.memory_space<vmem>>, vector<1x64xf32>
    %c30 = arith.constant 30 : index
    %c0_264 = arith.constant 0 : index
    %286 = vector.load %arg14[%c30, %c0_264] : memref<64x64xf32, #tpu.memory_space<vmem>>, vector<1x64xf32>
    %c31 = arith.constant 31 : index
    %c0_265 = arith.constant 0 : index
    %287 = vector.load %arg14[%c31, %c0_265] : memref<64x64xf32, #tpu.memory_space<vmem>>, vector<1x64xf32>
    %c32_266 = arith.constant 32 : index
    %c0_267 = arith.constant 0 : index
    %288 = vector.load %arg14[%c32_266, %c0_267] : memref<64x64xf32, #tpu.memory_space<vmem>>, vector<1x64xf32>
    %c33_268 = arith.constant 33 : index
    %c0_269 = arith.constant 0 : index
    %289 = vector.load %arg14[%c33_268, %c0_269] : memref<64x64xf32, #tpu.memory_space<vmem>>, vector<1x64xf32>
    %c34 = arith.constant 34 : index
    %c0_270 = arith.constant 0 : index
    %290 = vector.load %arg14[%c34, %c0_270] : memref<64x64xf32, #tpu.memory_space<vmem>>, vector<1x64xf32>
    %c35 = arith.constant 35 : index
    %c0_271 = arith.constant 0 : index
    %291 = vector.load %arg14[%c35, %c0_271] : memref<64x64xf32, #tpu.memory_space<vmem>>, vector<1x64xf32>
    %c36_272 = arith.constant 36 : index
    %c0_273 = arith.constant 0 : index
    %292 = vector.load %arg14[%c36_272, %c0_273] : memref<64x64xf32, #tpu.memory_space<vmem>>, vector<1x64xf32>
    %c37_274 = arith.constant 37 : index
    %c0_275 = arith.constant 0 : index
    %293 = vector.load %arg14[%c37_274, %c0_275] : memref<64x64xf32, #tpu.memory_space<vmem>>, vector<1x64xf32>
    %c38_276 = arith.constant 38 : index
    %c0_277 = arith.constant 0 : index
    %294 = vector.load %arg14[%c38_276, %c0_277] : memref<64x64xf32, #tpu.memory_space<vmem>>, vector<1x64xf32>
    %c39 = arith.constant 39 : index
    %c0_278 = arith.constant 0 : index
    %295 = vector.load %arg14[%c39, %c0_278] : memref<64x64xf32, #tpu.memory_space<vmem>>, vector<1x64xf32>
    %c40_279 = arith.constant 40 : index
    %c0_280 = arith.constant 0 : index
    %296 = vector.load %arg14[%c40_279, %c0_280] : memref<64x64xf32, #tpu.memory_space<vmem>>, vector<1x64xf32>
    %c41 = arith.constant 41 : index
    %c0_281 = arith.constant 0 : index
    %297 = vector.load %arg14[%c41, %c0_281] : memref<64x64xf32, #tpu.memory_space<vmem>>, vector<1x64xf32>
    %c42 = arith.constant 42 : index
    %c0_282 = arith.constant 0 : index
    %298 = vector.load %arg14[%c42, %c0_282] : memref<64x64xf32, #tpu.memory_space<vmem>>, vector<1x64xf32>
    %c43 = arith.constant 43 : index
    %c0_283 = arith.constant 0 : index
    %299 = vector.load %arg14[%c43, %c0_283] : memref<64x64xf32, #tpu.memory_space<vmem>>, vector<1x64xf32>
    %c44 = arith.constant 44 : index
    %c0_284 = arith.constant 0 : index
    %300 = vector.load %arg14[%c44, %c0_284] : memref<64x64xf32, #tpu.memory_space<vmem>>, vector<1x64xf32>
    %c45 = arith.constant 45 : index
    %c0_285 = arith.constant 0 : index
    %301 = vector.load %arg14[%c45, %c0_285] : memref<64x64xf32, #tpu.memory_space<vmem>>, vector<1x64xf32>
    %c46 = arith.constant 46 : index
    %c0_286 = arith.constant 0 : index
    %302 = vector.load %arg14[%c46, %c0_286] : memref<64x64xf32, #tpu.memory_space<vmem>>, vector<1x64xf32>
    %c47 = arith.constant 47 : index
    %c0_287 = arith.constant 0 : index
    %303 = vector.load %arg14[%c47, %c0_287] : memref<64x64xf32, #tpu.memory_space<vmem>>, vector<1x64xf32>
    %c48_288 = arith.constant 48 : index
    %c0_289 = arith.constant 0 : index
    %304 = vector.load %arg14[%c48_288, %c0_289] : memref<64x64xf32, #tpu.memory_space<vmem>>, vector<1x64xf32>
    %c49 = arith.constant 49 : index
    %c0_290 = arith.constant 0 : index
    %305 = vector.load %arg14[%c49, %c0_290] : memref<64x64xf32, #tpu.memory_space<vmem>>, vector<1x64xf32>
    %c50 = arith.constant 50 : index
    %c0_291 = arith.constant 0 : index
    %306 = vector.load %arg14[%c50, %c0_291] : memref<64x64xf32, #tpu.memory_space<vmem>>, vector<1x64xf32>
    %c51 = arith.constant 51 : index
    %c0_292 = arith.constant 0 : index
    %307 = vector.load %arg14[%c51, %c0_292] : memref<64x64xf32, #tpu.memory_space<vmem>>, vector<1x64xf32>
    %c52 = arith.constant 52 : index
    %c0_293 = arith.constant 0 : index
    %308 = vector.load %arg14[%c52, %c0_293] : memref<64x64xf32, #tpu.memory_space<vmem>>, vector<1x64xf32>
    %c53 = arith.constant 53 : index
    %c0_294 = arith.constant 0 : index
    %309 = vector.load %arg14[%c53, %c0_294] : memref<64x64xf32, #tpu.memory_space<vmem>>, vector<1x64xf32>
    %c54_295 = arith.constant 54 : index
    %c0_296 = arith.constant 0 : index
    %310 = vector.load %arg14[%c54_295, %c0_296] : memref<64x64xf32, #tpu.memory_space<vmem>>, vector<1x64xf32>
    %c55_297 = arith.constant 55 : index
    %c0_298 = arith.constant 0 : index
    %311 = vector.load %arg14[%c55_297, %c0_298] : memref<64x64xf32, #tpu.memory_space<vmem>>, vector<1x64xf32>
    %c56_299 = arith.constant 56 : index
    %c0_300 = arith.constant 0 : index
    %312 = vector.load %arg14[%c56_299, %c0_300] : memref<64x64xf32, #tpu.memory_space<vmem>>, vector<1x64xf32>
    %c57 = arith.constant 57 : index
    %c0_301 = arith.constant 0 : index
    %313 = vector.load %arg14[%c57, %c0_301] : memref<64x64xf32, #tpu.memory_space<vmem>>, vector<1x64xf32>
    %c58 = arith.constant 58 : index
    %c0_302 = arith.constant 0 : index
    %314 = vector.load %arg14[%c58, %c0_302] : memref<64x64xf32, #tpu.memory_space<vmem>>, vector<1x64xf32>
    %c59 = arith.constant 59 : index
    %c0_303 = arith.constant 0 : index
    %315 = vector.load %arg14[%c59, %c0_303] : memref<64x64xf32, #tpu.memory_space<vmem>>, vector<1x64xf32>
    %c60 = arith.constant 60 : index
    %c0_304 = arith.constant 0 : index
    %316 = vector.load %arg14[%c60, %c0_304] : memref<64x64xf32, #tpu.memory_space<vmem>>, vector<1x64xf32>
    %c61 = arith.constant 61 : index
    %c0_305 = arith.constant 0 : index
    %317 = vector.load %arg14[%c61, %c0_305] : memref<64x64xf32, #tpu.memory_space<vmem>>, vector<1x64xf32>
    %c62 = arith.constant 62 : index
    %c0_306 = arith.constant 0 : index
    %318 = vector.load %arg14[%c62, %c0_306] : memref<64x64xf32, #tpu.memory_space<vmem>>, vector<1x64xf32>
    %c63 = arith.constant 63 : index
    %c0_307 = arith.constant 0 : index
    %319 = vector.load %arg14[%c63, %c0_307] : memref<64x64xf32, #tpu.memory_space<vmem>>, vector<1x64xf32>
    %320 = tpu.concatenate %256, %257, %258, %259, %260, %261, %262, %263, %264, %265, %266, %267, %268, %269, %270, %271 in 1 : vector<1x64xf32>, vector<1x64xf32>, vector<1x64xf32>, vector<1x64xf32>, vector<1x64xf32>, vector<1x64xf32>, vector<1x64xf32>, vector<1x64xf32>, vector<1x64xf32>, vector<1x64xf32>, vector<1x64xf32>, vector<1x64xf32>, vector<1x64xf32>, vector<1x64xf32>, vector<1x64xf32>, vector<1x64xf32> -> vector<1x1024xf32>
    %321 = tpu.concatenate %272, %273, %274, %275, %276, %277, %278, %279, %280, %281, %282, %283, %284, %285, %286, %287 in 1 : vector<1x64xf32>, vector<1x64xf32>, vector<1x64xf32>, vector<1x64xf32>, vector<1x64xf32>, vector<1x64xf32>, vector<1x64xf32>, vector<1x64xf32>, vector<1x64xf32>, vector<1x64xf32>, vector<1x64xf32>, vector<1x64xf32>, vector<1x64xf32>, vector<1x64xf32>, vector<1x64xf32>, vector<1x64xf32> -> vector<1x1024xf32>
    %322 = tpu.concatenate %288, %289, %290, %291, %292, %293, %294, %295, %296, %297, %298, %299, %300, %301, %302, %303 in 1 : vector<1x64xf32>, vector<1x64xf32>, vector<1x64xf32>, vector<1x64xf32>, vector<1x64xf32>, vector<1x64xf32>, vector<1x64xf32>, vector<1x64xf32>, vector<1x64xf32>, vector<1x64xf32>, vector<1x64xf32>, vector<1x64xf32>, vector<1x64xf32>, vector<1x64xf32>, vector<1x64xf32>, vector<1x64xf32> -> vector<1x1024xf32>
    %323 = tpu.concatenate %304, %305, %306, %307, %308, %309, %310, %311, %312, %313, %314, %315, %316, %317, %318, %319 in 1 : vector<1x64xf32>, vector<1x64xf32>, vector<1x64xf32>, vector<1x64xf32>, vector<1x64xf32>, vector<1x64xf32>, vector<1x64xf32>, vector<1x64xf32>, vector<1x64xf32>, vector<1x64xf32>, vector<1x64xf32>, vector<1x64xf32>, vector<1x64xf32>, vector<1x64xf32>, vector<1x64xf32>, vector<1x64xf32> -> vector<1x1024xf32>
    %324 = tpu.concatenate %320, %321, %322, %323 in 1 : vector<1x1024xf32>, vector<1x1024xf32>, vector<1x1024xf32>, vector<1x1024xf32> -> vector<1x4096xf32>
    %c0_308 = arith.constant 0 : index
    %c0_309 = arith.constant 0 : index
    %325 = vector.load %arg6[%c0_308, %c0_309] : memref<4096x128xf32, #tpu.memory_space<vmem>>, vector<4096x128xf32>
    %cst_310 = arith.constant dense<0.000000e+00> : vector<1x128xf32>
    %326 = tpu.matmul %324, %325, %cst_310 {dimension_numbers = #tpu.dot_dimension_numbers<[1], [0], [0], [1], [0, 0, 1, 1], [], []>} : vector<1x4096xf32>, vector<4096x128xf32>, vector<1x128xf32> -> vector<1x128xf32>
    %c0_311 = arith.constant 0 : index
    %c0_312 = arith.constant 0 : index
    %327 = vector.load %arg7[%c0_311, %c0_312] : memref<1x128xf32, #tpu.memory_space<vmem>>, vector<1x128xf32>
    %328 = arith.addf %326, %327 : vector<1x128xf32>
    %cst_313 = arith.constant 0.000000e+00 : f32
    %329 = vector.broadcast %cst_313 : f32 to vector<1x128xf32>
    %330 = arith.maximumf %328, %329 : vector<1x128xf32>
    %c0_314 = arith.constant 0 : index
    %c0_315 = arith.constant 0 : index
    %331 = vector.load %arg8[%c0_314, %c0_315] : memref<128x10xf32, #tpu.memory_space<vmem>>, vector<128x10xf32>
    %cst_316 = arith.constant dense<0.000000e+00> : vector<1x10xf32>
    %332 = tpu.matmul %330, %331, %cst_316 {dimension_numbers = #tpu.dot_dimension_numbers<[1], [0], [0], [1], [0, 0, 1, 1], [], []>} : vector<1x128xf32>, vector<128x10xf32>, vector<1x10xf32> -> vector<1x10xf32>
    %c0_317 = arith.constant 0 : index
    %c0_318 = arith.constant 0 : index
    %333 = vector.load %arg9[%c0_317, %c0_318] : memref<1x10xf32, #tpu.memory_space<vmem>>, vector<1x10xf32>
    %334 = arith.addf %332, %333 : vector<1x10xf32>
    %c0_319 = arith.constant 0 : index
    %c0_320 = arith.constant 0 : index
    %c0_321 = arith.constant 0 : index
    %335 = vector.load %arg10[%c0_319, %c0_320, %c0_321] : memref<1x1x10xf32, #tpu.memory_space<vmem>>, vector<1x1x10xf32>
    %336 = vector.shape_cast %335 : vector<1x1x10xf32> to vector<1x10xf32>
    %337 = vector.shape_cast %334 : vector<1x10xf32> to vector<1x1x10xf32>
    tpu.vector_store %arg10[%c0_319, %c0_320, %c0_321], %337 {strides = array<i32>} : memref<1x1x10xf32, #tpu.memory_space<vmem>>, vector<1x1x10xf32>,
    return
  }
  func.func @transform_0(%arg0: i32) -> (i32, i32, i32) {
    %c0_i32 = arith.constant 0 : i32
    %c0_i32_0 = arith.constant 0 : i32
    %c0_i32_1 = arith.constant 0 : i32
    return %arg0, %c0_i32, %c0_i32_0 : i32, i32, i32
  }
  func.func @transform_1(%arg0: i32) -> (i32, i32) {
    %c0_i32 = arith.constant 0 : i32
    %c0_i32_0 = arith.constant 0 : i32
    %c0_i32_1 = arith.constant 0 : i32
    return %c0_i32, %c0_i32_0 : i32, i32
  }
  func.func @transform_2(%arg0: i32) -> (i32, i32) {
    %c0_i32 = arith.constant 0 : i32
    %c0_i32_0 = arith.constant 0 : i32
    %c0_i32_1 = arith.constant 0 : i32
    return %c0_i32, %c0_i32_0 : i32, i32
  }
  func.func @transform_3(%arg0: i32) -> (i32, i32, i32) {
    %c0_i32 = arith.constant 0 : i32
    %c0_i32_0 = arith.constant 0 : i32
    %c0_i32_1 = arith.constant 0 : i32
    %c0_i32_2 = arith.constant 0 : i32
    return %c0_i32, %c0_i32_0, %c0_i32_1 : i32, i32, i32
  }
  func.func @transform_4(%arg0: i32) -> (i32, i32) {
    %c0_i32 = arith.constant 0 : i32
    %c0_i32_0 = arith.constant 0 : i32
    %c0_i32_1 = arith.constant 0 : i32
    return %c0_i32, %c0_i32_0 : i32, i32
  }
  func.func @transform_5(%arg0: i32) -> (i32, i32) {
    %c0_i32 = arith.constant 0 : i32
    %c0_i32_0 = arith.constant 0 : i32
    %c0_i32_1 = arith.constant 0 : i32
    return %c0_i32, %c0_i32_0 : i32, i32
  }
  func.func @transform_6(%arg0: i32) -> (i32, i32) {
    %c0_i32 = arith.constant 0 : i32
    %c0_i32_0 = arith.constant 0 : i32
    %c0_i32_1 = arith.constant 0 : i32
    return %c0_i32, %c0_i32_0 : i32, i32
  }
  func.func @transform_7(%arg0: i32) -> (i32, i32) {
    %c0_i32 = arith.constant 0 : i32
    %c0_i32_0 = arith.constant 0 : i32
    %c0_i32_1 = arith.constant 0 : i32
    return %c0_i32, %c0_i32_0 : i32, i32
  }
  func.func @transform_8(%arg0: i32) -> (i32, i32) {
    %c0_i32 = arith.constant 0 : i32
    %c0_i32_0 = arith.constant 0 : i32
    %c0_i32_1 = arith.constant 0 : i32
    return %c0_i32, %c0_i32_0 : i32, i32
  }
  func.func @transform_9(%arg0: i32) -> (i32, i32, i32) {
    %c0_i32 = arith.constant 0 : i32
    %c0_i32_0 = arith.constant 0 : i32
    %c0_i32_1 = arith.constant 0 : i32
    return %arg0, %c0_i32, %c0_i32_0 : i32, i32, i32
  }
}

</mosaic_0001>

<bundles_post_ra>
// kernel: simple_cnn_forward.1
= control target key start
LH: loop header
LB: loop body
LE: loop exit
PB: predicated region body
PF: predicated region fallthrough
CT: control target
= control target key end

     0   :  { %14 = vsyncpa [#allocation7], 0  ;;  %s11403_s0 = inlined_call_operand.vmem [shape: f32[2,1024,32], index: 0, kind: input, shape index: {}]   ;;  %s11404_s1 = inlined_call_operand.vmem [shape: f32[32,32], index: 1, kind: input, shape index: {}]   ;;  %s11405_s2 = inlined_call_operand.vmem [shape: f32[1,32], index: 2, kind: input, shape index: {}]   ;;  %s11406_s3 = inlined_call_operand.vmem [shape: f32[3,96,64], index: 3, kind: input, shape index: {}]   ;;  %s11407_s4 = inlined_call_operand.vmem [shape: f32[1,64], index: 4, kind: input, shape index: {}]   ;;  %s11408_s5 = inlined_call_operand.vmem [shape: f32[4096,128], index: 5, kind: input, shape index: {}]   ;;  %s11409_s6 = inlined_call_operand.vmem [shape: f32[1,128], index: 6, kind: input, shape index: {}]   ;;  %s11410_s7 = inlined_call_operand.vmem [shape: f32[128,10], index: 7, kind: input, shape index: {}]   ;;  %s11411_s8 = inlined_call_operand.vmem [shape: f32[1,10], index: 8, kind: input, shape index: {}]   ;;  %s11412_s9 = inlined_call_operand.hbm [shape: f32[2,1,10], index: 9, kind: output, shape index: {}]  }
   0x1   :  { %16 = vsyncpa [#allocation7 + $0x1], 0  ;;  %s8526_s30 = smov 0   ;;  %s8528_s10 = smov 0  }
   0x2   :  { %s8530_s11 = smov 0   ;;  %s8532_s12 = smov 0  }
   0x3 LB: > { %s8547_s13 = sadd.s32 4294967295, %s8468_s12   ;;  %s5999_s14 = sadd.s32 4294967294, %s8468_s12   ;;  %s8468_s12 = sphi %s8532_s12, %s11418_s12   ;;  %s8464_s11 = sphi %s8530_s11, %s11417_s11   ;;  %s8460_s10 = sphi %s8528_s10, %s11416_s10   ;;  %s8456_s30 = sphi %s8526_s30, %s11415_s30  }
   0x4   : > { %s8551_s15 = sadd.s32 1, %s8468_s12   ;;  %s223_s16 = sadd.s32 1, %s8464_s11 }
   0x5   : > { %s220_s17 = ssub.s32 %s8468_s12, %s8551_s15  ;;  %p233_p0 = scmp.ne.s32.totalorder %s8464_s11, %s8460_s10 }
   0x6   : > { %p221_p1 = scmp.eq.s32.totalorder %s220_s17, 0  ;;  %p234_p2 = scmp.eq.s32.totalorder %s8547_s13, 1 }
   0x7   : > { %p239_p3 = scmp.ne.s32.totalorder %s8460_s10, %s8456_s30  ;;  %p240_p4 = scmp.eq.s32.totalorder %s5999_s14, 1 }
   0x8   : > { %s8562_s18 = scalar_select %p221_p1, %s8464_s11, %s223_s16  }
   0x9   : > { %p8564_p5 = por %p234_p2, %p233_p0  ;;  %p8568_p6 = por %p240_p4, %p239_p3 }
   0xa   : > { %p6002_p7 = scmp.ge.s32.totalorder %s8468_s12, 1  ;;  %p290_p8 = scmp.lt.s32.totalorder %s8468_s12, 3 }
   0xc   : > { %p291_p9 = pnand %p6002_p7, %p290_p8 }
   0xd   : > { %v501_v0 = vld [vmem:[%s11404_s1] sm:$0xff] (!%p291_p9)  ;;  %v502_v1 = vld [vmem:[%s11404_s1 + $0x8] sm:$0xff] (!%p291_p9)  ;;  %v503_v2 = vld [vmem:[%s11404_s1 + $0x10] sm:$0xff] (!%p291_p9)  ;;  %p325_p10 = scmp.lt.s32.totalorder (!%p291_p9), %s8547_s13, 1  ;;  %vm512_vm0 = vcmask (!%p291_p9), 261120   ;;  %vm330_vm1 = vcmask (!%p291_p9), 785408  }
   0xe   : > { %294 = sbr.rel (%p291_p9) target bundleno = 1750 (0x6d6), region = 56  ;;  %v7593_v3 = vpack.c.bf16 (!%p291_p9), %v502_v1, %v501_v0  ;;  %v504_v4 = vld [vmem:[%s11404_s1 + $0x18] sm:$0xff] (!%p291_p9)  ;;  %v8470_v63 = vmov (!%p291_p9), 0.0   ;;  %s8471_s26 = smov (!%p291_p9), 64   ;;  %vm1889_vm2 = vcmask (!%p291_p9), 523520   ;;  %vm1898_vm3 = vcmask (!%p291_p9), 785920  }
   0xf   : > { %v7597_v5 = vpack.c.bf16 (!%p291_p9), %v504_v4, %v503_v2  ;;  %333 = vst.msk [vmem:[#allocation3 + $0x10] sm:$0xff] (!%p291_p9), %vm330_vm1, %v8470_v63  ;;  %334 = vst.msk [vmem:[#allocation3 + $0x18] sm:$0xff] (!%p291_p9), %vm330_vm1, %v8470_v63  ;;  %s8472_s27 = smov (!%p291_p9), 32   ;;  %vm371_vm4 = vcmask (!%p291_p9), 783360   ;;  %vm3851_vm5 = vcmask (!%p291_p9), 523264   ;;  %vm8474_vm6 = vmmov (!%p291_p9), 0  }
  0x10   : > { %7594 = vmatprep.subr.bf16.mxu0 (!%p291_p9), %v7593_v3  ;;  %331 = vst.msk [vmem:[#allocation3] sm:$0xff] (!%p291_p9), %vm330_vm1, %v8470_v63  ;;  %332 = vst.msk [vmem:[#allocation3 + $0x8] sm:$0xff] (!%p291_p9), %vm330_vm1, %v8470_v63  ;;  %s6267_s16 = sshll.u32 (!%p291_p9), %s8547_s13, 4  ;;  %vm5929_vm7 = vcmask (!%p291_p9), 73728  }
  0x11   : > { %7596 = vmatpush3.bf16.msra.mxu0 (!%p291_p9), %v7593_v3  ;;  %335 = vst.msk [vmem:[#allocation3 + $0x20] sm:$0xff] (!%p291_p9), %vm330_vm1, %v8470_v63  ;;  %336 = vst.msk [vmem:[#allocation3 + $0x28] sm:$0xff] (!%p291_p9), %vm330_vm1, %v8470_v63  ;;  %s11361_s25 = scalar_lea.hbm (!%p291_p9), %s11412_s9, %s6267_s16 }
  0x12   : > { %7598 = vmatprep.subr.bf16.mxu0 (!%p291_p9), %v7597_v5  ;;  %337 = vst.msk [vmem:[#allocation3 + $0x30] sm:$0xff] (!%p291_p9), %vm330_vm1, %v8470_v63  ;;  %338 = vst.msk [vmem:[#allocation3 + $0x38] sm:$0xff] (!%p291_p9), %vm330_vm1, %v8470_v63 }
  0x13   : > { %339 = vst.msk [vmem:[#allocation3 + $0x40] sm:$0xff] (!%p291_p9), %vm330_vm1, %v8470_v63  ;;  %340 = vst.msk [vmem:[#allocation3 + $0x48] sm:$0xff] (!%p291_p9), %vm330_vm1, %v8470_v63 }
  0x14   : > { %341 = vst.msk [vmem:[#allocation3 + $0x50] sm:$0xff] (!%p291_p9), %vm330_vm1, %v8470_v63  ;;  %342 = vst.msk [vmem:[#allocation3 + $0x58] sm:$0xff] (!%p291_p9), %vm330_vm1, %v8470_v63 }
  0x15   : > { %s326_s29 = scalar_select %p325_p10, %s8547_s13, 1  ;;  %7600 = vmatpush3.bf16.msra.mxu0 %v7597_v5  ;;  %343 = vst.msk [vmem:[#allocation3 + $0x60] sm:$0xff] %vm330_vm1, %v8470_v63  ;;  %344 = vst.msk [vmem:[#allocation3 + $0x68] sm:$0xff] %vm330_vm1, %v8470_v63 }
  0x16   : > { %345 = vst.msk [vmem:[#allocation3 + $0x70] sm:$0xff] %vm330_vm1, %v8470_v63  ;;  %346 = vst.msk [vmem:[#allocation3 + $0x78] sm:$0xff] %vm330_vm1, %v8470_v63  ;;  %s8475_s13 = smov [#allocation6]  }
  0x17   : > { %s6270_s14 = sshll.u32 %s326_s29, 10  ;;  %347 = vst.msk [vmem:[#allocation3 + $0x80] sm:$0xff] %vm330_vm1, %v8470_v63  ;;  %348 = vst.msk [vmem:[#allocation3 + $0x88] sm:$0xff] %vm330_vm1, %v8470_v63  ;;  %s8410_s28 = sshll.u32 %s8475_s13, 4  ;;  %s8411_s28 = int_to_ptr.vmem [resolvable:$false] %s8410_s28 }
  0x18   : > { %s8591_s21 = scalar_lea.vmem %s11403_s0, %s6270_s14  ;;  %349 = vst.msk [vmem:[#allocation3 + $0x90] sm:$0xff] %vm330_vm1, %v8470_v63  ;;  %350 = vst.msk [vmem:[#allocation3 + $0x98] sm:$0xff] %vm330_vm1, %v8470_v63  ;;  %s8412_s29 = scalar_lea.vmem %s8411_s28, 32 }
  0x19   : > { %v373_v6 = vld [vmem:[%s8591_s21] sm:$0xff]  ;;  %v374_v7 = vld [vmem:[%s8591_s21 + $0x8] sm:$0xff]  ;;  %v375_v8 = vld [vmem:[%s8591_s21 + $0x10] sm:$0xff]  ;;  %351 = vst.msk [vmem:[#allocation3 + $0xa0] sm:$0xff] %vm330_vm1, %v8470_v63 }
  0x1a   : > { %7132 = vmatprep.mubr.msk.f32.mxu0 %vm512_vm0, %v373_v6  ;;  %v376_v9 = vld [vmem:[%s8591_s21 + $0x18] sm:$0xff]  ;;  %v377_v10 = vld [vmem:[%s8591_s21 + $0x20] sm:$0xff]  ;;  %v378_v11 = vld [vmem:[%s8591_s21 + $0x28] sm:$0xff]  ;;  %352 = vst.msk [vmem:[#allocation3 + $0xa8] sm:$0xff] %vm330_vm1, %v8470_v63 }
  0x1b   : > { %7133 = vmatmul.mubr.msk.f32.vlgmr.msra.gmra.mrb[0].mxu0 %vm512_vm0, %v374_v7  ;;  %v379_v12 = vld [vmem:[%s8591_s21 + $0x30] sm:$0xff]  ;;  %v380_v13 = vld [vmem:[%s8591_s21 + $0x38] sm:$0xff]  ;;  %v381_v14 = vld [vmem:[%s8591_s21 + $0x40] sm:$0xff]  ;;  %353 = vst.msk [vmem:[#allocation3 + $0xb0] sm:$0xff] %vm330_vm1, %v8470_v63 }
  0x1c   : > { %7135 = vmatprep.mubr.msk.f32.mxu0 %vm512_vm0, %v375_v8  ;;  %v382_v15 = vld [vmem:[%s8591_s21 + $0x48] sm:$0xff]  ;;  %v383_v16 = vld [vmem:[%s8591_s21 + $0x50] sm:$0xff]  ;;  %v384_v17 = vld [vmem:[%s8591_s21 + $0x58] sm:$0xff]  ;;  %354 = vst.msk [vmem:[#allocation3 + $0xb8] sm:$0xff] %vm330_vm1, %v8470_v63 }
  0x1d   : > { %v385_v18 = vld [vmem:[%s8591_s21 + $0x60] sm:$0xff]  ;;  %v386_v19 = vld [vmem:[%s8591_s21 + $0x68] sm:$0xff]  ;;  %v387_v20 = vld [vmem:[%s8591_s21 + $0x70] sm:$0xff]  ;;  %355 = vst.msk [vmem:[#allocation3 + $0xc0] sm:$0xff] %vm330_vm1, %v8470_v63 }
  0x1e   : > { %v388_v21 = vld [vmem:[%s8591_s21 + $0x78] sm:$0xff]  ;;  %v389_v22 = vld [vmem:[%s8591_s21 + $0x80] sm:$0xff]  ;;  %v390_v23 = vld [vmem:[%s8591_s21 + $0x88] sm:$0xff]  ;;  %356 = vst.msk [vmem:[#allocation3 + $0xc8] sm:$0xff] %vm330_vm1, %v8470_v63 }
  0x1f   : > { %7136 = vmatmul.mubr.msk.f32.gmra.mrb[2].mxu0 %vm512_vm0, %v376_v9  ;;  %v391_v24 = vld [vmem:[%s8591_s21 + $0x90] sm:$0xff]  ;;  %v392_v25 = vld [vmem:[%s8591_s21 + $0x98] sm:$0xff]  ;;  %v393_v26 = vld [vmem:[%s8591_s21 + $0xa0] sm:$0xff]  ;;  %357 = vst.msk [vmem:[#allocation3 + $0xd0] sm:$0xff] %vm330_vm1, %v8470_v63 }
  0x20   : > { %7138 = vmatprep.mubr.msk.f32.mxu0 %vm512_vm0, %v377_v10  ;;  %v394_v27 = vld [vmem:[%s8591_s21 + $0xa8] sm:$0xff]  ;;  %v395_v28 = vld [vmem:[%s8591_s21 + $0xb0] sm:$0xff]  ;;  %v396_v29 = vld [vmem:[%s8591_s21 + $0xb8] sm:$0xff]  ;;  %358 = vst.msk [vmem:[#allocation3 + $0xd8] sm:$0xff] %vm330_vm1, %v8470_v63 }
  0x21   : > { %v397_v30 = vld [vmem:[%s8591_s21 + $0xc0] sm:$0xff]  ;;  %v398_v31 = vld [vmem:[%s8591_s21 + $0xc8] sm:$0xff]  ;;  %v399_v32 = vld [vmem:[%s8591_s21 + $0xd0] sm:$0xff]  ;;  %359 = vst.msk [vmem:[#allocation3 + $0xe0] sm:$0xff] %vm330_vm1, %v8470_v63 }
  0x22   : > { %v400_v33 = vld [vmem:[%s8591_s21 + $0xd8] sm:$0xff]  ;;  %v401_v34 = vld [vmem:[%s8591_s21 + $0xe0] sm:$0xff]  ;;  %v402_v35 = vld [vmem:[%s8591_s21 + $0xe8] sm:$0xff]  ;;  %360 = vst.msk [vmem:[#allocation3 + $0xe8] sm:$0xff] %vm330_vm1, %v8470_v63 }
  0x23   : > { %7139 = vmatmul.mubr.msk.f32.gmra.mrb[4].mxu0 %vm512_vm0, %v378_v11  ;;  %v403_v36 = vld [vmem:[%s8591_s21 + $0xf0] sm:$0xff]  ;;  %v404_v37 = vld [vmem:[%s8591_s21 + $0xf8] sm:$0xff]  ;;  %v405_v38 = vld [vmem:[%s8591_s21 + $0x100] sm:$0xff]  ;;  %361 = vst.msk [vmem:[#allocation3 + $0xf0] sm:$0xff] %vm330_vm1, %v8470_v63 }
  0x24   : > { %7141 = vmatprep.mubr.msk.f32.mxu0 %vm512_vm0, %v379_v12  ;;  %v406_v39 = vld [vmem:[%s8591_s21 + $0x108] sm:$0xff]  ;;  %v407_v40 = vld [vmem:[%s8591_s21 + $0x110] sm:$0xff]  ;;  %v408_v41 = vld [vmem:[%s8591_s21 + $0x118] sm:$0xff]  ;;  %362 = vst.msk [vmem:[#allocation3 + $0xf8] sm:$0xff] %vm330_vm1, %v8470_v63 }
  0x25   : > { %v409_v42 = vld [vmem:[%s8591_s21 + $0x120] sm:$0xff]  ;;  %v410_v43 = vld [vmem:[%s8591_s21 + $0x128] sm:$0xff]  ;;  %v411_v44 = vld [vmem:[%s8591_s21 + $0x130] sm:$0xff]  ;;  %363 = vst.msk [vmem:[#allocation3 + $0x100] sm:$0xff] %vm330_vm1, %v8470_v63 }
  0x26   : > { %v412_v45 = vld [vmem:[%s8591_s21 + $0x138] sm:$0xff]  ;;  %v413_v46 = vld [vmem:[%s8591_s21 + $0x140] sm:$0xff]  ;;  %v414_v47 = vld [vmem:[%s8591_s21 + $0x148] sm:$0xff]  ;;  %364 = vst.msk [vmem:[#allocation3 + $0x108] sm:$0xff] %vm330_vm1, %v8470_v63 }
  0x27   : > { %7142 = vmatmul.mubr.msk.f32.gmra.mrb[6].mxu0 %vm512_vm0, %v380_v13  ;;  %v415_v48 = vld [vmem:[%s8591_s21 + $0x150] sm:$0xff]  ;;  %v416_v49 = vld [vmem:[%s8591_s21 + $0x158] sm:$0xff]  ;;  %v417_v50 = vld [vmem:[%s8591_s21 + $0x160] sm:$0xff]  ;;  %365 = vst.msk [vmem:[#allocation3 + $0x110] sm:$0xff] %vm330_vm1, %v8470_v63 }
  0x28   : > { %7144 = vmatprep.mubr.msk.f32.mxu0 %vm512_vm0, %v381_v14  ;;  %v418_v51 = vld [vmem:[%s8591_s21 + $0x168] sm:$0xff]  ;;  %v419_v52 = vld [vmem:[%s8591_s21 + $0x170] sm:$0xff]  ;;  %v420_v53 = vld [vmem:[%s8591_s21 + $0x178] sm:$0xff]  ;;  %366 = vst.msk [vmem:[#allocation3 + $0x118] sm:$0xff] %vm330_vm1, %v8470_v63 }
  0x29   : > { %v421_v54 = vld [vmem:[%s8591_s21 + $0x180] sm:$0xff]  ;;  %v422_v55 = vld [vmem:[%s8591_s21 + $0x188] sm:$0xff]  ;;  %v423_v56 = vld [vmem:[%s8591_s21 + $0x190] sm:$0xff]  ;;  %367 = vst.msk [vmem:[#allocation3 + $0x120] sm:$0xff] %vm330_vm1, %v8470_v63 }
  0x2a   : > { %v424_v57 = vld [vmem:[%s8591_s21 + $0x198] sm:$0xff]  ;;  %v425_v58 = vld [vmem:[%s8591_s21 + $0x1a0] sm:$0xff]  ;;  %v426_v59 = vld [vmem:[%s8591_s21 + $0x1a8] sm:$0xff]  ;;  %368 = vst.msk [vmem:[#allocation3 + $0x128] sm:$0xff] %vm330_vm1, %v8470_v63 }
  0x2b   : > { %7145 = vmatmul.mubr.msk.f32.gmra.mrb[8].mxu0 %vm512_vm0, %v382_v15  ;;  %v427_v60 = vld [vmem:[%s8591_s21 + $0x1b0] sm:$0xff]  ;;  %v428_v61 = vld [vmem:[%s8591_s21 + $0x1b8] sm:$0xff]  ;;  %v429_v62 = vld [vmem:[%s8591_s21 + $0x1c0] sm:$0xff]  ;;  %369 = vst.msk [vmem:[#allocation3 + $0x130] sm:$0xff] %vm330_vm1, %v8470_v63 }
  0x2c   : > { %7147 = vmatprep.mubr.msk.f32.mxu0 %vm512_vm0, %v383_v16  ;;  %370 = vst.msk [vmem:[#allocation3 + $0x138] sm:$0xff] %vm330_vm1, %v8470_v63  ;;  %v430_v0 = vld [vmem:[%s8591_s21 + $0x1c8] sm:$0xff]  ;;  %v431_v1 = vld [vmem:[%s8591_s21 + $0x1d0] sm:$0xff]  ;;  %v432_v2 = vld [vmem:[%s8591_s21 + $0x1d8] sm:$0xff] }
  0x2d   : > { %v433_v3 = vld [vmem:[%s8591_s21 + $0x1e0] sm:$0xff]  ;;  %v434_v4 = vld [vmem:[%s8591_s21 + $0x1e8] sm:$0xff]  ;;  %v435_v5 = vld [vmem:[%s8591_s21 + $0x1f0] sm:$0xff]  ;;  %372 = vst.msk [vmem:[#allocation3 + $0x140] sm:$0x3f] %vm371_vm4, %v8470_v63 }
  0x2e   : > { %v436_v6 = vld [vmem:[%s8591_s21 + $0x1f8] sm:$0xff]  ;;  %v437_v7 = vld [vmem:[%s8591_s21 + $0x200] sm:$0xff]  ;;  %v438_v8 = vld [vmem:[%s8591_s21 + $0x208] sm:$0xff] }
  0x2f   : > { %7148 = vmatmul.mubr.msk.f32.gmra.mrb[10].mxu0 %vm512_vm0, %v384_v17  ;;  %v439_v9 = vld [vmem:[%s8591_s21 + $0x210] sm:$0xff]  ;;  %v440_v10 = vld [vmem:[%s8591_s21 + $0x218] sm:$0xff]  ;;  %v441_v11 = vld [vmem:[%s8591_s21 + $0x220] sm:$0xff] }
  0x30   : > { %7150 = vmatprep.mubr.msk.f32.mxu0 %vm512_vm0, %v385_v18  ;;  %v442_v12 = vld [vmem:[%s8591_s21 + $0x228] sm:$0xff]  ;;  %v443_v13 = vld [vmem:[%s8591_s21 + $0x230] sm:$0xff]  ;;  %v444_v14 = vld [vmem:[%s8591_s21 + $0x238] sm:$0xff] }
  0x31   : > { %v445_v15 = vld [vmem:[%s8591_s21 + $0x240] sm:$0xff]  ;;  %v446_v16 = vld [vmem:[%s8591_s21 + $0x248] sm:$0xff]  ;;  %v447_v17 = vld [vmem:[%s8591_s21 + $0x250] sm:$0xff] }
  0x32   : > { %v448_v18 = vld [vmem:[%s8591_s21 + $0x258] sm:$0xff] }
  0x33   : > { %7151 = vmatmul.mubr.msk.f32.gmra.mrb[12].mxu0 %vm512_vm0, %v386_v19  ;;  %v449_v19 = vld [vmem:[%s8591_s21 + $0x260] sm:$0xff] }
  0x34   : > { %7153 = vmatprep.mubr.msk.f32.mxu0 %vm512_vm0, %v387_v20  ;;  %v450_v20 = vld [vmem:[%s8591_s21 + $0x268] sm:$0xff] }
  0x37   : > { %7154 = vmatmul.mubr.msk.f32.gmra.mrb[14].mxu0 %vm512_vm0, %v388_v21  ;;  %v451_v21 = vld [vmem:[%s8591_s21 + $0x270] sm:$0xff] }
  0x38   : > { %7156 = vmatprep.mubr.msk.f32.mxu0 %vm512_vm0, %v389_v22  ;;  %v452_v22 = vld [vmem:[%s8591_s21 + $0x278] sm:$0xff] }
  0x3b   : > { %7157 = vmatmul.mubr.msk.f32.gmra.mrb[16].mxu0 %vm512_vm0, %v390_v23  ;;  %v453_v23 = vld [vmem:[%s8591_s21 + $0x280] sm:$0xff] }
  0x3c   : > { %7159 = vmatprep.mubr.msk.f32.mxu0 %vm512_vm0, %v391_v24  ;;  %v454_v24 = vld [vmem:[%s8591_s21 + $0x288] sm:$0xff] }
  0x3f   : > { %7160 = vmatmul.mubr.msk.f32.gmra.mrb[18].mxu0 %vm512_vm0, %v392_v25  ;;  %v455_v25 = vld [vmem:[%s8591_s21 + $0x290] sm:$0xff] }
  0x40   : > { %7162 = vmatprep.mubr.msk.f32.mxu0 %vm512_vm0, %v393_v26  ;;  %v456_v26 = vld [vmem:[%s8591_s21 + $0x298] sm:$0xff] }
  0x43   : > { %7163 = vmatmul.mubr.msk.f32.gmra.mrb[20].mxu0 %vm512_vm0, %v394_v27  ;;  %v457_v27 = vld [vmem:[%s8591_s21 + $0x2a0] sm:$0xff] }
  0x44   : > { %7165 = vmatprep.mubr.msk.f32.mxu0 %vm512_vm0, %v395_v28  ;;  %v458_v28 = vld [vmem:[%s8591_s21 + $0x2a8] sm:$0xff] }
  0x47   : > { %7166 = vmatmul.mubr.msk.f32.gmra.mrb[22].mxu0 %vm512_vm0, %v396_v29  ;;  %v459_v29 = vld [vmem:[%s8591_s21 + $0x2b0] sm:$0xff] }
  0x48   : > { %7168 = vmatprep.mubr.msk.f32.mxu0 %vm512_vm0, %v397_v30  ;;  %v460_v30 = vld [vmem:[%s8591_s21 + $0x2b8] sm:$0xff] }
  0x4b   : > { %7169 = vmatmul.mubr.msk.f32.gmra.mrb[24].mxu0 %vm512_vm0, %v398_v31  ;;  %v461_v31 = vld [vmem:[%s8591_s21 + $0x2c0] sm:$0xff] }
  0x4c   : > { %7171 = vmatprep.mubr.msk.f32.mxu0 %vm512_vm0, %v399_v32  ;;  %v462_v32 = vld [vmem:[%s8591_s21 + $0x2c8] sm:$0xff] }
  0x4f   : > { %7172 = vmatmul.mubr.msk.f32.gmra.mrb[26].mxu0 %vm512_vm0, %v400_v33  ;;  %v463_v33 = vld [vmem:[%s8591_s21 + $0x2d0] sm:$0xff] }
  0x50   : > { %7174 = vmatprep.mubr.msk.f32.mxu0 %vm512_vm0, %v401_v34  ;;  %v464_v34 = vld [vmem:[%s8591_s21 + $0x2d8] sm:$0xff] }
  0x53   : > { %7175 = vmatmul.mubr.msk.f32.gmra.mrb[28].mxu0 %vm512_vm0, %v402_v35  ;;  %v465_v35 = vld [vmem:[%s8591_s21 + $0x2e0] sm:$0xff] }
  0x54   : > { %7177 = vmatprep.mubr.msk.f32.mxu0 %vm512_vm0, %v403_v36  ;;  %v466_v36 = vld [vmem:[%s8591_s21 + $0x2e8] sm:$0xff] }
  0x57   : > { %7178 = vmatmul.mubr.msk.f32.gmra.mrb[30].mxu0 %vm512_vm0, %v404_v37  ;;  %v467_v37 = vld [vmem:[%s8591_s21 + $0x2f0] sm:$0xff] }
  0x58   : > { %7180 = vmatprep.mubr.msk.f32.mxu0 %vm512_vm0, %v405_v38  ;;  %v468_v38 = vld [vmem:[%s8591_s21 + $0x2f8] sm:$0xff] }
  0x5b   : > { %7181 = vmatmul.mubr.msk.f32.gmra.mrb[32].mxu0 %vm512_vm0, %v406_v39  ;;  %v469_v39 = vld [vmem:[%s8591_s21 + $0x300] sm:$0xff] }
  0x5c   : > { %7183 = vmatprep.mubr.msk.f32.mxu0 %vm512_vm0, %v407_v40  ;;  %v470_v40 = vld [vmem:[%s8591_s21 + $0x308] sm:$0xff] }
  0x5f   : > { %7184 = vmatmul.mubr.msk.f32.gmra.mrb[34].mxu0 %vm512_vm0, %v408_v41  ;;  %v471_v41 = vld [vmem:[%s8591_s21 + $0x310] sm:$0xff] }
  0x60   : > { %7186 = vmatprep.mubr.msk.f32.mxu0 %vm512_vm0, %v409_v42  ;;  %v472_v42 = vld [vmem:[%s8591_s21 + $0x318] sm:$0xff] }
  0x63   : > { %7187 = vmatmul.mubr.msk.f32.gmra.mrb[36].mxu0 %vm512_vm0, %v410_v43  ;;  %v473_v43 = vld [vmem:[%s8591_s21 + $0x320] sm:$0xff] }
  0x64   : > { %7189 = vmatprep.mubr.msk.f32.mxu0 %vm512_vm0, %v411_v44  ;;  %v474_v44 = vld [vmem:[%s8591_s21 + $0x328] sm:$0xff] }
  0x67   : > { %7190 = vmatmul.mubr.msk.f32.gmra.mrb[38].mxu0 %vm512_vm0, %v412_v45  ;;  %v475_v45 = vld [vmem:[%s8591_s21 + $0x330] sm:$0xff] }
  0x68   : > { %7192 = vmatprep.mubr.msk.f32.mxu0 %vm512_vm0, %v413_v46  ;;  %v476_v46 = vld [vmem:[%s8591_s21 + $0x338] sm:$0xff] }
  0x6b   : > { %7193 = vmatmul.mubr.msk.f32.gmra.mrb[40].mxu0 %vm512_vm0, %v414_v47  ;;  %v477_v47 = vld [vmem:[%s8591_s21 + $0x340] sm:$0xff] }
  0x6c   : > { %7195 = vmatprep.mubr.msk.f32.mxu0 %vm512_vm0, %v415_v48  ;;  %v478_v48 = vld [vmem:[%s8591_s21 + $0x348] sm:$0xff] }
  0x6f   : > { %7196 = vmatmul.mubr.msk.f32.gmra.mrb[42].mxu0 %vm512_vm0, %v416_v49  ;;  %v479_v49 = vld [vmem:[%s8591_s21 + $0x350] sm:$0xff] }
  0x70   : > { %7198 = vmatprep.mubr.msk.f32.mxu0 %vm512_vm0, %v417_v50  ;;  %v8889_v50 = vld [vmem:[%s11405_s2] ss:$0 sm:$0xff] }
  0x73   : > { %7199 = vmatmul.mubr.msk.f32.gmra.mrb[44].mxu0 %vm512_vm0, %v418_v51  ;;  %v480_v51 = vld [vmem:[%s8591_s21 + $0x358] sm:$0xff] }
  0x74   : > { %7201 = vmatprep.mubr.msk.f32.mxu0 %vm512_vm0, %v419_v52  ;;  %v481_v52 = vld [vmem:[%s8591_s21 + $0x360] sm:$0xff] }
  0x77   : > { %7202 = vmatmul.mubr.msk.f32.gmra.mrb[46].mxu0 %vm512_vm0, %v420_v53  ;;  %v6134_v53 = vld [vmem:[%s11406_s3 + $0x60] sm:$0xff] }
  0x78   : > { %7204 = vmatprep.mubr.msk.f32.mxu0 %vm512_vm0, %v421_v54  ;;  %v6135_v54 = vld [vmem:[%s11406_s3 + $0x68] sm:$0xff] }
  0x7b   : > { %7205 = vmatmul.mubr.msk.f32.gmra.mrb[48].mxu0 %vm512_vm0, %v422_v55 }
  0x7c   : > { %7207 = vmatprep.mubr.msk.f32.mxu0 %vm512_vm0, %v423_v56  ;;  %v7601_v56 = vpack.c.bf16 %v6135_v54, %v6134_v53 }
  0x7e   : > { %7602 = vmatprep.subr.bf16.mxu1 %v7601_v56 }
  0x7f   : > { %7208 = vmatmul.mubr.msk.f32.gmra.mrb[50].mxu0 %vm512_vm0, %v424_v57  ;;  %7604 = vmatpush3.bf16.msra.mxu1 %v7601_v56 }
  0x80   : > { %7210 = vmatprep.mubr.msk.f32.mxu0 %vm512_vm0, %v425_v58 }
  0x83   : > { %7211 = vmatmul.mubr.msk.f32.gmra.mrb[52].mxu0 %vm512_vm0, %v426_v59 }
  0x84   : > { %7213 = vmatprep.mubr.msk.f32.mxu0 %vm512_vm0, %v427_v60  ;;  %v482_v60 = vld [vmem:[%s8591_s21 + $0x368] sm:$0xff] }
  0x87   : > { %7214 = vmatmul.mubr.msk.f32.gmra.mrb[54].mxu0 %vm512_vm0, %v428_v61 }
  0x88   : > { %7216 = vmatprep.mubr.msk.f32.mxu0 %vm512_vm0, %v429_v62  ;;  %v483_v62 = vld [vmem:[%s8591_s21 + $0x370] sm:$0xff] }
  0x8b   : > { %7217 = vmatmul.mubr.msk.f32.gmra.mrb[56].mxu0 %vm512_vm0, %v430_v0  ;;  %v6136_v0 = vld [vmem:[%s11406_s3 + $0x70] sm:$0xff] }
  0x8c   : > { %7219 = vmatprep.mubr.msk.f32.mxu0 %vm512_vm0, %v431_v1  ;;  %v6137_v1 = vld [vmem:[%s11406_s3 + $0x78] sm:$0xff] }
  0x8f   : > { %7220 = vmatmul.mubr.msk.f32.gmra.mrb[58].mxu0 %vm512_vm0, %v432_v2 }
  0x90   : > { %7222 = vmatprep.mubr.msk.f32.mxu0 %vm512_vm0, %v433_v3 }
  0x93   : > { %7223 = vmatmul.mubr.msk.f32.gmra.mrb[60].mxu0 %vm512_vm0, %v434_v4  ;;  %v7605_v4 = vpack.c.bf16 %v6137_v1, %v6136_v0 }
  0x94   : > { %7225 = vmatprep.mubr.msk.f32.mxu0 %vm512_vm0, %v435_v5 }
  0x95   : > { %7606 = vmatprep.subr.bf16.mxu1 %v7605_v4 }
  0x96   : > { %7608 = vmatpush3.bf16.msra.mxu1 %v7605_v4 }
  0x97   : > { %7226 = vmatmul.mubr.msk.f32.gmra.mrb[62].mxu0 %vm512_vm0, %v436_v6 }
  0x98   : > { %7228 = vmatprep.mubr.msk.f32.mxu0 %vm512_vm0, %v437_v7 }
  0x9b   : > { %7229 = vmatmul.mubr.msk.f32.gmra.mrb[64].mxu0 %vm512_vm0, %v438_v8  ;;  %v484_v8 = vld [vmem:[%s8591_s21 + $0x378] sm:$0xff] }
  0x9c   : > { %7231 = vmatprep.mubr.msk.f32.mxu0 %vm512_vm0, %v439_v9 }
  0x9f   : > { %7232 = vmatmul.mubr.msk.f32.gmra.mrb[66].mxu0 %vm512_vm0, %v440_v10  ;;  %v485_v10 = vld [vmem:[%s8591_s21 + $0x380] sm:$0xff] }
  0xa0   : > { %7234 = vmatprep.mubr.msk.f32.mxu0 %vm512_vm0, %v441_v11  ;;  %v6138_v11 = vld [vmem:[%s11406_s3 + $0x80] sm:$0xff] }
  0xa3   : > { %7235 = vmatmul.mubr.msk.f32.gmra.mrb[68].mxu0 %vm512_vm0, %v442_v12  ;;  %v6139_v12 = vld [vmem:[%s11406_s3 + $0x88] sm:$0xff] }
  0xa4   : > { %7237 = vmatprep.mubr.msk.f32.mxu0 %vm512_vm0, %v443_v13 }
  0xa7   : > { %7238 = vmatmul.mubr.msk.f32.gmra.mrb[70].mxu0 %vm512_vm0, %v444_v14 }
  0xa8   : > { %7240 = vmatprep.mubr.msk.f32.mxu0 %vm512_vm0, %v445_v15  ;;  %v7609_v15 = vpack.c.bf16 %v6139_v12, %v6138_v11 }
  0xaa   : > { %7610 = vmatprep.subr.bf16.mxu1 %v7609_v15 }
  0xab   : > { %7241 = vmatmul.mubr.msk.f32.gmra.mrb[72].mxu0 %vm512_vm0, %v446_v16  ;;  %7612 = vmatpush3.bf16.msra.mxu1 %v7609_v15 }
  0xac   : > { %7243 = vmatprep.mubr.msk.f32.mxu0 %vm512_vm0, %v447_v17 }
  0xaf   : > { %7244 = vmatmul.mubr.msk.f32.gmra.mrb[74].mxu0 %vm512_vm0, %v448_v18 }
  0xb0   : > { %7246 = vmatprep.mubr.msk.f32.mxu0 %vm512_vm0, %v449_v19  ;;  %v486_v19 = vld [vmem:[%s8591_s21 + $0x388] sm:$0xff] }
  0xb3   : > { %7247 = vmatmul.mubr.msk.f32.gmra.mrb[76].mxu0 %vm512_vm0, %v450_v20 }
  0xb4   : > { %7249 = vmatprep.mubr.msk.f32.mxu0 %vm512_vm0, %v451_v21  ;;  %v487_v21 = vld [vmem:[%s8591_s21 + $0x390] sm:$0xff] }
  0xb7   : > { %7250 = vmatmul.mubr.msk.f32.gmra.mrb[78].mxu0 %vm512_vm0, %v452_v22 }
  0xb8   : > { %7252 = vmatprep.mubr.msk.f32.mxu0 %vm512_vm0, %v453_v23 }
  0xbb   : > { %7253 = vmatmul.mubr.msk.f32.gmra.mrb[80].mxu0 %vm512_vm0, %v454_v24  ;;  %v6140_v24 = vld [vmem:[%s11406_s3 + $0x90] sm:$0xff] }
  0xbc   : > { %7255 = vmatprep.mubr.msk.f32.mxu0 %vm512_vm0, %v455_v25  ;;  %v6141_v25 = vld [vmem:[%s11406_s3 + $0x98] sm:$0xff] }
  0xbf   : > { %7256 = vmatmul.mubr.msk.f32.gmra.mrb[82].mxu0 %vm512_vm0, %v456_v26 }
  0xc0   : > { %7258 = vmatprep.mubr.msk.f32.mxu0 %vm512_vm0, %v457_v27 }
  0xc3   : > { %7259 = vmatmul.mubr.msk.f32.gmra.mrb[84].mxu0 %vm512_vm0, %v458_v28  ;;  %v7613_v28 = vpack.c.bf16 %v6141_v25, %v6140_v24 }
  0xc4   : > { %7261 = vmatprep.mubr.msk.f32.mxu0 %vm512_vm0, %v459_v29 }
  0xc5   : > { %7614 = vmatprep.subr.bf16.mxu1 %v7613_v28 }
  0xc6   : > { %7616 = vmatpush3.bf16.msra.mxu1 %v7613_v28  ;;  %v498_v28 = vld [vmem:[%s8591_s21 + $0x3e8] sm:$0xff] }
  0xc7   : > { %7262 = vmatmul.mubr.msk.f32.gmra.mrb[86].mxu0 %vm512_vm0, %v460_v30  ;;  %v488_v30 = vld [vmem:[%s8591_s21 + $0x398] sm:$0xff] }
  0xc8   : > { %7264 = vmatprep.mubr.msk.f32.mxu0 %vm512_vm0, %v461_v31 }
  0xcb   : > { %7265 = vmatmul.mubr.msk.f32.gmra.mrb[88].mxu0 %vm512_vm0, %v462_v32  ;;  %v489_v32 = vld [vmem:[%s8591_s21 + $0x3a0] sm:$0xff] }
  0xcc   : > { %7267 = vmatprep.mubr.msk.f32.mxu0 %vm512_vm0, %v463_v33 }
  0xcf   : > { %7268 = vmatmul.mubr.msk.f32.gmra.mrb[90].mxu0 %vm512_vm0, %v464_v34 }
  0xd0   : > { %7270 = vmatprep.mubr.msk.f32.mxu0 %vm512_vm0, %v465_v35  ;;  %v6142_v35 = vld [vmem:[%s11406_s3 + $0xa0] sm:$0xff] }
  0xd3   : > { %7271 = vmatmul.mubr.msk.f32.gmra.mrb[92].mxu0 %vm512_vm0, %v466_v36  ;;  %v6143_v36 = vld [vmem:[%s11406_s3 + $0xa8] sm:$0xff] }
  0xd4   : > { %7273 = vmatprep.mubr.msk.f32.mxu0 %vm512_vm0, %v467_v37 }
  0xd7   : > { %7274 = vmatmul.mubr.msk.f32.gmra.mrb[94].mxu0 %vm512_vm0, %v468_v38 }
  0xd8   : > { %7276 = vmatprep.mubr.msk.f32.mxu0 %vm512_vm0, %v469_v39  ;;  %v7617_v39 = vpack.c.bf16 %v6143_v36, %v6142_v35 }
  0xda   : > { %7618 = vmatprep.subr.bf16.mxu1 %v7617_v39 }
  0xdb   : > { %7277 = vmatmul.mubr.msk.f32.gmra.mrb[96].mxu0 %vm512_vm0, %v470_v40  ;;  %7620 = vmatpush3.bf16.msra.mxu1 %v7617_v39 }
  0xdc   : > { %7279 = vmatprep.mubr.msk.f32.mxu0 %vm512_vm0, %v471_v41  ;;  %v490_v41 = vld [vmem:[%s8591_s21 + $0x3a8] sm:$0xff] }
  0xdf   : > { %7280 = vmatmul.mubr.msk.f32.gmra.mrb[98].mxu0 %vm512_vm0, %v472_v42 }
  0xe0   : > { %7282 = vmatprep.mubr.msk.f32.mxu0 %vm512_vm0, %v473_v43  ;;  %v491_v43 = vld [vmem:[%s8591_s21 + $0x3b0] sm:$0xff] }
  0xe3   : > { %7283 = vmatmul.mubr.msk.f32.gmra.mrb[100].mxu0 %vm512_vm0, %v474_v44 }
  0xe4   : > { %7285 = vmatprep.mubr.msk.f32.mxu0 %vm512_vm0, %v475_v45 }
  0xe7   : > { %7286 = vmatmul.mubr.msk.f32.gmra.mrb[102].mxu0 %vm512_vm0, %v476_v46 }
  0xe8   : > { %7288 = vmatprep.mubr.msk.f32.mxu0 %vm512_vm0, %v477_v47 }
  0xeb   : > { %7289 = vmatmul.mubr.msk.f32.gmra.mrb[104].mxu0 %vm512_vm0, %v478_v48  ;;  %v6144_v48 = vld [vmem:[%s11406_s3 + $0xb0] sm:$0xff] }
  0xec   : > { %7291 = vmatprep.mubr.msk.f32.mxu0 %vm512_vm0, %v479_v49  ;;  %v6145_v49 = vld [vmem:[%s11406_s3 + $0xb8] sm:$0xff] }
  0xee   : > { %v7134_v55 = vpop.f32.mrb[0].mxu0 }
  0xef   : > { %v969_v57 = vadd.f32 %v7134_v55, %v8889_v50  ;;  %v963_v58 = vpop.f32.mrb[1].mxu0  ;;  %7292 = vmatmul.mubr.msk.f32.gmra.mrb[106].mxu0 %vm512_vm0, %v480_v51  ;;  %v7621_v55 = vpack.c.bf16 %v6145_v49, %v6144_v48 }
  0xf0   : > { %v964_v59 = vadd.f32 %v8889_v50, %v963_v58  ;;  %7294 = vmatprep.mubr.msk.f32.mxu0 %vm512_vm0, %v481_v52 }
  0xf1   : > { %v1603_v61 = vmax.f32 %v969_v57, 0.0  ;;  %v492_v57 = vld [vmem:[%s8591_s21 + $0x3b8] sm:$0xff]  ;;  %7622 = vmatprep.subr.bf16.mxu1 %v7621_v55 }
  0xf2   : > { %v1602_v2 = vmax.f32 %v964_v59, 0.0  ;;  %v7137_v3 = vpop.f32.mrb[2].mxu0  ;;  %7624 = vmatpush3.bf16.msra.mxu1 %v7621_v55 }
  0xf3   : > { %1731 = vst.msk [vmem:[#allocation2 + $0x8] sm:$0xff] %vm512_vm0, %v1603_v61  ;;  %v979_v5 = vadd.f32 %v7137_v3, %v8889_v50  ;;  %v973_v6 = vpop.f32.mrb[3].mxu0  ;;  %7295 = vmatmul.mubr.msk.f32.gmra.mrb[108].mxu0 %vm512_vm0, %v482_v60  ;;  %v493_v3 = vld [vmem:[%s8591_s21 + $0x3c0] sm:$0xff] }
  0xf4   : > { %1730 = vst.msk [vmem:[#allocation2] sm:$0xff] %vm512_vm0, %v1602_v2  ;;  %v974_v7 = vadd.f32 %v8889_v50, %v973_v6  ;;  %7297 = vmatprep.mubr.msk.f32.mxu0 %vm512_vm0, %v483_v62 }
  0xf5   : > { %v1605_v9 = vmax.f32 %v979_v5, 0.0 }
  0xf6   : > { %v1604_v13 = vmax.f32 %v974_v7, 0.0  ;;  %v7140_v14 = vpop.f32.mrb[4].mxu0 }
  0xf7   : > { %1733 = vst.msk [vmem:[#allocation2 + $0x18] sm:$0xff] %vm512_vm0, %v1605_v9  ;;  %v989_v16 = vadd.f32 %v7140_v14, %v8889_v50  ;;  %v983_v17 = vpop.f32.mrb[5].mxu0  ;;  %7298 = vmatmul.mubr.msk.f32.gmra.mrb[110].mxu0 %vm512_vm0, %v484_v8  ;;  %v494_v9 = vld [vmem:[%s8591_s21 + $0x3c8] sm:$0xff] }
  0xf8   : > { %1732 = vst.msk [vmem:[#allocation2 + $0x10] sm:$0xff] %vm512_vm0, %v1604_v13  ;;  %v984_v18 = vadd.f32 %v8889_v50, %v983_v17  ;;  %7300 = vmatprep.mubr.msk.f32.mxu0 %vm512_vm0, %v485_v10 }
  0xf9   : > { %v1607_v20 = vmax.f32 %v989_v16, 0.0  ;;  %v495_v16 = vld [vmem:[%s8591_s21 + $0x3d0] sm:$0xff] }
  0xfa   : > { %v1606_v22 = vmax.f32 %v984_v18, 0.0  ;;  %v7143_v23 = vpop.f32.mrb[6].mxu0 }
  0xfb   : > { %1735 = vst.msk [vmem:[#allocation2 + $0x28] sm:$0xff] %vm512_vm0, %v1607_v20  ;;  %v999_v26 = vadd.f32 %v7143_v23, %v8889_v50  ;;  %v993_v27 = vpop.f32.mrb[7].mxu0  ;;  %7301 = vmatmul.mubr.msk.f32.gmra.mrb[112].mxu0 %vm512_vm0, %v486_v19  ;;  %v1858_v44 = vld [vmem:[#allocation2] ss:$2 sm:$0xff]  ;;  %v1862_v45 = vld [vmem:[#allocation2 + $0x1] ss:$2 sm:$0xff] }
  0xfc   : > { %1734 = vst.msk [vmem:[#allocation2 + $0x20] sm:$0xff] %vm512_vm0, %v1606_v22  ;;  %v994_v29 = vadd.f32 %v8889_v50, %v993_v27  ;;  %7303 = vmatprep.mubr.msk.f32.mxu0 %vm512_vm0, %v487_v21  ;;  %v1865_v58 = vmax.f32 %v1858_v44, %v1862_v45  ;;  %v496_v20 = vld [vmem:[%s8591_s21 + $0x3d8] sm:$0xff]  ;;  %v497_v22 = vld [vmem:[%s8591_s21 + $0x3e0] sm:$0xff] }
  0xfd   : > { %v1609_v31 = vmax.f32 %v999_v26, 0.0 }
  0xfe   : > { %v1608_v33 = vmax.f32 %v994_v29, 0.0  ;;  %v7146_v34 = vpop.f32.mrb[8].mxu0 }
  0xff   : > { %1737 = vst.msk [vmem:[#allocation2 + $0x38] sm:$0xff] %vm512_vm0, %v1609_v31  ;;  %v1009_v37 = vadd.f32 %v7146_v34, %v8889_v50  ;;  %v1003_v38 = vpop.f32.mrb[9].mxu0  ;;  %7304 = vmatmul.mubr.msk.f32.gmra.mrb[114].mxu0 %vm512_vm0, %v488_v30  ;;  %v1860_v61 = vld [vmem:[#allocation2 + $0x10] ss:$2 sm:$0xff]  ;;  %v1864_v62 = vld [vmem:[#allocation2 + $0x11] ss:$2 sm:$0xff] }
 0x100   : > { %1736 = vst.msk [vmem:[#allocation2 + $0x30] sm:$0xff] %vm512_vm0, %v1608_v33  ;;  %v1004_v40 = vadd.f32 %v8889_v50, %v1003_v38  ;;  %7306 = vmatprep.mubr.msk.f32.mxu0 %vm512_vm0, %v489_v32  ;;  %v1866_v10 = vmax.f32 %v1860_v61, %v1864_v62  ;;  %v499_v30 = vld [vmem:[%s8591_s21 + $0x3f0] sm:$0xff] }
 0x101   : > { %v1611_v42 = vmax.f32 %v1009_v37, 0.0 }
 0x102   : > { %v1610_v46 = vmax.f32 %v1004_v40, 0.0  ;;  %v7149_v47 = vpop.f32.mrb[10].mxu0  ;;  %v500_v40 = vld [vmem:[%s8591_s21 + $0x3f8] sm:$0xff] }
 0x103   : > { %1739 = vst.msk [vmem:[#allocation2 + $0x48] sm:$0xff] %vm512_vm0, %v1611_v42  ;;  %v1019_v51 = vadd.f32 %v7149_v47, %v8889_v50  ;;  %v1013_v52 = vpop.f32.mrb[11].mxu0  ;;  %7307 = vmatmul.mubr.msk.f32.gmra.mrb[116].mxu0 %vm512_vm0, %v490_v41  ;;  %v1868_v53 = vld [vmem:[#allocation2 + $0x20] ss:$2 sm:$0xff]  ;;  %v1872_v54 = vld [vmem:[#allocation2 + $0x21] ss:$2 sm:$0xff] }
 0x104   : > { %1738 = vst.msk [vmem:[#allocation2 + $0x40] sm:$0xff] %vm512_vm0, %v1610_v46  ;;  %v1014_v56 = vadd.f32 %v8889_v50, %v1013_v52  ;;  %7309 = vmatprep.mubr.msk.f32.mxu0 %vm512_vm0, %v491_v43  ;;  %v1875_v59 = vmax.f32 %v1868_v53, %v1872_v54 }
 0x105   : > { %v1613_v60 = vmax.f32 %v1019_v51, 0.0 }
 0x106   : > { %v1612_v0 = vmax.f32 %v1014_v56, 0.0  ;;  %v7152_v1 = vpop.f32.mrb[12].mxu0  ;;  %v1877_v2 = vmax.f32 %v1865_v58, %v1875_v59 }
 0x107   : > { %1741 = vst.msk [vmem:[#allocation2 + $0x58] sm:$0xff] %vm512_vm0, %v1613_v60  ;;  %v1029_v4 = vadd.f32 %v7152_v1, %v8889_v50  ;;  %v1023_v5 = vpop.f32.mrb[13].mxu0  ;;  %7310 = vmatmul.mubr.msk.f32.gmra.mrb[118].mxu0 %vm512_vm0, %v492_v57  ;;  %v1870_v6 = vld [vmem:[#allocation2 + $0x30] ss:$2 sm:$0xff]  ;;  %v1874_v7 = vld [vmem:[#allocation2 + $0x31] ss:$2 sm:$0xff] }
 0x108   : > { %1740 = vst.msk [vmem:[#allocation2 + $0x50] sm:$0xff] %vm512_vm0, %v1612_v0  ;;  %v1024_v8 = vadd.f32 %v8889_v50, %v1023_v5  ;;  %1892 = vrot.lane.b32.xlu1 %v1877_v2, %s8471_s26  ;;  %1883 = vrot.lane.b32.xlu0 %v1877_v2, %s8472_s27  ;;  %v1876_v11 = vmax.f32 %v1870_v6, %v1874_v7  ;;  %1879 = vst.msk [vmem:[#allocation3 + $0x14] sm:$0xff] %vm512_vm0, %v1877_v2 }
 0x109   : > { %v1615_v12 = vmax.f32 %v1029_v4, 0.0  ;;  %7312 = vmatprep.mubr.msk.f32.mxu0 %vm512_vm0, %v493_v3 }
 0x10a   : > { %v1614_v13 = vmax.f32 %v1024_v8, 0.0  ;;  %v7155_v14 = vpop.f32.mrb[14].mxu0  ;;  %v1878_v15 = vmax.f32 %v1866_v10, %v1876_v11 }
 0x10b   : > { %1743 = vst.msk [vmem:[#allocation2 + $0x68] sm:$0xff] %vm512_vm0, %v1615_v12  ;;  %v1039_v17 = vadd.f32 %v7155_v14, %v8889_v50  ;;  %v1033_v18 = vpop.f32.mrb[15].mxu0  ;;  %7313 = vmatmul.mubr.msk.f32.gmra.mrb[120].mxu0 %vm512_vm0, %v494_v9  ;;  %v1902_v31 = vld [vmem:[#allocation2 + $0x40] ss:$2 sm:$0xff]  ;;  %v1906_v32 = vld [vmem:[#allocation2 + $0x41] ss:$2 sm:$0xff] }
 0x10c   : > { %1742 = vst.msk [vmem:[#allocation2 + $0x60] sm:$0xff] %vm512_vm0, %v1614_v13  ;;  %v1034_v19 = vadd.f32 %v8889_v50, %v1033_v18  ;;  %1894 = vrot.lane.b32.xlu1 %v1878_v15, %s8471_s26  ;;  %1885 = vrot.lane.b32.xlu0 %v1878_v15, %s8472_s27  ;;  %1880 = vst.msk [vmem:[#allocation3 + $0x1c] sm:$0xff] %vm512_vm0, %v1878_v15  ;;  %v1909_v41 = vmax.f32 %v1902_v31, %v1906_v32 }
 0x10d   : > { %v1617_v21 = vmax.f32 %v1039_v17, 0.0  ;;  %7315 = vmatprep.mubr.msk.f32.mxu0 %vm512_vm0, %v495_v16 }
 0x10e   : > { %v1616_v23 = vmax.f32 %v1034_v19, 0.0  ;;  %v7158_v24 = vpop.f32.mrb[16].mxu0 }
 0x10f   : > { %1745 = vst.msk [vmem:[#allocation2 + $0x78] sm:$0xff] %vm512_vm0, %v1617_v21  ;;  %v1049_v25 = vadd.f32 %v7158_v24, %v8889_v50  ;;  %v1043_v26 = vpop.f32.mrb[17].mxu0  ;;  %7316 = vmatmul.mubr.msk.f32.gmra.mrb[122].mxu0 %vm512_vm0, %v496_v20  ;;  %v1904_v44 = vld [vmem:[#allocation2 + $0x50] ss:$2 sm:$0xff]  ;;  %v1908_v45 = vld [vmem:[#allocation2 + $0x51] ss:$2 sm:$0xff] }
 0x110   : > { %1744 = vst.msk [vmem:[#allocation2 + $0x70] sm:$0xff] %vm512_vm0, %v1616_v23  ;;  %v1044_v27 = vadd.f32 %v8889_v50, %v1043_v26  ;;  %7318 = vmatprep.mubr.msk.f32.mxu0 %vm512_vm0, %v497_v22  ;;  %v1910_v55 = vmax.f32 %v1904_v44, %v1908_v45 }
 0x111   : > { %v1619_v29 = vmax.f32 %v1049_v25, 0.0 }
 0x112   : > { %v1618_v33 = vmax.f32 %v1044_v27, 0.0  ;;  %v7161_v34 = vpop.f32.mrb[18].mxu0 }
 0x113   : > { %1747 = vst.msk [vmem:[#allocation2 + $0x88] sm:$0xff] %vm512_vm0, %v1619_v29  ;;  %v1059_v35 = vadd.f32 %v7161_v34, %v8889_v50  ;;  %v1053_v36 = vpop.f32.mrb[19].mxu0  ;;  %7319 = vmatmul.mubr.msk.f32.gmra.mrb[124].mxu0 %vm512_vm0, %v498_v28  ;;  %v1912_v37 = vld [vmem:[#allocation2 + $0x60] ss:$2 sm:$0xff]  ;;  %v1916_v38 = vld [vmem:[#allocation2 + $0x61] ss:$2 sm:$0xff] }
 0x114   : > { %1746 = vst.msk [vmem:[#allocation2 + $0x80] sm:$0xff] %vm512_vm0, %v1618_v33  ;;  %v1054_v39 = vadd.f32 %v8889_v50, %v1053_v36  ;;  %7321 = vmatprep.mubr.msk.f32.mxu0 %vm512_vm0, %v499_v30  ;;  %v1919_v42 = vmax.f32 %v1912_v37, %v1916_v38 }
 0x115   : > { %v1621_v43 = vmax.f32 %v1059_v35, 0.0 }
 0x116   : > { %v1620_v46 = vmax.f32 %v1054_v39, 0.0  ;;  %v7164_v47 = vpop.f32.mrb[20].mxu0  ;;  %v1921_v48 = vmax.f32 %v1909_v41, %v1919_v42 }
 0x117   : > { %1749 = vst.msk [vmem:[#allocation2 + $0x98] sm:$0xff] %vm512_vm0, %v1621_v43  ;;  %v1069_v49 = vadd.f32 %v7164_v47, %v8889_v50  ;;  %v1063_v51 = vpop.f32.mrb[21].mxu0  ;;  %7322 = vmatmul.mubr.msk.f32.gmra.mrb[126].mxu0 %vm512_vm0, %v500_v40  ;;  %v1914_v52 = vld [vmem:[#allocation2 + $0x70] ss:$2 sm:$0xff]  ;;  %v1918_v53 = vld [vmem:[#allocation2 + $0x71] ss:$2 sm:$0xff] }
 0x118   : > { %1748 = vst.msk [vmem:[#allocation2 + $0x90] sm:$0xff] %vm512_vm0, %v1620_v46  ;;  %v1064_v54 = vadd.f32 %v8889_v50, %v1063_v51  ;;  %1927 = vrot.lane.b32.xlu0 %v1921_v48, %s8472_s27  ;;  %v1920_v56 = vmax.f32 %v1914_v52, %v1918_v53  ;;  %1923 = vst.msk [vmem:[#allocation3 + $0x26] sm:$0xff] %vm512_vm0, %v1921_v48 }
 0x119   : > { %v1623_v57 = vmax.f32 %v1069_v49, 0.0 }
 0x11a   : > { %v1622_v58 = vmax.f32 %v1064_v54, 0.0  ;;  %v7167_v59 = vpop.f32.mrb[22].mxu0  ;;  %v1922_v60 = vmax.f32 %v1910_v55, %v1920_v56 }
 0x11b   : > { %1751 = vst.msk [vmem:[#allocation2 + $0xa8] sm:$0xff] %vm512_vm0, %v1623_v57  ;;  %v1079_v61 = vadd.f32 %v7167_v59, %v8889_v50  ;;  %v1073_v62 = vpop.f32.mrb[23].mxu0  ;;  %v1944_v8 = vld [vmem:[#allocation2 + $0x80] ss:$2 sm:$0xff]  ;;  %v1948_v9 = vld [vmem:[#allocation2 + $0x81] ss:$2 sm:$0xff] }
 0x11c   : > { %1750 = vst.msk [vmem:[#allocation2 + $0xa0] sm:$0xff] %vm512_vm0, %v1622_v58  ;;  %v1074_v0 = vadd.f32 %v8889_v50, %v1073_v62  ;;  %1929 = vrot.lane.b32.xlu1 %v1922_v60, %s8472_s27  ;;  %1935 = vrot.lane.b32.xlu0 %v1921_v48, %s8471_s26  ;;  %1924 = vst.msk [vmem:[#allocation3 + $0x2e] sm:$0xff] %vm512_vm0, %v1922_v60  ;;  %v1951_v17 = vmax.f32 %v1944_v8, %v1948_v9 }
 0x11d   : > { %v1625_v1 = vmax.f32 %v1079_v61, 0.0 }
 0x11e   : > { %v1624_v2 = vmax.f32 %v1074_v0, 0.0  ;;  %v7170_v3 = vpop.f32.mrb[24].mxu0 }
 0x11f   : > { %1753 = vst.msk [vmem:[#allocation2 + $0xb8] sm:$0xff] %vm512_vm0, %v1625_v1  ;;  %v1089_v4 = vadd.f32 %v7170_v3, %v8889_v50  ;;  %v1083_v5 = vpop.f32.mrb[25].mxu0  ;;  %v1946_v20 = vld [vmem:[#allocation2 + $0x90] ss:$2 sm:$0xff]  ;;  %v1950_v21 = vld [vmem:[#allocation2 + $0x91] ss:$2 sm:$0xff] }
 0x120   : > { %1752 = vst.msk [vmem:[#allocation2 + $0xb0] sm:$0xff] %vm512_vm0, %v1624_v2  ;;  %v1084_v6 = vadd.f32 %v8889_v50, %v1083_v5  ;;  %1937 = vrot.lane.b32.xlu1 %v1922_v60, %s8471_s26  ;;  %v1952_v30 = vmax.f32 %v1946_v20, %v1950_v21 }
 0x121   : > { %v1627_v7 = vmax.f32 %v1089_v4, 0.0 }
 0x122   : > { %v1626_v10 = vmax.f32 %v1084_v6, 0.0  ;;  %v7173_v11 = vpop.f32.mrb[26].mxu0 }
 0x123   : > { %1755 = vst.msk [vmem:[#allocation2 + $0xc8] sm:$0xff] %vm512_vm0, %v1627_v7  ;;  %v1099_v12 = vadd.f32 %v7173_v11, %v8889_v50  ;;  %v1093_v13 = vpop.f32.mrb[27].mxu0  ;;  %v1954_v14 = vld [vmem:[#allocation2 + $0xa0] ss:$2 sm:$0xff]  ;;  %v1958_v15 = vld [vmem:[#allocation2 + $0xa1] ss:$2 sm:$0xff] }
 0x124   : > { %1754 = vst.msk [vmem:[#allocation2 + $0xc0] sm:$0xff] %vm512_vm0, %v1626_v10  ;;  %v1094_v16 = vadd.f32 %v8889_v50, %v1093_v13  ;;  %v1961_v18 = vmax.f32 %v1954_v14, %v1958_v15 }
 0x125   : > { %v1629_v19 = vmax.f32 %v1099_v12, 0.0 }
 0x126   : > { %v1628_v22 = vmax.f32 %v1094_v16, 0.0  ;;  %v7176_v23 = vpop.f32.mrb[28].mxu0  ;;  %v1963_v24 = vmax.f32 %v1951_v17, %v1961_v18 }
 0x127   : > { %1757 = vst.msk [vmem:[#allocation2 + $0xd8] sm:$0xff] %vm512_vm0, %v1629_v19  ;;  %v1109_v25 = vadd.f32 %v7176_v23, %v8889_v50  ;;  %v1103_v26 = vpop.f32.mrb[29].mxu0  ;;  %v1956_v27 = vld [vmem:[#allocation2 + $0xb0] ss:$2 sm:$0xff]  ;;  %v1960_v28 = vld [vmem:[#allocation2 + $0xb1] ss:$2 sm:$0xff] }
 0x128   : > { %1756 = vst.msk [vmem:[#allocation2 + $0xd0] sm:$0xff] %vm512_vm0, %v1628_v22  ;;  %v1104_v29 = vadd.f32 %v8889_v50, %v1103_v26  ;;  %1969 = vrot.lane.b32.xlu0 %v1963_v24, %s8472_s27  ;;  %v1962_v31 = vmax.f32 %v1956_v27, %v1960_v28  ;;  %1965 = vst.msk [vmem:[#allocation3 + $0x38] sm:$0xff] %vm512_vm0, %v1963_v24 }
 0x129   : > { %v1631_v32 = vmax.f32 %v1109_v25, 0.0 }
 0x12a   : > { %v1630_v33 = vmax.f32 %v1104_v29, 0.0  ;;  %v7179_v34 = vpop.f32.mrb[30].mxu0  ;;  %v1964_v35 = vmax.f32 %v1952_v30, %v1962_v31 }
 0x12b   : > { %1759 = vst.msk [vmem:[#allocation2 + $0xe8] sm:$0xff] %vm512_vm0, %v1631_v32  ;;  %v1119_v36 = vadd.f32 %v7179_v34, %v8889_v50  ;;  %v1113_v37 = vpop.f32.mrb[31].mxu0  ;;  %v1986_v46 = vld [vmem:[#allocation2 + $0xc0] ss:$2 sm:$0xff]  ;;  %v1990_v47 = vld [vmem:[#allocation2 + $0xc1] ss:$2 sm:$0xff] }
 0x12c   : > { %1758 = vst.msk [vmem:[#allocation2 + $0xe0] sm:$0xff] %vm512_vm0, %v1630_v33  ;;  %v1114_v38 = vadd.f32 %v8889_v50, %v1113_v37  ;;  %1971 = vrot.lane.b32.xlu1 %v1964_v35, %s8472_s27  ;;  %1977 = vrot.lane.b32.xlu0 %v1963_v24, %s8471_s26  ;;  %1966 = vst.msk [vmem:[#allocation3 + $0x40] sm:$0xff] %vm512_vm0, %v1964_v35  ;;  %v1993_v56 = vmax.f32 %v1986_v46, %v1990_v47 }
 0x12d   : > { %v1633_v39 = vmax.f32 %v1119_v36, 0.0 }
 0x12e   : > { %v1632_v40 = vmax.f32 %v1114_v38, 0.0  ;;  %v7182_v41 = vpop.f32.mrb[32].mxu0 }
 0x12f   : > { %1761 = vst.msk [vmem:[#allocation2 + $0xf8] sm:$0xff] %vm512_vm0, %v1633_v39  ;;  %v1129_v42 = vadd.f32 %v7182_v41, %v8889_v50  ;;  %v1123_v43 = vpop.f32.mrb[33].mxu0  ;;  %v1988_v59 = vld [vmem:[#allocation2 + $0xd0] ss:$2 sm:$0xff]  ;;  %v1992_v60 = vld [vmem:[#allocation2 + $0xd1] ss:$2 sm:$0xff] }
 0x130   : > { %1760 = vst.msk [vmem:[#allocation2 + $0xf0] sm:$0xff] %vm512_vm0, %v1632_v40  ;;  %v1124_v44 = vadd.f32 %v8889_v50, %v1123_v43  ;;  %1979 = vrot.lane.b32.xlu1 %v1964_v35, %s8471_s26  ;;  %v1994_v6 = vmax.f32 %v1988_v59, %v1992_v60 }
 0x131   : > { %v1635_v45 = vmax.f32 %v1129_v42, 0.0 }
 0x132   : > { %v1634_v48 = vmax.f32 %v1124_v44, 0.0  ;;  %v7185_v49 = vpop.f32.mrb[34].mxu0 }
 0x133   : > { %1763 = vst.msk [vmem:[#allocation2 + $0x108] sm:$0xff] %vm512_vm0, %v1635_v45  ;;  %v1139_v51 = vadd.f32 %v7185_v49, %v8889_v50  ;;  %v1133_v52 = vpop.f32.mrb[35].mxu0  ;;  %v1996_v53 = vld [vmem:[#allocation2 + $0xe0] ss:$2 sm:$0xff]  ;;  %v2000_v54 = vld [vmem:[#allocation2 + $0xe1] ss:$2 sm:$0xff] }
 0x134   : > { %1762 = vst.msk [vmem:[#allocation2 + $0x100] sm:$0xff] %vm512_vm0, %v1634_v48  ;;  %v1134_v55 = vadd.f32 %v8889_v50, %v1133_v52  ;;  %v2003_v57 = vmax.f32 %v1996_v53, %v2000_v54 }
 0x135   : > { %v1637_v58 = vmax.f32 %v1139_v51, 0.0 }
 0x136   : > { %v1636_v61 = vmax.f32 %v1134_v55, 0.0  ;;  %v7188_v62 = vpop.f32.mrb[36].mxu0  ;;  %v2005_v0 = vmax.f32 %v1993_v56, %v2003_v57 }
 0x137   : > { %1765 = vst.msk [vmem:[#allocation2 + $0x118] sm:$0xff] %vm512_vm0, %v1637_v58  ;;  %v1149_v1 = vadd.f32 %v7188_v62, %v8889_v50  ;;  %v1143_v2 = vpop.f32.mrb[37].mxu0  ;;  %v1998_v3 = vld [vmem:[#allocation2 + $0xf0] ss:$2 sm:$0xff]  ;;  %v2002_v4 = vld [vmem:[#allocation2 + $0xf1] ss:$2 sm:$0xff] }
 0x138   : > { %1764 = vst.msk [vmem:[#allocation2 + $0x110] sm:$0xff] %vm512_vm0, %v1636_v61  ;;  %v1144_v5 = vadd.f32 %v8889_v50, %v1143_v2  ;;  %2011 = vrot.lane.b32.xlu0 %v2005_v0, %s8472_s27  ;;  %v2004_v7 = vmax.f32 %v1998_v3, %v2002_v4  ;;  %2007 = vst.msk [vmem:[#allocation3 + $0x4a] sm:$0xff] %vm512_vm0, %v2005_v0 }
 0x139   : > { %v1639_v8 = vmax.f32 %v1149_v1, 0.0 }
 0x13a   : > { %v1638_v9 = vmax.f32 %v1144_v5, 0.0  ;;  %v7191_v10 = vpop.f32.mrb[38].mxu0  ;;  %v2006_v11 = vmax.f32 %v1994_v6, %v2004_v7 }
 0x13b   : > { %1767 = vst.msk [vmem:[#allocation2 + $0x128] sm:$0xff] %vm512_vm0, %v1639_v8  ;;  %v1159_v12 = vadd.f32 %v7191_v10, %v8889_v50  ;;  %v1153_v13 = vpop.f32.mrb[39].mxu0  ;;  %v2028_v22 = vld [vmem:[#allocation2 + $0x100] ss:$2 sm:$0xff]  ;;  %v2032_v23 = vld [vmem:[#allocation2 + $0x101] ss:$2 sm:$0xff] }
 0x13c   : > { %1766 = vst.msk [vmem:[#allocation2 + $0x120] sm:$0xff] %vm512_vm0, %v1638_v9  ;;  %v1154_v14 = vadd.f32 %v8889_v50, %v1153_v13  ;;  %2013 = vrot.lane.b32.xlu1 %v2006_v11, %s8472_s27  ;;  %2019 = vrot.lane.b32.xlu0 %v2005_v0, %s8471_s26  ;;  %2008 = vst.msk [vmem:[#allocation3 + $0x52] sm:$0xff] %vm512_vm0, %v2006_v11  ;;  %v2035_v31 = vmax.f32 %v2028_v22, %v2032_v23 }
 0x13d   : > { %v1641_v15 = vmax.f32 %v1159_v12, 0.0 }
 0x13e   : > { %v1640_v16 = vmax.f32 %v1154_v14, 0.0  ;;  %v7194_v17 = vpop.f32.mrb[40].mxu0 }
 0x13f   : > { %1769 = vst.msk [vmem:[#allocation2 + $0x138] sm:$0xff] %vm512_vm0, %v1641_v15  ;;  %v1169_v18 = vadd.f32 %v7194_v17, %v8889_v50  ;;  %v1163_v19 = vpop.f32.mrb[41].mxu0  ;;  %v2030_v34 = vld [vmem:[#allocation2 + $0x110] ss:$2 sm:$0xff]  ;;  %v2034_v35 = vld [vmem:[#allocation2 + $0x111] ss:$2 sm:$0xff] }
 0x140   : > { %1768 = vst.msk [vmem:[#allocation2 + $0x130] sm:$0xff] %vm512_vm0, %v1640_v16  ;;  %v1164_v20 = vadd.f32 %v8889_v50, %v1163_v19  ;;  %2021 = vrot.lane.b32.xlu1 %v2006_v11, %s8471_s26  ;;  %v2036_v44 = vmax.f32 %v2030_v34, %v2034_v35 }
 0x141   : > { %v1643_v21 = vmax.f32 %v1169_v18, 0.0 }
 0x142   : > { %v1642_v24 = vmax.f32 %v1164_v20, 0.0  ;;  %v7197_v25 = vpop.f32.mrb[42].mxu0 }
 0x143   : > { %1771 = vst.msk [vmem:[#allocation2 + $0x148] sm:$0xff] %vm512_vm0, %v1643_v21  ;;  %v1179_v26 = vadd.f32 %v7197_v25, %v8889_v50  ;;  %v1173_v27 = vpop.f32.mrb[43].mxu0  ;;  %v2038_v28 = vld [vmem:[#allocation2 + $0x120] ss:$2 sm:$0xff]  ;;  %v2042_v29 = vld [vmem:[#allocation2 + $0x121] ss:$2 sm:$0xff] }
 0x144   : > { %1770 = vst.msk [vmem:[#allocation2 + $0x140] sm:$0xff] %vm512_vm0, %v1642_v24  ;;  %v1174_v30 = vadd.f32 %v8889_v50, %v1173_v27  ;;  %v2045_v32 = vmax.f32 %v2038_v28, %v2042_v29 }
 0x145   : > { %v1645_v33 = vmax.f32 %v1179_v26, 0.0 }
 0x146   : > { %v1644_v36 = vmax.f32 %v1174_v30, 0.0  ;;  %v7200_v37 = vpop.f32.mrb[44].mxu0  ;;  %v2047_v38 = vmax.f32 %v2035_v31, %v2045_v32 }
 0x147   : > { %1773 = vst.msk [vmem:[#allocation2 + $0x158] sm:$0xff] %vm512_vm0, %v1645_v33  ;;  %v1189_v39 = vadd.f32 %v7200_v37, %v8889_v50  ;;  %v1183_v40 = vpop.f32.mrb[45].mxu0  ;;  %v2040_v41 = vld [vmem:[#allocation2 + $0x130] ss:$2 sm:$0xff]  ;;  %v2044_v42 = vld [vmem:[#allocation2 + $0x131] ss:$2 sm:$0xff] }
 0x148   : > { %1772 = vst.msk [vmem:[#allocation2 + $0x150] sm:$0xff] %vm512_vm0, %v1644_v36  ;;  %v1184_v43 = vadd.f32 %v8889_v50, %v1183_v40  ;;  %2061 = vrot.lane.b32.xlu1 %v2047_v38, %s8471_s26  ;;  %2053 = vrot.lane.b32.xlu0 %v2047_v38, %s8472_s27  ;;  %v2046_v45 = vmax.f32 %v2040_v41, %v2044_v42  ;;  %2049 = vst.msk [vmem:[#allocation3 + $0x5c] sm:$0xff] %vm512_vm0, %v2047_v38 }
 0x149   : > { %v1647_v46 = vmax.f32 %v1189_v39, 0.0 }
 0x14a   : > { %v1646_v47 = vmax.f32 %v1184_v43, 0.0  ;;  %v7203_v48 = vpop.f32.mrb[46].mxu0  ;;  %v2048_v49 = vmax.f32 %v2036_v44, %v2046_v45 }
 0x14b   : > { %1775 = vst.msk [vmem:[#allocation2 + $0x168] sm:$0xff] %vm512_vm0, %v1647_v46  ;;  %v1199_v51 = vadd.f32 %v7203_v48, %v8889_v50  ;;  %v1193_v52 = vpop.f32.mrb[47].mxu0  ;;  %v2070_v61 = vld [vmem:[#allocation2 + $0x140] ss:$2 sm:$0xff]  ;;  %v2074_v62 = vld [vmem:[#allocation2 + $0x141] ss:$2 sm:$0xff] }
 0x14c   : > { %1774 = vst.msk [vmem:[#allocation2 + $0x160] sm:$0xff] %vm512_vm0, %v1646_v47  ;;  %v1194_v53 = vadd.f32 %v8889_v50, %v1193_v52  ;;  %2063 = vrot.lane.b32.xlu1 %v2048_v49, %s8471_s26  ;;  %2055 = vrot.lane.b32.xlu0 %v2048_v49, %s8472_s27  ;;  %2050 = vst.msk [vmem:[#allocation3 + $0x64] sm:$0xff] %vm512_vm0, %v2048_v49  ;;  %v2077_v7 = vmax.f32 %v2070_v61, %v2074_v62 }
 0x14d   : > { %v1649_v54 = vmax.f32 %v1199_v51, 0.0 }
 0x14e   : > { %v1648_v55 = vmax.f32 %v1194_v53, 0.0  ;;  %v7206_v56 = vpop.f32.mrb[48].mxu0 }
 0x14f   : > { %1777 = vst.msk [vmem:[#allocation2 + $0x178] sm:$0xff] %vm512_vm0, %v1649_v54  ;;  %v1209_v57 = vadd.f32 %v7206_v56, %v8889_v50  ;;  %v1203_v58 = vpop.f32.mrb[49].mxu0  ;;  %v2072_v10 = vld [vmem:[#allocation2 + $0x150] ss:$2 sm:$0xff]  ;;  %v2076_v11 = vld [vmem:[#allocation2 + $0x151] ss:$2 sm:$0xff] }
 0x150   : > { %1776 = vst.msk [vmem:[#allocation2 + $0x170] sm:$0xff] %vm512_vm0, %v1648_v55  ;;  %v1204_v59 = vadd.f32 %v8889_v50, %v1203_v58  ;;  %v2078_v20 = vmax.f32 %v2072_v10, %v2076_v11 }
 0x151   : > { %v1651_v60 = vmax.f32 %v1209_v57, 0.0 }
 0x152   : > { %v1650_v0 = vmax.f32 %v1204_v59, 0.0  ;;  %v7209_v1 = vpop.f32.mrb[50].mxu0 }
 0x153   : > { %1779 = vst.msk [vmem:[#allocation2 + $0x188] sm:$0xff] %vm512_vm0, %v1651_v60  ;;  %v1219_v2 = vadd.f32 %v7209_v1, %v8889_v50  ;;  %v1213_v3 = vpop.f32.mrb[51].mxu0  ;;  %v2080_v4 = vld [vmem:[#allocation2 + $0x160] ss:$2 sm:$0xff]  ;;  %v2084_v5 = vld [vmem:[#allocation2 + $0x161] ss:$2 sm:$0xff] }
 0x154   : > { %1778 = vst.msk [vmem:[#allocation2 + $0x180] sm:$0xff] %vm512_vm0, %v1650_v0  ;;  %v1214_v6 = vadd.f32 %v8889_v50, %v1213_v3  ;;  %v2087_v8 = vmax.f32 %v2080_v4, %v2084_v5 }
 0x155   : > { %v1653_v9 = vmax.f32 %v1219_v2, 0.0 }
 0x156   : > { %v1652_v12 = vmax.f32 %v1214_v6, 0.0  ;;  %v7212_v13 = vpop.f32.mrb[52].mxu0  ;;  %v2089_v14 = vmax.f32 %v2077_v7, %v2087_v8 }
 0x157   : > { %1781 = vst.msk [vmem:[#allocation2 + $0x198] sm:$0xff] %vm512_vm0, %v1653_v9  ;;  %v1229_v15 = vadd.f32 %v7212_v13, %v8889_v50  ;;  %v1223_v16 = vpop.f32.mrb[53].mxu0  ;;  %v2082_v17 = vld [vmem:[#allocation2 + $0x170] ss:$2 sm:$0xff]  ;;  %v2086_v18 = vld [vmem:[#allocation2 + $0x171] ss:$2 sm:$0xff] }
 0x158   : > { %1780 = vst.msk [vmem:[#allocation2 + $0x190] sm:$0xff] %vm512_vm0, %v1652_v12  ;;  %v1224_v19 = vadd.f32 %v8889_v50, %v1223_v16  ;;  %2103 = vrot.lane.b32.xlu1 %v2089_v14, %s8471_s26  ;;  %2095 = vrot.lane.b32.xlu0 %v2089_v14, %s8472_s27  ;;  %v2088_v21 = vmax.f32 %v2082_v17, %v2086_v18  ;;  %2091 = vst.msk [vmem:[#allocation3 + $0x6e] sm:$0xff] %vm512_vm0, %v2089_v14 }
 0x159   : > { %v1655_v22 = vmax.f32 %v1229_v15, 0.0 }
 0x15a   : > { %v1654_v23 = vmax.f32 %v1224_v19, 0.0  ;;  %v7215_v24 = vpop.f32.mrb[54].mxu0  ;;  %v2090_v25 = vmax.f32 %v2078_v20, %v2088_v21 }
 0x15b   : > { %1783 = vst.msk [vmem:[#allocation2 + $0x1a8] sm:$0xff] %vm512_vm0, %v1655_v22  ;;  %v1239_v26 = vadd.f32 %v7215_v24, %v8889_v50  ;;  %v1233_v27 = vpop.f32.mrb[55].mxu0  ;;  %v2112_v36 = vld [vmem:[#allocation2 + $0x180] ss:$2 sm:$0xff]  ;;  %v2116_v37 = vld [vmem:[#allocation2 + $0x181] ss:$2 sm:$0xff] }
 0x15c   : > { %1782 = vst.msk [vmem:[#allocation2 + $0x1a0] sm:$0xff] %vm512_vm0, %v1654_v23  ;;  %v1234_v28 = vadd.f32 %v8889_v50, %v1233_v27  ;;  %2105 = vrot.lane.b32.xlu1 %v2090_v25, %s8471_s26  ;;  %2097 = vrot.lane.b32.xlu0 %v2090_v25, %s8472_s27  ;;  %2092 = vst.msk [vmem:[#allocation3 + $0x76] sm:$0xff] %vm512_vm0, %v2090_v25  ;;  %v2119_v45 = vmax.f32 %v2112_v36, %v2116_v37 }
 0x15d   : > { %v1657_v29 = vmax.f32 %v1239_v26, 0.0 }
 0x15e   : > { %v1656_v30 = vmax.f32 %v1234_v28, 0.0  ;;  %v7218_v31 = vpop.f32.mrb[56].mxu0 }
 0x15f   : > { %1785 = vst.msk [vmem:[#allocation2 + $0x1b8] sm:$0xff] %vm512_vm0, %v1657_v29  ;;  %v1249_v32 = vadd.f32 %v7218_v31, %v8889_v50  ;;  %v1243_v33 = vpop.f32.mrb[57].mxu0  ;;  %v2114_v48 = vld [vmem:[#allocation2 + $0x190] ss:$2 sm:$0xff]  ;;  %v2118_v49 = vld [vmem:[#allocation2 + $0x191] ss:$2 sm:$0xff] }
 0x160   : > { %1784 = vst.msk [vmem:[#allocation2 + $0x1b0] sm:$0xff] %vm512_vm0, %v1656_v30  ;;  %v1244_v34 = vadd.f32 %v8889_v50, %v1243_v33  ;;  %v2120_v59 = vmax.f32 %v2114_v48, %v2118_v49 }
 0x161   : > { %v1659_v35 = vmax.f32 %v1249_v32, 0.0 }
 0x162   : > { %v1658_v38 = vmax.f32 %v1244_v34, 0.0  ;;  %v7221_v39 = vpop.f32.mrb[58].mxu0 }
 0x163   : > { %1787 = vst.msk [vmem:[#allocation2 + $0x1c8] sm:$0xff] %vm512_vm0, %v1659_v35  ;;  %v1259_v40 = vadd.f32 %v7221_v39, %v8889_v50  ;;  %v1253_v41 = vpop.f32.mrb[59].mxu0  ;;  %v2122_v42 = vld [vmem:[#allocation2 + $0x1a0] ss:$2 sm:$0xff]  ;;  %v2126_v43 = vld [vmem:[#allocation2 + $0x1a1] ss:$2 sm:$0xff] }
 0x164   : > { %1786 = vst.msk [vmem:[#allocation2 + $0x1c0] sm:$0xff] %vm512_vm0, %v1658_v38  ;;  %v1254_v44 = vadd.f32 %v8889_v50, %v1253_v41  ;;  %v2129_v46 = vmax.f32 %v2122_v42, %v2126_v43 }
 0x165   : > { %v1661_v47 = vmax.f32 %v1259_v40, 0.0 }
 0x166   : > { %v1660_v51 = vmax.f32 %v1254_v44, 0.0  ;;  %v7224_v52 = vpop.f32.mrb[60].mxu0  ;;  %v2131_v53 = vmax.f32 %v2119_v45, %v2129_v46 }
 0x167   : > { %1789 = vst.msk [vmem:[#allocation2 + $0x1d8] sm:$0xff] %vm512_vm0, %v1661_v47  ;;  %v1269_v54 = vadd.f32 %v7224_v52, %v8889_v50  ;;  %v1263_v55 = vpop.f32.mrb[61].mxu0  ;;  %v2124_v56 = vld [vmem:[#allocation2 + $0x1b0] ss:$2 sm:$0xff]  ;;  %v2128_v57 = vld [vmem:[#allocation2 + $0x1b1] ss:$2 sm:$0xff] }
 0x168   : > { %1788 = vst.msk [vmem:[#allocation2 + $0x1d0] sm:$0xff] %vm512_vm0, %v1660_v51  ;;  %v1264_v58 = vadd.f32 %v8889_v50, %v1263_v55  ;;  %2145 = vrot.lane.b32.xlu1 %v2131_v53, %s8471_s26  ;;  %2137 = vrot.lane.b32.xlu0 %v2131_v53, %s8472_s27  ;;  %v2130_v60 = vmax.f32 %v2124_v56, %v2128_v57  ;;  %2133 = vst.msk [vmem:[#allocation3 + $0x80] sm:$0xff] %vm512_vm0, %v2131_v53 }
 0x169   : > { %v1663_v61 = vmax.f32 %v1269_v54, 0.0 }
 0x16a   : > { %v1662_v62 = vmax.f32 %v1264_v58, 0.0  ;;  %v7227_v0 = vpop.f32.mrb[62].mxu0  ;;  %v2132_v1 = vmax.f32 %v2120_v59, %v2130_v60 }
 0x16b   : > { %1791 = vst.msk [vmem:[#allocation2 + $0x1e8] sm:$0xff] %vm512_vm0, %v1663_v61  ;;  %v1279_v2 = vadd.f32 %v7227_v0, %v8889_v50  ;;  %v1273_v3 = vpop.f32.mrb[63].mxu0  ;;  %v2154_v12 = vld [vmem:[#allocation2 + $0x1c0] ss:$2 sm:$0xff]  ;;  %v2158_v13 = vld [vmem:[#allocation2 + $0x1c1] ss:$2 sm:$0xff] }
 0x16c   : > { %1790 = vst.msk [vmem:[#allocation2 + $0x1e0] sm:$0xff] %vm512_vm0, %v1662_v62  ;;  %v1274_v4 = vadd.f32 %v8889_v50, %v1273_v3  ;;  %2147 = vrot.lane.b32.xlu1 %v2132_v1, %s8471_s26  ;;  %2139 = vrot.lane.b32.xlu0 %v2132_v1, %s8472_s27  ;;  %2134 = vst.msk [vmem:[#allocation3 + $0x88] sm:$0xff] %vm512_vm0, %v2132_v1  ;;  %v2161_v21 = vmax.f32 %v2154_v12, %v2158_v13 }
 0x16d   : > { %v1665_v5 = vmax.f32 %v1279_v2, 0.0 }
 0x16e   : > { %v1664_v6 = vmax.f32 %v1274_v4, 0.0  ;;  %v7230_v7 = vpop.f32.mrb[64].mxu0 }
 0x16f   : > { %1793 = vst.msk [vmem:[#allocation2 + $0x1f8] sm:$0xff] %vm512_vm0, %v1665_v5  ;;  %v1289_v8 = vadd.f32 %v7230_v7, %v8889_v50  ;;  %v1283_v9 = vpop.f32.mrb[65].mxu0  ;;  %v2156_v24 = vld [vmem:[#allocation2 + $0x1d0] ss:$2 sm:$0xff]  ;;  %v2160_v25 = vld [vmem:[#allocation2 + $0x1d1] ss:$2 sm:$0xff] }
 0x170   : > { %1792 = vst.msk [vmem:[#allocation2 + $0x1f0] sm:$0xff] %vm512_vm0, %v1664_v6  ;;  %v1284_v10 = vadd.f32 %v8889_v50, %v1283_v9  ;;  %v2162_v34 = vmax.f32 %v2156_v24, %v2160_v25 }
 0x171   : > { %v1667_v11 = vmax.f32 %v1289_v8, 0.0 }
 0x172   : > { %v1666_v14 = vmax.f32 %v1284_v10, 0.0  ;;  %v7233_v15 = vpop.f32.mrb[66].mxu0 }
 0x173   : > { %1795 = vst.msk [vmem:[#allocation2 + $0x208] sm:$0xff] %vm512_vm0, %v1667_v11  ;;  %v1299_v16 = vadd.f32 %v7233_v15, %v8889_v50  ;;  %v1293_v17 = vpop.f32.mrb[67].mxu0  ;;  %v2164_v18 = vld [vmem:[#allocation2 + $0x1e0] ss:$2 sm:$0xff]  ;;  %v2168_v19 = vld [vmem:[#allocation2 + $0x1e1] ss:$2 sm:$0xff] }
 0x174   : > { %1794 = vst.msk [vmem:[#allocation2 + $0x200] sm:$0xff] %vm512_vm0, %v1666_v14  ;;  %v1294_v20 = vadd.f32 %v8889_v50, %v1293_v17  ;;  %v2171_v22 = vmax.f32 %v2164_v18, %v2168_v19 }
 0x175   : > { %v1669_v23 = vmax.f32 %v1299_v16, 0.0 }
 0x176   : > { %v1668_v26 = vmax.f32 %v1294_v20, 0.0  ;;  %v7236_v27 = vpop.f32.mrb[68].mxu0  ;;  %v2173_v28 = vmax.f32 %v2161_v21, %v2171_v22 }
 0x177   : > { %1797 = vst.msk [vmem:[#allocation2 + $0x218] sm:$0xff] %vm512_vm0, %v1669_v23  ;;  %v1309_v29 = vadd.f32 %v7236_v27, %v8889_v50  ;;  %v1303_v30 = vpop.f32.mrb[69].mxu0  ;;  %v2166_v31 = vld [vmem:[#allocation2 + $0x1f0] ss:$2 sm:$0xff]  ;;  %v2170_v32 = vld [vmem:[#allocation2 + $0x1f1] ss:$2 sm:$0xff] }
 0x178   : > { %1796 = vst.msk [vmem:[#allocation2 + $0x210] sm:$0xff] %vm512_vm0, %v1668_v26  ;;  %v1304_v33 = vadd.f32 %v8889_v50, %v1303_v30  ;;  %2187 = vrot.lane.b32.xlu1 %v2173_v28, %s8471_s26  ;;  %2179 = vrot.lane.b32.xlu0 %v2173_v28, %s8472_s27  ;;  %2175 = vst.msk [vmem:[#allocation3 + $0x92] sm:$0xff] %vm512_vm0, %v2173_v28  ;;  %v2172_v35 = vmax.f32 %v2166_v31, %v2170_v32  ;;  %v9157_v50 = vld [vmem:[%s11405_s2] ss:$0 sm:$0xff] }
 0x179   : > { %v1671_v36 = vmax.f32 %v1309_v29, 0.0 }
 0x17a   : > { %v1670_v37 = vmax.f32 %v1304_v33, 0.0  ;;  %v7239_v38 = vpop.f32.mrb[70].mxu0  ;;  %v1893_v39 = vpop.permute.xlu1 %1892  ;;  %v2174_v40 = vmax.f32 %v2162_v34, %v2172_v35 }
 0x17b   : > { %1799 = vst.msk [vmem:[#allocation2 + $0x228] sm:$0xff] %vm512_vm0, %v1671_v36  ;;  %v1319_v41 = vadd.f32 %v9157_v50, %v7239_v38  ;;  %v1884_v42 = vpop.permute.xlu0 %1883  ;;  %v1313_v43 = vpop.f32.mrb[71].mxu0  ;;  %v2196_v55 = vld [vmem:[#allocation2 + $0x200] ss:$2 sm:$0xff]  ;;  %v2200_v56 = vld [vmem:[#allocation2 + $0x201] ss:$2 sm:$0xff] }
 0x17c   : > { %1798 = vst.msk [vmem:[#allocation2 + $0x220] sm:$0xff] %vm512_vm0, %v1670_v37  ;;  %v1314_v44 = vadd.f32 %v9157_v50, %v1313_v43  ;;  %2189 = vrot.lane.b32.xlu1 %v2174_v40, %s8471_s26  ;;  %2176 = vst.msk [vmem:[#allocation3 + $0x9a] sm:$0xff] %vm512_vm0, %v2174_v40  ;;  %2181 = vrot.lane.b32.xlu0 %v2174_v40, %s8472_s27  ;;  %v2203_v2 = vmax.f32 %v2196_v55, %v2200_v56 }
 0x17d   : > { %1890 = vst.msk [vmem:[#allocation3 + $0x13] sm:$0xff] %vm1889_vm2, %v1884_v42  ;;  %v1673_v45 = vmax.f32 %v1319_v41, 0.0 }
 0x17e   : > { %1899 = vst.msk [vmem:[#allocation3 + $0x12] sm:$0xff] %vm1898_vm3, %v1893_v39  ;;  %v1672_v46 = vmax.f32 %v1314_v44, 0.0  ;;  %v7242_v47 = vpop.f32.mrb[72].mxu0  ;;  %v1895_v48 = vpop.permute.xlu1 %1894 }
 0x17f   : > { %1801 = vst.msk [vmem:[#allocation2 + $0x238] sm:$0xff] %vm512_vm0, %v1673_v45  ;;  %v1329_v49 = vadd.f32 %v9157_v50, %v7242_v47  ;;  %v1886_v51 = vpop.permute.xlu0 %1885  ;;  %v1323_v52 = vpop.f32.mrb[73].mxu0  ;;  %v2198_v5 = vld [vmem:[#allocation2 + $0x210] ss:$2 sm:$0xff]  ;;  %v2202_v6 = vld [vmem:[#allocation2 + $0x211] ss:$2 sm:$0xff] }
 0x180   : > { %1800 = vst.msk [vmem:[#allocation2 + $0x230] sm:$0xff] %vm512_vm0, %v1672_v46  ;;  %v1324_v53 = vadd.f32 %v9157_v50, %v1323_v52  ;;  %v2204_v16 = vmax.f32 %v2198_v5, %v2202_v6 }
 0x181   : > { %1891 = vst.msk [vmem:[#allocation3 + $0x1b] sm:$0xff] %vm1889_vm2, %v1886_v51  ;;  %v1675_v54 = vmax.f32 %v1329_v49, 0.0 }
 0x182   : > { %1900 = vst.msk [vmem:[#allocation3 + $0x1a] sm:$0xff] %vm1898_vm3, %v1895_v48  ;;  %v1674_v57 = vmax.f32 %v1324_v53, 0.0  ;;  %v7245_v58 = vpop.f32.mrb[74].mxu0 }
 0x183   : > { %1803 = vst.msk [vmem:[#allocation2 + $0x248] sm:$0xff] %vm512_vm0, %v1675_v54  ;;  %v1339_v59 = vadd.f32 %v9157_v50, %v7245_v58  ;;  %v1333_v60 = vpop.f32.mrb[75].mxu0  ;;  %v2206_v61 = vld [vmem:[#allocation2 + $0x220] ss:$2 sm:$0xff]  ;;  %v2210_v62 = vld [vmem:[#allocation2 + $0x221] ss:$2 sm:$0xff] }
 0x184   : > { %1802 = vst.msk [vmem:[#allocation2 + $0x240] sm:$0xff] %vm512_vm0, %v1674_v57  ;;  %v1334_v0 = vadd.f32 %v9157_v50, %v1333_v60  ;;  %v2213_v3 = vmax.f32 %v2206_v61, %v2210_v62 }
 0x185   : > { %v2579_v1 = vld [vmem:[#allocation3 + $0x12] sm:$0xff]  ;;  %v1677_v4 = vmax.f32 %v1339_v59, 0.0 }
 0x186   : > { %7348 = vmatprep.mubr.msk.f32.mxu1 %vm330_vm1, %v2579_v1  ;;  %v1676_v7 = vmax.f32 %v1334_v0, 0.0  ;;  %v7248_v8 = vpop.f32.mrb[76].mxu0  ;;  %v2215_v9 = vmax.f32 %v2203_v2, %v2213_v3 }
 0x187   : > { %1805 = vst.msk [vmem:[#allocation2 + $0x258] sm:$0xff] %vm512_vm0, %v1677_v4  ;;  %v1349_v10 = vadd.f32 %v9157_v50, %v7248_v8  ;;  %v1343_v11 = vpop.f32.mrb[77].mxu0  ;;  %v2208_v12 = vld [vmem:[#allocation2 + $0x230] ss:$2 sm:$0xff]  ;;  %v2212_v13 = vld [vmem:[#allocation2 + $0x231] ss:$2 sm:$0xff] }
 0x188   : > { %1804 = vst.msk [vmem:[#allocation2 + $0x250] sm:$0xff] %vm512_vm0, %v1676_v7  ;;  %v1344_v14 = vadd.f32 %v9157_v50, %v1343_v11  ;;  %2221 = vrot.lane.b32.xlu0 %v2215_v9, %s8472_s27  ;;  %2217 = vst.msk [vmem:[#allocation3 + $0xa4] sm:$0xff] %vm512_vm0, %v2215_v9  ;;  %v2214_v17 = vmax.f32 %v2208_v12, %v2212_v13 }
 0x189   : > { %v2580_v15 = vld [vmem:[#allocation3 + $0x1a] sm:$0xff]  ;;  %v1679_v18 = vmax.f32 %v1349_v10, 0.0 }
 0x18a   : > { %7349 = vmatmul.mubr.msk.f32.vlgmr.msra.gmra.mrb[0].mxu1 %vm330_vm1, %v2580_v15  ;;  %v1678_v19 = vmax.f32 %v1344_v14, 0.0  ;;  %v7251_v20 = vpop.f32.mrb[78].mxu0  ;;  %v1928_v21 = vpop.permute.xlu0 %1927  ;;  %v2216_v22 = vmax.f32 %v2204_v16, %v2214_v17 }
 0x18b   : > { %1807 = vst.msk [vmem:[#allocation2 + $0x268] sm:$0xff] %vm512_vm0, %v1679_v18  ;;  %v1359_v23 = vadd.f32 %v9157_v50, %v7251_v20  ;;  %v1353_v24 = vpop.f32.mrb[79].mxu0  ;;  %v2238_v35 = vld [vmem:[#allocation2 + $0x240] ss:$2 sm:$0xff]  ;;  %v2242_v36 = vld [vmem:[#allocation2 + $0x241] ss:$2 sm:$0xff] }
 0x18c   : > { %1933 = vst.msk [vmem:[#allocation3 + $0x25] sm:$0xff] %vm1889_vm2, %v1928_v21  ;;  %v1354_v25 = vadd.f32 %v9157_v50, %v1353_v24  ;;  %2223 = vrot.lane.b32.xlu1 %v2216_v22, %s8472_s27  ;;  %2229 = vrot.lane.b32.xlu0 %v2215_v9, %s8471_s26  ;;  %v2245_v45 = vmax.f32 %v2238_v35, %v2242_v36 }
 0x18d   : > { %1806 = vst.msk [vmem:[#allocation2 + $0x260] sm:$0xff] %vm512_vm0, %v1678_v19  ;;  %2218 = vst.msk [vmem:[#allocation3 + $0xac] sm:$0xff] %vm512_vm0, %v2216_v22  ;;  %v1681_v26 = vmax.f32 %v1359_v23, 0.0 }
 0x18e   : > { %v1680_v27 = vmax.f32 %v1354_v25, 0.0  ;;  %v7254_v28 = vpop.f32.mrb[80].mxu0  ;;  %v1930_v29 = vpop.permute.xlu1 %1929 }
 0x18f   : > { %1809 = vst.msk [vmem:[#allocation2 + $0x278] sm:$0xff] %vm512_vm0, %v1681_v26  ;;  %v1369_v30 = vadd.f32 %v9157_v50, %v7254_v28  ;;  %v1936_v31 = vpop.permute.xlu0 %1935  ;;  %v1363_v32 = vpop.f32.mrb[81].mxu0  ;;  %v2240_v48 = vld [vmem:[#allocation2 + $0x250] ss:$2 sm:$0xff]  ;;  %v2244_v49 = vld [vmem:[#allocation2 + $0x251] ss:$2 sm:$0xff] }
 0x190   : > { %1934 = vst.msk [vmem:[#allocation3 + $0x2d] sm:$0xff] %vm1889_vm2, %v1930_v29  ;;  %v1364_v33 = vadd.f32 %v9157_v50, %v1363_v32  ;;  %2231 = vrot.lane.b32.xlu1 %v2216_v22, %s8471_s26  ;;  %v2246_v60 = vmax.f32 %v2240_v48, %v2244_v49 }
 0x191   : > { %1808 = vst.msk [vmem:[#allocation2 + $0x270] sm:$0xff] %vm512_vm0, %v1680_v27  ;;  %v1683_v34 = vmax.f32 %v1369_v30, 0.0 }
 0x192   : > { %1941 = vst.msk [vmem:[#allocation3 + $0x24] sm:$0xff] %vm1898_vm3, %v1936_v31  ;;  %v1682_v37 = vmax.f32 %v1364_v33, 0.0  ;;  %v7257_v38 = vpop.f32.mrb[82].mxu0  ;;  %v1938_v39 = vpop.permute.xlu1 %1937 }
 0x193   : > { %1811 = vst.msk [vmem:[#allocation2 + $0x288] sm:$0xff] %vm512_vm0, %v1683_v34  ;;  %v1379_v40 = vadd.f32 %v9157_v50, %v7257_v38  ;;  %v1373_v41 = vpop.f32.mrb[83].mxu0 }
 0x194   : > { %1942 = vst.msk [vmem:[#allocation3 + $0x2c] sm:$0xff] %vm1898_vm3, %v1938_v39  ;;  %v2248_v42 = vld [vmem:[#allocation2 + $0x260] ss:$2 sm:$0xff]  ;;  %v2252_v43 = vld [vmem:[#allocation2 + $0x261] ss:$2 sm:$0xff]  ;;  %v1374_v44 = vadd.f32 %v9157_v50, %v1373_v41 }
 0x195   : > { %1810 = vst.msk [vmem:[#allocation2 + $0x280] sm:$0xff] %vm512_vm0, %v1682_v37  ;;  %v2255_v46 = vmax.f32 %v2248_v42, %v2252_v43  ;;  %v1685_v47 = vmax.f32 %v1379_v40, 0.0 }
 0x196   : > { %v1684_v51 = vmax.f32 %v1374_v44, 0.0  ;;  %v7260_v52 = vpop.f32.mrb[84].mxu0 }
 0x197   : > { %v2257_v53 = vmax.f32 %v2245_v45, %v2255_v46  ;;  %1813 = vst.msk [vmem:[#allocation2 + $0x298] sm:$0xff] %vm512_vm0, %v1685_v47  ;;  %v1389_v54 = vadd.f32 %v9157_v50, %v7260_v52  ;;  %v1383_v55 = vpop.f32.mrb[85].mxu0 }
 0x198   : > { %v2250_v57 = vld [vmem:[#allocation2 + $0x270] ss:$2 sm:$0xff]  ;;  %v2254_v58 = vld [vmem:[#allocation2 + $0x271] ss:$2 sm:$0xff]  ;;  %1812 = vst.msk [vmem:[#allocation2 + $0x290] sm:$0xff] %vm512_vm0, %v1684_v51  ;;  %v1384_v59 = vadd.f32 %v9157_v50, %v1383_v55 }
 0x199   : > { %v2581_v56 = vld [vmem:[#allocation3 + $0x22] sm:$0xff]  ;;  %2263 = vrot.lane.b32.xlu0 %v2257_v53, %s8472_s27  ;;  %2259 = vst.msk [vmem:[#allocation3 + $0xb6] sm:$0xff] %vm512_vm0, %v2257_v53  ;;  %v2256_v61 = vmax.f32 %v2250_v57, %v2254_v58  ;;  %v1687_v62 = vmax.f32 %v1389_v54, 0.0 }
 0x19a   : > { %7351 = vmatprep.mubr.msk.f32.mxu1 %vm330_vm1, %v2581_v56  ;;  %v1686_v0 = vmax.f32 %v1384_v59, 0.0  ;;  %v7263_v1 = vpop.f32.mrb[86].mxu0  ;;  %v1970_v2 = vpop.permute.xlu0 %1969 }
 0x19b   : > { %v2582_v3 = vld [vmem:[#allocation3 + $0x2a] sm:$0xff]  ;;  %v2258_v4 = vmax.f32 %v2246_v60, %v2256_v61  ;;  %1815 = vst.msk [vmem:[#allocation2 + $0x2a8] sm:$0xff] %vm512_vm0, %v1687_v62  ;;  %v1399_v5 = vadd.f32 %v9157_v50, %v7263_v1  ;;  %v1393_v6 = vpop.f32.mrb[87].mxu0 }
 0x19c   : > { %1975 = vst.msk [vmem:[#allocation3 + $0x37] sm:$0xff] %vm1889_vm2, %v1970_v2  ;;  %7352 = vmatmul.mubr.msk.f32.gmra.mrb[2].mxu1 %vm330_vm1, %v2582_v3  ;;  %v1394_v7 = vadd.f32 %v9157_v50, %v1393_v6  ;;  %v2280_v17 = vld [vmem:[#allocation2 + $0x280] ss:$2 sm:$0xff]  ;;  %v2284_v18 = vld [vmem:[#allocation2 + $0x281] ss:$2 sm:$0xff] }
 0x19d   : > { %1814 = vst.msk [vmem:[#allocation2 + $0x2a0] sm:$0xff] %vm512_vm0, %v1686_v0  ;;  %2265 = vrot.lane.b32.xlu1 %v2258_v4, %s8472_s27  ;;  %2260 = vst.msk [vmem:[#allocation3 + $0xbe] sm:$0xff] %vm512_vm0, %v2258_v4  ;;  %2271 = vrot.lane.b32.xlu0 %v2257_v53, %s8471_s26  ;;  %v1689_v8 = vmax.f32 %v1399_v5, 0.0  ;;  %v2287_v27 = vmax.f32 %v2280_v17, %v2284_v18 }
 0x19e   : > { %v1688_v9 = vmax.f32 %v1394_v7, 0.0  ;;  %v7266_v10 = vpop.f32.mrb[88].mxu0  ;;  %v1972_v11 = vpop.permute.xlu1 %1971 }
 0x19f   : > { %1817 = vst.msk [vmem:[#allocation2 + $0x2b8] sm:$0xff] %vm512_vm0, %v1689_v8  ;;  %v1409_v12 = vadd.f32 %v9157_v50, %v7266_v10  ;;  %v1978_v13 = vpop.permute.xlu0 %1977  ;;  %v1403_v14 = vpop.f32.mrb[89].mxu0  ;;  %v2282_v30 = vld [vmem:[#allocation2 + $0x290] ss:$2 sm:$0xff]  ;;  %v2286_v31 = vld [vmem:[#allocation2 + $0x291] ss:$2 sm:$0xff] }
 0x1a0   : > { %1976 = vst.msk [vmem:[#allocation3 + $0x3f] sm:$0xff] %vm1889_vm2, %v1972_v11  ;;  %v1404_v15 = vadd.f32 %v9157_v50, %v1403_v14  ;;  %v2288_v41 = vmax.f32 %v2282_v30, %v2286_v31  ;;  %v2567_v8 = vld [vmem:[%s11406_s3] sm:$0xff] }
 0x1a1   : > { %1816 = vst.msk [vmem:[#allocation2 + $0x2b0] sm:$0xff] %vm512_vm0, %v1688_v9  ;;  %2273 = vrot.lane.b32.xlu1 %v2258_v4, %s8471_s26  ;;  %v1691_v16 = vmax.f32 %v1409_v12, 0.0  ;;  %v2568_v12 = vld [vmem:[%s11406_s3 + $0x8] sm:$0xff] }
 0x1a2   : > { %1983 = vst.msk [vmem:[#allocation3 + $0x36] sm:$0xff] %vm1898_vm3, %v1978_v13  ;;  %v1690_v19 = vmax.f32 %v1404_v15, 0.0  ;;  %v7269_v20 = vpop.f32.mrb[90].mxu0  ;;  %v1980_v21 = vpop.permute.xlu1 %1979 }
 0x1a3   : > { %1819 = vst.msk [vmem:[#allocation2 + $0x2c8] sm:$0xff] %vm512_vm0, %v1691_v16  ;;  %v1419_v22 = vadd.f32 %v9157_v50, %v7269_v20  ;;  %v1413_v23 = vpop.f32.mrb[91].mxu0  ;;  %v7625_v16 = vpack.c.bf16 %v2568_v12, %v2567_v8 }
 0x1a4   : > { %1984 = vst.msk [vmem:[#allocation3 + $0x3e] sm:$0xff] %vm1898_vm3, %v1980_v21  ;;  %v2290_v24 = vld [vmem:[#allocation2 + $0x2a0] ss:$2 sm:$0xff]  ;;  %v2294_v25 = vld [vmem:[#allocation2 + $0x2a1] ss:$2 sm:$0xff]  ;;  %v1414_v26 = vadd.f32 %v9157_v50, %v1413_v23 }
 0x1a5   : > { %1818 = vst.msk [vmem:[#allocation2 + $0x2c0] sm:$0xff] %vm512_vm0, %v1690_v19  ;;  %v2297_v28 = vmax.f32 %v2290_v24, %v2294_v25  ;;  %v1693_v29 = vmax.f32 %v1419_v22, 0.0  ;;  %7626 = vmatprep.subr.bf16.mxu1 %v7625_v16 }
 0x1a6   : > { %v1692_v32 = vmax.f32 %v1414_v26, 0.0  ;;  %v7272_v33 = vpop.f32.mrb[92].mxu0  ;;  %7628 = vmatpush3.bf16.msra.mxu1 %v7625_v16 }
 0x1a7   : > { %v2299_v34 = vmax.f32 %v2287_v27, %v2297_v28  ;;  %1821 = vst.msk [vmem:[#allocation2 + $0x2d8] sm:$0xff] %vm512_vm0, %v1693_v29  ;;  %v1429_v35 = vadd.f32 %v9157_v50, %v7272_v33  ;;  %v1423_v36 = vpop.f32.mrb[93].mxu0 }
 0x1a8   : > { %v2292_v38 = vld [vmem:[#allocation2 + $0x2b0] ss:$2 sm:$0xff]  ;;  %v2296_v39 = vld [vmem:[#allocation2 + $0x2b1] ss:$2 sm:$0xff]  ;;  %1820 = vst.msk [vmem:[#allocation2 + $0x2d0] sm:$0xff] %vm512_vm0, %v1692_v32  ;;  %v1424_v40 = vadd.f32 %v9157_v50, %v1423_v36 }
 0x1a9   : > { %v2583_v37 = vld [vmem:[#allocation3 + $0x32] sm:$0xff]  ;;  %2305 = vrot.lane.b32.xlu0 %v2299_v34, %s8472_s27  ;;  %2301 = vst.msk [vmem:[#allocation3 + $0xc8] sm:$0xff] %vm512_vm0, %v2299_v34  ;;  %v2298_v42 = vmax.f32 %v2292_v38, %v2296_v39  ;;  %v1695_v43 = vmax.f32 %v1429_v35, 0.0 }
 0x1aa   : > { %7354 = vmatprep.mubr.msk.f32.mxu1 %vm330_vm1, %v2583_v37  ;;  %v1694_v44 = vmax.f32 %v1424_v40, 0.0  ;;  %v7275_v45 = vpop.f32.mrb[94].mxu0  ;;  %v2012_v46 = vpop.permute.xlu0 %2011 }
 0x1ab   : > { %v2584_v47 = vld [vmem:[#allocation3 + $0x3a] sm:$0xff]  ;;  %v2300_v48 = vmax.f32 %v2288_v41, %v2298_v42  ;;  %1823 = vst.msk [vmem:[#allocation2 + $0x2e8] sm:$0xff] %vm512_vm0, %v1695_v43  ;;  %v1439_v49 = vadd.f32 %v9157_v50, %v7275_v45  ;;  %v1433_v51 = vpop.f32.mrb[95].mxu0 }
 0x1ac   : > { %2017 = vst.msk [vmem:[#allocation3 + $0x49] sm:$0xff] %vm1889_vm2, %v2012_v46  ;;  %7355 = vmatmul.mubr.msk.f32.gmra.mrb[4].mxu1 %vm330_vm1, %v2584_v47  ;;  %v1434_v52 = vadd.f32 %v9157_v50, %v1433_v51  ;;  %v2322_v62 = vld [vmem:[#allocation2 + $0x2c0] ss:$2 sm:$0xff]  ;;  %v2326_v0 = vld [vmem:[#allocation2 + $0x2c1] ss:$2 sm:$0xff]  ;;  %v2569_v47 = vld [vmem:[%s11406_s3 + $0x10] sm:$0xff] }
 0x1ad   : > { %1822 = vst.msk [vmem:[#allocation2 + $0x2e0] sm:$0xff] %vm512_vm0, %v1694_v44  ;;  %2307 = vrot.lane.b32.xlu1 %v2300_v48, %s8472_s27  ;;  %2302 = vst.msk [vmem:[#allocation3 + $0xd0] sm:$0xff] %vm512_vm0, %v2300_v48  ;;  %2313 = vrot.lane.b32.xlu0 %v2299_v34, %s8471_s26  ;;  %v1697_v53 = vmax.f32 %v1439_v49, 0.0  ;;  %v2329_v10 = vmax.f32 %v2322_v62, %v2326_v0 }
 0x1ae   : > { %v1696_v54 = vmax.f32 %v1434_v52, 0.0  ;;  %v7278_v55 = vpop.f32.mrb[96].mxu0  ;;  %v2014_v56 = vpop.permute.xlu1 %2013 }
 0x1af   : > { %1825 = vst.msk [vmem:[#allocation2 + $0x2f8] sm:$0xff] %vm512_vm0, %v1697_v53  ;;  %v1449_v57 = vadd.f32 %v9157_v50, %v7278_v55  ;;  %v2020_v58 = vpop.permute.xlu0 %2019  ;;  %v1443_v59 = vpop.f32.mrb[97].mxu0  ;;  %v2324_v14 = vld [vmem:[#allocation2 + $0x2d0] ss:$2 sm:$0xff]  ;;  %v2328_v15 = vld [vmem:[#allocation2 + $0x2d1] ss:$2 sm:$0xff] }
 0x1b0   : > { %2018 = vst.msk [vmem:[#allocation3 + $0x51] sm:$0xff] %vm1889_vm2, %v2014_v56  ;;  %v1444_v60 = vadd.f32 %v9157_v50, %v1443_v59  ;;  %v2330_v26 = vmax.f32 %v2324_v14, %v2328_v15 }
 0x1b1   : > { %1824 = vst.msk [vmem:[#allocation2 + $0x2f0] sm:$0xff] %vm512_vm0, %v1696_v54  ;;  %2315 = vrot.lane.b32.xlu1 %v2300_v48, %s8471_s26  ;;  %v1699_v61 = vmax.f32 %v1449_v57, 0.0  ;;  %v2570_v48 = vld [vmem:[%s11406_s3 + $0x18] sm:$0xff] }
 0x1b2   : > { %2025 = vst.msk [vmem:[#allocation3 + $0x48] sm:$0xff] %vm1898_vm3, %v2020_v58  ;;  %v1698_v1 = vmax.f32 %v1444_v60, 0.0  ;;  %v7281_v2 = vpop.f32.mrb[98].mxu0  ;;  %v2022_v3 = vpop.permute.xlu1 %2021  ;;  %v7629_v53 = vpack.c.bf16 %v2570_v48, %v2569_v47 }
 0x1b3   : > { %1827 = vst.msk [vmem:[#allocation2 + $0x308] sm:$0xff] %vm512_vm0, %v1699_v61  ;;  %v1459_v4 = vadd.f32 %v9157_v50, %v7281_v2  ;;  %v1453_v5 = vpop.f32.mrb[99].mxu0 }
 0x1b4   : > { %2026 = vst.msk [vmem:[#allocation3 + $0x50] sm:$0xff] %vm1898_vm3, %v2022_v3  ;;  %v2332_v6 = vld [vmem:[#allocation2 + $0x2e0] ss:$2 sm:$0xff]  ;;  %v2336_v7 = vld [vmem:[#allocation2 + $0x2e1] ss:$2 sm:$0xff]  ;;  %v1454_v9 = vadd.f32 %v9157_v50, %v1453_v5  ;;  %7630 = vmatprep.subr.bf16.mxu1 %v7629_v53 }
 0x1b5   : > { %1826 = vst.msk [vmem:[#allocation2 + $0x300] sm:$0xff] %vm512_vm0, %v1698_v1  ;;  %v2339_v11 = vmax.f32 %v2332_v6, %v2336_v7  ;;  %v1701_v13 = vmax.f32 %v1459_v4, 0.0  ;;  %7632 = vmatpush3.bf16.msra.mxu1 %v7629_v53 }
 0x1b6   : > { %v1700_v17 = vmax.f32 %v1454_v9, 0.0  ;;  %v7284_v18 = vpop.f32.mrb[100].mxu0 }
 0x1b7   : > { %v2341_v19 = vmax.f32 %v2329_v10, %v2339_v11  ;;  %1829 = vst.msk [vmem:[#allocation2 + $0x318] sm:$0xff] %vm512_vm0, %v1701_v13  ;;  %v1469_v20 = vadd.f32 %v9157_v50, %v7284_v18  ;;  %v1463_v21 = vpop.f32.mrb[101].mxu0 }
 0x1b8   : > { %v2334_v23 = vld [vmem:[#allocation2 + $0x2f0] ss:$2 sm:$0xff]  ;;  %v2338_v24 = vld [vmem:[#allocation2 + $0x2f1] ss:$2 sm:$0xff]  ;;  %1828 = vst.msk [vmem:[#allocation2 + $0x310] sm:$0xff] %vm512_vm0, %v1700_v17  ;;  %v1464_v25 = vadd.f32 %v9157_v50, %v1463_v21 }
 0x1b9   : > { %v2585_v22 = vld [vmem:[#allocation3 + $0x42] sm:$0xff]  ;;  %2347 = vrot.lane.b32.xlu0 %v2341_v19, %s8472_s27  ;;  %2343 = vst.msk [vmem:[#allocation3 + $0xda] sm:$0xff] %vm512_vm0, %v2341_v19  ;;  %v2340_v27 = vmax.f32 %v2334_v23, %v2338_v24  ;;  %v1703_v28 = vmax.f32 %v1469_v20, 0.0 }
 0x1ba   : > { %7357 = vmatprep.mubr.msk.f32.mxu1 %vm330_vm1, %v2585_v22  ;;  %v1702_v29 = vmax.f32 %v1464_v25, 0.0  ;;  %v7287_v30 = vpop.f32.mrb[102].mxu0  ;;  %v2062_v31 = vpop.permute.xlu1 %2061  ;;  %v2571_v24 = vld [vmem:[%s11406_s3 + $0x20] sm:$0xff]  ;;  %v2572_v25 = vld [vmem:[%s11406_s3 + $0x28] sm:$0xff] }
 0x1bb   : > { %v2586_v32 = vld [vmem:[#allocation3 + $0x4a] sm:$0xff]  ;;  %v2342_v33 = vmax.f32 %v2330_v26, %v2340_v27  ;;  %v2587_v34 = vld [vmem:[#allocation3 + $0x52] sm:$0xff]  ;;  %1831 = vst.msk [vmem:[#allocation2 + $0x328] sm:$0xff] %vm512_vm0, %v1703_v28  ;;  %v1479_v35 = vadd.f32 %v9157_v50, %v7287_v30  ;;  %v2054_v36 = vpop.permute.xlu0 %2053  ;;  %v1473_v37 = vpop.f32.mrb[103].mxu0  ;;  %v7633_v27 = vpack.c.bf16 %v2572_v25, %v2571_v24 }
 0x1bc   : > { %7358 = vmatmul.mubr.msk.f32.gmra.mrb[6].mxu1 %vm330_vm1, %v2586_v32  ;;  %1830 = vst.msk [vmem:[#allocation2 + $0x320] sm:$0xff] %vm512_vm0, %v1702_v29  ;;  %v1474_v38 = vadd.f32 %v9157_v50, %v1473_v37  ;;  %v2364_v51 = vld [vmem:[#allocation2 + $0x300] ss:$2 sm:$0xff]  ;;  %v2368_v52 = vld [vmem:[#allocation2 + $0x301] ss:$2 sm:$0xff] }
 0x1bd   : > { %2059 = vst.msk [vmem:[#allocation3 + $0x5b] sm:$0xff] %vm1889_vm2, %v2054_v36  ;;  %2349 = vrot.lane.b32.xlu1 %v2342_v33, %s8472_s27  ;;  %2355 = vrot.lane.b32.xlu0 %v2341_v19, %s8471_s26  ;;  %v1705_v39 = vmax.f32 %v1479_v35, 0.0  ;;  %v2371_v62 = vmax.f32 %v2364_v51, %v2368_v52 }
 0x1be   : > { %2344 = vst.msk [vmem:[#allocation3 + $0xe2] sm:$0xff] %vm512_vm0, %v2342_v33  ;;  %7360 = vmatprep.mubr.msk.f32.mxu1 %vm330_vm1, %v2587_v34  ;;  %v1704_v40 = vmax.f32 %v1474_v38, 0.0  ;;  %v7290_v41 = vpop.f32.mrb[104].mxu0  ;;  %v2064_v42 = vpop.permute.xlu1 %2063  ;;  %7634 = vmatprep.subr.bf16.mxu1 %v7633_v27 }
 0x1bf   : > { %2067 = vst.msk [vmem:[#allocation3 + $0x5a] sm:$0xff] %vm1898_vm3, %v2062_v31  ;;  %v1489_v43 = vadd.f32 %v9157_v50, %v7290_v41  ;;  %v2056_v44 = vpop.permute.xlu0 %2055  ;;  %v1483_v45 = vpop.f32.mrb[105].mxu0  ;;  %v2366_v2 = vld [vmem:[#allocation2 + $0x310] ss:$2 sm:$0xff]  ;;  %v2370_v3 = vld [vmem:[#allocation2 + $0x311] ss:$2 sm:$0xff]  ;;  %7636 = vmatpush3.bf16.msra.mxu1 %v7633_v27 }
 0x1c0   : > { %1833 = vst.msk [vmem:[#allocation2 + $0x338] sm:$0xff] %vm512_vm0, %v1705_v39  ;;  %1832 = vst.msk [vmem:[#allocation2 + $0x330] sm:$0xff] %vm512_vm0, %v1704_v40  ;;  %v1484_v46 = vadd.f32 %v9157_v50, %v1483_v45  ;;  %v2372_v13 = vmax.f32 %v2366_v2, %v2370_v3 }
 0x1c1   : > { %2060 = vst.msk [vmem:[#allocation3 + $0x63] sm:$0xff] %vm1889_vm2, %v2056_v44  ;;  %2357 = vrot.lane.b32.xlu1 %v2342_v33, %s8471_s26  ;;  %v1707_v49 = vmax.f32 %v1489_v43, 0.0 }
 0x1c2   : > { %2068 = vst.msk [vmem:[#allocation3 + $0x62] sm:$0xff] %vm1898_vm3, %v2064_v42  ;;  %v1706_v54 = vmax.f32 %v1484_v46, 0.0  ;;  %v7293_v55 = vpop.f32.mrb[106].mxu0 }
 0x1c3   : > { %1835 = vst.msk [vmem:[#allocation2 + $0x348] sm:$0xff] %vm512_vm0, %v1707_v49  ;;  %v1499_v56 = vadd.f32 %v9157_v50, %v7293_v55  ;;  %v1493_v57 = vpop.f32.mrb[107].mxu0  ;;  %v2374_v58 = vld [vmem:[#allocation2 + $0x320] ss:$2 sm:$0xff]  ;;  %v2378_v59 = vld [vmem:[#allocation2 + $0x321] ss:$2 sm:$0xff] }
 0x1c4   : > { %1834 = vst.msk [vmem:[#allocation2 + $0x340] sm:$0xff] %vm512_vm0, %v1706_v54  ;;  %v1494_v60 = vadd.f32 %v9157_v50, %v1493_v57  ;;  %v2381_v0 = vmax.f32 %v2374_v58, %v2378_v59 }
 0x1c5   : > { %v1709_v1 = vmax.f32 %v1499_v56, 0.0 }
 0x1c6   : > { %v2588_v61 = vld [vmem:[#allocation3 + $0x5a] sm:$0xff]  ;;  %v1708_v4 = vmax.f32 %v1494_v60, 0.0  ;;  %v7296_v5 = vpop.f32.mrb[108].mxu0  ;;  %v2383_v6 = vmax.f32 %v2371_v62, %v2381_v0  ;;  %v2573_v0 = vld [vmem:[%s11406_s3 + $0x30] sm:$0xff] }
 0x1c7   : > { %7361 = vmatmul.mubr.msk.f32.gmra.mrb[8].mxu1 %vm330_vm1, %v2588_v61  ;;  %1837 = vst.msk [vmem:[#allocation2 + $0x358] sm:$0xff] %vm512_vm0, %v1709_v1  ;;  %v1509_v7 = vadd.f32 %v9157_v50, %v7296_v5  ;;  %v1503_v8 = vpop.f32.mrb[109].mxu0  ;;  %v2376_v9 = vld [vmem:[#allocation2 + $0x330] ss:$2 sm:$0xff]  ;;  %v2380_v10 = vld [vmem:[#allocation2 + $0x331] ss:$2 sm:$0xff] }
 0x1c8   : > { %1836 = vst.msk [vmem:[#allocation2 + $0x350] sm:$0xff] %vm512_vm0, %v1708_v4  ;;  %v1504_v11 = vadd.f32 %v9157_v50, %v1503_v8  ;;  %2397 = vrot.lane.b32.xlu1 %v2383_v6, %s8471_s26  ;;  %2385 = vst.msk [vmem:[#allocation3 + $0xec] sm:$0xff] %vm512_vm0, %v2383_v6  ;;  %2389 = vrot.lane.b32.xlu0 %v2383_v6, %s8472_s27  ;;  %v2382_v14 = vmax.f32 %v2376_v9, %v2380_v10  ;;  %v2574_v1 = vld [vmem:[%s11406_s3 + $0x38] sm:$0xff] }
 0x1c9   : > { %v2589_v12 = vld [vmem:[#allocation3 + $0x62] sm:$0xff]  ;;  %v1711_v15 = vmax.f32 %v1509_v7, 0.0  ;;  %v7637_v3 = vpack.c.bf16 %v2574_v1, %v2573_v0  ;;  %v2578_v1 = vld [vmem:[%s11406_s3 + $0x58] sm:$0xff] }
 0x1ca   : > { %7363 = vmatprep.mubr.msk.f32.mxu1 %vm330_vm1, %v2589_v12  ;;  %v1710_v16 = vmax.f32 %v1504_v11, 0.0  ;;  %v7299_v17 = vpop.f32.mrb[110].mxu0  ;;  %v2104_v18 = vpop.permute.xlu1 %2103  ;;  %v2384_v19 = vmax.f32 %v2372_v13, %v2382_v14 }
 0x1cb   : > { %1839 = vst.msk [vmem:[#allocation2 + $0x368] sm:$0xff] %vm512_vm0, %v1711_v15  ;;  %v1519_v20 = vadd.f32 %v9157_v50, %v7299_v17  ;;  %v2096_v21 = vpop.permute.xlu0 %2095  ;;  %v1513_v22 = vpop.f32.mrb[111].mxu0  ;;  %v2406_v36 = vld [vmem:[#allocation2 + $0x340] ss:$2 sm:$0xff]  ;;  %v2410_v37 = vld [vmem:[#allocation2 + $0x341] ss:$2 sm:$0xff]  ;;  %7638 = vmatprep.subr.bf16.mxu1 %v7637_v3 }
 0x1cc   : > { %1838 = vst.msk [vmem:[#allocation2 + $0x360] sm:$0xff] %vm512_vm0, %v1710_v16  ;;  %v1514_v23 = vadd.f32 %v9157_v50, %v1513_v22  ;;  %2399 = vrot.lane.b32.xlu1 %v2384_v19, %s8471_s26  ;;  %2386 = vst.msk [vmem:[#allocation3 + $0xf4] sm:$0xff] %vm512_vm0, %v2384_v19  ;;  %2391 = vrot.lane.b32.xlu0 %v2384_v19, %s8472_s27  ;;  %v2413_v46 = vmax.f32 %v2406_v36, %v2410_v37 }
 0x1cd   : > { %2101 = vst.msk [vmem:[#allocation3 + $0x6d] sm:$0xff] %vm1889_vm2, %v2096_v21  ;;  %v1713_v26 = vmax.f32 %v1519_v20, 0.0  ;;  %7640 = vmatpush3.bf16.msra.mxu1 %v7637_v3 }
 0x1ce   : > { %2109 = vst.msk [vmem:[#allocation3 + $0x6c] sm:$0xff] %vm1898_vm3, %v2104_v18  ;;  %v1712_v28 = vmax.f32 %v1514_v23, 0.0  ;;  %v7302_v29 = vpop.f32.mrb[112].mxu0  ;;  %v2106_v30 = vpop.permute.xlu1 %2105 }
 0x1cf   : > { %1841 = vst.msk [vmem:[#allocation2 + $0x378] sm:$0xff] %vm512_vm0, %v1713_v26  ;;  %v1529_v31 = vadd.f32 %v9157_v50, %v7302_v29  ;;  %v2098_v32 = vpop.permute.xlu0 %2097  ;;  %v1523_v33 = vpop.f32.mrb[113].mxu0  ;;  %v2408_v49 = vld [vmem:[#allocation2 + $0x350] ss:$2 sm:$0xff]  ;;  %v2412_v51 = vld [vmem:[#allocation2 + $0x351] ss:$2 sm:$0xff] }
 0x1d0   : > { %1840 = vst.msk [vmem:[#allocation2 + $0x370] sm:$0xff] %vm512_vm0, %v1712_v28  ;;  %v1524_v34 = vadd.f32 %v9157_v50, %v1523_v33  ;;  %v2414_v61 = vmax.f32 %v2408_v49, %v2412_v51  ;;  %v2575_v33 = vld [vmem:[%s11406_s3 + $0x40] sm:$0xff] }
 0x1d1   : > { %2102 = vst.msk [vmem:[#allocation3 + $0x75] sm:$0xff] %vm1889_vm2, %v2098_v32  ;;  %v1715_v35 = vmax.f32 %v1529_v31, 0.0 }
 0x1d2   : > { %2110 = vst.msk [vmem:[#allocation3 + $0x74] sm:$0xff] %vm1898_vm3, %v2106_v30  ;;  %v1714_v38 = vmax.f32 %v1524_v34, 0.0  ;;  %v7305_v39 = vpop.f32.mrb[114].mxu0  ;;  %v2576_v34 = vld [vmem:[%s11406_s3 + $0x48] sm:$0xff] }
 0x1d3   : > { %1843 = vst.msk [vmem:[#allocation2 + $0x388] sm:$0xff] %vm512_vm0, %v1715_v35  ;;  %v1539_v40 = vadd.f32 %v9157_v50, %v7305_v39  ;;  %v1533_v41 = vpop.f32.mrb[115].mxu0  ;;  %v2416_v42 = vld [vmem:[#allocation2 + $0x360] ss:$2 sm:$0xff]  ;;  %v2420_v43 = vld [vmem:[#allocation2 + $0x361] ss:$2 sm:$0xff] }
 0x1d4   : > { %1842 = vst.msk [vmem:[#allocation2 + $0x380] sm:$0xff] %vm512_vm0, %v1714_v38  ;;  %v1534_v44 = vadd.f32 %v9157_v50, %v1533_v41  ;;  %v2423_v47 = vmax.f32 %v2416_v42, %v2420_v43  ;;  %v7641_v38 = vpack.c.bf16 %v2576_v34, %v2575_v33 }
 0x1d5   : > { %v2590_v45 = vld [vmem:[#allocation3 + $0x6a] sm:$0xff]  ;;  %v1717_v48 = vmax.f32 %v1539_v40, 0.0 }
 0x1d6   : > { %7364 = vmatmul.mubr.msk.f32.gmra.mrb[10].mxu1 %vm330_vm1, %v2590_v45  ;;  %v1716_v52 = vmax.f32 %v1534_v44, 0.0  ;;  %v7308_v53 = vpop.f32.mrb[116].mxu0  ;;  %v2425_v54 = vmax.f32 %v2413_v46, %v2423_v47  ;;  %7642 = vmatprep.subr.bf16.mxu1 %v7641_v38 }
 0x1d7   : > { %1845 = vst.msk [vmem:[#allocation2 + $0x398] sm:$0xff] %vm512_vm0, %v1717_v48  ;;  %v1549_v55 = vadd.f32 %v9157_v50, %v7308_v53  ;;  %v1543_v56 = vpop.f32.mrb[117].mxu0  ;;  %v2418_v57 = vld [vmem:[#allocation2 + $0x370] ss:$2 sm:$0xff]  ;;  %v2422_v58 = vld [vmem:[#allocation2 + $0x371] ss:$2 sm:$0xff]  ;;  %7644 = vmatpush3.bf16.msra.mxu1 %v7641_v38 }
 0x1d8   : > { %1844 = vst.msk [vmem:[#allocation2 + $0x390] sm:$0xff] %vm512_vm0, %v1716_v52  ;;  %v1544_v59 = vadd.f32 %v9157_v50, %v1543_v56  ;;  %2439 = vrot.lane.b32.xlu1 %v2425_v54, %s8471_s26  ;;  %2427 = vst.msk [vmem:[#allocation3 + $0xfe] sm:$0xff] %vm512_vm0, %v2425_v54  ;;  %2431 = vrot.lane.b32.xlu0 %v2425_v54, %s8472_s27  ;;  %v2424_v62 = vmax.f32 %v2418_v57, %v2422_v58 }
 0x1d9   : > { %v2591_v60 = vld [vmem:[#allocation3 + $0x72] sm:$0xff]  ;;  %v1719_v2 = vmax.f32 %v1549_v55, 0.0 }
 0x1da   : > { %7366 = vmatprep.mubr.msk.f32.mxu1 %vm330_vm1, %v2591_v60  ;;  %v1718_v4 = vmax.f32 %v1544_v59, 0.0  ;;  %v7311_v5 = vpop.f32.mrb[118].mxu0  ;;  %v2146_v6 = vpop.permute.xlu1 %2145  ;;  %v2426_v7 = vmax.f32 %v2414_v61, %v2424_v62 }
 0x1db   : > { %1847 = vst.msk [vmem:[#allocation2 + $0x3a8] sm:$0xff] %vm512_vm0, %v1719_v2  ;;  %v1559_v8 = vadd.f32 %v9157_v50, %v7311_v5  ;;  %v2138_v9 = vpop.permute.xlu0 %2137  ;;  %v1553_v10 = vpop.f32.mrb[119].mxu0  ;;  %v2448_v21 = vld [vmem:[#allocation2 + $0x380] ss:$2 sm:$0xff]  ;;  %v2452_v22 = vld [vmem:[#allocation2 + $0x381] ss:$2 sm:$0xff] }
 0x1dc   : > { %1846 = vst.msk [vmem:[#allocation2 + $0x3a0] sm:$0xff] %vm512_vm0, %v1718_v4  ;;  %v1554_v11 = vadd.f32 %v9157_v50, %v1553_v10  ;;  %2441 = vrot.lane.b32.xlu1 %v2426_v7, %s8471_s26  ;;  %2428 = vst.msk [vmem:[#allocation3 + $0x106] sm:$0xff] %vm512_vm0, %v2426_v7  ;;  %2433 = vrot.lane.b32.xlu0 %v2426_v7, %s8472_s27  ;;  %v2455_v31 = vmax.f32 %v2448_v21, %v2452_v22  ;;  %v6218_v21 = vld [vmem:[%s11406_s3 + $0xc0] sm:$0xff]  ;;  %v6219_v22 = vld [vmem:[%s11406_s3 + $0xc8] sm:$0xff] }
 0x1dd   : > { %2143 = vst.msk [vmem:[#allocation3 + $0x7f] sm:$0xff] %vm1889_vm2, %v2138_v9  ;;  %v1721_v12 = vmax.f32 %v1559_v8, 0.0 }
 0x1de   : > { %2151 = vst.msk [vmem:[#allocation3 + $0x7e] sm:$0xff] %vm1898_vm3, %v2146_v6  ;;  %v1720_v13 = vmax.f32 %v1554_v11, 0.0  ;;  %v7314_v14 = vpop.f32.mrb[120].mxu0  ;;  %v2148_v15 = vpop.permute.xlu1 %2147 }
 0x1df   : > { %1849 = vst.msk [vmem:[#allocation2 + $0x3b8] sm:$0xff] %vm512_vm0, %v1721_v12  ;;  %v1569_v16 = vadd.f32 %v9157_v50, %v7314_v14  ;;  %v2140_v17 = vpop.permute.xlu0 %2139  ;;  %v1563_v18 = vpop.f32.mrb[121].mxu0  ;;  %v2450_v36 = vld [vmem:[#allocation2 + $0x390] ss:$2 sm:$0xff]  ;;  %v2454_v37 = vld [vmem:[#allocation2 + $0x391] ss:$2 sm:$0xff] }
 0x1e0   : > { %1848 = vst.msk [vmem:[#allocation2 + $0x3b0] sm:$0xff] %vm512_vm0, %v1720_v13  ;;  %v1564_v19 = vadd.f32 %v9157_v50, %v1563_v18  ;;  %v2456_v48 = vmax.f32 %v2450_v36, %v2454_v37 }
 0x1e1   : > { %2144 = vst.msk [vmem:[#allocation3 + $0x87] sm:$0xff] %vm1889_vm2, %v2140_v17  ;;  %v1723_v20 = vmax.f32 %v1569_v16, 0.0 }
 0x1e2   : > { %2152 = vst.msk [vmem:[#allocation3 + $0x86] sm:$0xff] %vm1898_vm3, %v2148_v15  ;;  %v1722_v23 = vmax.f32 %v1564_v19, 0.0  ;;  %v7317_v24 = vpop.f32.mrb[122].mxu0 }
 0x1e3   : > { %1851 = vst.msk [vmem:[#allocation2 + $0x3c8] sm:$0xff] %vm512_vm0, %v1723_v20  ;;  %v1579_v25 = vadd.f32 %v9157_v50, %v7317_v24  ;;  %v1573_v26 = vpop.f32.mrb[123].mxu0  ;;  %v2458_v27 = vld [vmem:[#allocation2 + $0x3a0] ss:$2 sm:$0xff]  ;;  %v2462_v28 = vld [vmem:[#allocation2 + $0x3a1] ss:$2 sm:$0xff] }
 0x1e4   : > { %1850 = vst.msk [vmem:[#allocation2 + $0x3c0] sm:$0xff] %vm512_vm0, %v1722_v23  ;;  %v1574_v29 = vadd.f32 %v9157_v50, %v1573_v26  ;;  %v2465_v32 = vmax.f32 %v2458_v27, %v2462_v28  ;;  %v9417_v23 = vpack.c.bf16 %v6219_v22, %v6218_v21  ;;  %v6225_v21 = vld [vmem:[%s11406_s3 + $0xf8] sm:$0xff]  ;;  %v2535_v22 = vld [vmem:[#allocation3 + $0x20] sm:$0xff] }
 0x1e5   : > { %v2592_v30 = vld [vmem:[#allocation3 + $0x7a] sm:$0xff]  ;;  %v1725_v35 = vmax.f32 %v1579_v25, 0.0 }
 0x1e6   : > { %7367 = vmatmul.mubr.msk.f32.gmra.mrb[12].mxu1 %vm330_vm1, %v2592_v30  ;;  %v1724_v39 = vmax.f32 %v1574_v29, 0.0  ;;  %v7320_v40 = vpop.f32.mrb[124].mxu0  ;;  %v2467_v41 = vmax.f32 %v2455_v31, %v2465_v32 }
 0x1e7   : > { %1853 = vst.msk [vmem:[#allocation2 + $0x3d8] sm:$0xff] %vm512_vm0, %v1725_v35  ;;  %v1589_v42 = vadd.f32 %v9157_v50, %v7320_v40  ;;  %v1583_v43 = vpop.f32.mrb[125].mxu0  ;;  %v2460_v44 = vld [vmem:[#allocation2 + $0x3b0] ss:$2 sm:$0xff]  ;;  %v2464_v45 = vld [vmem:[#allocation2 + $0x3b1] ss:$2 sm:$0xff] }
 0x1e8   : > { %1852 = vst.msk [vmem:[#allocation2 + $0x3d0] sm:$0xff] %vm512_vm0, %v1724_v39  ;;  %v1584_v46 = vadd.f32 %v9157_v50, %v1583_v43  ;;  %2481 = vrot.lane.b32.xlu1 %v2467_v41, %s8471_s26  ;;  %2469 = vst.msk [vmem:[#allocation3 + $0x110] sm:$0xff] %vm512_vm0, %v2467_v41  ;;  %2473 = vrot.lane.b32.xlu0 %v2467_v41, %s8472_s27  ;;  %v2466_v49 = vmax.f32 %v2460_v44, %v2464_v45 }
 0x1e9   : > { %v2593_v47 = vld [vmem:[#allocation3 + $0x82] sm:$0xff]  ;;  %v1727_v51 = vmax.f32 %v1589_v42, 0.0 }
 0x1ea   : > { %7369 = vmatprep.mubr.msk.f32.mxu1 %vm330_vm1, %v2593_v47  ;;  %v1726_v52 = vmax.f32 %v1584_v46, 0.0  ;;  %v7323_v53 = vpop.f32.mrb[126].mxu0  ;;  %v2188_v54 = vpop.permute.xlu1 %2187  ;;  %v2468_v55 = vmax.f32 %v2456_v48, %v2466_v49 }
 0x1eb   : > { %1855 = vst.msk [vmem:[#allocation2 + $0x3e8] sm:$0xff] %vm512_vm0, %v1727_v51  ;;  %v1599_v56 = vadd.f32 %v9157_v50, %v7323_v53  ;;  %v2180_v57 = vpop.permute.xlu0 %2179  ;;  %v1593_v58 = vpop.f32.mrb[127].mxu0  ;;  %v2490_v2 = vld [vmem:[#allocation2 + $0x3c0] ss:$2 sm:$0xff]  ;;  %v2494_v3 = vld [vmem:[#allocation2 + $0x3c1] ss:$2 sm:$0xff] }
 0x1ec   : > { %1854 = vst.msk [vmem:[#allocation2 + $0x3e0] sm:$0xff] %vm512_vm0, %v1726_v52  ;;  %v1594_v59 = vadd.f32 %v9157_v50, %v1593_v58  ;;  %2483 = vrot.lane.b32.xlu1 %v2468_v55, %s8471_s26  ;;  %2470 = vst.msk [vmem:[#allocation3 + $0x118] sm:$0xff] %vm512_vm0, %v2468_v55  ;;  %2475 = vrot.lane.b32.xlu0 %v2468_v55, %s8472_s27  ;;  %v2577_v50 = vld [vmem:[%s11406_s3 + $0x50] sm:$0xff]  ;;  %v2497_v8 = vmax.f32 %v2490_v2, %v2494_v3 }
 0x1ed   : > { %2185 = vst.msk [vmem:[#allocation3 + $0x91] sm:$0xff] %vm1889_vm2, %v2180_v57  ;;  %v1729_v60 = vmax.f32 %v1599_v56, 0.0  ;;  %v7645_v4 = vpack.c.bf16 %v2578_v1, %v2577_v50 }
 0x1ee   : > { %2193 = vst.msk [vmem:[#allocation3 + $0x90] sm:$0xff] %vm1898_vm3, %v2188_v54  ;;  %v1728_v61 = vmax.f32 %v1594_v59, 0.0  ;;  %v2190_v62 = vpop.permute.xlu1 %2189 }
 0x1ef   : > { %1857 = vst.msk [vmem:[#allocation2 + $0x3f8] sm:$0xff] %vm512_vm0, %v1729_v60  ;;  %v2182_v0 = vpop.permute.xlu0 %2181  ;;  %7646 = vmatprep.subr.bf16.mxu1 %v7645_v4  ;;  %v2492_v10 = vld [vmem:[#allocation2 + $0x3d0] ss:$2 sm:$0xff]  ;;  %v2496_v11 = vld [vmem:[#allocation2 + $0x3d1] ss:$2 sm:$0xff] }
 0x1f0   : > { %1856 = vst.msk [vmem:[#allocation2 + $0x3f0] sm:$0xff] %vm512_vm0, %v1728_v61  ;;  %7648 = vmatpush3.bf16.msra.mxu1 %v7645_v4  ;;  %v2498_v17 = vmax.f32 %v2492_v10, %v2496_v11  ;;  %v2531_v10 = vld [vmem:[#allocation3] sm:$0xff]  ;;  %v6220_v11 = vld [vmem:[%s11406_s3 + $0xd0] sm:$0xff] }
 0x1f1   : > { %2186 = vst.msk [vmem:[#allocation3 + $0x99] sm:$0xff] %vm1889_vm2, %v2182_v0  ;;  %7650 = vmatprep.subr.bf16.mxu1 %v9417_v23 }
 0x1f2   : > { %2194 = vst.msk [vmem:[#allocation3 + $0x98] sm:$0xff] %vm1898_vm3, %v2190_v62 }
 0x1f3   : > { %v2500_v5 = vld [vmem:[#allocation2 + $0x3e0] ss:$2 sm:$0xff]  ;;  %v2504_v6 = vld [vmem:[#allocation2 + $0x3e1] ss:$2 sm:$0xff] }
 0x1f4   : > { %v2507_v9 = vmax.f32 %v2500_v5, %v2504_v6 }
 0x1f5   : > { %v2594_v7 = vld [vmem:[#allocation3 + $0x8a] sm:$0xff] }
 0x1f6   : > { %7370 = vmatmul.mubr.msk.f32.gmra.mrb[14].mxu1 %vm330_vm1, %v2594_v7  ;;  %v2509_v12 = vmax.f32 %v2497_v8, %v2507_v9 }
 0x1f7   : > { %v2502_v13 = vld [vmem:[#allocation2 + $0x3f0] ss:$2 sm:$0xff]  ;;  %v2506_v14 = vld [vmem:[#allocation2 + $0x3f1] ss:$2 sm:$0xff] }
 0x1f8   : > { %2523 = vrot.lane.b32.xlu1 %v2509_v12, %s8471_s26  ;;  %2511 = vst.msk [vmem:[#allocation3 + $0x122] sm:$0xff] %vm512_vm0, %v2509_v12  ;;  %2515 = vrot.lane.b32.xlu0 %v2509_v12, %s8472_s27  ;;  %v2508_v18 = vmax.f32 %v2502_v13, %v2506_v14  ;;  %v6221_v12 = vld [vmem:[%s11406_s3 + $0xd8] sm:$0xff]  ;;  %v2532_v13 = vld [vmem:[#allocation3 + $0x8] sm:$0xff] }
 0x1f9   : > { %v2595_v15 = vld [vmem:[#allocation3 + $0x92] sm:$0xff]  ;;  %v2596_v16 = vld [vmem:[#allocation3 + $0x9a] sm:$0xff]  ;;  %v7653_v14 = vpack.c.bf16 %v6221_v12, %v6220_v11 }
 0x1fa   : > { %7372 = vmatprep.mubr.msk.f32.mxu1 %vm330_vm1, %v2595_v15  ;;  %v2222_v19 = vpop.permute.xlu0 %2221  ;;  %v2510_v20 = vmax.f32 %v2498_v17, %v2508_v18  ;;  %v6222_v15 = vld [vmem:[%s11406_s3 + $0xe0] sm:$0xff]  ;;  %v2533_v17 = vld [vmem:[#allocation3 + $0x10] sm:$0xff] }
 0x1fb   : > { %7373 = vmatmul.mubr.msk.f32.gmra.mrb[16].mxu1 %vm330_vm1, %v2596_v16  ;;  %2227 = vst.msk [vmem:[#allocation3 + $0xa3] sm:$0xff] %vm1889_vm2, %v2222_v19  ;;  %v6223_v16 = vld [vmem:[%s11406_s3 + $0xe8] sm:$0xff]  ;;  %v2534_v19 = vld [vmem:[#allocation3 + $0x18] sm:$0xff] }
 0x1fc   : > { %2525 = vrot.lane.b32.xlu1 %v2510_v20, %s8471_s26  ;;  %2512 = vst.msk [vmem:[#allocation3 + $0x12a] sm:$0xff] %vm512_vm0, %v2510_v20  ;;  %2517 = vrot.lane.b32.xlu0 %v2510_v20, %s8472_s27  ;;  %v7657_v18 = vpack.c.bf16 %v6223_v16, %v6222_v15  ;;  %v6224_v20 = vld [vmem:[%s11406_s3 + $0xf0] sm:$0xff] }
 0x1fe   : > { %v2224_v24 = vpop.permute.xlu1 %2223  ;;  %v2230_v25 = vpop.permute.xlu0 %2229 }
 0x1ff   : > { %2228 = vst.msk [vmem:[#allocation3 + $0xab] sm:$0xff] %vm1889_vm2, %v2224_v24  ;;  %v2536_v24 = vld [vmem:[#allocation3 + $0x28] sm:$0xff] }
 0x200   : > { %2235 = vst.msk [vmem:[#allocation3 + $0xa2] sm:$0xff] %vm1898_vm3, %v2230_v25  ;;  %v6226_v25 = vld [vmem:[%s11406_s3 + $0x100] sm:$0xff] }
 0x202   : > { %v2232_v26 = vpop.permute.xlu1 %2231 }
 0x203   : > { %2236 = vst.msk [vmem:[#allocation3 + $0xaa] sm:$0xff] %vm1898_vm3, %v2232_v26  ;;  %v6227_v26 = vld [vmem:[%s11406_s3 + $0x108] sm:$0xff] }
 0x207   : > { %v2597_v27 = vld [vmem:[#allocation3 + $0xa2] sm:$0xff] }
 0x208   : > { %7375 = vmatprep.mubr.msk.f32.mxu1 %vm330_vm1, %v2597_v27  ;;  %v2537_v27 = vld [vmem:[#allocation3 + $0x30] sm:$0xff] }
 0x20a   : > { %v2598_v29 = vld [vmem:[#allocation3 + $0xaa] sm:$0xff] }
 0x20b   : > { %v2264_v28 = vpop.permute.xlu0 %2263  ;;  %7376 = vmatmul.mubr.msk.f32.gmra.mrb[18].mxu1 %vm330_vm1, %v2598_v29  ;;  %v7665_v29 = vpack.c.bf16 %v6227_v26, %v6226_v25  ;;  %v3337_v25 = vld [vmem:[#allocation3 + $0x3c] sm:$0xff]  ;;  %v3338_v26 = vld [vmem:[#allocation3 + $0x44] sm:$0xff] }
 0x20c   : > { %2269 = vst.msk [vmem:[#allocation3 + $0xb5] sm:$0xff] %vm1889_vm2, %v2264_v28  ;;  %v2538_v28 = vld [vmem:[#allocation3 + $0x38] sm:$0xff] }
 0x20f   : > { %v2266_v30 = vpop.permute.xlu1 %2265  ;;  %v2272_v31 = vpop.permute.xlu0 %2271 }
 0x210   : > { %2270 = vst.msk [vmem:[#allocation3 + $0xbd] sm:$0xff] %vm1889_vm2, %v2266_v30  ;;  %v2539_v30 = vld [vmem:[#allocation3 + $0x40] sm:$0xff] }
 0x211   : > { %2277 = vst.msk [vmem:[#allocation3 + $0xb4] sm:$0xff] %vm1898_vm3, %v2272_v31  ;;  %v6228_v31 = vld [vmem:[%s11406_s3 + $0x110] sm:$0xff] }
 0x213   : > { %v2274_v32 = vpop.permute.xlu1 %2273 }
 0x214   : > { %2278 = vst.msk [vmem:[#allocation3 + $0xbc] sm:$0xff] %vm1898_vm3, %v2274_v32  ;;  %v6229_v32 = vld [vmem:[%s11406_s3 + $0x118] sm:$0xff] }
 0x218   : > { %v2599_v33 = vld [vmem:[#allocation3 + $0xb2] sm:$0xff] }
 0x219   : > { %7378 = vmatprep.mubr.msk.f32.mxu1 %vm330_vm1, %v2599_v33  ;;  %v4256_v33 = vld [vmem:[%s11408_s5 + $0x180] sm:$0xff] }
 0x21b   : > { %v2306_v34 = vpop.permute.xlu0 %2305  ;;  %v2600_v35 = vld [vmem:[#allocation3 + $0xba] sm:$0xff] }
 0x21c   : > { %2311 = vst.msk [vmem:[#allocation3 + $0xc7] sm:$0xff] %vm1889_vm2, %v2306_v34  ;;  %7379 = vmatmul.mubr.msk.f32.gmra.mrb[20].mxu1 %vm330_vm1, %v2600_v35  ;;  %v4257_v34 = vld [vmem:[%s11408_s5 + $0x188] sm:$0xff]  ;;  %v4240_v35 = vld [vmem:[%s11408_s5 + $0x100] sm:$0xff] }
 0x21f   : > { %v2308_v36 = vpop.permute.xlu1 %2307  ;;  %v2314_v37 = vpop.permute.xlu0 %2313 }
 0x220   : > { %2312 = vst.msk [vmem:[#allocation3 + $0xcf] sm:$0xff] %vm1889_vm2, %v2308_v36  ;;  %v7705_v36 = vpack.c.bf16 %v4257_v34, %v4256_v33  ;;  %v3345_v33 = vld [vmem:[#allocation3 + $0x7c] sm:$0xff]  ;;  %v3346_v34 = vld [vmem:[#allocation3 + $0x84] sm:$0xff] }
 0x221   : > { %2319 = vst.msk [vmem:[#allocation3 + $0xc6] sm:$0xff] %vm1898_vm3, %v2314_v37  ;;  %v4241_v37 = vld [vmem:[%s11408_s5 + $0x108] sm:$0xff] }
 0x222   : > { %7706 = vmatprep.subr.bf16.mxu0 %v7705_v36  ;;  %v3348_v36 = vld [vmem:[#allocation3 + $0x94] sm:$0xff] }
 0x223   : > { %v2316_v38 = vpop.permute.xlu1 %2315 }
 0x224   : > { %2320 = vst.msk [vmem:[#allocation3 + $0xce] sm:$0xff] %vm1898_vm3, %v2316_v38  ;;  %v4258_v38 = vld [vmem:[%s11408_s5 + $0x190] sm:$0xff] }
 0x228   : > { %v2601_v39 = vld [vmem:[#allocation3 + $0xc2] sm:$0xff] }
 0x229   : > { %7381 = vmatprep.mubr.msk.f32.mxu1 %vm330_vm1, %v2601_v39  ;;  %v7669_v39 = vpack.c.bf16 %v6229_v32, %v6228_v31  ;;  %v3343_v31 = vld [vmem:[#allocation3 + $0x6c] sm:$0xff]  ;;  %v3344_v32 = vld [vmem:[#allocation3 + $0x74] sm:$0xff] }
 0x22b   : > { %v2348_v40 = vpop.permute.xlu0 %2347  ;;  %v2602_v41 = vld [vmem:[#allocation3 + $0xca] sm:$0xff] }
 0x22c   : > { %2353 = vst.msk [vmem:[#allocation3 + $0xd9] sm:$0xff] %vm1889_vm2, %v2348_v40  ;;  %7382 = vmatmul.mubr.msk.f32.gmra.mrb[22].mxu1 %vm330_vm1, %v2602_v41  ;;  %v7707_v40 = vpack.c.bf16 %v4241_v37, %v4240_v35  ;;  %v4259_v41 = vld [vmem:[%s11408_s5 + $0x198] sm:$0xff]  ;;  %v2556_v11 = vld [vmem:[#allocation3 + $0xc8] sm:$0xff]  ;;  %v2557_v12 = vld [vmem:[#allocation3 + $0xd0] sm:$0xff] }
 0x22d   : > { %v3347_v35 = vld [vmem:[#allocation3 + $0x8c] sm:$0xff]  ;;  %v3349_v37 = vld [vmem:[#allocation3 + $0x9c] sm:$0xff] }
 0x22e   : > { %7708 = vmatpush3.bf16.msra.mxu0 %v7707_v40  ;;  %v3352_v40 = vld [vmem:[#allocation3 + $0xb4] sm:$0xff] }
 0x22f   : > { %v2350_v42 = vpop.permute.xlu1 %2349  ;;  %v2356_v43 = vpop.permute.xlu0 %2355 }
 0x230   : > { %2354 = vst.msk [vmem:[#allocation3 + $0xe1] sm:$0xff] %vm1889_vm2, %v2350_v42  ;;  %v4242_v42 = vld [vmem:[%s11408_s5 + $0x110] sm:$0xff] }
 0x231   : > { %2361 = vst.msk [vmem:[#allocation3 + $0xd8] sm:$0xff] %vm1898_vm3, %v2356_v43  ;;  %v4243_v43 = vld [vmem:[%s11408_s5 + $0x118] sm:$0xff] }
 0x233   : > { %v2358_v44 = vpop.permute.xlu1 %2357 }
 0x234   : > { %2362 = vst.msk [vmem:[#allocation3 + $0xe0] sm:$0xff] %vm1898_vm3, %v2358_v44  ;;  %v2540_v44 = vld [vmem:[#allocation3 + $0x48] sm:$0xff] }
 0x238   : > { %v2603_v45 = vld [vmem:[#allocation3 + $0xd2] sm:$0xff] }
 0x239   : > { %7384 = vmatprep.mubr.msk.f32.mxu1 %vm330_vm1, %v2603_v45  ;;  %v7709_v45 = vpack.c.bf16 %v4259_v41, %v4258_v38  ;;  %v3350_v38 = vld [vmem:[#allocation3 + $0xa4] sm:$0xff]  ;;  %v3353_v41 = vld [vmem:[#allocation3 + $0xbc] sm:$0xff] }
 0x23a   : > { %v2398_v46 = vpop.permute.xlu1 %2397  ;;  %v2390_v47 = vpop.permute.xlu0 %2389 }
 0x23b   : > { %v2604_v48 = vld [vmem:[#allocation3 + $0xda] sm:$0xff]  ;;  %v2605_v49 = vld [vmem:[#allocation3 + $0xe2] sm:$0xff]  ;;  %2395 = vst.msk [vmem:[#allocation3 + $0xeb] sm:$0xff] %vm1889_vm2, %v2390_v47  ;;  %7710 = vmatprep.subr.bf16.mxu0 %v7709_v45 }
 0x23c   : > { %7385 = vmatmul.mubr.msk.f32.gmra.mrb[24].mxu1 %vm330_vm1, %v2604_v48  ;;  %2403 = vst.msk [vmem:[#allocation3 + $0xea] sm:$0xff] %vm1898_vm3, %v2398_v46  ;;  %v4260_v46 = vld [vmem:[%s11408_s5 + $0x1a0] sm:$0xff]  ;;  %v4261_v47 = vld [vmem:[%s11408_s5 + $0x1a8] sm:$0xff]  ;;  %v2541_v48 = vld [vmem:[#allocation3 + $0x50] sm:$0xff] }
 0x23d   : > { %7387 = vmatprep.mubr.msk.f32.mxu1 %vm330_vm1, %v2605_v49  ;;  %v7711_v49 = vpack.c.bf16 %v4243_v43, %v4242_v42  ;;  %v3354_v42 = vld [vmem:[#allocation3 + $0xc4] sm:$0xff]  ;;  %v3355_v43 = vld [vmem:[#allocation3 + $0xcc] sm:$0xff]  ;;  %v3357_v45 = vld [vmem:[#allocation3 + $0xdc] sm:$0xff] }
 0x23e   : > { %v2400_v51 = vpop.permute.xlu1 %2399  ;;  %v2392_v52 = vpop.permute.xlu0 %2391 }
 0x23f   : > { %2396 = vst.msk [vmem:[#allocation3 + $0xf3] sm:$0xff] %vm1889_vm2, %v2392_v52  ;;  %v4245_v52 = vld [vmem:[%s11408_s5 + $0x128] sm:$0xff]  ;;  %7712 = vmatpush3.bf16.msra.mxu0 %v7711_v49 }
 0x240   : > { %2404 = vst.msk [vmem:[#allocation3 + $0xf2] sm:$0xff] %vm1898_vm3, %v2400_v51  ;;  %v4244_v51 = vld [vmem:[%s11408_s5 + $0x120] sm:$0xff] }
 0x243   : > { %v2606_v53 = vld [vmem:[#allocation3 + $0xea] sm:$0xff] }
 0x244   : > { %7388 = vmatmul.mubr.msk.f32.gmra.mrb[26].mxu1 %vm330_vm1, %v2606_v53  ;;  %v7713_v53 = vpack.c.bf16 %v4261_v47, %v4260_v46  ;;  %v2560_v15 = vld [vmem:[#allocation3 + $0xe8] sm:$0xff] }
 0x245   : > { %v3358_v46 = vld [vmem:[#allocation3 + $0xe4] sm:$0xff] }
 0x246   : > { %7714 = vmatprep.subr.bf16.mxu0 %v7713_v53 }
 0x247   : > { %v2607_v54 = vld [vmem:[#allocation3 + $0xf2] sm:$0xff] }
 0x248   : > { %7390 = vmatprep.mubr.msk.f32.mxu1 %vm330_vm1, %v2607_v54  ;;  %v4262_v54 = vld [vmem:[%s11408_s5 + $0x1b0] sm:$0xff] }
 0x249   : > { %v2561_v16 = vld [vmem:[#allocation3 + $0xf0] sm:$0xff] }
 0x24a   : > { %v2440_v55 = vpop.permute.xlu1 %2439  ;;  %v2432_v56 = vpop.permute.xlu0 %2431  ;;  %v3359_v47 = vld [vmem:[#allocation3 + $0xec] sm:$0xff] }
 0x24b   : > { %2437 = vst.msk [vmem:[#allocation3 + $0xfd] sm:$0xff] %vm1889_vm2, %v2432_v56  ;;  %v2542_v56 = vld [vmem:[#allocation3 + $0x58] sm:$0xff] }
 0x24c   : > { %2445 = vst.msk [vmem:[#allocation3 + $0xfc] sm:$0xff] %vm1898_vm3, %v2440_v55  ;;  %v4263_v55 = vld [vmem:[%s11408_s5 + $0x1b8] sm:$0xff] }
 0x24e   : > { %v2442_v57 = vpop.permute.xlu1 %2441  ;;  %v2434_v58 = vpop.permute.xlu0 %2433 }
 0x24f   : > { %2438 = vst.msk [vmem:[#allocation3 + $0x105] sm:$0xff] %vm1889_vm2, %v2434_v58  ;;  %v7715_v58 = vpack.c.bf16 %v4245_v52, %v4244_v51 }
 0x250   : > { %2446 = vst.msk [vmem:[#allocation3 + $0x104] sm:$0xff] %vm1898_vm3, %v2442_v57  ;;  %v2543_v57 = vld [vmem:[#allocation3 + $0x60] sm:$0xff] }
 0x251   : > { %7716 = vmatpush3.bf16.msra.mxu0 %v7715_v58  ;;  %v3369_v58 = vld [vmem:[#allocation3 + $0x13c] sm:$0xff] }
 0x253   : > { %v2608_v59 = vld [vmem:[#allocation3 + $0xfa] sm:$0xff] }
 0x254   : > { %7391 = vmatmul.mubr.msk.f32.gmra.mrb[28].mxu1 %vm330_vm1, %v2608_v59  ;;  %v7717_v59 = vpack.c.bf16 %v4263_v55, %v4262_v54  ;;  %v3361_v49 = vld [vmem:[#allocation3 + $0xfc] sm:$0xff] }
 0x256   : > { %7718 = vmatprep.subr.bf16.mxu0 %v7717_v59  ;;  %v4264_v59 = vld [vmem:[%s11408_s5 + $0x1c0] sm:$0xff] }
 0x257   : > { %v2609_v60 = vld [vmem:[#allocation3 + $0x102] sm:$0xff] }
 0x258   : > { %7393 = vmatprep.mubr.msk.f32.mxu1 %vm330_vm1, %v2609_v60  ;;  %v4246_v60 = vld [vmem:[%s11408_s5 + $0x130] sm:$0xff]  ;;  %v3362_v51 = vld [vmem:[#allocation3 + $0x104] sm:$0xff] }
 0x25a   : > { %v2482_v61 = vpop.permute.xlu1 %2481  ;;  %v2474_v62 = vpop.permute.xlu0 %2473 }
 0x25b   : > { %2479 = vst.msk [vmem:[#allocation3 + $0x10f] sm:$0xff] %vm1889_vm2, %v2474_v62  ;;  %v2544_v62 = vld [vmem:[#allocation3 + $0x68] sm:$0xff] }
 0x25c   : > { %2487 = vst.msk [vmem:[#allocation3 + $0x10e] sm:$0xff] %vm1898_vm3, %v2482_v61  ;;  %v4247_v61 = vld [vmem:[%s11408_s5 + $0x138] sm:$0xff] }
 0x25e   : > { %v2484_v0 = vpop.permute.xlu1 %2483  ;;  %v2476_v50 = vpop.permute.xlu0 %2475 }
 0x25f   : > { %2480 = vst.msk [vmem:[#allocation3 + $0x117] sm:$0xff] %vm1889_vm2, %v2476_v50  ;;  %v7719_v50 = vpack.c.bf16 %v4247_v61, %v4246_v60  ;;  %v4265_v60 = vld [vmem:[%s11408_s5 + $0x1c8] sm:$0xff]  ;;  %v4248_v61 = vld [vmem:[%s11408_s5 + $0x140] sm:$0xff] }
 0x260   : > { %2488 = vst.msk [vmem:[#allocation3 + $0x116] sm:$0xff] %vm1898_vm3, %v2484_v0  ;;  %v2545_v0 = vld [vmem:[#allocation3 + $0x70] sm:$0xff] }
 0x261   : > { %7720 = vmatpush3.bf16.msra.mxu0 %v7719_v50 }
 0x263   : > { %v2610_v1 = vld [vmem:[#allocation3 + $0x10a] sm:$0xff] }
 0x264   : > { %7394 = vmatmul.mubr.msk.f32.gmra.mrb[30].mxu1 %vm330_vm1, %v2610_v1  ;;  %v2546_v1 = vld [vmem:[#allocation3 + $0x78] sm:$0xff]  ;;  %v3363_v52 = vld [vmem:[#allocation3 + $0x10c] sm:$0xff] }
 0x267   : > { %v2611_v2 = vld [vmem:[#allocation3 + $0x112] sm:$0xff] }
 0x268   : > { %7396 = vmatprep.mubr.msk.f32.mxu1 %vm330_vm1, %v2611_v2  ;;  %v2547_v2 = vld [vmem:[#allocation3 + $0x80] sm:$0xff]  ;;  %v3364_v53 = vld [vmem:[#allocation3 + $0x114] sm:$0xff] }
 0x26a   : > { %v2524_v3 = vpop.permute.xlu1 %2523  ;;  %v2516_v4 = vpop.permute.xlu0 %2515 }
 0x26b   : > { %2521 = vst.msk [vmem:[#allocation3 + $0x121] sm:$0xff] %vm1889_vm2, %v2516_v4  ;;  %v2549_v4 = vld [vmem:[#allocation3 + $0x90] sm:$0xff] }
 0x26c   : > { %2529 = vst.msk [vmem:[#allocation3 + $0x120] sm:$0xff] %vm1898_vm3, %v2524_v3  ;;  %v2548_v3 = vld [vmem:[#allocation3 + $0x88] sm:$0xff] }
 0x26e   : > { %v2526_v5 = vpop.permute.xlu1 %2525  ;;  %v2518_v6 = vpop.permute.xlu0 %2517 }
 0x26f   : > { %2522 = vst.msk [vmem:[#allocation3 + $0x129] sm:$0xff] %vm1889_vm2, %v2518_v6  ;;  %v2551_v6 = vld [vmem:[#allocation3 + $0xa0] sm:$0xff] }
 0x270   : > { %2530 = vst.msk [vmem:[#allocation3 + $0x128] sm:$0xff] %vm1898_vm3, %v2526_v5  ;;  %v2550_v5 = vld [vmem:[#allocation3 + $0x98] sm:$0xff] }
 0x273   : > { %v2612_v7 = vld [vmem:[#allocation3 + $0x11a] sm:$0xff] }
 0x274   : > { %7397 = vmatmul.mubr.msk.f32.gmra.mrb[32].mxu1 %vm330_vm1, %v2612_v7  ;;  %v2552_v7 = vld [vmem:[#allocation3 + $0xa8] sm:$0xff]  ;;  %v3365_v54 = vld [vmem:[#allocation3 + $0x11c] sm:$0xff] }
 0x277   : > { %v2613_v8 = vld [vmem:[#allocation3 + $0x122] sm:$0xff]  ;;  %v2614_v9 = vld [vmem:[#allocation3 + $0x12a] sm:$0xff] }
 0x278   : > { %7399 = vmatprep.mubr.msk.f32.mxu1 %vm330_vm1, %v2613_v8  ;;  %v2553_v8 = vld [vmem:[#allocation3 + $0xb0] sm:$0xff]  ;;  %v3366_v55 = vld [vmem:[#allocation3 + $0x124] sm:$0xff] }
 0x279   : > { %7400 = vmatmul.mubr.msk.f32.gmra.mrb[34].mxu1 %vm330_vm1, %v2614_v9  ;;  %v2554_v9 = vld [vmem:[#allocation3 + $0xb8] sm:$0xff] }
 0x27a   : > { %7426 = vmatprep.mubr.msk.f32.mxu1 %vm330_vm1, %v2531_v10  ;;  %v2555_v10 = vld [vmem:[#allocation3 + $0xc0] sm:$0xff] }
 0x27d   : > { %7427 = vmatmul.mubr.msk.f32.vlgmr.msra.gmra.mrb[0].mxu1 %vm330_vm1, %v2532_v13  ;;  %v2558_v13 = vld [vmem:[#allocation3 + $0xd8] sm:$0xff] }
 0x27e   : > { %7652 = vmatpush3.bf16.msra.mxu1 %v9417_v23  ;;  %7429 = vmatprep.mubr.msk.f32.mxu1 %vm330_vm1, %v2533_v17  ;;  %v7661_v23 = vpack.c.bf16 %v6225_v21, %v6224_v20  ;;  %v2562_v17 = vld [vmem:[#allocation3 + $0xf8] sm:$0xff]  ;;  %v2565_v20 = vld [vmem:[#allocation3 + $0x110] sm:$0xff] }
 0x27f   : > { %7654 = vmatprep.subr.bf16.mxu1 %v7653_v14  ;;  %v2566_v21 = vld [vmem:[#allocation3 + $0x118] sm:$0xff] }
 0x281   : > { %7430 = vmatmul.mubr.msk.f32.gmra.mrb[2].mxu1 %vm330_vm1, %v2534_v19  ;;  %v2564_v19 = vld [vmem:[#allocation3 + $0x108] sm:$0xff] }
 0x282   : > { %7432 = vmatprep.mubr.msk.f32.mxu1 %vm330_vm1, %v2535_v22  ;;  %7656 = vmatpush3.bf16.msra.mxu1 %v7653_v14  ;;  %v2559_v14 = vld [vmem:[#allocation3 + $0xe0] sm:$0xff] }
 0x283   : > { %7658 = vmatprep.subr.bf16.mxu1 %v7657_v18  ;;  %v3334_v22 = vld [vmem:[#allocation3 + $0x24] sm:$0xff] }
 0x285   : > { %7433 = vmatmul.mubr.msk.f32.gmra.mrb[4].mxu1 %vm330_vm1, %v2536_v24  ;;  %v3336_v24 = vld [vmem:[#allocation3 + $0x34] sm:$0xff] }
 0x286   : > { %7435 = vmatprep.mubr.msk.f32.mxu1 %vm330_vm1, %v2537_v27  ;;  %7660 = vmatpush3.bf16.msra.mxu1 %v7657_v18  ;;  %v2563_v18 = vld [vmem:[#allocation3 + $0x100] sm:$0xff]  ;;  %v3339_v27 = vld [vmem:[#allocation3 + $0x4c] sm:$0xff] }
 0x287   : > { %7662 = vmatprep.subr.bf16.mxu1 %v7661_v23 }
 0x289   : > { %7436 = vmatmul.mubr.msk.f32.gmra.mrb[6].mxu1 %vm330_vm1, %v2538_v28  ;;  %v3340_v28 = vld [vmem:[#allocation3 + $0x54] sm:$0xff] }
 0x28a   : > { %7438 = vmatprep.mubr.msk.f32.mxu1 %vm330_vm1, %v2539_v30  ;;  %7664 = vmatpush3.bf16.msra.mxu1 %v7661_v23  ;;  %v3335_v23 = vld [vmem:[#allocation3 + $0x2c] sm:$0xff]  ;;  %v3342_v30 = vld [vmem:[#allocation3 + $0x64] sm:$0xff] }
 0x28b   : > { %7666 = vmatprep.subr.bf16.mxu1 %v7665_v29 }
 0x28d   : > { %7439 = vmatmul.mubr.msk.f32.gmra.mrb[8].mxu1 %vm330_vm1, %v2540_v44  ;;  %v3356_v44 = vld [vmem:[#allocation3 + $0xd4] sm:$0xff] }
 0x28e   : > { %7441 = vmatprep.mubr.msk.f32.mxu1 %vm330_vm1, %v2541_v48  ;;  %7668 = vmatpush3.bf16.msra.mxu1 %v7665_v29  ;;  %v3341_v29 = vld [vmem:[#allocation3 + $0x5c] sm:$0xff]  ;;  %v3360_v48 = vld [vmem:[#allocation3 + $0xf4] sm:$0xff] }
 0x28f   : > { %7670 = vmatprep.subr.bf16.mxu1 %v7669_v39 }
 0x291   : > { %7442 = vmatmul.mubr.msk.f32.gmra.mrb[10].mxu1 %vm330_vm1, %v2542_v56  ;;  %v3368_v56 = vld [vmem:[#allocation3 + $0x134] sm:$0xff] }
 0x292   : > { %7444 = vmatprep.mubr.msk.f32.mxu1 %vm330_vm1, %v2543_v57  ;;  %7672 = vmatpush3.bf16.msra.mxu1 %v7669_v39  ;;  %v3351_v39 = vld [vmem:[#allocation3 + $0xac] sm:$0xff] }
 0x293   : > { %v3367_v57 = vld [vmem:[#allocation3 + $0x12c] sm:$0xff] }
 0x295   : > { %7445 = vmatmul.mubr.msk.f32.gmra.mrb[12].mxu1 %vm330_vm1, %v2544_v62  ;;  %v7721_v62 = vpack.c.bf16 %v4265_v60, %v4264_v59  ;;  %v4220_v59 = vld [vmem:[%s11408_s5 + $0x60] sm:$0xff]  ;;  %v4221_v60 = vld [vmem:[%s11408_s5 + $0x68] sm:$0xff] }
 0x296   : > { %7447 = vmatprep.mubr.msk.f32.mxu1 %vm330_vm1, %v2545_v0  ;;  %v4249_v0 = vld [vmem:[%s11408_s5 + $0x148] sm:$0xff] }
 0x297   : > { %v7723_v50 = vpack.c.bf16 %v4249_v0, %v4248_v61  ;;  %7722 = vmatprep.subr.bf16.mxu0 %v7721_v62  ;;  %v4238_v61 = vld [vmem:[%s11408_s5 + $0xf0] sm:$0xff]  ;;  %v4239_v62 = vld [vmem:[%s11408_s5 + $0xf8] sm:$0xff]  ;;  %v7699_v0 = vpack.c.bf16 %v4221_v60, %v4220_v59  ;;  %v4321_v60 = vld [vmem:[%s11408_s5 + $0x388] sm:$0xff] }
 0x299   : > { %7448 = vmatmul.mubr.msk.f32.gmra.mrb[14].mxu1 %vm330_vm1, %v2546_v1  ;;  %7724 = vmatpush3.bf16.msra.mxu0 %v7723_v50  ;;  %v4266_v1 = vld [vmem:[%s11408_s5 + $0x1d0] sm:$0xff]  ;;  %v7701_v50 = vpack.c.bf16 %v4239_v62, %v4238_v61 }
 0x29a   : > { %7450 = vmatprep.mubr.msk.f32.mxu1 %vm330_vm1, %v2547_v2  ;;  %v4267_v2 = vld [vmem:[%s11408_s5 + $0x1d8] sm:$0xff] }
 0x29d   : > { %7451 = vmatmul.mubr.msk.f32.gmra.mrb[16].mxu1 %vm330_vm1, %v2548_v3  ;;  %v7725_v3 = vpack.c.bf16 %v4267_v2, %v4266_v1  ;;  %v4222_v1 = vld [vmem:[%s11408_s5 + $0x70] sm:$0xff]  ;;  %v4223_v2 = vld [vmem:[%s11408_s5 + $0x78] sm:$0xff] }
 0x29e   : > { %7453 = vmatprep.mubr.msk.f32.mxu1 %vm330_vm1, %v2549_v4  ;;  %v4250_v4 = vld [vmem:[%s11408_s5 + $0x150] sm:$0xff] }
 0x29f   : > { %7726 = vmatprep.subr.bf16.mxu0 %v7725_v3  ;;  %v7703_v3 = vpack.c.bf16 %v4223_v2, %v4222_v1 }
 0x2a1   : > { %7454 = vmatmul.mubr.msk.f32.gmra.mrb[18].mxu1 %vm330_vm1, %v2550_v5  ;;  %v4251_v5 = vld [vmem:[%s11408_s5 + $0x158] sm:$0xff] }
 0x2a2   : > { %7456 = vmatprep.mubr.msk.f32.mxu1 %vm330_vm1, %v2551_v6  ;;  %v7727_v6 = vpack.c.bf16 %v4251_v5, %v4250_v4  ;;  %v9771_v4 = vld [vmem:[%s11407_s4] ss:$0 sm:$0xff] }
 0x2a4   : > { %7728 = vmatpush3.bf16.msra.mxu0 %v7727_v6 }
 0x2a5   : > { %7457 = vmatmul.mubr.msk.f32.gmra.mrb[20].mxu1 %vm330_vm1, %v2552_v7  ;;  %v4224_v7 = vld [vmem:[%s11408_s5 + $0x80] sm:$0xff] }
 0x2a6   : > { %7459 = vmatprep.mubr.msk.f32.mxu1 %vm330_vm1, %v2553_v8  ;;  %v4225_v8 = vld [vmem:[%s11408_s5 + $0x88] sm:$0xff] }
 0x2a9   : > { %7460 = vmatmul.mubr.msk.f32.gmra.mrb[22].mxu1 %vm330_vm1, %v2554_v9  ;;  %v4208_v9 = vld [vmem:[%s11408_s5] sm:$0xff] }
 0x2aa   : > { %7462 = vmatprep.mubr.msk.f32.mxu1 %vm330_vm1, %v2555_v10  ;;  %v7673_v10 = vpack.c.bf16 %v4225_v8, %v4224_v7 }
 0x2ac   : > { %7674 = vmatprep.subr.bf16.mxu1 %v7673_v10 }
 0x2ad   : > { %7463 = vmatmul.mubr.msk.f32.gmra.mrb[24].mxu1 %vm330_vm1, %v2556_v11  ;;  %v4209_v11 = vld [vmem:[%s11408_s5 + $0x8] sm:$0xff] }
 0x2ae   : > { %7465 = vmatprep.mubr.msk.f32.mxu1 %vm330_vm1, %v2557_v12  ;;  %v7675_v12 = vpack.c.bf16 %v4209_v11, %v4208_v9 }
 0x2b1   : > { %7466 = vmatmul.mubr.msk.f32.gmra.mrb[26].mxu1 %vm330_vm1, %v2558_v13  ;;  %v4226_v13 = vld [vmem:[%s11408_s5 + $0x90] sm:$0xff] }
 0x2b2   : > { %7468 = vmatprep.mubr.msk.f32.mxu1 %vm330_vm1, %v2559_v14  ;;  %v4227_v14 = vld [vmem:[%s11408_s5 + $0x98] sm:$0xff] }
 0x2b5   : > { %7469 = vmatmul.mubr.msk.f32.gmra.mrb[28].mxu1 %vm330_vm1, %v2560_v15  ;;  %v4210_v15 = vld [vmem:[%s11408_s5 + $0x10] sm:$0xff] }
 0x2b6   : > { %7471 = vmatprep.mubr.msk.f32.mxu1 %vm330_vm1, %v2561_v16  ;;  %v7677_v16 = vpack.c.bf16 %v4227_v14, %v4226_v13 }
 0x2b9   : > { %7472 = vmatmul.mubr.msk.f32.gmra.mrb[30].mxu1 %vm330_vm1, %v2562_v17  ;;  %v4211_v17 = vld [vmem:[%s11408_s5 + $0x18] sm:$0xff] }
 0x2ba   : > { %7474 = vmatprep.mubr.msk.f32.mxu1 %vm330_vm1, %v2563_v18  ;;  %v4268_v18 = vld [vmem:[%s11408_s5 + $0x1e0] sm:$0xff] }
 0x2bd   : > { %7475 = vmatmul.mubr.msk.f32.gmra.mrb[32].mxu1 %vm330_vm1, %v2564_v19  ;;  %v4269_v19 = vld [vmem:[%s11408_s5 + $0x1e8] sm:$0xff] }
 0x2be   : > { %7477 = vmatprep.mubr.msk.f32.mxu1 %vm330_vm1, %v2565_v20  ;;  %v7679_v20 = vpack.c.bf16 %v4211_v17, %v4210_v15 }
 0x2c1   : > { %7478 = vmatmul.mubr.msk.f32.gmra.mrb[34].mxu1 %vm330_vm1, %v2566_v21  ;;  %v7729_v21 = vpack.c.bf16 %v4269_v19, %v4268_v18 }
 0x2c2   : > { %7504 = vmatprep.mubr.msk.f32.mxu1 %vm330_vm1, %v3334_v22  ;;  %v4252_v22 = vld [vmem:[%s11408_s5 + $0x160] sm:$0xff] }
 0x2c3   : > { %7730 = vmatprep.subr.bf16.mxu0 %v7729_v21 }
 0x2c5   : > { %7505 = vmatmul.mubr.msk.f32.vlgmr.msra.gmra.mrb[0].mxu1 %vm330_vm1, %v3335_v23  ;;  %v4253_v23 = vld [vmem:[%s11408_s5 + $0x168] sm:$0xff] }
 0x2c6   : > { %7507 = vmatprep.mubr.msk.f32.mxu1 %vm330_vm1, %v3336_v24  ;;  %7676 = vmatpush3.bf16.msra.mxu1 %v7675_v12  ;;  %v7731_v24 = vpack.c.bf16 %v4253_v23, %v4252_v22 }
 0x2c7   : > { %7678 = vmatprep.subr.bf16.mxu1 %v7677_v16 }
 0x2c8   : > { %7732 = vmatpush3.bf16.msra.mxu0 %v7731_v24 }
 0x2c9   : > { %7508 = vmatmul.mubr.msk.f32.gmra.mrb[2].mxu1 %vm330_vm1, %v3337_v25  ;;  %v4228_v25 = vld [vmem:[%s11408_s5 + $0xa0] sm:$0xff] }
 0x2ca   : > { %7510 = vmatprep.mubr.msk.f32.mxu1 %vm330_vm1, %v3338_v26  ;;  %7680 = vmatpush3.bf16.msra.mxu1 %v7679_v20  ;;  %v4229_v26 = vld [vmem:[%s11408_s5 + $0xa8] sm:$0xff] }
 0x2cd   : > { %7511 = vmatmul.mubr.msk.f32.gmra.mrb[4].mxu1 %vm330_vm1, %v3339_v27  ;;  %v4212_v27 = vld [vmem:[%s11408_s5 + $0x20] sm:$0xff] }
 0x2ce   : > { %7513 = vmatprep.mubr.msk.f32.mxu1 %vm330_vm1, %v3340_v28  ;;  %v7681_v28 = vpack.c.bf16 %v4229_v26, %v4228_v25 }
 0x2d0   : > { %7682 = vmatprep.subr.bf16.mxu1 %v7681_v28 }
 0x2d1   : > { %7514 = vmatmul.mubr.msk.f32.gmra.mrb[6].mxu1 %vm330_vm1, %v3341_v29  ;;  %v4213_v29 = vld [vmem:[%s11408_s5 + $0x28] sm:$0xff] }
 0x2d2   : > { %7516 = vmatprep.mubr.msk.f32.mxu1 %vm330_vm1, %v3342_v30  ;;  %v4230_v30 = vld [vmem:[%s11408_s5 + $0xb0] sm:$0xff] }
 0x2d5   : > { %7517 = vmatmul.mubr.msk.f32.gmra.mrb[8].mxu1 %vm330_vm1, %v3343_v31  ;;  %v4231_v31 = vld [vmem:[%s11408_s5 + $0xb8] sm:$0xff] }
 0x2d6   : > { %7519 = vmatprep.mubr.msk.f32.mxu1 %vm330_vm1, %v3344_v32  ;;  %v7683_v32 = vpack.c.bf16 %v4213_v29, %v4212_v27 }
 0x2d8   : > { %7684 = vmatpush3.bf16.msra.mxu1 %v7683_v32 }
 0x2d9   : > { %7520 = vmatmul.mubr.msk.f32.gmra.mrb[10].mxu1 %vm330_vm1, %v3345_v33  ;;  %v7685_v33 = vpack.c.bf16 %v4231_v31, %v4230_v30 }
 0x2da   : > { %7522 = vmatprep.mubr.msk.f32.mxu1 %vm330_vm1, %v3346_v34  ;;  %v4214_v34 = vld [vmem:[%s11408_s5 + $0x30] sm:$0xff] }
 0x2db   : > { %7686 = vmatprep.subr.bf16.mxu1 %v7685_v33 }
 0x2dd   : > { %7523 = vmatmul.mubr.msk.f32.gmra.mrb[12].mxu1 %vm330_vm1, %v3347_v35  ;;  %v4215_v35 = vld [vmem:[%s11408_s5 + $0x38] sm:$0xff] }
 0x2de   : > { %7525 = vmatprep.mubr.msk.f32.mxu1 %vm330_vm1, %v3348_v36  ;;  %v4232_v36 = vld [vmem:[%s11408_s5 + $0xc0] sm:$0xff] }
 0x2e1   : > { %7526 = vmatmul.mubr.msk.f32.gmra.mrb[14].mxu1 %vm330_vm1, %v3349_v37  ;;  %v4233_v37 = vld [vmem:[%s11408_s5 + $0xc8] sm:$0xff] }
 0x2e2   : > { %7528 = vmatprep.mubr.msk.f32.mxu1 %vm330_vm1, %v3350_v38  ;;  %v7687_v38 = vpack.c.bf16 %v4215_v35, %v4214_v34 }
 0x2e4   : > { %7688 = vmatpush3.bf16.msra.mxu1 %v7687_v38 }
 0x2e5   : > { %7529 = vmatmul.mubr.msk.f32.gmra.mrb[16].mxu1 %vm330_vm1, %v3351_v39  ;;  %v4270_v39 = vld [vmem:[%s11408_s5 + $0x1f0] sm:$0xff] }
 0x2e6   : > { %7531 = vmatprep.mubr.msk.f32.mxu1 %vm330_vm1, %v3352_v40  ;;  %v4271_v40 = vld [vmem:[%s11408_s5 + $0x1f8] sm:$0xff] }
 0x2e9   : > { %7532 = vmatmul.mubr.msk.f32.gmra.mrb[18].mxu1 %vm330_vm1, %v3353_v41  ;;  %v4254_v41 = vld [vmem:[%s11408_s5 + $0x170] sm:$0xff] }
 0x2ea   : > { %7534 = vmatprep.mubr.msk.f32.mxu1 %vm330_vm1, %v3354_v42  ;;  %v7689_v42 = vpack.c.bf16 %v4233_v37, %v4232_v36 }
 0x2ec   : > { %7690 = vmatprep.subr.bf16.mxu1 %v7689_v42 }
 0x2ed   : > { %7535 = vmatmul.mubr.msk.f32.gmra.mrb[20].mxu1 %vm330_vm1, %v3355_v43  ;;  %v4216_v43 = vld [vmem:[%s11408_s5 + $0x40] sm:$0xff] }
 0x2ee   : > { %7537 = vmatprep.mubr.msk.f32.mxu1 %vm330_vm1, %v3356_v44  ;;  %v4217_v44 = vld [vmem:[%s11408_s5 + $0x48] sm:$0xff] }
 0x2f1   : > { %7538 = vmatmul.mubr.msk.f32.gmra.mrb[22].mxu1 %vm330_vm1, %v3357_v45  ;;  %v7733_v45 = vpack.c.bf16 %v4271_v40, %v4270_v39 }
 0x2f2   : > { %7540 = vmatprep.mubr.msk.f32.mxu1 %vm330_vm1, %v3358_v46  ;;  %v4255_v46 = vld [vmem:[%s11408_s5 + $0x178] sm:$0xff] }
 0x2f3   : > { %7734 = vmatprep.subr.bf16.mxu0 %v7733_v45 }
 0x2f5   : > { %7541 = vmatmul.mubr.msk.f32.gmra.mrb[24].mxu1 %vm330_vm1, %v3359_v47  ;;  %v7735_v47 = vpack.c.bf16 %v4255_v46, %v4254_v41 }
 0x2f6   : > { %7543 = vmatprep.mubr.msk.f32.mxu1 %vm330_vm1, %v3360_v48  ;;  %v4234_v48 = vld [vmem:[%s11408_s5 + $0xd0] sm:$0xff] }
 0x2f7   : > { %7736 = vmatpush3.bf16.msra.mxu0 %v7735_v47 }
 0x2f9   : > { %7544 = vmatmul.mubr.msk.f32.gmra.mrb[26].mxu1 %vm330_vm1, %v3361_v49  ;;  %v4235_v49 = vld [vmem:[%s11408_s5 + $0xd8] sm:$0xff] }
 0x2fa   : > { %7546 = vmatprep.mubr.msk.f32.mxu1 %vm330_vm1, %v3362_v51  ;;  %v7691_v51 = vpack.c.bf16 %v4217_v44, %v4216_v43 }
 0x2fc   : > { %7692 = vmatpush3.bf16.msra.mxu1 %v7691_v51 }
 0x2fd   : > { %7547 = vmatmul.mubr.msk.f32.gmra.mrb[28].mxu1 %vm330_vm1, %v3363_v52  ;;  %v7693_v52 = vpack.c.bf16 %v4235_v49, %v4234_v48 }
 0x2fe   : > { %7549 = vmatprep.mubr.msk.f32.mxu1 %vm330_vm1, %v3364_v53  ;;  %v4218_v53 = vld [vmem:[%s11408_s5 + $0x50] sm:$0xff] }
 0x2ff   : > { %7694 = vmatprep.subr.bf16.mxu1 %v7693_v52 }
 0x301   : > { %7550 = vmatmul.mubr.msk.f32.gmra.mrb[30].mxu1 %vm330_vm1, %v3365_v54  ;;  %v4219_v54 = vld [vmem:[%s11408_s5 + $0x58] sm:$0xff] }
 0x302   : > { %7552 = vmatprep.mubr.msk.f32.mxu1 %vm330_vm1, %v3366_v55  ;;  %v4236_v55 = vld [vmem:[%s11408_s5 + $0xe0] sm:$0xff] }
 0x305   : > { %7553 = vmatmul.mubr.msk.f32.gmra.mrb[32].mxu1 %vm330_vm1, %v3367_v57  ;;  %v7695_v57 = vpack.c.bf16 %v4219_v54, %v4218_v53  ;;  %v4288_v53 = vld [vmem:[%s11408_s5 + $0x280] sm:$0xff]  ;;  %v4289_v54 = vld [vmem:[%s11408_s5 + $0x288] sm:$0xff] }
 0x306   : > { %7555 = vmatprep.mubr.msk.f32.mxu1 %vm330_vm1, %v3368_v56  ;;  %v4237_v56 = vld [vmem:[%s11408_s5 + $0xe8] sm:$0xff]  ;;  %v7737_v59 = vpack.c.bf16 %v4289_v54, %v4288_v53 }
 0x307   : > { %7696 = vmatpush3.bf16.msra.mxu1 %v7695_v57 }
 0x309   : > { %7556 = vmatmul.mubr.msk.f32.gmra.mrb[34].mxu1 %vm330_vm1, %v3369_v58  ;;  %v7697_v58 = vpack.c.bf16 %v4237_v56, %v4236_v55  ;;  %v4320_v55 = vld [vmem:[%s11408_s5 + $0x380] sm:$0xff] }
 0x30b   : > { %7698 = vmatprep.subr.bf16.mxu1 %v7697_v58 }
 0x30c   : > { %7700 = vmatpush3.bf16.msra.mxu1 %v7699_v0  ;;  %v7769_v0 = vpack.c.bf16 %v4321_v60, %v4320_v55 }
 0x30d   : > { %7702 = vmatprep.subr.bf16.mxu1 %v7701_v50 }
 0x30e   : > { %7770 = vmatprep.subr.bf16.mxu0 %v7769_v0 }
 0x310   : > { %7704 = vmatpush3.bf16.msra.mxu1 %v7703_v3 }
 0x311   : > { %7738 = vmatprep.subr.bf16.mxu1 %v7737_v59 }
 0x398   : > { %v7506_v5 = vpop.f32.mrb[0].mxu1 }
 0x399   : > { %v3780_v6 = vadd.f32 %v7506_v5, %v9771_v4  ;;  %v3557_v7 = vpop.f32.mrb[1].mxu1 }
 0x39a   : > { %v3779_v8 = vadd.f32 %v9771_v4, %v3557_v7 }
 0x39b   : > { %v3816_v9 = vmax.f32 %v3780_v6, 0.0 }
 0x39c   : > { %v3815_v10 = vmax.f32 %v3779_v8, 0.0  ;;  %v7509_v11 = vpop.f32.mrb[2].mxu1 }
 0x39d   : > { %3853 = vst.msk [vmem:[#allocation4 + $0x8] sm:$0xff] %vm3851_vm5, %v3816_v9  ;;  %v3782_v12 = vadd.f32 %v7509_v11, %v9771_v4  ;;  %v3567_v13 = vpop.f32.mrb[3].mxu1 }
 0x39e   : > { %3852 = vst.msk [vmem:[#allocation4] sm:$0xff] %vm3851_vm5, %v3815_v10  ;;  %v3781_v14 = vadd.f32 %v9771_v4, %v3567_v13 }
 0x39f   : > { %v3818_v15 = vmax.f32 %v3782_v12, 0.0 }
 0x3a0   : > { %v3817_v16 = vmax.f32 %v3781_v14, 0.0  ;;  %v7512_v17 = vpop.f32.mrb[4].mxu1 }
 0x3a1   : > { %3855 = vst.msk [vmem:[#allocation4 + $0x18] sm:$0xff] %vm3851_vm5, %v3818_v15  ;;  %v3784_v18 = vadd.f32 %v7512_v17, %v9771_v4  ;;  %v3577_v19 = vpop.f32.mrb[5].mxu1 }
 0x3a2   : > { %3854 = vst.msk [vmem:[#allocation4 + $0x10] sm:$0xff] %vm3851_vm5, %v3817_v16  ;;  %v3783_v20 = vadd.f32 %v9771_v4, %v3577_v19 }
 0x3a3   : > { %v3820_v21 = vmax.f32 %v3784_v18, 0.0 }
 0x3a4   : > { %v3819_v22 = vmax.f32 %v3783_v20, 0.0  ;;  %v7515_v23 = vpop.f32.mrb[6].mxu1 }
 0x3a5   : > { %3857 = vst.msk [vmem:[#allocation4 + $0x28] sm:$0xff] %vm3851_vm5, %v3820_v21  ;;  %v3786_v24 = vadd.f32 %v7515_v23, %v9771_v4  ;;  %v3587_v25 = vpop.f32.mrb[7].mxu1  ;;  %v3889_v35 = vld [vmem:[#allocation4 + $0x1] ss:$2 sm:$0xff] }
 0x3a6   : > { %3856 = vst.msk [vmem:[#allocation4 + $0x20] sm:$0xff] %vm3851_vm5, %v3819_v22  ;;  %v3785_v26 = vadd.f32 %v9771_v4, %v3587_v25 }
 0x3a7   : > { %v3822_v27 = vmax.f32 %v3786_v24, 0.0 }
 0x3a8   : > { %v3821_v28 = vmax.f32 %v3785_v26, 0.0  ;;  %v7518_v29 = vpop.f32.mrb[8].mxu1 }
 0x3a9   : > { %3859 = vst.msk [vmem:[#allocation4 + $0x38] sm:$0xff] %vm3851_vm5, %v3822_v27  ;;  %v3788_v30 = vadd.f32 %v7518_v29, %v9771_v4  ;;  %v3597_v31 = vpop.f32.mrb[9].mxu1  ;;  %v3891_v33 = vld [vmem:[#allocation4 + $0x2] ss:$2 sm:$0xff] }
 0x3aa   : > { %3858 = vst.msk [vmem:[#allocation4 + $0x30] sm:$0xff] %vm3851_vm5, %v3821_v28  ;;  %v3787_v32 = vadd.f32 %v9771_v4, %v3597_v31  ;;  %v3892_v42 = vmax.f32 %v3889_v35, %v3891_v33 }
 0x3ab   : > { %v3824_v34 = vmax.f32 %v3788_v30, 0.0 }
 0x3ac   : > { %v3823_v36 = vmax.f32 %v3787_v32, 0.0  ;;  %v7521_v37 = vpop.f32.mrb[10].mxu1 }
 0x3ad   : > { %v3894_v38 = vld [vmem:[#allocation4 + $0x13] ss:$2 sm:$0xff]  ;;  %v3896_v39 = vld [vmem:[#allocation4 + $0x14] ss:$2 sm:$0xff]  ;;  %3861 = vst.msk [vmem:[#allocation4 + $0x48] sm:$0xff] %vm3851_vm5, %v3824_v34  ;;  %v3790_v40 = vadd.f32 %v7521_v37, %v9771_v4  ;;  %v3607_v41 = vpop.f32.mrb[11].mxu1 }
 0x3ae   : > { %v3897_v43 = vmax.f32 %v3894_v38, %v3896_v39  ;;  %3860 = vst.msk [vmem:[#allocation4 + $0x40] sm:$0xff] %vm3851_vm5, %v3823_v36  ;;  %v3789_v44 = vadd.f32 %v9771_v4, %v3607_v41 }
 0x3af   : > { %v3826_v45 = vmax.f32 %v3790_v40, 0.0 }
 0x3b0   : > { %v3898_v46 = vmax.f32 %v3892_v42, %v3897_v43  ;;  %v3825_v47 = vmax.f32 %v3789_v44, 0.0  ;;  %v7524_v48 = vpop.f32.mrb[12].mxu1 }
 0x3b1   : > { %3863 = vst.msk [vmem:[#allocation4 + $0x58] sm:$0xff] %vm3851_vm5, %v3826_v45  ;;  %v3792_v49 = vadd.f32 %v7524_v48, %v9771_v4  ;;  %v3617_v51 = vpop.f32.mrb[13].mxu1  ;;  %v3901_v56 = vld [vmem:[#allocation4 + $0x25] ss:$2 sm:$0xff]  ;;  %v3903_v57 = vld [vmem:[#allocation4 + $0x26] ss:$2 sm:$0xff] }
 0x3b2   : > { %3899 = vst.msk [vmem:[#allocation5] sm:$0xff] %vm3851_vm5, %v3898_v46  ;;  %3862 = vst.msk [vmem:[#allocation4 + $0x50] sm:$0xff] %vm3851_vm5, %v3825_v47  ;;  %v3791_v52 = vadd.f32 %v9771_v4, %v3617_v51  ;;  %v3904_v5 = vmax.f32 %v3901_v56, %v3903_v57 }
 0x3b3   : > { %v3828_v58 = vmax.f32 %v3792_v49, 0.0 }
 0x3b4   : > { %v3827_v61 = vmax.f32 %v3791_v52, 0.0  ;;  %v7527_v62 = vpop.f32.mrb[14].mxu1 }
 0x3b5   : > { %v3906_v50 = vld [vmem:[#allocation4 + $0x37] ss:$2 sm:$0xff]  ;;  %v3908_v1 = vld [vmem:[#allocation4 + $0x38] ss:$2 sm:$0xff]  ;;  %3865 = vst.msk [vmem:[#allocation4 + $0x68] sm:$0xff] %vm3851_vm5, %v3828_v58  ;;  %v3794_v2 = vadd.f32 %v7527_v62, %v9771_v4  ;;  %v3627_v3 = vpop.f32.mrb[15].mxu1 }
 0x3b6   : > { %v3909_v6 = vmax.f32 %v3906_v50, %v3908_v1  ;;  %3864 = vst.msk [vmem:[#allocation4 + $0x60] sm:$0xff] %vm3851_vm5, %v3827_v61  ;;  %v3793_v7 = vadd.f32 %v9771_v4, %v3627_v3 }
 0x3b7   : > { %v3830_v8 = vmax.f32 %v3794_v2, 0.0 }
 0x3b8   : > { %v3910_v9 = vmax.f32 %v3904_v5, %v3909_v6  ;;  %v3829_v10 = vmax.f32 %v3793_v7, 0.0  ;;  %v7530_v11 = vpop.f32.mrb[16].mxu1 }
 0x3b9   : > { %v3913_v12 = vld [vmem:[#allocation4 + $0x49] ss:$2 sm:$0xff]  ;;  %3867 = vst.msk [vmem:[#allocation4 + $0x78] sm:$0xff] %vm3851_vm5, %v3830_v8  ;;  %v3796_v13 = vadd.f32 %v7530_v11, %v9771_v4  ;;  %v3637_v14 = vpop.f32.mrb[17].mxu1  ;;  %v3989_v16 = vld [vmem:[#allocation5 + $0x5] sm:$0x1] }
 0x3ba   : > { %3911 = vst.msk [vmem:[#allocation5 + $0x8] sm:$0xff] %vm3851_vm5, %v3910_v9  ;;  %3866 = vst.msk [vmem:[#allocation4 + $0x70] sm:$0xff] %vm3851_vm5, %v3829_v10  ;;  %v3795_v15 = vadd.f32 %v9771_v4, %v3637_v14  ;;  %v3991_v17 = vld [vmem:[#allocation5 + $0x7] sm:$0x1]  ;;  %v3985_v18 = vld [vmem:[#allocation5 + $0x1] sm:$0x1] }
 0x3bb   : > { %v3915_v19 = vld [vmem:[#allocation4 + $0x4a] ss:$2 sm:$0xff]  ;;  %v3832_v20 = vmax.f32 %v3796_v13, 0.0  ;;  %v8330_v21 = vpack.i.bf16 %v3989_v16, %v3991_v17  ;;  %v3987_v22 = vld [vmem:[#allocation5 + $0x3] sm:$0x1] }
 0x3bc   : > { %v3831_v23 = vmax.f32 %v3795_v15, 0.0  ;;  %v8325_v24 = vpack.i.bf16 %v3985_v18, %v3987_v22  ;;  %v7533_v25 = vpop.f32.mrb[18].mxu1  ;;  %v3916_v30 = vmax.f32 %v3913_v12, %v3915_v19 }
 0x3bd   : > { %v3918_v26 = vld [vmem:[#allocation4 + $0x5b] ss:$2 sm:$0xff]  ;;  %v3920_v27 = vld [vmem:[#allocation4 + $0x5c] ss:$2 sm:$0xff]  ;;  %3869 = vst.msk [vmem:[#allocation4 + $0x88] sm:$0xff] %vm3851_vm5, %v3832_v20  ;;  %8331 = vrot.lane.b32.xlu1 %v8330_v21, %s8471_s26  ;;  %v3798_v28 = vadd.f32 %v7533_v25, %v9771_v4  ;;  %v3647_v29 = vpop.f32.mrb[19].mxu1 }
 0x3be   : > { %v3921_v31 = vmax.f32 %v3918_v26, %v3920_v27  ;;  %3868 = vst.msk [vmem:[#allocation4 + $0x80] sm:$0xff] %vm3851_vm5, %v3831_v23  ;;  %8326 = vrot.lane.b32.xlu0 %v8325_v24, %s8471_s26  ;;  %v3797_v32 = vadd.f32 %v9771_v4, %v3647_v29 }
 0x3bf   : > { %v3834_v33 = vmax.f32 %v3798_v28, 0.0 }
 0x3c0   : > { %v3922_v34 = vmax.f32 %v3916_v30, %v3921_v31  ;;  %v3833_v35 = vmax.f32 %v3797_v32, 0.0  ;;  %v7536_v36 = vpop.f32.mrb[20].mxu1 }
 0x3c1   : > { %v3925_v37 = vld [vmem:[#allocation4 + $0x6d] ss:$2 sm:$0xff]  ;;  %3871 = vst.msk [vmem:[#allocation4 + $0x98] sm:$0xff] %vm3851_vm5, %v3834_v33  ;;  %v3800_v38 = vadd.f32 %v7536_v36, %v9771_v4  ;;  %v3657_v39 = vpop.f32.mrb[21].mxu1  ;;  %v3993_v43 = vld [vmem:[#allocation5 + $0x9] sm:$0x1] }
 0x3c2   : > { %3923 = vst.msk [vmem:[#allocation5 + $0x10] sm:$0xff] %vm3851_vm5, %v3922_v34  ;;  %3870 = vst.msk [vmem:[#allocation4 + $0x90] sm:$0xff] %vm3851_vm5, %v3833_v35  ;;  %v3799_v40 = vadd.f32 %v9771_v4, %v3657_v39  ;;  %v3997_v41 = vld [vmem:[#allocation5 + $0xd] sm:$0x1]  ;;  %v3999_v42 = vld [vmem:[#allocation5 + $0xf] sm:$0x1] }
 0x3c3   : > { %v3927_v44 = vld [vmem:[#allocation4 + $0x6e] ss:$2 sm:$0xff]  ;;  %v3836_v45 = vmax.f32 %v3800_v38, 0.0  ;;  %v8340_v46 = vpack.i.bf16 %v3997_v41, %v3999_v42  ;;  %v3995_v47 = vld [vmem:[#allocation5 + $0xb] sm:$0x1] }
 0x3c4   : > { %v3835_v48 = vmax.f32 %v3799_v40, 0.0  ;;  %v8335_v49 = vpack.i.bf16 %v3993_v43, %v3995_v47  ;;  %v7539_v51 = vpop.f32.mrb[22].mxu1  ;;  %v3928_v56 = vmax.f32 %v3925_v37, %v3927_v44 }
 0x3c5   : > { %v3930_v52 = vld [vmem:[#allocation4 + $0x7f] ss:$2 sm:$0xff]  ;;  %v3932_v53 = vld [vmem:[#allocation4 + $0x80] ss:$2 sm:$0xff]  ;;  %3873 = vst.msk [vmem:[#allocation4 + $0xa8] sm:$0xff] %vm3851_vm5, %v3836_v45  ;;  %8341 = vrot.lane.b32.xlu1 %v8340_v46, %s8471_s26  ;;  %v3802_v54 = vadd.f32 %v7539_v51, %v9771_v4  ;;  %v3667_v55 = vpop.f32.mrb[23].mxu1 }
 0x3c6   : > { %v3933_v57 = vmax.f32 %v3930_v52, %v3932_v53  ;;  %3872 = vst.msk [vmem:[#allocation4 + $0xa0] sm:$0xff] %vm3851_vm5, %v3835_v48  ;;  %8336 = vrot.lane.b32.xlu0 %v8335_v49, %s8471_s26  ;;  %v3801_v58 = vadd.f32 %v9771_v4, %v3667_v55 }
 0x3c7   : > { %v3838_v59 = vmax.f32 %v3802_v54, 0.0 }
 0x3c8   : > { %v3934_v60 = vmax.f32 %v3928_v56, %v3933_v57  ;;  %v3837_v61 = vmax.f32 %v3801_v58, 0.0  ;;  %v7542_v62 = vpop.f32.mrb[24].mxu1 }
 0x3c9   : > { %3875 = vst.msk [vmem:[#allocation4 + $0xb8] sm:$0xff] %vm3851_vm5, %v3838_v59  ;;  %v3804_v0 = vadd.f32 %v7542_v62, %v9771_v4  ;;  %v3677_v50 = vpop.f32.mrb[25].mxu1  ;;  %v4005_v1 = vld [vmem:[#allocation5 + $0x15] sm:$0x1]  ;;  %v4007_v3 = vld [vmem:[#allocation5 + $0x17] sm:$0x1] }
 0x3ca   : > { %3935 = vst.msk [vmem:[#allocation5 + $0x18] sm:$0xff] %vm3851_vm5, %v3934_v60  ;;  %3874 = vst.msk [vmem:[#allocation4 + $0xb0] sm:$0xff] %vm3851_vm5, %v3837_v61  ;;  %v3803_v2 = vadd.f32 %v9771_v4, %v3677_v50  ;;  %v4001_v5 = vld [vmem:[#allocation5 + $0x11] sm:$0x1]  ;;  %v4003_v6 = vld [vmem:[#allocation5 + $0x13] sm:$0x1]  ;;  %v8350_v8 = vpack.i.bf16 %v4005_v1, %v4007_v3 }
 0x3cb   : > { %v3840_v7 = vmax.f32 %v3804_v0, 0.0  ;;  %v8345_v9 = vpack.i.bf16 %v4001_v5, %v4003_v6  ;;  %v3937_v17 = vld [vmem:[#allocation4 + $0x91] ss:$2 sm:$0xff] }
 0x3cc   : > { %v3839_v10 = vmax.f32 %v3803_v2, 0.0  ;;  %v7545_v11 = vpop.f32.mrb[26].mxu1  ;;  %8351 = vrot.lane.b32.xlu1 %v8350_v8, %s8471_s26 }
 0x3cd   : > { %3877 = vst.msk [vmem:[#allocation4 + $0xc8] sm:$0xff] %vm3851_vm5, %v3840_v7  ;;  %8346 = vrot.lane.b32.xlu0 %v8345_v9, %s8471_s26  ;;  %v3806_v12 = vadd.f32 %v7545_v11, %v9771_v4  ;;  %v3687_v13 = vpop.f32.mrb[27].mxu1  ;;  %v3939_v15 = vld [vmem:[#allocation4 + $0x92] ss:$2 sm:$0xff] }
 0x3ce   : > { %3876 = vst.msk [vmem:[#allocation4 + $0xc0] sm:$0xff] %vm3851_vm5, %v3839_v10  ;;  %v3805_v14 = vadd.f32 %v9771_v4, %v3687_v13  ;;  %v3940_v24 = vmax.f32 %v3937_v17, %v3939_v15 }
 0x3cf   : > { %v3842_v16 = vmax.f32 %v3806_v12, 0.0 }
 0x3d0   : > { %v3841_v18 = vmax.f32 %v3805_v14, 0.0  ;;  %v7548_v19 = vpop.f32.mrb[28].mxu1 }
 0x3d1   : > { %v3942_v20 = vld [vmem:[#allocation4 + $0xa3] ss:$2 sm:$0xff]  ;;  %v3944_v21 = vld [vmem:[#allocation4 + $0xa4] ss:$2 sm:$0xff]  ;;  %3879 = vst.msk [vmem:[#allocation4 + $0xd8] sm:$0xff] %vm3851_vm5, %v3842_v16  ;;  %v3808_v22 = vadd.f32 %v7548_v19, %v9771_v4  ;;  %v3697_v23 = vpop.f32.mrb[29].mxu1 }
 0x3d2   : > { %v3945_v25 = vmax.f32 %v3942_v20, %v3944_v21  ;;  %3878 = vst.msk [vmem:[#allocation4 + $0xd0] sm:$0xff] %vm3851_vm5, %v3841_v18  ;;  %v3807_v26 = vadd.f32 %v9771_v4, %v3697_v23  ;;  %v4013_v27 = vld [vmem:[#allocation5 + $0x1d] sm:$0x1]  ;;  %v4015_v28 = vld [vmem:[#allocation5 + $0x1f] sm:$0x1] }
 0x3d3   : > { %v4009_v29 = vld [vmem:[#allocation5 + $0x19] sm:$0x1]  ;;  %v3844_v30 = vmax.f32 %v3808_v22, 0.0  ;;  %v8360_v31 = vpack.i.bf16 %v4013_v27, %v4015_v28  ;;  %v4011_v32 = vld [vmem:[#allocation5 + $0x1b] sm:$0x1] }
 0x3d4   : > { %v3946_v33 = vmax.f32 %v3940_v24, %v3945_v25  ;;  %v3843_v34 = vmax.f32 %v3807_v26, 0.0  ;;  %v8355_v35 = vpack.i.bf16 %v4009_v29, %v4011_v32  ;;  %v7551_v36 = vpop.f32.mrb[30].mxu1 }
 0x3d5   : > { %3881 = vst.msk [vmem:[#allocation4 + $0xe8] sm:$0xff] %vm3851_vm5, %v3844_v30  ;;  %8361 = vrot.lane.b32.xlu1 %v8360_v31, %s8471_s26  ;;  %v3810_v37 = vadd.f32 %v7551_v36, %v9771_v4  ;;  %v3707_v38 = vpop.f32.mrb[31].mxu1  ;;  %v3949_v40 = vld [vmem:[#allocation4 + $0xb5] ss:$2 sm:$0xff]  ;;  %v3951_v41 = vld [vmem:[#allocation4 + $0xb6] ss:$2 sm:$0xff] }
 0x3d6   : > { %3947 = vst.msk [vmem:[#allocation5 + $0x20] sm:$0xff] %vm3851_vm5, %v3946_v33  ;;  %3880 = vst.msk [vmem:[#allocation4 + $0xe0] sm:$0xff] %vm3851_vm5, %v3843_v34  ;;  %8356 = vrot.lane.b32.xlu0 %v8355_v35, %s8471_s26  ;;  %v3809_v39 = vadd.f32 %v9771_v4, %v3707_v38  ;;  %v3952_v49 = vmax.f32 %v3949_v40, %v3951_v41  ;;  %v4272_v36 = vld [vmem:[%s11408_s5 + $0x200] sm:$0xff]  ;;  %v4305_v38 = vld [vmem:[%s11408_s5 + $0x308] sm:$0xff] }
 0x3d7   : > { %v3846_v42 = vmax.f32 %v3810_v37, 0.0  ;;  %v4304_v37 = vld [vmem:[%s11408_s5 + $0x300] sm:$0xff]  ;;  %v4273_v40 = vld [vmem:[%s11408_s5 + $0x208] sm:$0xff]  ;;  %v4322_v41 = vld [vmem:[%s11408_s5 + $0x390] sm:$0xff] }
 0x3d8   : > { %v3845_v43 = vmax.f32 %v3809_v39, 0.0  ;;  %v7554_v44 = vpop.f32.mrb[32].mxu1 }
 0x3d9   : > { %v3954_v45 = vld [vmem:[#allocation4 + $0xc7] ss:$2 sm:$0xff]  ;;  %v3956_v46 = vld [vmem:[#allocation4 + $0xc8] ss:$2 sm:$0xff]  ;;  %3883 = vst.msk [vmem:[#allocation4 + $0xf8] sm:$0xff] %vm3851_vm5, %v3846_v42  ;;  %v3812_v47 = vadd.f32 %v7554_v44, %v9771_v4  ;;  %v3717_v48 = vpop.f32.mrb[33].mxu1 }
 0x3da   : > { %v3957_v51 = vmax.f32 %v3954_v45, %v3956_v46  ;;  %3882 = vst.msk [vmem:[#allocation4 + $0xf0] sm:$0xff] %vm3851_vm5, %v3845_v43  ;;  %v3811_v52 = vadd.f32 %v9771_v4, %v3717_v48  ;;  %v4323_v42 = vld [vmem:[%s11408_s5 + $0x398] sm:$0xff]  ;;  %v4290_v46 = vld [vmem:[%s11408_s5 + $0x290] sm:$0xff] }
 0x3db   : > { %v3848_v53 = vmax.f32 %v3812_v47, 0.0  ;;  %v4291_v47 = vld [vmem:[%s11408_s5 + $0x298] sm:$0xff] }
 0x3dc   : > { %v3958_v54 = vmax.f32 %v3952_v49, %v3957_v51  ;;  %v3847_v55 = vmax.f32 %v3811_v52, 0.0  ;;  %v7557_v56 = vpop.f32.mrb[34].mxu1  ;;  %v3986_v51 = vld [vmem:[#allocation5 + $0x2] sm:$0x1]  ;;  %v3990_v52 = vld [vmem:[#allocation5 + $0x6] sm:$0x1] }
 0x3dd   : > { %v3961_v57 = vld [vmem:[#allocation4 + $0xd9] ss:$2 sm:$0xff]  ;;  %3885 = vst.msk [vmem:[#allocation4 + $0x108] sm:$0xff] %vm3851_vm5, %v3848_v53  ;;  %v3814_v58 = vadd.f32 %v7557_v56, %v9771_v4  ;;  %v3727_v59 = vpop.f32.mrb[35].mxu1  ;;  %v3963_v50 = vld [vmem:[#allocation4 + $0xda] ss:$2 sm:$0xff] }
 0x3de   : > { %3959 = vst.msk [vmem:[#allocation5 + $0x28] sm:$0xff] %vm3851_vm5, %v3958_v54  ;;  %3884 = vst.msk [vmem:[#allocation4 + $0x100] sm:$0xff] %vm3851_vm5, %v3847_v55  ;;  %v3813_v60 = vadd.f32 %v9771_v4, %v3727_v59  ;;  %v4021_v61 = vld [vmem:[#allocation5 + $0x25] sm:$0x1]  ;;  %v4023_v62 = vld [vmem:[#allocation5 + $0x27] sm:$0x1]  ;;  %v3964_v9 = vmax.f32 %v3961_v57, %v3963_v50  ;;  %v7771_v54 = vpack.c.bf16 %v4305_v38, %v4304_v37 }
 0x3df   : > { %v4017_v0 = vld [vmem:[#allocation5 + $0x21] sm:$0x1]  ;;  %v3850_v1 = vmax.f32 %v3814_v58, 0.0  ;;  %v8370_v2 = vpack.i.bf16 %v4021_v61, %v4023_v62  ;;  %v4019_v3 = vld [vmem:[#allocation5 + $0x23] sm:$0x1]  ;;  %v4274_v55 = vld [vmem:[%s11408_s5 + $0x210] sm:$0xff]  ;;  %v7739_v59 = vpack.c.bf16 %v4273_v40, %v4272_v36 }
 0x3e0   : > { %v3849_v5 = vmax.f32 %v3813_v60, 0.0  ;;  %v8365_v6 = vpack.i.bf16 %v4017_v0, %v4019_v3  ;;  %v3988_v53 = vld [vmem:[#allocation5 + $0x4] sm:$0x1]  ;;  %v3984_v57 = vld [vmem:[#allocation5] sm:$0x1]  ;;  %v7773_v60 = vpack.c.bf16 %v4323_v42, %v4322_v41  ;;  %v4306_v61 = vld [vmem:[%s11408_s5 + $0x310] sm:$0xff] }
 0x3e1   : > { %v3966_v7 = vld [vmem:[#allocation4 + $0xeb] ss:$2 sm:$0xff]  ;;  %v3968_v8 = vld [vmem:[#allocation4 + $0xec] ss:$2 sm:$0xff]  ;;  %3887 = vst.msk [vmem:[#allocation4 + $0x118] sm:$0xff] %vm3851_vm5, %v3850_v1  ;;  %8371 = vrot.lane.b32.xlu1 %v8370_v2, %s8471_s26  ;;  %v7741_v1 = vpack.c.bf16 %v4291_v47, %v4290_v46  ;;  %v4329_v36 = vld [vmem:[%s11408_s5 + $0x3c8] sm:$0xff] }
 0x3e2   : > { %v3969_v10 = vmax.f32 %v3966_v7, %v3968_v8  ;;  %3886 = vst.msk [vmem:[#allocation4 + $0x110] sm:$0xff] %vm3851_vm5, %v3849_v5  ;;  %8366 = vrot.lane.b32.xlu0 %v8365_v6, %s8471_s26  ;;  %v4307_v62 = vld [vmem:[%s11408_s5 + $0x318] sm:$0xff]  ;;  %v4324_v3 = vld [vmem:[%s11408_s5 + $0x3a0] sm:$0xff]  ;;  %v4325_v5 = vld [vmem:[%s11408_s5 + $0x3a8] sm:$0xff] }
 0x3e3   : > { %v4275_v2 = vld [vmem:[%s11408_s5 + $0x218] sm:$0xff]  ;;  %v4292_v6 = vld [vmem:[%s11408_s5 + $0x2a0] sm:$0xff]  ;;  %v4293_v7 = vld [vmem:[%s11408_s5 + $0x2a8] sm:$0xff]  ;;  %v7775_v8 = vpack.c.bf16 %v4307_v62, %v4306_v61 }
 0x3e4   : > { %v3970_v4 = vmax.f32 %v3964_v9, %v3969_v10  ;;  %v7743_v9 = vpack.c.bf16 %v4275_v2, %v4274_v55  ;;  %v7777_v10 = vpack.c.bf16 %v4325_v5, %v4324_v3  ;;  %v4296_v37 = vld [vmem:[%s11408_s5 + $0x2c0] sm:$0xff]  ;;  %v4297_v38 = vld [vmem:[%s11408_s5 + $0x2c8] sm:$0xff]  ;;  %v4330_v47 = vld [vmem:[%s11408_s5 + $0x3d0] sm:$0xff] }
 0x3e5   : > { %v4029_v11 = vld [vmem:[#allocation5 + $0x2d] sm:$0x1]  ;;  %v4031_v12 = vld [vmem:[#allocation5 + $0x2f] sm:$0x1]  ;;  %v4025_v13 = vld [vmem:[#allocation5 + $0x29] sm:$0x1] }
 0x3e6   : > { %3971 = vst.msk [vmem:[#allocation5 + $0x30] sm:$0xff] %vm3851_vm5, %v3970_v4  ;;  %v4027_v14 = vld [vmem:[#allocation5 + $0x2b] sm:$0x1]  ;;  %v3975_v16 = vld [vmem:[#allocation4 + $0xfe] ss:$2 sm:$0xff]  ;;  %v8380_v17 = vpack.i.bf16 %v4029_v11, %v4031_v12 }
 0x3e7   : > { %v3973_v15 = vld [vmem:[#allocation4 + $0xfd] ss:$2 sm:$0xff]  ;;  %v8375_v18 = vpack.i.bf16 %v4025_v13, %v4027_v14  ;;  %v7745_v14 = vpack.c.bf16 %v4293_v7, %v4292_v6 }
 0x3e8   : > { %8381 = vrot.lane.b32.xlu1 %v8380_v17, %s8471_s26  ;;  %v3976_v21 = vmax.f32 %v3973_v15, %v3975_v16  ;;  %v4276_v4 = vld [vmem:[%s11408_s5 + $0x220] sm:$0xff]  ;;  %v4309_v12 = vld [vmem:[%s11408_s5 + $0x328] sm:$0xff]  ;;  %v4326_v16 = vld [vmem:[%s11408_s5 + $0x3b0] sm:$0xff] }
 0x3e9   : > { %v3978_v19 = vld [vmem:[#allocation4 + $0x10f] ss:$2 sm:$0xff]  ;;  %v3980_v20 = vld [vmem:[#allocation4 + $0x110] ss:$2 sm:$0xff]  ;;  %8376 = vrot.lane.b32.xlu0 %v8375_v18, %s8471_s26  ;;  %v4277_v15 = vld [vmem:[%s11408_s5 + $0x228] sm:$0xff] }
 0x3ea   : > { %v3981_v22 = vmax.f32 %v3978_v19, %v3980_v20  ;;  %v4308_v11 = vld [vmem:[%s11408_s5 + $0x320] sm:$0xff]  ;;  %v4327_v17 = vld [vmem:[%s11408_s5 + $0x3b8] sm:$0xff]  ;;  %v4294_v20 = vld [vmem:[%s11408_s5 + $0x2b0] sm:$0xff] }
 0x3eb   : > { %v4280_v42 = vld [vmem:[%s11408_s5 + $0x240] sm:$0xff]  ;;  %v4281_v46 = vld [vmem:[%s11408_s5 + $0x248] sm:$0xff]  ;;  %v4282_v55 = vld [vmem:[%s11408_s5 + $0x250] sm:$0xff] }
 0x3ec   : > { %v3982_v23 = vmax.f32 %v3976_v21, %v3981_v22  ;;  %v4295_v21 = vld [vmem:[%s11408_s5 + $0x2b8] sm:$0xff]  ;;  %v4333_v61 = vld [vmem:[%s11408_s5 + $0x3e8] sm:$0xff]  ;;  %v4300_v62 = vld [vmem:[%s11408_s5 + $0x2e0] sm:$0xff] }
 0x3ed   : > { %v4037_v24 = vld [vmem:[#allocation5 + $0x35] sm:$0x1]  ;;  %v4039_v25 = vld [vmem:[#allocation5 + $0x37] sm:$0x1]  ;;  %v4033_v26 = vld [vmem:[#allocation5 + $0x31] sm:$0x1] }
 0x3ee   : > { %3983 = vst.msk [vmem:[#allocation5 + $0x38] sm:$0xff] %vm3851_vm5, %v3982_v23  ;;  %v8390_v27 = vpack.i.bf16 %v4037_v24, %v4039_v25  ;;  %v4035_v28 = vld [vmem:[#allocation5 + $0x33] sm:$0x1]  ;;  %v3994_v23 = vld [vmem:[#allocation5 + $0xa] sm:$0x1]  ;;  %v7779_v25 = vpack.c.bf16 %v4309_v12, %v4308_v11  ;;  %v4284_v3 = vld [vmem:[%s11408_s5 + $0x260] sm:$0xff] }
 0x3ef   : > { %v8385_v29 = vpack.i.bf16 %v4033_v26, %v4035_v28  ;;  %v3998_v24 = vld [vmem:[#allocation5 + $0xe] sm:$0x1]  ;;  %v7781_v28 = vpack.c.bf16 %v4327_v17, %v4326_v16  ;;  %v4316_v5 = vld [vmem:[%s11408_s5 + $0x360] sm:$0xff]  ;;  %v4317_v6 = vld [vmem:[%s11408_s5 + $0x368] sm:$0xff] }
 0x3f0   : > { %8391 = vrot.lane.b32.xlu1 %v8390_v27, %s8471_s26  ;;  %v7747_v27 = vpack.c.bf16 %v4277_v15, %v4276_v4  ;;  %v4302_v4 = vld [vmem:[%s11408_s5 + $0x2f0] sm:$0xff]  ;;  %v4303_v11 = vld [vmem:[%s11408_s5 + $0x2f8] sm:$0xff]  ;;  %v7795_v12 = vpack.c.bf16 %v4317_v6, %v4316_v5  ;;  %v4373_v5 = vld [vmem:[%s11408_s5 + $0x528] sm:$0xff] }
 0x3f1   : > { %8386 = vrot.lane.b32.xlu0 %v8385_v29, %s8471_s26  ;;  %v4278_v29 = vld [vmem:[%s11408_s5 + $0x230] sm:$0xff] }
 0x3f2   : > { %v4286_v16 = vld [vmem:[%s11408_s5 + $0x270] sm:$0xff] }
 0x3f3   : > { %v4318_v17 = vld [vmem:[%s11408_s5 + $0x370] sm:$0xff] }
 0x3f5   : > { %v4045_v30 = vld [vmem:[#allocation5 + $0x3d] sm:$0x1]  ;;  %v4047_v31 = vld [vmem:[#allocation5 + $0x3f] sm:$0x1]  ;;  %v4041_v32 = vld [vmem:[#allocation5 + $0x39] sm:$0x1] }
 0x3f6   : > { %v8400_v33 = vpack.i.bf16 %v4045_v30, %v4047_v31  ;;  %v4043_v34 = vld [vmem:[#allocation5 + $0x3b] sm:$0x1]  ;;  %v4310_v30 = vld [vmem:[%s11408_s5 + $0x330] sm:$0xff]  ;;  %v4311_v31 = vld [vmem:[%s11408_s5 + $0x338] sm:$0xff] }
 0x3f7   : > { %v8395_v35 = vpack.i.bf16 %v4041_v32, %v4043_v34  ;;  %v4279_v34 = vld [vmem:[%s11408_s5 + $0x238] sm:$0xff] }
 0x3f8   : > { %8401 = vrot.lane.b32.xlu1 %v8400_v33, %s8471_s26  ;;  %v7749_v33 = vpack.c.bf16 %v4295_v21, %v4294_v20  ;;  %v7751_v40 = vpack.c.bf16 %v4279_v34, %v4278_v29  ;;  %v7765_v20 = vpack.c.bf16 %v4303_v11, %v4302_v4  ;;  %v4287_v21 = vld [vmem:[%s11408_s5 + $0x278] sm:$0xff] }
 0x3f9   : > { %8396 = vrot.lane.b32.xlu0 %v8395_v35, %s8471_s26  ;;  %v4328_v35 = vld [vmem:[%s11408_s5 + $0x3c0] sm:$0xff]  ;;  %v4359_v4 = vld [vmem:[%s11408_s5 + $0x4b8] sm:$0xff]  ;;  %s323_s26 = sand.u32 1, %s8460_s10  }
 0x3fa   : > { %v7785_v41 = vpack.c.bf16 %v4329_v36, %v4328_v35  ;;  %v4336_v35 = vld [vmem:[%s11408_s5 + $0x400] sm:$0xff]  ;;  %v4337_v36 = vld [vmem:[%s11408_s5 + $0x408] sm:$0xff]  ;;  %s324_s17 = scalar_lea.vmem [#allocation6], %s323_s26  ;;  %s5932_s27 = scalar_lea.sflag [#allocation7], %s323_s26 }
 0x3fb   : > { %s5944_s22 = sshll.u32 %s324_s17, 4  ;;  %s11363_s22 = int_to_ptr.vmem [resolvable:$true] %s5944_s22 }
 0x3fc   : > { %s8406_s21 = scalar_lea.vmem %s11363_s22, 16  ;;  %p8413_p0 = scmp.lt.s32.totalorder %s11363_s22, %s8411_s28 }
 0x3fd   : > { %p8407_p11 = scmp.ne.s32.totalorder %s11363_s22, %s8406_s21  ;;  %p8414_p1 = scmp.lt.s32.totalorder %s8412_s29, %s8406_s21 }
 0x3ff   : > { %p8408_p12 = pnand %p8407_p11, %p8564_p5  ;;  %p8415_p2 = por %p8414_p1, %p8413_p0 }
 0x401   : > { %p8409_p13 = pneg %p8408_p12 }
 0x403   : > { %p8416_p3 = pnand %p8415_p2, %p8409_p13 }
 0x42f   : > { %v8332_v39 = vpop.permute.xlu1 %8331 }
 0x430   : > { %v8334_v43 = vunpack.i.h.bf16 %v8332_v39  ;;  %v8333_v44 = vunpack.i.l.bf16 %v8332_v39  ;;  %v8327_v45 = vpop.permute.xlu0 %8326  ;;  %v7783_v39 = vpack.c.bf16 %v4311_v31, %v4310_v30  ;;  %v4368_v30 = vld [vmem:[%s11408_s5 + $0x500] sm:$0xff]  ;;  %v4369_v31 = vld [vmem:[%s11408_s5 + $0x508] sm:$0xff] }
 0x431   : > { %v8329_v48 = vunpack.i.h.bf16 %v8327_v45  ;;  %v8328_v49 = vunpack.i.l.bf16 %v8327_v45  ;;  %v7753_v45 = vpack.c.bf16 %v4297_v38, %v4296_v37  ;;  %v4354_v38 = vld [vmem:[%s11408_s5 + $0x490] sm:$0xff] }
 0x432   : > { %v4083_v56 = vsel %vm3851_vm5, %v3990_v52, %v8333_v44  ;;  %v4082_v58 = vsel %vm3851_vm5, %v3988_v53, %v8334_v43  ;;  %v4312_v43 = vld [vmem:[%s11408_s5 + $0x340] sm:$0xff]  ;;  %v4313_v44 = vld [vmem:[%s11408_s5 + $0x348] sm:$0xff]  ;;  %v7755_v53 = vpack.c.bf16 %v4281_v46, %v4280_v42  ;;  %v7835_v42 = vpack.c.bf16 %v4369_v31, %v4368_v30  ;;  %v4338_v46 = vld [vmem:[%s11408_s5 + $0x410] sm:$0xff] }
 0x433   : > { %v4081_v0 = vsel %vm3851_vm5, %v3986_v51, %v8328_v49  ;;  %4855 = vmatprep.mubr.f32.mxu0 %v4083_v56  ;;  %v4080_v50 = vsel %vm3851_vm5, %v3984_v57, %v8329_v48  ;;  %v4331_v48 = vld [vmem:[%s11408_s5 + $0x3d8] sm:$0xff]  ;;  %v4298_v49 = vld [vmem:[%s11408_s5 + $0x2d0] sm:$0xff]  ;;  %v7787_v52 = vpack.c.bf16 %v4313_v44, %v4312_v43  ;;  %v4376_v30 = vld [vmem:[%s11408_s5 + $0x540] sm:$0xff] }
 0x434   : > { %4785 = vmatprep.mubr.f32.mxu1 %v4081_v0  ;;  %4856 = vmatmul.mubr.f32.vlgmr.msra.gmra.mrb[128].mxu0 %v4082_v58  ;;  %v4299_v51 = vld [vmem:[%s11408_s5 + $0x2d8] sm:$0xff]  ;;  %v4314_v56 = vld [vmem:[%s11408_s5 + $0x350] sm:$0xff]  ;;  %v4301_v0 = vld [vmem:[%s11408_s5 + $0x2e8] sm:$0xff] }
 0x435   : > { %4786 = vmatmul.mubr.f32.vlgmr.msra.gmra.mrb[36].mxu1 %v4080_v50  ;;  %7772 = vmatpush3.bf16.msra.mxu0 %v7771_v54  ;;  %v7789_v54 = vpack.c.bf16 %v4331_v48, %v4330_v47  ;;  %v4315_v57 = vld [vmem:[%s11408_s5 + $0x358] sm:$0xff]  ;;  %v7757_v58 = vpack.c.bf16 %v4299_v51, %v4298_v49  ;;  %v7761_v7 = vpack.c.bf16 %v4301_v0, %v4300_v62  ;;  %v4386_v43 = vld [vmem:[%s11408_s5 + $0x590] sm:$0xff]  ;;  %v4377_v31 = vld [vmem:[%s11408_s5 + $0x548] sm:$0xff] }
 0x436   : > { %7740 = vmatpush3.bf16.msra.mxu1 %v7739_v59  ;;  %7774 = vmatprep.subr.bf16.mxu0 %v7773_v60  ;;  %v4283_v59 = vld [vmem:[%s11408_s5 + $0x258] sm:$0xff]  ;;  %v4332_v60 = vld [vmem:[%s11408_s5 + $0x3e0] sm:$0xff]  ;;  %v7791_v50 = vpack.c.bf16 %v4315_v57, %v4314_v56  ;;  %v4370_v47 = vld [vmem:[%s11408_s5 + $0x510] sm:$0xff] }
 0x437   : > { %7742 = vmatprep.subr.bf16.mxu1 %v7741_v1  ;;  %v9942_v13 = vpop.permute.xlu1 %8341  ;;  %v7759_v1 = vpack.c.bf16 %v4283_v59, %v4282_v55  ;;  %v7793_v2 = vpack.c.bf16 %v4333_v61, %v4332_v60  ;;  %v4371_v48 = vld [vmem:[%s11408_s5 + $0x518] sm:$0xff]  ;;  %v4357_v59 = vld [vmem:[%s11408_s5 + $0x4a8] sm:$0xff] }
 0x438   : > { %v8343_v18 = vunpack.i.l.bf16 %v9942_v13  ;;  %v9954_v19 = vpop.permute.xlu0 %8336  ;;  %v4002_v56 = vld [vmem:[#allocation5 + $0x12] sm:$0x1]  ;;  %v4006_v61 = vld [vmem:[#allocation5 + $0x16] sm:$0x1]  ;;  %v7839_v62 = vpack.c.bf16 %v4371_v48, %v4370_v47  ;;  %v4364_v47 = vld [vmem:[%s11408_s5 + $0x4e0] sm:$0xff] }
 0x439   : > { %v8338_v22 = vunpack.i.l.bf16 %v9954_v19  ;;  %7776 = vmatpush3.bf16.msra.mxu0 %v7775_v8  ;;  %v4285_v8 = vld [vmem:[%s11408_s5 + $0x268] sm:$0xff]  ;;  %v8339_v37 = vunpack.i.h.bf16 %v9954_v19  ;;  %v4387_v19 = vld [vmem:[%s11408_s5 + $0x598] sm:$0xff] }
 0x43a   : > { %7744 = vmatpush3.bf16.msra.mxu1 %v7743_v9  ;;  %7778 = vmatprep.subr.bf16.mxu0 %v7777_v10  ;;  %v4087_v26 = vsel %vm3851_vm5, %v3998_v24, %v8343_v18  ;;  %v4334_v9 = vld [vmem:[%s11408_s5 + $0x3f0] sm:$0xff]  ;;  %v4335_v10 = vld [vmem:[%s11408_s5 + $0x3f8] sm:$0xff]  ;;  %v4352_v24 = vld [vmem:[%s11408_s5 + $0x480] sm:$0xff]  ;;  %v7837_v57 = vpack.c.bf16 %v4387_v19, %v4386_v43 }
 0x43b   : > { %7746 = vmatprep.subr.bf16.mxu1 %v7745_v14  ;;  %v4085_v32 = vsel %vm3851_vm5, %v3994_v23, %v8338_v22  ;;  %4995 = vmatprep.mubr.f32.mxu0 %v4087_v26  ;;  %v7763_v14 = vpack.c.bf16 %v4285_v8, %v4284_v3  ;;  %v7797_v15 = vpack.c.bf16 %v4335_v10, %v4334_v9  ;;  %v4319_v18 = vld [vmem:[%s11408_s5 + $0x378] sm:$0xff]  ;;  %v4384_v22 = vld [vmem:[%s11408_s5 + $0x580] sm:$0xff]  ;;  %v4385_v23 = vld [vmem:[%s11408_s5 + $0x588] sm:$0xff] }
 0x43c   : > { %4925 = vmatprep.mubr.f32.mxu1 %v4085_v32  ;;  %v7799_v26 = vpack.c.bf16 %v4319_v18, %v4318_v17  ;;  %v7833_v29 = vpack.c.bf16 %v4385_v23, %v4384_v22  ;;  %v8344_v32 = vunpack.i.h.bf16 %v9942_v13  ;;  %v4355_v13 = vld [vmem:[%s11408_s5 + $0x498] sm:$0xff]  ;;  %v4372_v3 = vld [vmem:[%s11408_s5 + $0x520] sm:$0xff]  ;;  %v4390_v8 = vld [vmem:[%s11408_s5 + $0x5b0] sm:$0xff] }
 0x43d   : > { %7780 = vmatpush3.bf16.msra.mxu0 %v7779_v25  ;;  %v4353_v25 = vld [vmem:[%s11408_s5 + $0x488] sm:$0xff]  ;;  %v7805_v51 = vpack.c.bf16 %v4355_v13, %v4354_v38  ;;  %v4391_v9 = vld [vmem:[%s11408_s5 + $0x5b8] sm:$0xff]  ;;  %v4358_v10 = vld [vmem:[%s11408_s5 + $0x4b0] sm:$0xff]  ;;  %v7843_v11 = vpack.c.bf16 %v4373_v5, %v4372_v3  ;;  %v7851_v13 = vpack.c.bf16 %v4377_v31, %v4376_v30 }
 0x43e   : > { %7748 = vmatpush3.bf16.msra.mxu1 %v7747_v27  ;;  %7782 = vmatprep.subr.bf16.mxu0 %v7781_v28  ;;  %v7767_v28 = vpack.c.bf16 %v4287_v21, %v4286_v16  ;;  %v7801_v34 = vpack.c.bf16 %v4353_v25, %v4352_v24  ;;  %v4374_v16 = vld [vmem:[%s11408_s5 + $0x530] sm:$0xff]  ;;  %v4375_v17 = vld [vmem:[%s11408_s5 + $0x538] sm:$0xff]  ;;  %v7813_v18 = vpack.c.bf16 %v4359_v4, %v4358_v10  ;;  %v4392_v21 = vld [vmem:[%s11408_s5 + $0x5c0] sm:$0xff] }
 0x43f   : > { %7750 = vmatprep.subr.bf16.mxu1 %v7749_v33  ;;  %v10085_v27 = vpop.permute.xlu0 %8346  ;;  %v10094_v33 = vpop.permute.xlu1 %8351  ;;  %v4393_v22 = vld [vmem:[%s11408_s5 + $0x5c8] sm:$0xff]  ;;  %v4360_v23 = vld [vmem:[%s11408_s5 + $0x4c0] sm:$0xff]  ;;  %v7847_v25 = vpack.c.bf16 %v4375_v17, %v4374_v16  ;;  %v4363_v38 = vld [vmem:[%s11408_s5 + $0x4d8] sm:$0xff] }
 0x440   : > { %v8353_v44 = vunpack.i.l.bf16 %v10094_v33  ;;  %v4361_v24 = vld [vmem:[%s11408_s5 + $0x4c8] sm:$0xff]  ;;  %v4379_v43 = vld [vmem:[%s11408_s5 + $0x558] sm:$0xff]  ;;  %v8354_v17 = vunpack.i.h.bf16 %v10094_v33  ;;  %v4450_v30 = vld [vmem:[%s11408_s5 + $0x790] sm:$0xff] }
 0x441   : > { %7784 = vmatpush3.bf16.msra.mxu0 %v7783_v39  ;;  %v8348_v39 = vunpack.i.l.bf16 %v10085_v27  ;;  %v4365_v48 = vld [vmem:[%s11408_s5 + $0x4e8] sm:$0xff]  ;;  %v4383_v3 = vld [vmem:[%s11408_s5 + $0x578] sm:$0xff] }
 0x442   : > { %7752 = vmatpush3.bf16.msra.mxu1 %v7751_v40  ;;  %7786 = vmatprep.subr.bf16.mxu0 %v7785_v41  ;;  %v3992_v40 = vld [vmem:[#allocation5 + $0x8] sm:$0x1]  ;;  %v3996_v41 = vld [vmem:[#allocation5 + $0xc] sm:$0x1]  ;;  %v4123_v0 = vsel %vm3851_vm5, %v4006_v61, %v8353_v44  ;;  %v4347_v44 = vld [vmem:[%s11408_s5 + $0x458] sm:$0xff] }
 0x443   : > { %7754 = vmatprep.subr.bf16.mxu1 %v7753_v45  ;;  %v7803_v45 = vpack.c.bf16 %v4337_v36, %v4336_v35  ;;  %v4086_v49 = vsel %vm3851_vm5, %v3996_v41, %v8344_v32  ;;  %v4084_v55 = vsel %vm3851_vm5, %v3992_v40, %v8339_v37  ;;  %v4121_v60 = vsel %vm3851_vm5, %v4002_v56, %v8348_v39  ;;  %v4394_v35 = vld [vmem:[%s11408_s5 + $0x5d0] sm:$0xff]  ;;  %v4395_v36 = vld [vmem:[%s11408_s5 + $0x5d8] sm:$0xff]  ;;  %v4417_v10 = vld [vmem:[%s11408_s5 + $0x688] sm:$0xff] }
 0x444   : > { %v7817_v32 = vpack.c.bf16 %v4361_v24, %v4360_v23  ;;  %v4362_v37 = vld [vmem:[%s11408_s5 + $0x4d0] sm:$0xff]  ;;  %v7853_v40 = vpack.c.bf16 %v4395_v36, %v4394_v35  ;;  %v7825_v56 = vpack.c.bf16 %v4365_v48, %v4364_v47  ;;  %v4367_v61 = vld [vmem:[%s11408_s5 + $0x4f8] sm:$0xff]  ;;  %v4433_v16 = vld [vmem:[%s11408_s5 + $0x708] sm:$0xff]  ;;  %v8349_v23 = vunpack.i.h.bf16 %v10085_v27 }
 0x445   : > { %7788 = vmatpush3.bf16.msra.mxu0 %v7787_v52  ;;  %v4339_v52 = vld [vmem:[%s11408_s5 + $0x418] sm:$0xff]  ;;  %v4346_v41 = vld [vmem:[%s11408_s5 + $0x450] sm:$0xff]  ;;  %v7821_v19 = vpack.c.bf16 %v4363_v38, %v4362_v37 }
 0x446   : > { %7756 = vmatpush3.bf16.msra.mxu1 %v7755_v53  ;;  %7790 = vmatprep.subr.bf16.mxu0 %v7789_v54  ;;  %v4388_v53 = vld [vmem:[%s11408_s5 + $0x5a0] sm:$0xff]  ;;  %v4389_v54 = vld [vmem:[%s11408_s5 + $0x5a8] sm:$0xff]  ;;  %v4418_v24 = vld [vmem:[%s11408_s5 + $0x690] sm:$0xff] }
 0x447   : > { %7758 = vmatprep.subr.bf16.mxu1 %v7757_v58  ;;  %v4356_v58 = vld [vmem:[%s11408_s5 + $0x4a0] sm:$0xff]  ;;  %v4419_v33 = vld [vmem:[%s11408_s5 + $0x698] sm:$0xff]  ;;  %v4434_v35 = vld [vmem:[%s11408_s5 + $0x710] sm:$0xff] }
 0x448   : > { %v7809_v6 = vpack.c.bf16 %v4357_v59, %v4356_v58  ;;  %v4398_v58 = vld [vmem:[%s11408_s5 + $0x5f0] sm:$0xff]  ;;  %v4399_v59 = vld [vmem:[%s11408_s5 + $0x5f8] sm:$0xff]  ;;  %v7869_v38 = vpack.c.bf16 %v4419_v33, %v4418_v24 }
 0x449   : > { %7792 = vmatpush3.bf16.msra.mxu0 %v7791_v50  ;;  %v7807_v50 = vpack.c.bf16 %v4339_v52, %v4338_v46  ;;  %v4397_v46 = vld [vmem:[%s11408_s5 + $0x5e8] sm:$0xff]  ;;  %v4451_v27 = vld [vmem:[%s11408_s5 + $0x798] sm:$0xff] }
 0x44a   : > { %7760 = vmatpush3.bf16.msra.mxu1 %v7759_v1  ;;  %7794 = vmatprep.subr.bf16.mxu0 %v7793_v2  ;;  %v7841_v1 = vpack.c.bf16 %v4389_v54, %v4388_v53  ;;  %v4340_v2 = vld [vmem:[%s11408_s5 + $0x420] sm:$0xff]  ;;  %v4435_v36 = vld [vmem:[%s11408_s5 + $0x718] sm:$0xff] }
 0x44b   : > { %7762 = vmatprep.subr.bf16.mxu1 %v7761_v7  ;;  %v4341_v7 = vld [vmem:[%s11408_s5 + $0x428] sm:$0xff]  ;;  %v4348_v53 = vld [vmem:[%s11408_s5 + $0x460] sm:$0xff]  ;;  %v7903_v47 = vpack.c.bf16 %v4435_v36, %v4434_v35  ;;  %v4427_v24 = vld [vmem:[%s11408_s5 + $0x6d8] sm:$0xff] }
 0x44c   : > { %v4380_v54 = vld [vmem:[%s11408_s5 + $0x560] sm:$0xff]  ;;  %v4429_v36 = vld [vmem:[%s11408_s5 + $0x6e8] sm:$0xff] }
 0x44d   : > { %7796 = vmatpush3.bf16.msra.mxu0 %v7795_v12  ;;  %v7811_v12 = vpack.c.bf16 %v4341_v7, %v4340_v2  ;;  %v4382_v2 = vld [vmem:[%s11408_s5 + $0x570] sm:$0xff]  ;;  %v4448_v7 = vld [vmem:[%s11408_s5 + $0x780] sm:$0xff] }
 0x44e   : > { %7764 = vmatpush3.bf16.msra.mxu1 %v7763_v14  ;;  %7798 = vmatprep.subr.bf16.mxu0 %v7797_v15  ;;  %v7845_v14 = vpack.c.bf16 %v4391_v9, %v4390_v8  ;;  %v4342_v15 = vld [vmem:[%s11408_s5 + $0x430] sm:$0xff]  ;;  %v4449_v8 = vld [vmem:[%s11408_s5 + $0x788] sm:$0xff]  ;;  %v4416_v9 = vld [vmem:[%s11408_s5 + $0x680] sm:$0xff]  ;;  %v7863_v4 = vpack.c.bf16 %v4383_v3, %v4382_v2 }
 0x44f   : > { %7766 = vmatprep.subr.bf16.mxu1 %v7765_v20  ;;  %v4343_v20 = vld [vmem:[%s11408_s5 + $0x438] sm:$0xff]  ;;  %v4428_v35 = vld [vmem:[%s11408_s5 + $0x6e0] sm:$0xff] }
 0x450   : > { %v4439_v2 = vld [vmem:[%s11408_s5 + $0x738] sm:$0xff] }
 0x451   : > { %7800 = vmatpush3.bf16.msra.mxu0 %v7799_v26  ;;  %v7815_v26 = vpack.c.bf16 %v4343_v20, %v4342_v15  ;;  %v4432_v15 = vld [vmem:[%s11408_s5 + $0x700] sm:$0xff]  ;;  %v7865_v20 = vpack.c.bf16 %v4417_v10, %v4416_v9  ;;  %v4425_v9 = vld [vmem:[%s11408_s5 + $0x6c8] sm:$0xff] }
 0x452   : > { %7768 = vmatpush3.bf16.msra.mxu1 %v7767_v28  ;;  %7834 = vmatprep.subr.bf16.mxu0 %v7833_v29  ;;  %v7849_v28 = vpack.c.bf16 %v4393_v22, %v4392_v21  ;;  %v4344_v29 = vld [vmem:[%s11408_s5 + $0x440] sm:$0xff]  ;;  %v4401_v22 = vld [vmem:[%s11408_s5 + $0x608] sm:$0xff] }
 0x453   : > { %7802 = vmatprep.subr.bf16.mxu1 %v7801_v34  ;;  %v4345_v34 = vld [vmem:[%s11408_s5 + $0x448] sm:$0xff]  ;;  %v4400_v21 = vld [vmem:[%s11408_s5 + $0x600] sm:$0xff] }
 0x454   : > { %4996 = vmatmul.mubr.f32.vlgmr.msra.gmra.mrb[130].mxu0 %v4086_v49  ;;  %v7819_v39 = vpack.c.bf16 %v4345_v34, %v4344_v29  ;;  %v7899_v29 = vpack.c.bf16 %v4433_v16, %v4432_v15  ;;  %v4402_v34 = vld [vmem:[%s11408_s5 + $0x610] sm:$0xff]  ;;  %v4440_v15 = vld [vmem:[%s11408_s5 + $0x740] sm:$0xff]  ;;  %v4441_v16 = vld [vmem:[%s11408_s5 + $0x748] sm:$0xff] }
 0x455   : > { %4926 = vmatmul.mubr.f32.vlgmr.msra.gmra.mrb[38].mxu1 %v4084_v55  ;;  %7836 = vmatpush3.bf16.msra.mxu0 %v7835_v42  ;;  %v4378_v42 = vld [vmem:[%s11408_s5 + $0x550] sm:$0xff]  ;;  %v4381_v55 = vld [vmem:[%s11408_s5 + $0x568] sm:$0xff]  ;;  %v7915_v33 = vpack.c.bf16 %v4441_v16, %v4440_v15 }
 0x456   : > { %7804 = vmatpush3.bf16.msra.mxu1 %v7803_v45  ;;  %5065 = vmatprep.mubr.f32.mxu1 %v4121_v60  ;;  %v4396_v45 = vld [vmem:[%s11408_s5 + $0x5e0] sm:$0xff]  ;;  %v7855_v49 = vpack.c.bf16 %v4379_v43, %v4378_v42  ;;  %v4366_v60 = vld [vmem:[%s11408_s5 + $0x4f0] sm:$0xff]  ;;  %v7901_v43 = vpack.c.bf16 %v4451_v27, %v4450_v30  ;;  %v4443_v30 = vld [vmem:[%s11408_s5 + $0x758] sm:$0xff] }
 0x457   : > { %5135 = vmatprep.mubr.f32.mxu0 %v4123_v0  ;;  %7806 = vmatprep.subr.bf16.mxu1 %v7805_v51  ;;  %v7823_v51 = vpack.c.bf16 %v4347_v44, %v4346_v41  ;;  %v7857_v52 = vpack.c.bf16 %v4397_v46, %v4396_v45  ;;  %v7829_v5 = vpack.c.bf16 %v4367_v61, %v4366_v60  ;;  %v4010_v42 = vld [vmem:[#allocation5 + $0x1a] sm:$0x1]  ;;  %v4421_v44 = vld [vmem:[%s11408_s5 + $0x6a8] sm:$0xff]  ;;  %v4014_v46 = vld [vmem:[#allocation5 + $0x1e] sm:$0x1] }
 0x458   : > { %7838 = vmatprep.subr.bf16.mxu0 %v7837_v57  ;;  %v4349_v57 = vld [vmem:[%s11408_s5 + $0x468] sm:$0xff]  ;;  %v4423_v60 = vld [vmem:[%s11408_s5 + $0x6b8] sm:$0xff]  ;;  %v4514_v15 = vld [vmem:[%s11408_s5 + $0x990] sm:$0xff] }
 0x459   : > { %7840 = vmatpush3.bf16.msra.mxu0 %v7839_v62  ;;  %v7859_v62 = vpack.c.bf16 %v4381_v55, %v4380_v54  ;;  %v7827_v0 = vpack.c.bf16 %v4349_v57, %v4348_v53  ;;  %v4436_v53 = vld [vmem:[%s11408_s5 + $0x720] sm:$0xff]  ;;  %v4437_v54 = vld [vmem:[%s11408_s5 + $0x728] sm:$0xff]  ;;  %v4454_v57 = vld [vmem:[%s11408_s5 + $0x7b0] sm:$0xff] }
 0x45a   : > { %7808 = vmatpush3.bf16.msra.mxu1 %v7807_v50  ;;  %7842 = vmatprep.subr.bf16.mxu0 %v7841_v1  ;;  %v7861_v50 = vpack.c.bf16 %v4399_v59, %v4398_v58  ;;  %v4350_v1 = vld [vmem:[%s11408_s5 + $0x470] sm:$0xff]  ;;  %v4455_v58 = vld [vmem:[%s11408_s5 + $0x7b8] sm:$0xff]  ;;  %v7907_v61 = vpack.c.bf16 %v4437_v54, %v4436_v53 }
 0x45b   : > { %7810 = vmatprep.subr.bf16.mxu1 %v7809_v6  ;;  %v4351_v6 = vld [vmem:[%s11408_s5 + $0x478] sm:$0xff]  ;;  %v4422_v59 = vld [vmem:[%s11408_s5 + $0x6b0] sm:$0xff] }
 0x45c   : > { %v7877_v3 = vpack.c.bf16 %v4423_v60, %v4422_v59  ;;  %v4447_v53 = vld [vmem:[%s11408_s5 + $0x778] sm:$0xff]  ;;  %v4481_v59 = vld [vmem:[%s11408_s5 + $0x888] sm:$0xff] }
 0x45d   : > { %7844 = vmatpush3.bf16.msra.mxu0 %v7843_v11  ;;  %v10289_v11 = vpop.permute.xlu0 %8356 }
 0x45e   : > { %7812 = vmatpush3.bf16.msra.mxu1 %v7811_v12  ;;  %7846 = vmatprep.subr.bf16.mxu0 %v7845_v14  ;;  %v7831_v12 = vpack.c.bf16 %v4351_v6, %v4350_v1  ;;  %v7897_v14 = vpack.c.bf16 %v4449_v8, %v4448_v7  ;;  %v4438_v1 = vld [vmem:[%s11408_s5 + $0x730] sm:$0xff]  ;;  %v4456_v6 = vld [vmem:[%s11408_s5 + $0x7c0] sm:$0xff]  ;;  %v4457_v7 = vld [vmem:[%s11408_s5 + $0x7c8] sm:$0xff] }
 0x45f   : > { %7814 = vmatprep.subr.bf16.mxu1 %v7813_v18  ;;  %v10298_v18 = vpop.permute.xlu1 %8361  ;;  %v4424_v8 = vld [vmem:[%s11408_s5 + $0x6c0] sm:$0xff]  ;;  %v7911_v10 = vpack.c.bf16 %v4439_v2, %v4438_v1  ;;  %v4497_v1 = vld [vmem:[%s11408_s5 + $0x908] sm:$0xff] }
 0x460   : > { %v8363_v31 = vunpack.i.l.bf16 %v10298_v18  ;;  %v8364_v2 = vunpack.i.h.bf16 %v10298_v18  ;;  %v4483_v18 = vld [vmem:[%s11408_s5 + $0x898] sm:$0xff] }
 0x461   : > { %7848 = vmatpush3.bf16.msra.mxu0 %v7847_v25  ;;  %v8358_v25 = vunpack.i.l.bf16 %v10289_v11 }
 0x462   : > { %7816 = vmatpush3.bf16.msra.mxu1 %v7815_v26  ;;  %7850 = vmatprep.subr.bf16.mxu0 %v7849_v28  ;;  %v4000_v26 = vld [vmem:[#allocation5 + $0x10] sm:$0x1]  ;;  %v4004_v28 = vld [vmem:[#allocation5 + $0x14] sm:$0x1]  ;;  %v4127_v48 = vsel %vm3851_vm5, %v4014_v46, %v8363_v31 }
 0x463   : > { %7818 = vmatprep.subr.bf16.mxu1 %v7817_v32  ;;  %v7867_v32 = vpack.c.bf16 %v4401_v22, %v4400_v21  ;;  %v4122_v37 = vsel %vm3851_vm5, %v4004_v28, %v8354_v17  ;;  %v4120_v41 = vsel %vm3851_vm5, %v4000_v26, %v8349_v23  ;;  %v4125_v45 = vsel %vm3851_vm5, %v4010_v42, %v8358_v25  ;;  %v4458_v21 = vld [vmem:[%s11408_s5 + $0x7d0] sm:$0xff]  ;;  %v4459_v22 = vld [vmem:[%s11408_s5 + $0x7d8] sm:$0xff] }
 0x464   : > { %v7881_v17 = vpack.c.bf16 %v4425_v9, %v4424_v8  ;;  %v4426_v23 = vld [vmem:[%s11408_s5 + $0x6d0] sm:$0xff]  ;;  %v7917_v26 = vpack.c.bf16 %v4459_v22, %v4458_v21  ;;  %v4411_v31 = vld [vmem:[%s11408_s5 + $0x658] sm:$0xff]  ;;  %v7889_v42 = vpack.c.bf16 %v4429_v36, %v4428_v35  ;;  %v8359_v8 = vunpack.i.h.bf16 %v10289_v11 }
 0x465   : > { %7852 = vmatpush3.bf16.msra.mxu0 %v7851_v13  ;;  %v4403_v13 = vld [vmem:[%s11408_s5 + $0x618] sm:$0xff]  ;;  %v4410_v28 = vld [vmem:[%s11408_s5 + $0x650] sm:$0xff]  ;;  %v7885_v27 = vpack.c.bf16 %v4427_v24, %v4426_v23 }
 0x466   : > { %7820 = vmatpush3.bf16.msra.mxu1 %v7819_v39  ;;  %7854 = vmatprep.subr.bf16.mxu0 %v7853_v40  ;;  %v4452_v39 = vld [vmem:[%s11408_s5 + $0x7a0] sm:$0xff]  ;;  %v4453_v40 = vld [vmem:[%s11408_s5 + $0x7a8] sm:$0xff]  ;;  %v4431_v46 = vld [vmem:[%s11408_s5 + $0x6f8] sm:$0xff] }
 0x467   : > { %7822 = vmatprep.subr.bf16.mxu1 %v7821_v19  ;;  %v4420_v19 = vld [vmem:[%s11408_s5 + $0x6a0] sm:$0xff]  ;;  %v4482_v9 = vld [vmem:[%s11408_s5 + $0x890] sm:$0xff]  ;;  %v4515_v11 = vld [vmem:[%s11408_s5 + $0x998] sm:$0xff] }
 0x468   : > { %v7873_v55 = vpack.c.bf16 %v4421_v44, %v4420_v19  ;;  %v4462_v19 = vld [vmem:[%s11408_s5 + $0x7f0] sm:$0xff]  ;;  %v4463_v44 = vld [vmem:[%s11408_s5 + $0x7f8] sm:$0xff]  ;;  %v7933_v24 = vpack.c.bf16 %v4483_v18, %v4482_v9 }
 0x469   : > { %7856 = vmatpush3.bf16.msra.mxu0 %v7855_v49  ;;  %v7871_v49 = vpack.c.bf16 %v4403_v13, %v4402_v34  ;;  %v4461_v34 = vld [vmem:[%s11408_s5 + $0x7e8] sm:$0xff]  ;;  %v4498_v21 = vld [vmem:[%s11408_s5 + $0x910] sm:$0xff]  ;;  %v4499_v22 = vld [vmem:[%s11408_s5 + $0x918] sm:$0xff] }
 0x46a   : > { %7824 = vmatpush3.bf16.msra.mxu1 %v7823_v51  ;;  %7858 = vmatprep.subr.bf16.mxu0 %v7857_v52  ;;  %v7905_v51 = vpack.c.bf16 %v4453_v40, %v4452_v39  ;;  %v4404_v52 = vld [vmem:[%s11408_s5 + $0x620] sm:$0xff]  ;;  %v7967_v35 = vpack.c.bf16 %v4499_v22, %v4498_v21  ;;  %v4491_v9 = vld [vmem:[%s11408_s5 + $0x8d8] sm:$0xff]  ;;  %v4493_v22 = vld [vmem:[%s11408_s5 + $0x8e8] sm:$0xff] }
 0x46b   : > { %7826 = vmatprep.subr.bf16.mxu1 %v7825_v56  ;;  %v4405_v56 = vld [vmem:[%s11408_s5 + $0x628] sm:$0xff]  ;;  %v4412_v39 = vld [vmem:[%s11408_s5 + $0x660] sm:$0xff] }
 0x46c   : > { %v4444_v40 = vld [vmem:[%s11408_s5 + $0x760] sm:$0xff] }
 0x46d   : > { %7860 = vmatpush3.bf16.msra.mxu0 %v7859_v62  ;;  %v7875_v62 = vpack.c.bf16 %v4405_v56, %v4404_v52  ;;  %v4446_v52 = vld [vmem:[%s11408_s5 + $0x770] sm:$0xff]  ;;  %v4512_v56 = vld [vmem:[%s11408_s5 + $0x980] sm:$0xff] }
 0x46e   : > { %7828 = vmatpush3.bf16.msra.mxu1 %v7827_v0  ;;  %7862 = vmatprep.subr.bf16.mxu0 %v7861_v50  ;;  %v7909_v0 = vpack.c.bf16 %v4455_v58, %v4454_v57  ;;  %v4406_v50 = vld [vmem:[%s11408_s5 + $0x630] sm:$0xff]  ;;  %v4513_v57 = vld [vmem:[%s11408_s5 + $0x988] sm:$0xff]  ;;  %v4480_v58 = vld [vmem:[%s11408_s5 + $0x880] sm:$0xff]  ;;  %v7927_v60 = vpack.c.bf16 %v4447_v53, %v4446_v52 }
 0x46f   : > { %7830 = vmatprep.subr.bf16.mxu1 %v7829_v5  ;;  %v4407_v5 = vld [vmem:[%s11408_s5 + $0x638] sm:$0xff]  ;;  %v4492_v21 = vld [vmem:[%s11408_s5 + $0x8e0] sm:$0xff] }
 0x470   : > { %v4503_v52 = vld [vmem:[%s11408_s5 + $0x938] sm:$0xff] }
 0x471   : > { %7864 = vmatpush3.bf16.msra.mxu0 %v7863_v4  ;;  %v7879_v4 = vpack.c.bf16 %v4407_v5, %v4406_v50  ;;  %v4496_v50 = vld [vmem:[%s11408_s5 + $0x900] sm:$0xff]  ;;  %v7929_v5 = vpack.c.bf16 %v4481_v59, %v4480_v58  ;;  %v4489_v58 = vld [vmem:[%s11408_s5 + $0x8c8] sm:$0xff] }
 0x472   : > { %7832 = vmatpush3.bf16.msra.mxu1 %v7831_v12  ;;  %7898 = vmatprep.subr.bf16.mxu0 %v7897_v14  ;;  %v7913_v12 = vpack.c.bf16 %v4457_v7, %v4456_v6  ;;  %v4408_v14 = vld [vmem:[%s11408_s5 + $0x640] sm:$0xff]  ;;  %v4465_v7 = vld [vmem:[%s11408_s5 + $0x808] sm:$0xff] }
 0x473   : > { %7866 = vmatprep.subr.bf16.mxu1 %v7865_v20  ;;  %v4409_v20 = vld [vmem:[%s11408_s5 + $0x648] sm:$0xff]  ;;  %v4464_v6 = vld [vmem:[%s11408_s5 + $0x800] sm:$0xff] }
 0x474   : > { %5136 = vmatmul.mubr.f32.vlgmr.msra.gmra.mrb[132].mxu0 %v4122_v37  ;;  %v7883_v25 = vpack.c.bf16 %v4409_v20, %v4408_v14  ;;  %v7963_v14 = vpack.c.bf16 %v4497_v1, %v4496_v50  ;;  %v4466_v20 = vld [vmem:[%s11408_s5 + $0x810] sm:$0xff]  ;;  %v4504_v50 = vld [vmem:[%s11408_s5 + $0x940] sm:$0xff]  ;;  %v4505_v1 = vld [vmem:[%s11408_s5 + $0x948] sm:$0xff] }
 0x475   : > { %5066 = vmatmul.mubr.f32.vlgmr.msra.gmra.mrb[40].mxu1 %v4120_v41  ;;  %7900 = vmatpush3.bf16.msra.mxu0 %v7899_v29  ;;  %v4442_v29 = vld [vmem:[%s11408_s5 + $0x750] sm:$0xff]  ;;  %v4445_v41 = vld [vmem:[%s11408_s5 + $0x768] sm:$0xff]  ;;  %v7979_v18 = vpack.c.bf16 %v4505_v1, %v4504_v50 }
 0x476   : > { %7868 = vmatpush3.bf16.msra.mxu1 %v7867_v32  ;;  %5205 = vmatprep.mubr.f32.mxu1 %v4125_v45  ;;  %v4460_v32 = vld [vmem:[%s11408_s5 + $0x7e0] sm:$0xff]  ;;  %v7919_v37 = vpack.c.bf16 %v4443_v30, %v4442_v29  ;;  %v4430_v45 = vld [vmem:[%s11408_s5 + $0x6f0] sm:$0xff]  ;;  %v4018_v29 = vld [vmem:[#allocation5 + $0x22] sm:$0x1]  ;;  %v7965_v30 = vpack.c.bf16 %v4515_v11, %v4514_v15 }
 0x477   : > { %5275 = vmatprep.mubr.f32.mxu0 %v4127_v48  ;;  %7870 = vmatprep.subr.bf16.mxu1 %v7869_v38  ;;  %v7887_v38 = vpack.c.bf16 %v4411_v31, %v4410_v28  ;;  %v7921_v13 = vpack.c.bf16 %v4461_v34, %v4460_v32  ;;  %v7893_v54 = vpack.c.bf16 %v4431_v46, %v4430_v45  ;;  %v4485_v31 = vld [vmem:[%s11408_s5 + $0x8a8] sm:$0xff]  ;;  %v4487_v45 = vld [vmem:[%s11408_s5 + $0x8b8] sm:$0xff]  ;;  %v4578_v50 = vld [vmem:[%s11408_s5 + $0xb90] sm:$0xff] }
 0x478   : > { %7902 = vmatprep.subr.bf16.mxu0 %v7901_v43  ;;  %v4413_v43 = vld [vmem:[%s11408_s5 + $0x668] sm:$0xff]  ;;  %v4507_v15 = vld [vmem:[%s11408_s5 + $0x958] sm:$0xff] }
 0x479   : > { %7904 = vmatpush3.bf16.msra.mxu0 %v7903_v47  ;;  %v7923_v47 = vpack.c.bf16 %v4445_v41, %v4444_v40  ;;  %v7891_v48 = vpack.c.bf16 %v4413_v43, %v4412_v39  ;;  %v4022_v34 = vld [vmem:[#allocation5 + $0x26] sm:$0x1]  ;;  %v4500_v39 = vld [vmem:[%s11408_s5 + $0x920] sm:$0xff]  ;;  %v4518_v43 = vld [vmem:[%s11408_s5 + $0x9b0] sm:$0xff] }
 0x47a   : > { %7872 = vmatpush3.bf16.msra.mxu1 %v7871_v49  ;;  %7906 = vmatprep.subr.bf16.mxu0 %v7905_v51  ;;  %v7925_v49 = vpack.c.bf16 %v4463_v44, %v4462_v19  ;;  %v4414_v51 = vld [vmem:[%s11408_s5 + $0x670] sm:$0xff]  ;;  %v4501_v40 = vld [vmem:[%s11408_s5 + $0x928] sm:$0xff]  ;;  %v4519_v19 = vld [vmem:[%s11408_s5 + $0x9b8] sm:$0xff] }
 0x47b   : > { %7874 = vmatprep.subr.bf16.mxu1 %v7873_v55  ;;  %v4415_v55 = vld [vmem:[%s11408_s5 + $0x678] sm:$0xff]  ;;  %v4486_v44 = vld [vmem:[%s11408_s5 + $0x8b0] sm:$0xff]  ;;  %v7971_v46 = vpack.c.bf16 %v4501_v40, %v4500_v39 }
 0x47c   : > { %v7941_v53 = vpack.c.bf16 %v4487_v45, %v4486_v44  ;;  %v4511_v39 = vld [vmem:[%s11408_s5 + $0x978] sm:$0xff]  ;;  %v4545_v44 = vld [vmem:[%s11408_s5 + $0xa88] sm:$0xff] }
 0x47d   : > { %7908 = vmatpush3.bf16.msra.mxu0 %v7907_v61  ;;  %v10493_v61 = vpop.permute.xlu0 %8366 }
 0x47e   : > { %7876 = vmatpush3.bf16.msra.mxu1 %v7875_v62  ;;  %7910 = vmatprep.subr.bf16.mxu0 %v7909_v0  ;;  %v7895_v62 = vpack.c.bf16 %v4415_v55, %v4414_v51  ;;  %v7961_v0 = vpack.c.bf16 %v4513_v57, %v4512_v56  ;;  %v4502_v51 = vld [vmem:[%s11408_s5 + $0x930] sm:$0xff]  ;;  %v4520_v55 = vld [vmem:[%s11408_s5 + $0x9c0] sm:$0xff]  ;;  %v4521_v56 = vld [vmem:[%s11408_s5 + $0x9c8] sm:$0xff] }
 0x47f   : > { %7878 = vmatprep.subr.bf16.mxu1 %v7877_v3  ;;  %v10502_v3 = vpop.permute.xlu1 %8371  ;;  %v4488_v57 = vld [vmem:[%s11408_s5 + $0x8c0] sm:$0xff]  ;;  %v7975_v59 = vpack.c.bf16 %v4503_v52, %v4502_v51  ;;  %v4561_v51 = vld [vmem:[%s11408_s5 + $0xb08] sm:$0xff] }
 0x480   : > { %v8373_v16 = vunpack.i.l.bf16 %v10502_v3  ;;  %v8374_v52 = vunpack.i.h.bf16 %v10502_v3  ;;  %v4547_v3 = vld [vmem:[%s11408_s5 + $0xa98] sm:$0xff] }
 0x481   : > { %7912 = vmatpush3.bf16.msra.mxu0 %v7911_v10  ;;  %v8368_v10 = vunpack.i.l.bf16 %v10493_v61 }
 0x482   : > { %7880 = vmatpush3.bf16.msra.mxu1 %v7879_v4  ;;  %7914 = vmatprep.subr.bf16.mxu0 %v7913_v12  ;;  %v4008_v4 = vld [vmem:[#allocation5 + $0x18] sm:$0x1]  ;;  %v4012_v12 = vld [vmem:[#allocation5 + $0x1c] sm:$0x1]  ;;  %v4163_v36 = vsel %vm3851_vm5, %v4022_v34, %v8373_v16  ;;  %v4475_v16 = vld [vmem:[%s11408_s5 + $0x858] sm:$0xff] }
 0x483   : > { %7882 = vmatprep.subr.bf16.mxu1 %v7881_v17  ;;  %v7931_v17 = vpack.c.bf16 %v4465_v7, %v4464_v6  ;;  %v4126_v23 = vsel %vm3851_vm5, %v4012_v12, %v8364_v2  ;;  %v4124_v28 = vsel %vm3851_vm5, %v4008_v4, %v8359_v8  ;;  %v4161_v32 = vsel %vm3851_vm5, %v4018_v29, %v8368_v10  ;;  %v4522_v6 = vld [vmem:[%s11408_s5 + $0x9d0] sm:$0xff]  ;;  %v4523_v7 = vld [vmem:[%s11408_s5 + $0x9d8] sm:$0xff] }
 0x484   : > { %v7945_v2 = vpack.c.bf16 %v4489_v58, %v4488_v57  ;;  %v4490_v8 = vld [vmem:[%s11408_s5 + $0x8d0] sm:$0xff]  ;;  %v7981_v4 = vpack.c.bf16 %v4523_v7, %v4522_v6  ;;  %v7953_v29 = vpack.c.bf16 %v4493_v22, %v4492_v21  ;;  %v4495_v34 = vld [vmem:[%s11408_s5 + $0x8f8] sm:$0xff]  ;;  %v8369_v57 = vunpack.i.h.bf16 %v10493_v61 }
 0x485   : > { %7916 = vmatpush3.bf16.msra.mxu0 %v7915_v33  ;;  %v4467_v33 = vld [vmem:[%s11408_s5 + $0x818] sm:$0xff]  ;;  %v4474_v12 = vld [vmem:[%s11408_s5 + $0x850] sm:$0xff]  ;;  %v7949_v11 = vpack.c.bf16 %v4491_v9, %v4490_v8 }
 0x486   : > { %7884 = vmatpush3.bf16.msra.mxu1 %v7883_v25  ;;  %7918 = vmatprep.subr.bf16.mxu0 %v7917_v26  ;;  %v4516_v25 = vld [vmem:[%s11408_s5 + $0x9a0] sm:$0xff]  ;;  %v4517_v26 = vld [vmem:[%s11408_s5 + $0x9a8] sm:$0xff]  ;;  %v4546_v58 = vld [vmem:[%s11408_s5 + $0xa90] sm:$0xff] }
 0x487   : > { %7886 = vmatprep.subr.bf16.mxu1 %v7885_v27  ;;  %v4484_v27 = vld [vmem:[%s11408_s5 + $0x8a0] sm:$0xff]  ;;  %v4579_v61 = vld [vmem:[%s11408_s5 + $0xb98] sm:$0xff]  ;;  %v4562_v6 = vld [vmem:[%s11408_s5 + $0xb10] sm:$0xff]  ;;  %v7997_v9 = vpack.c.bf16 %v4547_v3, %v4546_v58 }
 0x488   : > { %v7937_v41 = vpack.c.bf16 %v4485_v31, %v4484_v27  ;;  %v4526_v27 = vld [vmem:[%s11408_s5 + $0x9f0] sm:$0xff]  ;;  %v4527_v31 = vld [vmem:[%s11408_s5 + $0x9f8] sm:$0xff] }
 0x489   : > { %7920 = vmatpush3.bf16.msra.mxu0 %v7919_v37  ;;  %v7935_v37 = vpack.c.bf16 %v4467_v33, %v4466_v20  ;;  %v4525_v20 = vld [vmem:[%s11408_s5 + $0x9e8] sm:$0xff]  ;;  %v4563_v7 = vld [vmem:[%s11408_s5 + $0xb18] sm:$0xff] }
 0x48a   : > { %7888 = vmatpush3.bf16.msra.mxu1 %v7887_v38  ;;  %7922 = vmatprep.subr.bf16.mxu0 %v7921_v13  ;;  %v7969_v38 = vpack.c.bf16 %v4517_v26, %v4516_v25  ;;  %v4468_v13 = vld [vmem:[%s11408_s5 + $0x820] sm:$0xff]  ;;  %v8031_v21 = vpack.c.bf16 %v4563_v7, %v4562_v6  ;;  %v4555_v58 = vld [vmem:[%s11408_s5 + $0xad8] sm:$0xff]  ;;  %v4557_v7 = vld [vmem:[%s11408_s5 + $0xae8] sm:$0xff] }
 0x48b   : > { %7890 = vmatprep.subr.bf16.mxu1 %v7889_v42  ;;  %v4469_v42 = vld [vmem:[%s11408_s5 + $0x828] sm:$0xff]  ;;  %v4476_v25 = vld [vmem:[%s11408_s5 + $0x860] sm:$0xff] }
 0x48c   : > { %v4508_v26 = vld [vmem:[%s11408_s5 + $0x960] sm:$0xff] }
 0x48d   : > { %7924 = vmatpush3.bf16.msra.mxu0 %v7923_v47  ;;  %v7939_v47 = vpack.c.bf16 %v4469_v42, %v4468_v13  ;;  %v4510_v13 = vld [vmem:[%s11408_s5 + $0x970] sm:$0xff]  ;;  %v4576_v42 = vld [vmem:[%s11408_s5 + $0xb80] sm:$0xff] }
 0x48e   : > { %7892 = vmatpush3.bf16.msra.mxu1 %v7891_v48  ;;  %7926 = vmatprep.subr.bf16.mxu0 %v7925_v49  ;;  %v7973_v48 = vpack.c.bf16 %v4519_v19, %v4518_v43  ;;  %v4470_v49 = vld [vmem:[%s11408_s5 + $0x830] sm:$0xff]  ;;  %v4577_v43 = vld [vmem:[%s11408_s5 + $0xb88] sm:$0xff]  ;;  %v4544_v19 = vld [vmem:[%s11408_s5 + $0xa80] sm:$0xff]  ;;  %v7991_v45 = vpack.c.bf16 %v4511_v39, %v4510_v13 }
 0x48f   : > { %7894 = vmatprep.subr.bf16.mxu1 %v7893_v54  ;;  %v4471_v54 = vld [vmem:[%s11408_s5 + $0x838] sm:$0xff]  ;;  %v4556_v6 = vld [vmem:[%s11408_s5 + $0xae0] sm:$0xff] }
 0x490   : > { %v4567_v13 = vld [vmem:[%s11408_s5 + $0xb38] sm:$0xff] }
 0x491   : > { %7928 = vmatpush3.bf16.msra.mxu0 %v7927_v60  ;;  %v7943_v60 = vpack.c.bf16 %v4471_v54, %v4470_v49  ;;  %v4560_v49 = vld [vmem:[%s11408_s5 + $0xb00] sm:$0xff]  ;;  %v7993_v54 = vpack.c.bf16 %v4545_v44, %v4544_v19  ;;  %v4553_v19 = vld [vmem:[%s11408_s5 + $0xac8] sm:$0xff] }
 0x492   : > { %7896 = vmatpush3.bf16.msra.mxu1 %v7895_v62  ;;  %7962 = vmatprep.subr.bf16.mxu0 %v7961_v0  ;;  %v7977_v62 = vpack.c.bf16 %v4521_v56, %v4520_v55  ;;  %v4472_v0 = vld [vmem:[%s11408_s5 + $0x840] sm:$0xff]  ;;  %v4529_v56 = vld [vmem:[%s11408_s5 + $0xa08] sm:$0xff] }
 0x493   : > { %7930 = vmatprep.subr.bf16.mxu1 %v7929_v5  ;;  %v4473_v5 = vld [vmem:[%s11408_s5 + $0x848] sm:$0xff]  ;;  %v4528_v55 = vld [vmem:[%s11408_s5 + $0xa00] sm:$0xff] }
 0x494   : > { %5276 = vmatmul.mubr.f32.vlgmr.msra.gmra.mrb[134].mxu0 %v4126_v23  ;;  %v7947_v10 = vpack.c.bf16 %v4473_v5, %v4472_v0  ;;  %v8027_v0 = vpack.c.bf16 %v4561_v51, %v4560_v49  ;;  %v4530_v5 = vld [vmem:[%s11408_s5 + $0xa10] sm:$0xff]  ;;  %v4568_v49 = vld [vmem:[%s11408_s5 + $0xb40] sm:$0xff]  ;;  %v4569_v51 = vld [vmem:[%s11408_s5 + $0xb48] sm:$0xff] }
 0x495   : > { %5206 = vmatmul.mubr.f32.vlgmr.msra.gmra.mrb[42].mxu1 %v4124_v28  ;;  %7964 = vmatpush3.bf16.msra.mxu0 %v7963_v14  ;;  %v4506_v14 = vld [vmem:[%s11408_s5 + $0x950] sm:$0xff]  ;;  %v4509_v28 = vld [vmem:[%s11408_s5 + $0x968] sm:$0xff]  ;;  %v8043_v3 = vpack.c.bf16 %v4569_v51, %v4568_v49 }
 0x496   : > { %7932 = vmatpush3.bf16.msra.mxu1 %v7931_v17  ;;  %5345 = vmatprep.mubr.f32.mxu1 %v4161_v32  ;;  %v4524_v17 = vld [vmem:[%s11408_s5 + $0x9e0] sm:$0xff]  ;;  %v7983_v23 = vpack.c.bf16 %v4507_v15, %v4506_v14  ;;  %v4494_v32 = vld [vmem:[%s11408_s5 + $0x8f0] sm:$0xff]  ;;  %v8029_v15 = vpack.c.bf16 %v4579_v61, %v4578_v50  ;;  %v4571_v50 = vld [vmem:[%s11408_s5 + $0xb58] sm:$0xff] }
 0x497   : > { %5415 = vmatprep.mubr.f32.mxu0 %v4163_v36  ;;  %7934 = vmatprep.subr.bf16.mxu1 %v7933_v24  ;;  %v7951_v24 = vpack.c.bf16 %v4475_v16, %v4474_v12  ;;  %v7985_v33 = vpack.c.bf16 %v4525_v20, %v4524_v17  ;;  %v7957_v40 = vpack.c.bf16 %v4495_v34, %v4494_v32  ;;  %v4026_v14 = vld [vmem:[#allocation5 + $0x2a] sm:$0x1]  ;;  %v4549_v16 = vld [vmem:[%s11408_s5 + $0xaa8] sm:$0xff]  ;;  %v4030_v20 = vld [vmem:[#allocation5 + $0x2e] sm:$0x1] }
 0x498   : > { %7966 = vmatprep.subr.bf16.mxu0 %v7965_v30  ;;  %v4477_v30 = vld [vmem:[%s11408_s5 + $0x868] sm:$0xff]  ;;  %v4551_v32 = vld [vmem:[%s11408_s5 + $0xab8] sm:$0xff]  ;;  %v4642_v49 = vld [vmem:[%s11408_s5 + $0xd90] sm:$0xff] }
 0x499   : > { %7968 = vmatpush3.bf16.msra.mxu0 %v7967_v35  ;;  %v7987_v35 = vpack.c.bf16 %v4509_v28, %v4508_v26  ;;  %v7955_v36 = vpack.c.bf16 %v4477_v30, %v4476_v25  ;;  %v4564_v25 = vld [vmem:[%s11408_s5 + $0xb20] sm:$0xff]  ;;  %v4565_v26 = vld [vmem:[%s11408_s5 + $0xb28] sm:$0xff]  ;;  %v4582_v30 = vld [vmem:[%s11408_s5 + $0xbb0] sm:$0xff] }
 0x49a   : > { %7936 = vmatpush3.bf16.msra.mxu1 %v7935_v37  ;;  %7970 = vmatprep.subr.bf16.mxu0 %v7969_v38  ;;  %v7989_v37 = vpack.c.bf16 %v4527_v31, %v4526_v27  ;;  %v4478_v38 = vld [vmem:[%s11408_s5 + $0x870] sm:$0xff]  ;;  %v4583_v27 = vld [vmem:[%s11408_s5 + $0xbb8] sm:$0xff]  ;;  %v8035_v34 = vpack.c.bf16 %v4565_v26, %v4564_v25 }
 0x49b   : > { %7938 = vmatprep.subr.bf16.mxu1 %v7937_v41  ;;  %v4479_v41 = vld [vmem:[%s11408_s5 + $0x878] sm:$0xff]  ;;  %v4550_v31 = vld [vmem:[%s11408_s5 + $0xab0] sm:$0xff] }
 0x49c   : > { %v8005_v39 = vpack.c.bf16 %v4551_v32, %v4550_v31  ;;  %v4575_v25 = vld [vmem:[%s11408_s5 + $0xb78] sm:$0xff]  ;;  %v4609_v31 = vld [vmem:[%s11408_s5 + $0xc88] sm:$0xff] }
 0x49d   : > { %7972 = vmatpush3.bf16.msra.mxu0 %v7971_v46  ;;  %v10697_v46 = vpop.permute.xlu0 %8376 }
 0x49e   : > { %7940 = vmatpush3.bf16.msra.mxu1 %v7939_v47  ;;  %7974 = vmatprep.subr.bf16.mxu0 %v7973_v48  ;;  %v7959_v47 = vpack.c.bf16 %v4479_v41, %v4478_v38  ;;  %v8025_v48 = vpack.c.bf16 %v4577_v43, %v4576_v42  ;;  %v4566_v38 = vld [vmem:[%s11408_s5 + $0xb30] sm:$0xff]  ;;  %v4584_v41 = vld [vmem:[%s11408_s5 + $0xbc0] sm:$0xff]  ;;  %v4585_v42 = vld [vmem:[%s11408_s5 + $0xbc8] sm:$0xff] }
 0x49f   : > { %7942 = vmatprep.subr.bf16.mxu1 %v7941_v53  ;;  %v10706_v53 = vpop.permute.xlu1 %8381  ;;  %v4552_v43 = vld [vmem:[%s11408_s5 + $0xac0] sm:$0xff]  ;;  %v8039_v44 = vpack.c.bf16 %v4567_v13, %v4566_v38  ;;  %v4625_v38 = vld [vmem:[%s11408_s5 + $0xd08] sm:$0xff] }
 0x4a0   : > { %v8383_v1 = vunpack.i.l.bf16 %v10706_v53  ;;  %v8384_v13 = vunpack.i.h.bf16 %v10706_v53  ;;  %v4611_v53 = vld [vmem:[%s11408_s5 + $0xc98] sm:$0xff] }
 0x4a1   : > { %7976 = vmatpush3.bf16.msra.mxu0 %v7975_v59  ;;  %v8378_v59 = vunpack.i.l.bf16 %v10697_v46 }
 0x4a2   : > { %7944 = vmatpush3.bf16.msra.mxu1 %v7943_v60  ;;  %7978 = vmatprep.subr.bf16.mxu0 %v7977_v62  ;;  %v4016_v60 = vld [vmem:[#allocation5 + $0x20] sm:$0x1]  ;;  %v4020_v62 = vld [vmem:[#allocation5 + $0x24] sm:$0x1]  ;;  %v4167_v22 = vsel %vm3851_vm5, %v4030_v20, %v8383_v1  ;;  %v4539_v1 = vld [vmem:[%s11408_s5 + $0xa58] sm:$0xff] }
 0x4a3   : > { %7946 = vmatprep.subr.bf16.mxu1 %v7945_v2  ;;  %v7995_v2 = vpack.c.bf16 %v4529_v56, %v4528_v55  ;;  %v4162_v8 = vsel %vm3851_vm5, %v4020_v62, %v8374_v52  ;;  %v4160_v12 = vsel %vm3851_vm5, %v4016_v60, %v8369_v57  ;;  %v4165_v17 = vsel %vm3851_vm5, %v4026_v14, %v8378_v59  ;;  %v4586_v55 = vld [vmem:[%s11408_s5 + $0xbd0] sm:$0xff]  ;;  %v4587_v56 = vld [vmem:[%s11408_s5 + $0xbd8] sm:$0xff] }
 0x4a4   : > { %v8009_v52 = vpack.c.bf16 %v4553_v19, %v4552_v43  ;;  %v4554_v57 = vld [vmem:[%s11408_s5 + $0xad0] sm:$0xff]  ;;  %v8045_v60 = vpack.c.bf16 %v4587_v56, %v4586_v55  ;;  %v8017_v14 = vpack.c.bf16 %v4557_v7, %v4556_v6  ;;  %v4559_v20 = vld [vmem:[%s11408_s5 + $0xaf8] sm:$0xff]  ;;  %v8379_v43 = vunpack.i.h.bf16 %v10697_v46 }
 0x4a5   : > { %7980 = vmatpush3.bf16.msra.mxu0 %v7979_v18  ;;  %v4531_v18 = vld [vmem:[%s11408_s5 + $0xa18] sm:$0xff]  ;;  %v4538_v62 = vld [vmem:[%s11408_s5 + $0xa50] sm:$0xff]  ;;  %v8013_v61 = vpack.c.bf16 %v4555_v58, %v4554_v57 }
 0x4a6   : > { %7948 = vmatpush3.bf16.msra.mxu1 %v7947_v10  ;;  %7982 = vmatprep.subr.bf16.mxu0 %v7981_v4  ;;  %v4580_v10 = vld [vmem:[%s11408_s5 + $0xba0] sm:$0xff]  ;;  %v4581_v4 = vld [vmem:[%s11408_s5 + $0xba8] sm:$0xff]  ;;  %v4610_v19 = vld [vmem:[%s11408_s5 + $0xc90] sm:$0xff] }
 0x4a7   : > { %7950 = vmatprep.subr.bf16.mxu1 %v7949_v11  ;;  %v4548_v11 = vld [vmem:[%s11408_s5 + $0xaa0] sm:$0xff]  ;;  %v4643_v46 = vld [vmem:[%s11408_s5 + $0xd98] sm:$0xff]  ;;  %v4626_v55 = vld [vmem:[%s11408_s5 + $0xd10] sm:$0xff]  ;;  %v8061_v58 = vpack.c.bf16 %v4611_v53, %v4610_v19 }
 0x4a8   : > { %v8001_v28 = vpack.c.bf16 %v4549_v16, %v4548_v11  ;;  %v4590_v11 = vld [vmem:[%s11408_s5 + $0xbf0] sm:$0xff]  ;;  %v4591_v16 = vld [vmem:[%s11408_s5 + $0xbf8] sm:$0xff] }
 0x4a9   : > { %7984 = vmatpush3.bf16.msra.mxu0 %v7983_v23  ;;  %v7999_v23 = vpack.c.bf16 %v4531_v18, %v4530_v5  ;;  %v4589_v5 = vld [vmem:[%s11408_s5 + $0xbe8] sm:$0xff]  ;;  %v4627_v56 = vld [vmem:[%s11408_s5 + $0xd18] sm:$0xff] }
 0x4aa   : > { %7952 = vmatpush3.bf16.msra.mxu1 %v7951_v24  ;;  %7986 = vmatprep.subr.bf16.mxu0 %v7985_v33  ;;  %v8033_v24 = vpack.c.bf16 %v4581_v4, %v4580_v10  ;;  %v4532_v33 = vld [vmem:[%s11408_s5 + $0xa20] sm:$0xff]  ;;  %v8095_v6 = vpack.c.bf16 %v4627_v56, %v4626_v55  ;;  %v4619_v19 = vld [vmem:[%s11408_s5 + $0xcd8] sm:$0xff]  ;;  %v4621_v56 = vld [vmem:[%s11408_s5 + $0xce8] sm:$0xff] }
 0x4ab   : > { %7954 = vmatprep.subr.bf16.mxu1 %v7953_v29  ;;  %v4533_v29 = vld [vmem:[%s11408_s5 + $0xa28] sm:$0xff]  ;;  %v4540_v10 = vld [vmem:[%s11408_s5 + $0xa60] sm:$0xff] }
 0x4ac   : > { %v4572_v4 = vld [vmem:[%s11408_s5 + $0xb60] sm:$0xff] }
 0x4ad   : > { %7988 = vmatpush3.bf16.msra.mxu0 %v7987_v35  ;;  %v8003_v35 = vpack.c.bf16 %v4533_v29, %v4532_v33  ;;  %v4574_v33 = vld [vmem:[%s11408_s5 + $0xb70] sm:$0xff]  ;;  %v4640_v29 = vld [vmem:[%s11408_s5 + $0xd80] sm:$0xff] }
 0x4ae   : > { %7956 = vmatpush3.bf16.msra.mxu1 %v7955_v36  ;;  %7990 = vmatprep.subr.bf16.mxu0 %v7989_v37  ;;  %v8037_v36 = vpack.c.bf16 %v4583_v27, %v4582_v30  ;;  %v4534_v37 = vld [vmem:[%s11408_s5 + $0xa30] sm:$0xff]  ;;  %v4641_v30 = vld [vmem:[%s11408_s5 + $0xd88] sm:$0xff]  ;;  %v4608_v27 = vld [vmem:[%s11408_s5 + $0xc80] sm:$0xff]  ;;  %v8055_v32 = vpack.c.bf16 %v4575_v25, %v4574_v33 }
 0x4af   : > { %7958 = vmatprep.subr.bf16.mxu1 %v7957_v40  ;;  %v4535_v40 = vld [vmem:[%s11408_s5 + $0xa38] sm:$0xff]  ;;  %v4620_v55 = vld [vmem:[%s11408_s5 + $0xce0] sm:$0xff] }
 0x4b0   : > { %v4631_v33 = vld [vmem:[%s11408_s5 + $0xd38] sm:$0xff] }
 0x4b1   : > { %7992 = vmatpush3.bf16.msra.mxu0 %v7991_v45  ;;  %v8007_v45 = vpack.c.bf16 %v4535_v40, %v4534_v37  ;;  %v4624_v37 = vld [vmem:[%s11408_s5 + $0xd00] sm:$0xff]  ;;  %v8057_v40 = vpack.c.bf16 %v4609_v31, %v4608_v27  ;;  %v4617_v27 = vld [vmem:[%s11408_s5 + $0xcc8] sm:$0xff] }
 0x4b2   : > { %7960 = vmatpush3.bf16.msra.mxu1 %v7959_v47  ;;  %8026 = vmatprep.subr.bf16.mxu0 %v8025_v48  ;;  %v8041_v47 = vpack.c.bf16 %v4585_v42, %v4584_v41  ;;  %v4536_v48 = vld [vmem:[%s11408_s5 + $0xa40] sm:$0xff]  ;;  %v4593_v42 = vld [vmem:[%s11408_s5 + $0xc08] sm:$0xff] }
 0x4b3   : > { %7994 = vmatprep.subr.bf16.mxu1 %v7993_v54  ;;  %v4537_v54 = vld [vmem:[%s11408_s5 + $0xa48] sm:$0xff]  ;;  %v4592_v41 = vld [vmem:[%s11408_s5 + $0xc00] sm:$0xff] }
 0x4b4   : > { %5416 = vmatmul.mubr.f32.vlgmr.msra.gmra.mrb[136].mxu0 %v4162_v8  ;;  %v8011_v59 = vpack.c.bf16 %v4537_v54, %v4536_v48  ;;  %v8091_v48 = vpack.c.bf16 %v4625_v38, %v4624_v37  ;;  %v4594_v54 = vld [vmem:[%s11408_s5 + $0xc10] sm:$0xff]  ;;  %v4632_v37 = vld [vmem:[%s11408_s5 + $0xd40] sm:$0xff]  ;;  %v4633_v38 = vld [vmem:[%s11408_s5 + $0xd48] sm:$0xff] }
 0x4b5   : > { %5346 = vmatmul.mubr.f32.vlgmr.msra.gmra.mrb[44].mxu1 %v4160_v12  ;;  %8028 = vmatpush3.bf16.msra.mxu0 %v8027_v0  ;;  %v4570_v0 = vld [vmem:[%s11408_s5 + $0xb50] sm:$0xff]  ;;  %v4573_v12 = vld [vmem:[%s11408_s5 + $0xb68] sm:$0xff]  ;;  %v8107_v53 = vpack.c.bf16 %v4633_v38, %v4632_v37 }
 0x4b6   : > { %7996 = vmatpush3.bf16.msra.mxu1 %v7995_v2  ;;  %5485 = vmatprep.mubr.f32.mxu1 %v4165_v17  ;;  %v4588_v2 = vld [vmem:[%s11408_s5 + $0xbe0] sm:$0xff]  ;;  %v8047_v8 = vpack.c.bf16 %v4571_v50, %v4570_v0  ;;  %v4558_v17 = vld [vmem:[%s11408_s5 + $0xaf0] sm:$0xff]  ;;  %v4034_v0 = vld [vmem:[#allocation5 + $0x32] sm:$0x1]  ;;  %v8093_v50 = vpack.c.bf16 %v4643_v46, %v4642_v49 }
 0x4b7   : > { %5555 = vmatprep.mubr.f32.mxu0 %v4167_v22  ;;  %7998 = vmatprep.subr.bf16.mxu1 %v7997_v9  ;;  %v8015_v9 = vpack.c.bf16 %v4539_v1, %v4538_v62  ;;  %v8049_v18 = vpack.c.bf16 %v4589_v5, %v4588_v2  ;;  %v8021_v26 = vpack.c.bf16 %v4559_v20, %v4558_v17  ;;  %v4613_v1 = vld [vmem:[%s11408_s5 + $0xca8] sm:$0xff]  ;;  %v4038_v5 = vld [vmem:[#allocation5 + $0x36] sm:$0x1]  ;;  %v4706_v37 = vld [vmem:[%s11408_s5 + $0xf90] sm:$0xff] }
 0x4b8   : > { %8030 = vmatprep.subr.bf16.mxu0 %v8029_v15  ;;  %v4541_v15 = vld [vmem:[%s11408_s5 + $0xa68] sm:$0xff]  ;;  %v4615_v17 = vld [vmem:[%s11408_s5 + $0xcb8] sm:$0xff] }
 0x4b9   : > { %8032 = vmatpush3.bf16.msra.mxu0 %v8031_v21  ;;  %v8051_v21 = vpack.c.bf16 %v4573_v12, %v4572_v4  ;;  %v8019_v22 = vpack.c.bf16 %v4541_v15, %v4540_v10  ;;  %v4628_v10 = vld [vmem:[%s11408_s5 + $0xd20] sm:$0xff]  ;;  %v4629_v4 = vld [vmem:[%s11408_s5 + $0xd28] sm:$0xff]  ;;  %v4646_v15 = vld [vmem:[%s11408_s5 + $0xdb0] sm:$0xff] }
 0x4ba   : > { %8000 = vmatpush3.bf16.msra.mxu1 %v7999_v23  ;;  %8034 = vmatprep.subr.bf16.mxu0 %v8033_v24  ;;  %v8053_v23 = vpack.c.bf16 %v4591_v16, %v4590_v11  ;;  %v4542_v24 = vld [vmem:[%s11408_s5 + $0xa70] sm:$0xff]  ;;  %v4647_v11 = vld [vmem:[%s11408_s5 + $0xdb8] sm:$0xff]  ;;  %v8099_v20 = vpack.c.bf16 %v4629_v4, %v4628_v10 }
 0x4bb   : > { %8002 = vmatprep.subr.bf16.mxu1 %v8001_v28  ;;  %v4543_v28 = vld [vmem:[%s11408_s5 + $0xa78] sm:$0xff]  ;;  %v4614_v16 = vld [vmem:[%s11408_s5 + $0xcb0] sm:$0xff] }
 0x4bc   : > { %v8069_v25 = vpack.c.bf16 %v4615_v17, %v4614_v16  ;;  %v4635_v49 = vld [vmem:[%s11408_s5 + $0xd58] sm:$0xff]  ;;  %v4673_v16 = vld [vmem:[%s11408_s5 + $0xe88] sm:$0xff] }
 0x4bd   : > { %8036 = vmatpush3.bf16.msra.mxu0 %v8035_v34  ;;  %v10901_v34 = vpop.permute.xlu0 %8386  ;;  %v4639_v10 = vld [vmem:[%s11408_s5 + $0xd78] sm:$0xff] }
 0x4be   : > { %8004 = vmatpush3.bf16.msra.mxu1 %v8003_v35  ;;  %8038 = vmatprep.subr.bf16.mxu0 %v8037_v36  ;;  %v8023_v35 = vpack.c.bf16 %v4543_v28, %v4542_v24  ;;  %v8089_v36 = vpack.c.bf16 %v4641_v30, %v4640_v29  ;;  %v4630_v24 = vld [vmem:[%s11408_s5 + $0xd30] sm:$0xff]  ;;  %v4648_v28 = vld [vmem:[%s11408_s5 + $0xdc0] sm:$0xff]  ;;  %v4649_v29 = vld [vmem:[%s11408_s5 + $0xdc8] sm:$0xff] }
 0x4bf   : > { %8006 = vmatprep.subr.bf16.mxu1 %v8005_v39  ;;  %v10910_v39 = vpop.permute.xlu1 %8391  ;;  %v4616_v30 = vld [vmem:[%s11408_s5 + $0xcc0] sm:$0xff]  ;;  %v8103_v31 = vpack.c.bf16 %v4631_v33, %v4630_v24  ;;  %v4689_v24 = vld [vmem:[%s11408_s5 + $0xf08] sm:$0xff] }
 0x4c0   : > { %v8393_v51 = vunpack.i.l.bf16 %v10910_v39  ;;  %v8394_v33 = vunpack.i.h.bf16 %v10910_v39  ;;  %v4675_v39 = vld [vmem:[%s11408_s5 + $0xe98] sm:$0xff] }
 0x4c1   : > { %8040 = vmatpush3.bf16.msra.mxu0 %v8039_v44  ;;  %v8388_v44 = vunpack.i.l.bf16 %v10901_v34 }
 0x4c2   : > { %8008 = vmatpush3.bf16.msra.mxu1 %v8007_v45  ;;  %8042 = vmatprep.subr.bf16.mxu0 %v8041_v47  ;;  %v4024_v45 = vld [vmem:[#allocation5 + $0x28] sm:$0x1]  ;;  %v4028_v47 = vld [vmem:[#allocation5 + $0x2c] sm:$0x1]  ;;  %v4203_v7 = vsel %vm3851_vm5, %v4038_v5, %v8393_v51  ;;  %v4603_v51 = vld [vmem:[%s11408_s5 + $0xc58] sm:$0xff] }
 0x4c3   : > { %8010 = vmatprep.subr.bf16.mxu1 %v8009_v52  ;;  %v8059_v52 = vpack.c.bf16 %v4593_v42, %v4592_v41  ;;  %v4166_v57 = vsel %vm3851_vm5, %v4028_v47, %v8384_v13  ;;  %v4164_v62 = vsel %vm3851_vm5, %v4024_v45, %v8379_v43  ;;  %v4201_v2 = vsel %vm3851_vm5, %v4034_v0, %v8388_v44  ;;  %v4650_v41 = vld [vmem:[%s11408_s5 + $0xdd0] sm:$0xff]  ;;  %v4651_v42 = vld [vmem:[%s11408_s5 + $0xdd8] sm:$0xff] }
 0x4c4   : > { %v8073_v13 = vpack.c.bf16 %v4617_v27, %v4616_v30  ;;  %v4618_v43 = vld [vmem:[%s11408_s5 + $0xcd0] sm:$0xff]  ;;  %v8109_v45 = vpack.c.bf16 %v4651_v42, %v4650_v41  ;;  %v8081_v0 = vpack.c.bf16 %v4621_v56, %v4620_v55  ;;  %v4623_v5 = vld [vmem:[%s11408_s5 + $0xcf8] sm:$0xff]  ;;  %v8389_v30 = vunpack.i.h.bf16 %v10901_v34 }
 0x4c5   : > { %8044 = vmatpush3.bf16.msra.mxu0 %v8043_v3  ;;  %v4595_v3 = vld [vmem:[%s11408_s5 + $0xc18] sm:$0xff]  ;;  %v4602_v47 = vld [vmem:[%s11408_s5 + $0xc50] sm:$0xff]  ;;  %v8077_v46 = vpack.c.bf16 %v4619_v19, %v4618_v43 }
 0x4c6   : > { %8012 = vmatpush3.bf16.msra.mxu1 %v8011_v59  ;;  %8046 = vmatprep.subr.bf16.mxu0 %v8045_v60  ;;  %v4644_v59 = vld [vmem:[%s11408_s5 + $0xda0] sm:$0xff]  ;;  %v4645_v60 = vld [vmem:[%s11408_s5 + $0xda8] sm:$0xff]  ;;  %v4674_v27 = vld [vmem:[%s11408_s5 + $0xe90] sm:$0xff] }
 0x4c7   : > { %8014 = vmatprep.subr.bf16.mxu1 %v8013_v61  ;;  %v4612_v61 = vld [vmem:[%s11408_s5 + $0xca0] sm:$0xff]  ;;  %v4707_v34 = vld [vmem:[%s11408_s5 + $0xf98] sm:$0xff]  ;;  %v4690_v41 = vld [vmem:[%s11408_s5 + $0xf10] sm:$0xff]  ;;  %v8125_v19 = vpack.c.bf16 %v4675_v39, %v4674_v27 }
 0x4c8   : > { %v8065_v12 = vpack.c.bf16 %v4613_v1, %v4612_v61  ;;  %v4654_v61 = vld [vmem:[%s11408_s5 + $0xdf0] sm:$0xff]  ;;  %v4655_v1 = vld [vmem:[%s11408_s5 + $0xdf8] sm:$0xff] }
 0x4c9   : > { %8048 = vmatpush3.bf16.msra.mxu0 %v8047_v8  ;;  %v8063_v8 = vpack.c.bf16 %v4595_v3, %v4594_v54  ;;  %v4653_v54 = vld [vmem:[%s11408_s5 + $0xde8] sm:$0xff]  ;;  %v4691_v42 = vld [vmem:[%s11408_s5 + $0xf18] sm:$0xff] }
 0x4ca   : > { %8016 = vmatpush3.bf16.msra.mxu1 %v8015_v9  ;;  %8050 = vmatprep.subr.bf16.mxu0 %v8049_v18  ;;  %v8097_v9 = vpack.c.bf16 %v4645_v60, %v4644_v59  ;;  %v4596_v18 = vld [vmem:[%s11408_s5 + $0xc20] sm:$0xff]  ;;  %v8159_v55 = vpack.c.bf16 %v4691_v42, %v4690_v41  ;;  %v4683_v27 = vld [vmem:[%s11408_s5 + $0xed8] sm:$0xff]  ;;  %v4685_v42 = vld [vmem:[%s11408_s5 + $0xee8] sm:$0xff] }
 0x4cb   : > { %8018 = vmatprep.subr.bf16.mxu1 %v8017_v14  ;;  %v4597_v14 = vld [vmem:[%s11408_s5 + $0xc28] sm:$0xff]  ;;  %v4604_v59 = vld [vmem:[%s11408_s5 + $0xc60] sm:$0xff] }
 0x4cc   : > { %v4636_v60 = vld [vmem:[%s11408_s5 + $0xd60] sm:$0xff] }
 0x4cd   : > { %8052 = vmatpush3.bf16.msra.mxu0 %v8051_v21  ;;  %v8067_v21 = vpack.c.bf16 %v4597_v14, %v4596_v18  ;;  %v4638_v18 = vld [vmem:[%s11408_s5 + $0xd70] sm:$0xff]  ;;  %v4704_v14 = vld [vmem:[%s11408_s5 + $0xf80] sm:$0xff] }
 0x4ce   : > { %8020 = vmatpush3.bf16.msra.mxu1 %v8019_v22  ;;  %8054 = vmatprep.subr.bf16.mxu0 %v8053_v23  ;;  %v8101_v22 = vpack.c.bf16 %v4647_v11, %v4646_v15  ;;  %v4598_v23 = vld [vmem:[%s11408_s5 + $0xc30] sm:$0xff]  ;;  %v4705_v15 = vld [vmem:[%s11408_s5 + $0xf88] sm:$0xff]  ;;  %v4672_v11 = vld [vmem:[%s11408_s5 + $0xe80] sm:$0xff]  ;;  %v8119_v17 = vpack.c.bf16 %v4639_v10, %v4638_v18 }
 0x4cf   : > { %8022 = vmatprep.subr.bf16.mxu1 %v8021_v26  ;;  %v4599_v26 = vld [vmem:[%s11408_s5 + $0xc38] sm:$0xff]  ;;  %v4684_v41 = vld [vmem:[%s11408_s5 + $0xee0] sm:$0xff] }
 0x4d0   : > { %v4695_v18 = vld [vmem:[%s11408_s5 + $0xf38] sm:$0xff] }
 0x4d1   : > { %8056 = vmatpush3.bf16.msra.mxu0 %v8055_v32  ;;  %v8071_v32 = vpack.c.bf16 %v4599_v26, %v4598_v23  ;;  %v4688_v23 = vld [vmem:[%s11408_s5 + $0xf00] sm:$0xff]  ;;  %v8121_v26 = vpack.c.bf16 %v4673_v16, %v4672_v11  ;;  %v4681_v11 = vld [vmem:[%s11408_s5 + $0xec8] sm:$0xff] }
 0x4d2   : > { %8024 = vmatpush3.bf16.msra.mxu1 %v8023_v35  ;;  %8090 = vmatprep.subr.bf16.mxu0 %v8089_v36  ;;  %v8105_v35 = vpack.c.bf16 %v4649_v29, %v4648_v28  ;;  %v4600_v36 = vld [vmem:[%s11408_s5 + $0xc40] sm:$0xff]  ;;  %v4657_v29 = vld [vmem:[%s11408_s5 + $0xe08] sm:$0xff] }
 0x4d3   : > { %8058 = vmatprep.subr.bf16.mxu1 %v8057_v40  ;;  %v4601_v40 = vld [vmem:[%s11408_s5 + $0xc48] sm:$0xff]  ;;  %v4656_v28 = vld [vmem:[%s11408_s5 + $0xe00] sm:$0xff] }
 0x4d4   : > { %5556 = vmatmul.mubr.f32.vlgmr.msra.gmra.mrb[138].mxu0 %v4166_v57  ;;  %v8075_v44 = vpack.c.bf16 %v4601_v40, %v4600_v36  ;;  %v8155_v36 = vpack.c.bf16 %v4689_v24, %v4688_v23  ;;  %v4658_v40 = vld [vmem:[%s11408_s5 + $0xe10] sm:$0xff]  ;;  %v4696_v23 = vld [vmem:[%s11408_s5 + $0xf40] sm:$0xff]  ;;  %v4697_v24 = vld [vmem:[%s11408_s5 + $0xf48] sm:$0xff] }
 0x4d5   : > { %5486 = vmatmul.mubr.f32.vlgmr.msra.gmra.mrb[46].mxu1 %v4164_v62  ;;  %8092 = vmatpush3.bf16.msra.mxu0 %v8091_v48  ;;  %v4634_v48 = vld [vmem:[%s11408_s5 + $0xd50] sm:$0xff]  ;;  %v4637_v62 = vld [vmem:[%s11408_s5 + $0xd68] sm:$0xff]  ;;  %v8171_v39 = vpack.c.bf16 %v4697_v24, %v4696_v23 }
 0x4d6   : > { %8060 = vmatpush3.bf16.msra.mxu1 %v8059_v52  ;;  %5625 = vmatprep.mubr.f32.mxu1 %v4201_v2  ;;  %v4652_v52 = vld [vmem:[%s11408_s5 + $0xde0] sm:$0xff]  ;;  %v8111_v57 = vpack.c.bf16 %v4635_v49, %v4634_v48  ;;  %v4622_v2 = vld [vmem:[%s11408_s5 + $0xcf0] sm:$0xff]  ;;  %v8157_v49 = vpack.c.bf16 %v4707_v34, %v4706_v37  ;;  %v4699_v37 = vld [vmem:[%s11408_s5 + $0xf58] sm:$0xff] }
 0x4d7   : > { %5695 = vmatprep.mubr.f32.mxu0 %v4203_v7  ;;  %8062 = vmatprep.subr.bf16.mxu1 %v8061_v58  ;;  %v8079_v58 = vpack.c.bf16 %v4603_v51, %v4602_v47  ;;  %v8113_v3 = vpack.c.bf16 %v4653_v54, %v4652_v52  ;;  %v8085_v4 = vpack.c.bf16 %v4623_v5, %v4622_v2  ;;  %v4042_v48 = vld [vmem:[#allocation5 + $0x3a] sm:$0x1]  ;;  %v4677_v51 = vld [vmem:[%s11408_s5 + $0xea8] sm:$0xff]  ;;  %v4046_v54 = vld [vmem:[#allocation5 + $0x3e] sm:$0x1] }
 0x4d8   : > { %8094 = vmatprep.subr.bf16.mxu0 %v8093_v50  ;;  %v4605_v50 = vld [vmem:[%s11408_s5 + $0xc68] sm:$0xff]  ;;  %v4679_v2 = vld [vmem:[%s11408_s5 + $0xeb8] sm:$0xff] }
 0x4d9   : > { %8096 = vmatpush3.bf16.msra.mxu0 %v8095_v6  ;;  %v8115_v6 = vpack.c.bf16 %v4637_v62, %v4636_v60  ;;  %v8083_v7 = vpack.c.bf16 %v4605_v50, %v4604_v59  ;;  %v4692_v59 = vld [vmem:[%s11408_s5 + $0xf20] sm:$0xff]  ;;  %v4693_v60 = vld [vmem:[%s11408_s5 + $0xf28] sm:$0xff]  ;;  %v4710_v50 = vld [vmem:[%s11408_s5 + $0xfb0] sm:$0xff] }
 0x4da   : > { %8064 = vmatpush3.bf16.msra.mxu1 %v8063_v8  ;;  %8098 = vmatprep.subr.bf16.mxu0 %v8097_v9  ;;  %v8117_v8 = vpack.c.bf16 %v4655_v1, %v4654_v61  ;;  %v4606_v9 = vld [vmem:[%s11408_s5 + $0xc70] sm:$0xff]  ;;  %v4711_v61 = vld [vmem:[%s11408_s5 + $0xfb8] sm:$0xff]  ;;  %v8163_v5 = vpack.c.bf16 %v4693_v60, %v4692_v59 }
 0x4db   : > { %8066 = vmatprep.subr.bf16.mxu1 %v8065_v12  ;;  %v4607_v12 = vld [vmem:[%s11408_s5 + $0xc78] sm:$0xff]  ;;  %v4678_v1 = vld [vmem:[%s11408_s5 + $0xeb0] sm:$0xff] }
 0x4dc   : > { %v8133_v10 = vpack.c.bf16 %v4679_v2, %v4678_v1  ;;  %v4703_v1 = vld [vmem:[%s11408_s5 + $0xf78] sm:$0xff] }
 0x4dd   : > { %8100 = vmatpush3.bf16.msra.mxu0 %v8099_v20  ;;  %v11105_v20 = vpop.permute.xlu0 %8396 }
 0x4de   : > { %8068 = vmatpush3.bf16.msra.mxu1 %v8067_v21  ;;  %8102 = vmatprep.subr.bf16.mxu0 %v8101_v22  ;;  %v8087_v21 = vpack.c.bf16 %v4607_v12, %v4606_v9  ;;  %v8153_v22 = vpack.c.bf16 %v4705_v15, %v4704_v14  ;;  %v4694_v9 = vld [vmem:[%s11408_s5 + $0xf30] sm:$0xff]  ;;  %v4712_v12 = vld [vmem:[%s11408_s5 + $0xfc0] sm:$0xff]  ;;  %v4713_v14 = vld [vmem:[%s11408_s5 + $0xfc8] sm:$0xff] }
 0x4df   : > { %8070 = vmatprep.subr.bf16.mxu1 %v8069_v25  ;;  %v11114_v25 = vpop.permute.xlu1 %8401  ;;  %v4680_v15 = vld [vmem:[%s11408_s5 + $0xec0] sm:$0xff]  ;;  %v8167_v16 = vpack.c.bf16 %v4695_v18, %v4694_v9 }
 0x4e0   : > { %v8403_v38 = vunpack.i.l.bf16 %v11114_v25 }
 0x4e1   : > { %8104 = vmatpush3.bf16.msra.mxu0 %v8103_v31  ;;  %v8398_v31 = vunpack.i.l.bf16 %v11105_v20 }
 0x4e2   : > { %8072 = vmatpush3.bf16.msra.mxu1 %v8071_v32  ;;  %8106 = vmatprep.subr.bf16.mxu0 %v8105_v35  ;;  %v4032_v32 = vld [vmem:[#allocation5 + $0x30] sm:$0x1]  ;;  %v4036_v35 = vld [vmem:[#allocation5 + $0x34] sm:$0x1]  ;;  %v4207_v56 = vsel %vm3851_vm5, %v4046_v54, %v8403_v38 }
 0x4e3   : > { %8074 = vmatprep.subr.bf16.mxu1 %v8073_v13  ;;  %v8123_v13 = vpack.c.bf16 %v4657_v29, %v4656_v28  ;;  %v4202_v43 = vsel %vm3851_vm5, %v4036_v35, %v8394_v33  ;;  %v4200_v47 = vsel %vm3851_vm5, %v4032_v32, %v8389_v30  ;;  %v4205_v52 = vsel %vm3851_vm5, %v4042_v48, %v8398_v31  ;;  %v4714_v28 = vld [vmem:[%s11408_s5 + $0xfd0] sm:$0xff]  ;;  %v4715_v29 = vld [vmem:[%s11408_s5 + $0xfd8] sm:$0xff] }
 0x4e4   : > { %v8137_v33 = vpack.c.bf16 %v4681_v11, %v4680_v15  ;;  %v4682_v30 = vld [vmem:[%s11408_s5 + $0xed0] sm:$0xff]  ;;  %v8173_v32 = vpack.c.bf16 %v4715_v29, %v4714_v28  ;;  %v4667_v38 = vld [vmem:[%s11408_s5 + $0xe58] sm:$0xff] }
 0x4e5   : > { %8108 = vmatpush3.bf16.msra.mxu0 %v8107_v53  ;;  %v4659_v53 = vld [vmem:[%s11408_s5 + $0xe18] sm:$0xff]  ;;  %v4666_v35 = vld [vmem:[%s11408_s5 + $0xe50] sm:$0xff]  ;;  %v8141_v34 = vpack.c.bf16 %v4683_v27, %v4682_v30 }
 0x4e6   : > { %8076 = vmatpush3.bf16.msra.mxu1 %v8075_v44  ;;  %8110 = vmatprep.subr.bf16.mxu0 %v8109_v45  ;;  %v4708_v44 = vld [vmem:[%s11408_s5 + $0xfa0] sm:$0xff]  ;;  %v4709_v45 = vld [vmem:[%s11408_s5 + $0xfa8] sm:$0xff] }
 0x4e7   : > { %8078 = vmatprep.subr.bf16.mxu1 %v8077_v46  ;;  %v4676_v46 = vld [vmem:[%s11408_s5 + $0xea0] sm:$0xff] }
 0x4e8   : > { %v8129_v62 = vpack.c.bf16 %v4677_v51, %v4676_v46  ;;  %v4669_v46 = vld [vmem:[%s11408_s5 + $0xe68] sm:$0xff]  ;;  %v4718_v51 = vld [vmem:[%s11408_s5 + $0xff0] sm:$0xff] }
 0x4e9   : > { %8112 = vmatpush3.bf16.msra.mxu0 %v8111_v57  ;;  %v8127_v57 = vpack.c.bf16 %v4659_v53, %v4658_v40  ;;  %v4717_v40 = vld [vmem:[%s11408_s5 + $0xfe8] sm:$0xff] }
 0x4ea   : > { %8080 = vmatpush3.bf16.msra.mxu1 %v8079_v58  ;;  %8114 = vmatprep.subr.bf16.mxu0 %v8113_v3  ;;  %v8161_v58 = vpack.c.bf16 %v4709_v45, %v4708_v44  ;;  %v4660_v3 = vld [vmem:[%s11408_s5 + $0xe20] sm:$0xff] }
 0x4eb   : > { %8082 = vmatprep.subr.bf16.mxu1 %v8081_v0  ;;  %v4661_v0 = vld [vmem:[%s11408_s5 + $0xe28] sm:$0xff]  ;;  %v4668_v44 = vld [vmem:[%s11408_s5 + $0xe60] sm:$0xff] }
 0x4ec   : > { %v4700_v45 = vld [vmem:[%s11408_s5 + $0xf60] sm:$0xff] }
 0x4ed   : > { %8116 = vmatpush3.bf16.msra.mxu0 %v8115_v6  ;;  %v8131_v6 = vpack.c.bf16 %v4661_v0, %v4660_v3  ;;  %v8147_v0 = vpack.c.bf16 %v4669_v46, %v4668_v44  ;;  %v5850_v44 = vld [vmem:[%s11410_s7 + $0x40] sm:$0xff] }
 0x4ee   : > { %8084 = vmatpush3.bf16.msra.mxu1 %v8083_v7  ;;  %8118 = vmatprep.subr.bf16.mxu0 %v8117_v8  ;;  %v8165_v7 = vpack.c.bf16 %v4711_v61, %v4710_v50  ;;  %v4662_v8 = vld [vmem:[%s11408_s5 + $0xe30] sm:$0xff] }
 0x4ef   : > { %8086 = vmatprep.subr.bf16.mxu1 %v8085_v4  ;;  %v4663_v4 = vld [vmem:[%s11408_s5 + $0xe38] sm:$0xff]  ;;  %v4702_v61 = vld [vmem:[%s11408_s5 + $0xf70] sm:$0xff] }
 0x4f1   : > { %8120 = vmatpush3.bf16.msra.mxu0 %v8119_v17  ;;  %v8135_v17 = vpack.c.bf16 %v4663_v4, %v4662_v8  ;;  %v8183_v8 = vpack.c.bf16 %v4703_v1, %v4702_v61  ;;  %v8399_v4 = vunpack.i.h.bf16 %v11105_v20 }
 0x4f2   : > { %8088 = vmatpush3.bf16.msra.mxu1 %v8087_v21  ;;  %8154 = vmatprep.subr.bf16.mxu0 %v8153_v22  ;;  %v8169_v21 = vpack.c.bf16 %v4713_v14, %v4712_v12  ;;  %v4664_v22 = vld [vmem:[%s11408_s5 + $0xe40] sm:$0xff] }
 0x4f3   : > { %8122 = vmatprep.subr.bf16.mxu1 %v8121_v26  ;;  %v4665_v26 = vld [vmem:[%s11408_s5 + $0xe48] sm:$0xff]  ;;  %v4044_v12 = vld [vmem:[#allocation5 + $0x3c] sm:$0x1]  ;;  %v4040_v14 = vld [vmem:[#allocation5 + $0x38] sm:$0x1] }
 0x4f4   : > { %5696 = vmatmul.mubr.f32.vlgmr.msra.gmra.mrb[140].mxu0 %v4202_v43  ;;  %v8139_v31 = vpack.c.bf16 %v4665_v26, %v4664_v22  ;;  %v4204_v11 = vsel %vm3851_vm5, %v4040_v14, %v8399_v4 }
 0x4f5   : > { %5626 = vmatmul.mubr.f32.vlgmr.msra.gmra.mrb[48].mxu1 %v4200_v47  ;;  %8156 = vmatpush3.bf16.msra.mxu0 %v8155_v36  ;;  %v4698_v36 = vld [vmem:[%s11408_s5 + $0xf50] sm:$0xff]  ;;  %v4701_v47 = vld [vmem:[%s11408_s5 + $0xf68] sm:$0xff] }
 0x4f6   : > { %8124 = vmatpush3.bf16.msra.mxu1 %v8123_v13  ;;  %5765 = vmatprep.mubr.f32.mxu1 %v4205_v52  ;;  %v4716_v13 = vld [vmem:[%s11408_s5 + $0xfe0] sm:$0xff]  ;;  %v8175_v43 = vpack.c.bf16 %v4699_v37, %v4698_v36  ;;  %v4719_v52 = vld [vmem:[%s11408_s5 + $0xff8] sm:$0xff]  ;;  %v8179_v60 = vpack.c.bf16 %v4701_v47, %v4700_v45  ;;  %v5844_v36 = vld [vmem:[%s11410_s7 + $0x10] sm:$0xff]  ;;  %v8473_v37 = vmov 0.0|0.0  }
 0x4f7   : > { %5835 = vmatprep.mubr.f32.mxu0 %v4207_v56  ;;  %8126 = vmatprep.subr.bf16.mxu1 %v8125_v19  ;;  %v8143_v19 = vpack.c.bf16 %v4667_v38, %v4666_v35  ;;  %v8177_v53 = vpack.c.bf16 %v4717_v40, %v4716_v13  ;;  %v4686_v56 = vld [vmem:[%s11408_s5 + $0xef0] sm:$0xff]  ;;  %v8181_v50 = vpack.c.bf16 %v4719_v52, %v4718_v51  ;;  %v5843_v35 = vld [vmem:[%s11410_s7 + $0x8] sm:$0xff]  ;;  %v5845_v38 = vld [vmem:[%s11410_s7 + $0x18] sm:$0xff] }
 0x4f8   : > { %8158 = vmatprep.subr.bf16.mxu0 %v8157_v49  ;;  %v8145_v49 = vpack.c.bf16 %v4685_v42, %v4684_v41  ;;  %v8189_v13 = vpack.c.bf16 %v5845_v38, %v5844_v36  ;;  %v5846_v40 = vld [vmem:[%s11410_s7 + $0x20] sm:$0xff]  ;;  %v5847_v41 = vld [vmem:[%s11410_s7 + $0x28] sm:$0xff] }
 0x4f9   : > { %8160 = vmatpush3.bf16.msra.mxu0 %v8159_v55  ;;  %v8192_v42 = vpack.c.bf16 %v5847_v41, %v5846_v40  ;;  %v5851_v45 = vld [vmem:[%s11410_s7 + $0x48] sm:$0xff]  ;;  %v5858_v36 = vld [vmem:[%s11411_s8] sm:$0x1] }
 0x4fa   : > { %8128 = vmatpush3.bf16.msra.mxu1 %v8127_v57  ;;  %8162 = vmatprep.subr.bf16.mxu0 %v8161_v58  ;;  %v4687_v57 = vld [vmem:[%s11408_s5 + $0xef8] sm:$0xff]  ;;  %v4720_v58 = vld [vmem:[%s11409_s6] sm:$0x1]  ;;  %v8198_v47 = vpack.c.bf16 %v5851_v45, %v5850_v44 }
 0x4fb   : > { %8130 = vmatprep.subr.bf16.mxu1 %v8129_v62  ;;  %v8149_v2 = vpack.c.bf16 %v4687_v57, %v4686_v56 }
 0x4fd   : > { %8164 = vmatpush3.bf16.msra.mxu0 %v8163_v5  ;;  %v4670_v5 = vld [vmem:[%s11408_s5 + $0xe70] sm:$0xff] }
 0x4fe   : > { %8132 = vmatpush3.bf16.msra.mxu1 %v8131_v6  ;;  %8166 = vmatprep.subr.bf16.mxu0 %v8165_v7  ;;  %v4671_v6 = vld [vmem:[%s11408_s5 + $0xe78] sm:$0xff] }
 0x4ff   : > { %8134 = vmatprep.subr.bf16.mxu1 %v8133_v10  ;;  %v8151_v18 = vpack.c.bf16 %v4671_v6, %v4670_v5  ;;  %v8404_v10 = vunpack.i.h.bf16 %v11114_v25 }
 0x501   : > { %8168 = vmatpush3.bf16.msra.mxu0 %v8167_v16  ;;  %v4206_v15 = vsel %vm3851_vm5, %v4044_v12, %v8404_v10 }
 0x502   : > { %8136 = vmatpush3.bf16.msra.mxu1 %v8135_v17  ;;  %8170 = vmatprep.subr.bf16.mxu0 %v8169_v21 }
 0x503   : > { %8138 = vmatprep.subr.bf16.mxu1 %v8137_v33 }
 0x505   : > { %8172 = vmatpush3.bf16.msra.mxu0 %v8171_v39 }
 0x506   : > { %8140 = vmatpush3.bf16.msra.mxu1 %v8139_v31  ;;  %8174 = vmatprep.subr.bf16.mxu0 %v8173_v32  ;;  %v5842_v32 = vld [vmem:[%s11410_s7] sm:$0xff] }
 0x507   : > { %v6614_v48 = vpop.f32.mrb[128].mxu0  ;;  %8142 = vmatprep.subr.bf16.mxu1 %v8141_v34  ;;  %v8186_v34 = vpack.c.bf16 %v5843_v35, %v5842_v32 }
 0x508   : > { %v6579_v54 = vpop.f32.mrb[36].mxu1  ;;  %v6615_v55 = vpop.f32.mrb[129].mxu0 }
 0x509   : > { %v6580_v3 = vpop.f32.mrb[37].mxu1  ;;  %v6616_v59 = vadd.f32 %v6615_v55, %v6614_v48  ;;  %8176 = vmatpush3.bf16.msra.mxu0 %v8175_v43  ;;  %v5848_v43 = vld [vmem:[%s11410_s7 + $0x30] sm:$0xff] }
 0x50a   : > { %v6581_v62 = vadd.f32 %v6580_v3, %v6579_v54  ;;  %8144 = vmatpush3.bf16.msra.mxu1 %v8143_v19  ;;  %8178 = vmatprep.subr.bf16.mxu0 %v8177_v53  ;;  %v5849_v19 = vld [vmem:[%s11410_s7 + $0x38] sm:$0xff]  ;;  %v5852_v48 = vld [vmem:[%s11410_s7 + $0x50] sm:$0xff] }
 0x50b   : > { %8146 = vmatprep.subr.bf16.mxu1 %v8145_v49  ;;  %v8195_v53 = vpack.c.bf16 %v5849_v19, %v5848_v43  ;;  %v5853_v49 = vld [vmem:[%s11410_s7 + $0x58] sm:$0xff] }
 0x50c   : > { %v4788_v7 = vadd.f32 %v6581_v62, %v4720_v58  ;;  %v8201_v46 = vpack.c.bf16 %v5853_v49, %v5852_v48  ;;  %v5856_v62 = vld [vmem:[%s11410_s7 + $0x70] sm:$0xff] }
 0x50d   : > { %8180 = vmatpush3.bf16.msra.mxu0 %v8179_v60  ;;  %v5855_v60 = vld [vmem:[%s11410_s7 + $0x68] sm:$0xff] }
 0x50e   : > { %v4858_v9 = vadd.f32 %v6616_v59, %v4788_v7  ;;  %8148 = vmatpush3.bf16.msra.mxu1 %v8147_v0  ;;  %8182 = vmatprep.subr.bf16.mxu0 %v8181_v50  ;;  %v5854_v59 = vld [vmem:[%s11410_s7 + $0x60] sm:$0xff]  ;;  %v5857_v50 = vld [vmem:[%s11410_s7 + $0x78] sm:$0xff] }
 0x50f   : > { %8150 = vmatprep.subr.bf16.mxu1 %v8149_v2  ;;  %v8204_v0 = vpack.c.bf16 %v5855_v60, %v5854_v59  ;;  %v8207_v61 = vpack.c.bf16 %v5857_v50, %v5856_v62 }
 0x511   : > { %8184 = vmatpush3.bf16.msra.mxu0 %v8183_v8 }
 0x512   : > { %8152 = vmatpush3.bf16.msra.mxu1 %v8151_v18 }
 0x513   : > { %8185 = vmatprep.subr.bf16.mxu1 %v8473_v37 }
 0x514   : > { %5836 = vmatmul.mubr.f32.vlgmr.msra.gmra.mrb[142].mxu0 %v4206_v15 }
 0x515   : > { %5766 = vmatmul.mubr.f32.vlgmr.msra.gmra.mrb[50].mxu1 %v4204_v11 }
 0x516   : > { %8187 = vmatpush3.bf16.msra.mxu1 %v8186_v34  ;;  %7590 = vmatprep.mubr.msk.f32.mxu1 %vm8474_vm6, %v8470_v63 }
 0x517   : > { %8188 = vmatprep.subr.bf16.mxu1 %v8473_v37 }
 0x51a   : > { %8190 = vmatpush3.bf16.msra.mxu1 %v8189_v13 }
 0x51b   : > { %8191 = vmatprep.subr.bf16.mxu1 %v8473_v37 }
 0x51e   : > { %8193 = vmatpush3.bf16.msra.mxu1 %v8192_v42 }
 0x51f   : > { %8194 = vmatprep.subr.bf16.mxu1 %v8473_v37 }
 0x522   : > { %8196 = vmatpush3.bf16.msra.mxu1 %v8195_v53 }
 0x523   : > { %8197 = vmatprep.subr.bf16.mxu1 %v8473_v37 }
 0x526   : > { %8199 = vmatpush3.bf16.msra.mxu1 %v8198_v47 }
 0x527   : > { %v6684_v16 = vpop.f32.mrb[130].mxu0  ;;  %8200 = vmatprep.subr.bf16.mxu1 %v8473_v37 }
 0x528   : > { %v6649_v17 = vpop.f32.mrb[38].mxu1  ;;  %v6685_v21 = vpop.f32.mrb[131].mxu0 }
 0x529   : > { %v6650_v22 = vpop.f32.mrb[39].mxu1  ;;  %v6686_v23 = vadd.f32 %v6685_v21, %v6684_v16 }
 0x52a   : > { %v6651_v24 = vadd.f32 %v6650_v22, %v6649_v17  ;;  %8202 = vmatpush3.bf16.msra.mxu1 %v8201_v46 }
 0x52b   : > { %8203 = vmatprep.subr.bf16.mxu1 %v8473_v37 }
 0x52c   : > { %v4928_v25 = vadd.f32 %v6651_v24, %v4858_v9 }
 0x52e   : > { %v4998_v33 = vadd.f32 %v6686_v23, %v4928_v25  ;;  %8205 = vmatpush3.bf16.msra.mxu1 %v8204_v0 }
 0x52f   : > { %8206 = vmatprep.subr.bf16.mxu1 %v8473_v37 }
 0x532   : > { %8208 = vmatpush3.bf16.msra.mxu1 %v8207_v61 }
 0x547   : > { %v6754_v26 = vpop.f32.mrb[132].mxu0 }
 0x548   : > { %v6719_v20 = vpop.f32.mrb[40].mxu1  ;;  %v6755_v28 = vpop.f32.mrb[133].mxu0 }
 0x549   : > { %v6720_v29 = vpop.f32.mrb[41].mxu1  ;;  %v6756_v30 = vadd.f32 %v6755_v28, %v6754_v26 }
 0x54a   : > { %v6721_v27 = vadd.f32 %v6720_v29, %v6719_v20 }
 0x54c   : > { %v5068_v39 = vadd.f32 %v6721_v27, %v4998_v33 }
 0x54e   : > { %v5138_v31 = vadd.f32 %v6756_v30, %v5068_v39 }
 0x567   : > { %v6824_v51 = vpop.f32.mrb[134].mxu0 }
 0x568   : > { %v6789_v52 = vpop.f32.mrb[42].mxu1  ;;  %v6825_v54 = vpop.f32.mrb[135].mxu0 }
 0x569   : > { %v6790_v55 = vpop.f32.mrb[43].mxu1  ;;  %v6826_v56 = vadd.f32 %v6825_v54, %v6824_v51 }
 0x56a   : > { %v6791_v57 = vadd.f32 %v6790_v55, %v6789_v52 }
 0x56c   : > { %v5208_v58 = vadd.f32 %v6791_v57, %v5138_v31 }
 0x56e   : > { %v5278_v3 = vadd.f32 %v6826_v56, %v5208_v58 }
 0x587   : > { %v6894_v1 = vpop.f32.mrb[136].mxu0 }
 0x588   : > { %v6859_v2 = vpop.f32.mrb[44].mxu1  ;;  %v6895_v5 = vpop.f32.mrb[137].mxu0 }
 0x589   : > { %v6860_v6 = vpop.f32.mrb[45].mxu1  ;;  %v6896_v7 = vadd.f32 %v6895_v5, %v6894_v1 }
 0x58a   : > { %v6861_v8 = vadd.f32 %v6860_v6, %v6859_v2 }
 0x58c   : > { %v5348_v9 = vadd.f32 %v6861_v8, %v5278_v3 }
 0x58e   : > { %v5418_v18 = vadd.f32 %v6896_v7, %v5348_v9 }
 0x5a7   : > { %v6964_v10 = vpop.f32.mrb[138].mxu0 }
 0x5a8   : > { %v6929_v4 = vpop.f32.mrb[46].mxu1  ;;  %v6965_v12 = vpop.f32.mrb[139].mxu0 }
 0x5a9   : > { %v6930_v14 = vpop.f32.mrb[47].mxu1  ;;  %v6966_v15 = vadd.f32 %v6965_v12, %v6964_v10 }
 0x5aa   : > { %v6931_v11 = vadd.f32 %v6930_v14, %v6929_v4 }
 0x5ac   : > { %v5488_v16 = vadd.f32 %v6931_v11, %v5418_v18 }
 0x5ae   : > { %v5558_v63 = vadd.f32 %v6966_v15, %v5488_v16 }
 0x5c7   : > { %v7034_v17 = vpop.f32.mrb[140].mxu0 }
 0x5c8   : > { %v6999_v21 = vpop.f32.mrb[48].mxu1  ;;  %v7035_v22 = vpop.f32.mrb[141].mxu0 }
 0x5c9   : > { %v7000_v23 = vpop.f32.mrb[49].mxu1  ;;  %v7036_v24 = vadd.f32 %v7035_v22, %v7034_v17 }
 0x5ca   : > { %v7001_v25 = vadd.f32 %v7000_v23, %v6999_v21 }
 0x5cc   : > { %v5628_v33 = vadd.f32 %v7001_v25, %v5558_v63 }
 0x5ce   : > { %v5698_v26 = vadd.f32 %v7036_v24, %v5628_v33 }
 0x5e7   : > { %v7104_v20 = vpop.f32.mrb[142].mxu0 }
 0x5e8   : > { %v7069_v28 = vpop.f32.mrb[50].mxu1  ;;  %v7105_v29 = vpop.f32.mrb[143].mxu0 }
 0x5e9   : > { %v7070_v30 = vpop.f32.mrb[51].mxu1  ;;  %v7106_v27 = vadd.f32 %v7105_v29, %v7104_v20 }
 0x5ea   : > { %v7071_v39 = vadd.f32 %v7070_v30, %v7069_v28 }
 0x5ec   : > { %v5768_v31 = vadd.f32 %v7071_v39, %v5698_v26 }
 0x5ee   : > { %v5838_v32 = vadd.f32 %v7106_v27, %v5768_v31 }
 0x5f0   : > { %v5841_v35 = vmax.f32 %v5838_v32, 0.0 }
 0x5f2   : > { %7591 = vmatmul.mubr.f32.vlgmr.msra.gmra.mrb[52].mxu1 %v5841_v35 }
 0x6c5   : > { %v5925_v37 = vpop.f32.mrb[52].mxu1 }
 0x6c6   : > { %v5926_v34 = vadd.f32 %v5925_v37, %v5858_v36  ;;  %v7592_v38 = vpop.f32.mrb[53].mxu1 }
 0x6c8   : > { %5930 = vst.msk [vmem:[%s324_s17] sm:$0x1] %vm5929_vm7, %v5926_v34 }
 0x6c9   : > { %8419 = shalt.err (!%p8416_p3)
}
 0x6ca   : > { %s8420_s26 = scalar_lea.hbm %s11361_s25, 16  ;;  %s8424_s17 = scalar_lea.hbm %s11412_s9, 32 }
 0x6cb   : > { %p8421_p4 = scmp.ne.s32.totalorder %s11361_s25, %s8420_s26  ;;  %p8425_p9 = scmp.lt.u32.totalorder %s11361_s25, %s11412_s9 }
 0x6cc   : > { %p8426_p10 = scmp.lt.u32.totalorder %s8424_s17, %s8420_s26  ;;  %p8428_p12 = scmp.lt.u32.totalorder %s8420_s26, %s11361_s25 }
 0x6cd   : > { %p8422_p7 = pnand %p8421_p4, %p8564_p5 }
 0x6ce   : > { %p8427_p11 = por %p8426_p10, %p8425_p9 }
 0x6cf   : > { %p8423_p8 = pneg %p8422_p7 }
 0x6d0   : > { %p8429_p13 = por %p8428_p12, %p8427_p11 }
 0x6d2   : > { %p8430_p0 = pnand %p8429_p13, %p8423_p8 }
 0x6d4   : > { %8433 = shalt.err (!%p8430_p0)
}
 0x6d5   : > { %8281 = dma.vmem_to_hbm [thread:$0]  (%p8564_p5), %s11363_s22, 16, %s11361_s25, %s5932_s27  }
 0x6d6 PF: > { %p8287_p1 = scmp.ge.s32.totalorder %s8468_s12, 2  ;;  %s5956_s21 = sand.u32 1, %s8456_s30  }
 0x6d7   : > { %s5957_s13 = scalar_lea.sflag [#allocation7], %s5956_s21 }
 0x6d8   : > { %p8284_p2 = pnand %p8287_p1, %p8568_p6 }
 0x6da   : > { %8451 = dma.done.wait (!%p8284_p2), %s5957_s13, 16  }
 0x6db   : > { %8453 = vsyncadd (!%p8284_p2), %s5957_s13, 4294967280  ;;  %p19_p3 = scmp.ge.s32.totalorder %s8551_s15, 4   ;;  %s11415_s30 = smov %s8460_s10 }
 0x6dc   : > { %s11416_s10 = smov %s8464_s11  ;;  %s11417_s11 = smov %s8562_s18 }
 0x6dd   : > { %s11418_s12 = smov %s8551_s15  ;;  %21 = sbr.rel (!%p19_p3) target bundleno = 3 (0x3), region = 252 }
 0x6e4   :  { %5961 = vsyncpa [#allocation7], 1 }
 0x6e5   :  { %5963 = vsyncpa [#allocation7 + $0x1], 1 }

</bundles_post_ra>
